<compile_context>
chip_gen: v7x
topology: tpu7x:2x2x1
jax: 0.10.0
libtpu: 0.0.40
codegen_flags: <defaults>
</compile_context>

<pallas_src>
import math

import jax
import jax.numpy as jnp
from jax.experimental import pallas as pl
from jax.experimental.pallas import tpu as pltpu


_ACT_DTYPE = jnp.bfloat16      # inter-layer activations / patches / residuals
_MM_DTYPE = jnp.bfloat16       # MXU operand dtype (f32 accumulation)
_TM, _TN, _TK = 512, 512, 512  # tile caps


def _round_up(x, m):
    return ((x + m - 1) // m) * m


def _cdiv(a, b):
    return (a + b - 1) // b


# ----------------------------- Pallas kernels --------------------------------

def _make_mm_kernel(has_residual, epilogue):
    """Fused matmul + bias (+ residual add) (+ masked affine-ELU | tanh)."""

    def kernel(*refs):
        a_ref, w_ref, b_ref = refs[0], refs[1], refs[2]
        idx = 3
        s_ref = t_ref = m_ref = r_ref = None
        if epilogue == "affine_elu":
            s_ref, t_ref, m_ref = refs[idx], refs[idx + 1], refs[idx + 2]
            idx += 3
        if has_residual:
            r_ref = refs[idx]
            idx += 1
        o_ref, acc_ref = refs[idx], refs[idx + 1]

        k = pl.program_id(2)

        @pl.when(k == 0)
        def _():
            acc_ref[...] = jnp.zeros_like(acc_ref)

        acc_ref[...] += jnp.dot(a_ref[...], w_ref[...],
                                preferred_element_type=jnp.float32)

        @pl.when(k == pl.num_programs(2) - 1)
        def _():
            out = acc_ref[...] + b_ref[...]
            if has_residual:
                out = out + r_ref[...].astype(jnp.float32)
            if epilogue == "affine_elu":
                # per-output-column BN(eval) affine + ELU, applied only where
                # mask > 0.5 (skip / passthrough columns stay raw).
                y = out * s_ref[...] + t_ref[...]
                act = jnp.where(y > 0, y, jnp.exp(jnp.minimum(y, 0.0)) - 1.0)
                out = jnp.where(m_ref[...] > 0.5, act, out)
            elif epilogue == "tanh":
                out = jnp.tanh(out)
            o_ref[...] = out.astype(o_ref.dtype)

    return kernel


def _affine_elu_kernel(x_ref, s_ref, t_ref, o_ref):
    y = x_ref[...].astype(jnp.float32) * s_ref[...] + t_ref[...]
    o_ref[...] = jnp.where(y > 0, y,
                           jnp.exp(jnp.minimum(y, 0.0)) - 1.0).astype(o_ref.dtype)


# ----------------------------- matmul wrapper ---------------------------------

def matmul_fused(a, w, bias, *, residual=None, epilogue=None, epi=None,
                 out_dtype=_ACT_DTYPE):
    """(M,K)@(K,N) + bias, optional residual add and fused epilogue
    (masked affine+ELU or tanh).  bf16 operands, f32 accumulation."""
    M, K = a.shape
    _, N = w.shape

    # M: 16-aligned (bf16 sublane pack) and >=2 row tiles when possible so the
    # 'parallel' axis feeds both v7x TensorCores on small layers.
    tm = max(16, min(_TM, _round_up(_cdiv(M, 2), 16)))
    Mp = _round_up(M, tm)
    # N: lane-dense (128-multiple) output; single N tile when Cout <= 512.
    tn = min(_TN, _round_up(N, 128))
    Np = _round_up(N, tn)
    # K: single unpadded block whenever it fits (never inflate the patches).
    if K <= _TK:
        tk = K
    elif K % _TK == 0:
        tk = _TK
    else:
        tk = 128
    Kp = _round_up(K, tk)

    a_p = a.astype(_MM_DTYPE)
    if Mp != M or Kp != K:
        a_p = jnp.pad(a_p, ((0, Mp - M), (0, Kp - K)))
    w_p = w.astype(_MM_DTYPE)
    if Kp != K or Np != N:
        w_p = jnp.pad(w_p, ((0, Kp - K), (0, Np - N)))
    b_p = jnp.pad(bias.reshape(1, N).astype(jnp.float32), ((0, 0), (0, Np - N)))

    args = [a_p, w_p, b_p]
    in_specs = [
        pl.BlockSpec((tm, tk), lambda i, j, k: (i, k)),
        pl.BlockSpec((tk, tn), lambda i, j, k: (k, j)),
        pl.BlockSpec((1, tn), lambda i, j, k: (0, j)),
    ]
    if epilogue == "affine_elu":
        s, t, m = epi
        for vec in (s, t, m):
            args.append(jnp.pad(vec.reshape(1, N).astype(jnp.float32),
                                ((0, 0), (0, Np - N))))
            in_specs.append(pl.BlockSpec((1, tn), lambda i, j, k: (0, j)))
    has_res = residual is not None
    if has_res:
        r_p = residual.astype(_ACT_DTYPE)
        if Mp != M or Np != N:
            r_p = jnp.pad(r_p, ((0, Mp - M), (0, Np - N)))
        args.append(r_p)
        in_specs.append(pl.BlockSpec((tm, tn), lambda i, j, k: (i, j)))

    grid = (Mp // tm, Np // tn, Kp // tk)
    kernel = _make_mm_kernel(has_res, epilogue)

    out = pl.pallas_call(
        kernel,
        out_shape=jax.ShapeDtypeStruct((Mp, Np), out_dtype),
        grid=grid,
        in_specs=in_specs,
        out_specs=pl.BlockSpec((tm, tn), lambda i, j, k: (i, j)),
        scratch_shapes=[pltpu.VMEM((tm, tn), jnp.float32)],
        compiler_params=pltpu.CompilerParams(
            dimension_semantics=("parallel", "parallel", "arbitrary"),
            vmem_limit_bytes=32 * 1024 * 1024,
        ),
        cost_estimate=pl.CostEstimate(
            flops=2 * Mp * Kp * Np,
            transcendentals=Mp * Np if epilogue in ("affine_elu", "tanh") else 0,
            bytes_accessed=(a_p.size * a_p.dtype.itemsize
                            + w_p.size * w_p.dtype.itemsize
                            + Mp * Np * jnp.dtype(out_dtype).itemsize)),
    )(*args)

    if Mp != M or Np != N:
        out = out[:M, :N]
    return out


def affine_elu_pallas(x, scale, shift):
    """y = ELU(x * scale + shift), channelwise, on a raw NHWC tensor.

    Used only for ResBlock.norm1 (whose raw input is also the skip); all other
    BN+ELUs are fused into the producing matmul's epilogue."""
    shape = x.shape
    C = shape[-1]
    M = 1
    for d in shape[:-1]:
        M *= d
    tm = _round_up(M, 8) if M <= 2048 else 1024
    Mp = _round_up(M, tm)
    x2 = x.reshape(M, C)
    if Mp != M:
        x2 = jnp.pad(x2, ((0, Mp - M), (0, 0)))
    s2 = scale.reshape(1, C).astype(jnp.float32)
    t2 = shift.reshape(1, C).astype(jnp.float32)

    out = pl.pallas_call(
        _affine_elu_kernel,
        out_shape=jax.ShapeDtypeStruct((Mp, C), _ACT_DTYPE),
        grid=(Mp // tm,),
        in_specs=[pl.BlockSpec((tm, C), lambda i: (i, 0)),
                  pl.BlockSpec((1, C), lambda i: (0, 0)),
                  pl.BlockSpec((1, C), lambda i: (0, 0))],
        out_specs=pl.BlockSpec((tm, C), lambda i: (i, 0)),
        compiler_params=pltpu.CompilerParams(
            dimension_semantics=("parallel",)),
    )(x2, s2, t2)
    return out[:M].reshape(shape)


# ----------------------------- conv wrapper -----------------------------------

def conv2d_pallas(x, cp, *, stride=1, residual=None, epilogue=None, epi=None,
                  out_dtype=_ACT_DTYPE):
    """x: (N,H,W,Cin) NHWC (bf16).  cp: prepacked conv with
       wm: (KH*KW*Cin, Cout) bf16, b: (Cout,) f32, k: kernel size.
    Inputs are already activated, so plain zero padding matches the reference
    zero-pad-after-activation semantics exactly."""
    wm, b = cp["wm"], cp["b"]
    KH = KW = cp["k"]
    Nb, H, W, Cin = x.shape
    Cout = wm.shape[1]
    pad = KH // 2
    Ho = (H + 2 * pad - KH) // stride + 1
    Wo = (W + 2 * pad - KW) // stride + 1

    x = x.astype(_MM_DTYPE)
    if pad > 0:
        x = jnp.pad(x, ((0, 0), (pad, pad), (pad, pad), (0, 0)))

    if KH == 1 and KW == 1 and stride == 1:
        patches = x.reshape(Nb * Ho * Wo, Cin)
    else:
        # im2col in bf16 (layout glue in XLA).
        # TODO(synk): fold the KH*KW taps into the matmul K grid axis so the
        # duplicated patches array is never materialized in HBM.
        cols = []
        for kh in range(KH):
            for kw in range(KW):
                cols.append(jax.lax.slice(
                    x,
                    (0, kh, kw, 0),
                    (Nb, kh + (Ho - 1) * stride + 1,
                     kw + (Wo - 1) * stride + 1, Cin),
                    (1, stride, stride, 1)))
        patches = jnp.concatenate(cols, axis=-1).reshape(
            Nb * Ho * Wo, KH * KW * Cin)

    res2 = None if residual is None else residual.reshape(Nb * Ho * Wo, Cout)
    out = matmul_fused(patches, wm, b, residual=res2, epilogue=epilogue,
                       epi=epi, out_dtype=out_dtype)
    return out.reshape(Nb, Ho, Wo, Cout)


# ----------------------------- parameter init (PyTorch layout) ----------------

def _conv_init(key, cin, cout, k):
    kw_, kb = jax.random.split(key)
    bound = 1.0 / math.sqrt(cin * k * k)
    return {
        "w": jax.random.uniform(kw_, (cout, cin, k, k), jnp.float32, -bound, bound),
        "b": jax.random.uniform(kb, (cout,), jnp.float32, -bound, bound),
    }


def _bn_init(key, c):
    k1, k2, k3, k4 = jax.random.split(key, 4)
    return {
        "gamma": 1.0 + 0.1 * jax.random.normal(k1, (c,), jnp.float32),
        "beta": 0.1 * jax.random.normal(k2, (c,), jnp.float32),
        "mean": 0.1 * jax.random.normal(k3, (c,), jnp.float32),
        "var": 1.0 + 0.1 * jax.random.uniform(k4, (c,), jnp.float32),
        "eps": 1e-4,
    }


def _resblock_init(key, cin, cout, k=3):
    keys = jax.random.split(key, 4)
    first_out = cin // 2 if cin == cout else cin // 2 + cout
    return {
        "type": "resblock",
        "norm1": _bn_init(keys[0], cin),
        "conv1": _conv_init(keys[1], cin, first_out, k),
        "norm2": _bn_init(keys[2], cin // 2),
        "conv2": _conv_init(keys[3], cin // 2, cout, k),
        "skip": cin == cout,
        "bttl_nk": cin // 2,
    }


def _resdown_init(key, cin, cout, k=3):
    keys = jax.random.split(key, 4)
    return {
        "type": "resdown",
        "norm1": _bn_init(keys[0], cin),
        "conv1": _conv_init(keys[1], cin, cout // 2 + cout, k),
        "norm2": _bn_init(keys[2], cout // 2),
        "conv2": _conv_init(keys[3], cout // 2, cout, k),
        "channel_out": cout,
    }


def _resup_init(key, cin, cout, k=3):
    keys = jax.random.split(key, 4)
    return {
        "type": "resup",
        "norm1": _bn_init(keys[0], cin),
        "conv1": _conv_init(keys[1], cin, cin // 2 + cout, k),
        "norm2": _bn_init(keys[2], cin // 2),
        "conv2": _conv_init(keys[3], cin // 2, cout, k),
        "channel_out": cout,
    }


def _encoder_init(key, channels, ch, blocks, latent_channels, num_res_blocks):
    widths_in = list(blocks)
    widths_out = list(blocks[1:]) + [2 * blocks[-1]]
    n_layers = len(widths_in) + num_res_blocks
    keys = jax.random.split(key, 3 + n_layers)
    p = {"conv_in": _conv_init(keys[0], channels, blocks[0] * ch, 3), "blocks": []}
    ki = 1
    for w_in, w_out in zip(widths_in, widths_out):
        p["blocks"].append(_resdown_init(keys[ki], w_in * ch, w_out * ch)); ki += 1
    for _ in range(num_res_blocks):
        p["blocks"].append(_resblock_init(keys[ki], widths_out[-1] * ch,
                                          widths_out[-1] * ch)); ki += 1
    p["conv_mu"] = _conv_init(keys[ki], widths_out[-1] * ch, latent_channels, 1); ki += 1
    p["conv_log_var"] = _conv_init(keys[ki], widths_out[-1] * ch, latent_channels, 1)
    return p


def _decoder_init(key, channels, ch, blocks, latent_channels, num_res_blocks):
    widths_out = list(blocks)[::-1]
    widths_in = (list(blocks[1:]) + [2 * blocks[-1]])[::-1]
    n_layers = num_res_blocks + len(widths_in)
    keys = jax.random.split(key, 2 + n_layers)
    p = {"conv_in": _conv_init(keys[0], latent_channels, widths_in[0] * ch, 1),
         "blocks": []}
    ki = 1
    for _ in range(num_res_blocks):
        p["blocks"].append(_resblock_init(keys[ki], widths_in[0] * ch,
                                          widths_in[0] * ch)); ki += 1
    for w_in, w_out in zip(widths_in, widths_out):
        p["blocks"].append(_resup_init(keys[ki], w_in * ch, w_out * ch)); ki += 1
    p["conv_out"] = _conv_init(keys[ki], blocks[0] * ch, channels, 5)
    return p


def init_vae(key, channel_in=3, ch=64, blocks=(1, 2, 4, 8), latent_channels=256,
             num_res_blocks=1):
    ke, kd = jax.random.split(key)
    return {
        "encoder": _encoder_init(ke, channel_in, ch, blocks, latent_channels,
                                 num_res_blocks),
        "decoder": _decoder_init(kd, channel_in, ch, blocks, latent_channels,
                                 num_res_blocks),
    }


# ----------------------------- one-time param packing -------------------------

def _fold_bn(bn):
    scale = bn["gamma"] / jnp.sqrt(bn["var"] + bn["eps"])
    shift = bn["beta"] - bn["mean"] * scale
    return scale.astype(jnp.float32), shift.astype(jnp.float32)


def _pack_conv(c):
    cout, cin, kh, kw = c["w"].shape
    wm = jnp.transpose(c["w"], (2, 3, 1, 0)).reshape(kh * kw * cin, cout)
    return {"wm": wm.astype(_MM_DTYPE), "b": c["b"].astype(jnp.float32), "k": kh}


def _prepare_block(p):
    out = {"type": p["type"], "norm1": _fold_bn(p["norm1"])}
    s2, t2 = _fold_bn(p["norm2"])
    out["conv1"] = _pack_conv(p["conv1"])
    out["conv2"] = _pack_conv(p["conv2"])
    c1out = p["conv1"]["w"].shape[0]
    if p["type"] == "resblock":
        nk = p["bttl_nk"]
        act_lo, act_hi = 0, nk
        out["skip"] = p["skip"]
        out["bttl_nk"] = nk
    else:
        co = p["channel_out"]
        act_lo, act_hi = co, c1out
        out["channel_out"] = co
    mask = jnp.zeros((c1out,), jnp.float32).at[act_lo:act_hi].set(1.0)
    scale_cols = jnp.ones((c1out,), jnp.float32).at[act_lo:act_hi].set(s2)
    shift_cols = jnp.zeros((c1out,), jnp.float32).at[act_lo:act_hi].set(t2)
    out["conv1_epi"] = (scale_cols, shift_cols, mask)
    return out


def prepare_params(params):
    """One-time (eager) packing: fold BN to scale/shift, transpose/flatten/cast
    conv weights to (K, Cout) bf16, build per-block masked epilogue columns."""
    enc, dec = params["encoder"], params["decoder"]
    p_enc = {
        "conv_in": _pack_conv(enc["conv_in"]),
        "blocks": [_prepare_block(b) for b in enc["blocks"]],
        "latent": enc["conv_mu"]["w"].shape[0],
    }
    w_cat = jnp.concatenate([enc["conv_mu"]["w"], enc["conv_log_var"]["w"]], axis=0)
    b_cat = jnp.concatenate([enc["conv_mu"]["b"], enc["conv_log_var"]["b"]], axis=0)
    p_enc["conv_mu_logvar"] = _pack_conv({"w": w_cat, "b": b_cat})
    p_dec = {
        "conv_in": _pack_conv(dec["conv_in"]),
        "blocks": [_prepare_block(b) for b in dec["blocks"]],
        "conv_out": _pack_conv(dec["conv_out"]),
    }
    return {"encoder": p_enc, "decoder": p_dec}


# ----------------------------- forward pass -----------------------------------

def _plain_elu_epi(c):
    return (jnp.ones((c,), jnp.float32), jnp.zeros((c,), jnp.float32),
            jnp.ones((c,), jnp.float32))


def _lookahead_epi(block):
    """Epilogue to fuse into the producer when `block` consumes its input only
    through act(norm1(.)) (ResDown / ResUp).  ResBlock also needs the raw
    input (skip), so its norm1 is handled by a one-shot elementwise pass."""
    if block is None or block["type"] == "resblock":
        return None
    s1, t1 = block["norm1"]
    return (s1, t1, jnp.ones_like(s1))


def _block_forward(p, x, post_epi):
    """For ResDown/ResUp, x is already act(norm1(x)) (fused upstream).
    post_epi is fused into conv2's epilogue AFTER the residual add (it is the
    next consumer's act(norm1(.)) or the trailing plain ELU); None = raw."""
    epi_name = "affine_elu" if post_epi is not None else None

    if p["type"] == "resblock":
        s1, t1 = p["norm1"]
        act1 = affine_elu_pallas(x, s1, t1)          # raw x also feeds the skip
        x_cat = conv2d_pallas(act1, p["conv1"],
                              epilogue="affine_elu", epi=p["conv1_epi"])
        nk = p["bttl_nk"]
        h = x_cat[..., :nk]                          # already norm2+ELU'd
        skip = x if p["skip"] else x_cat[..., nk:]   # raw
        return conv2d_pallas(h, p["conv2"], residual=skip,
                             epilogue=epi_name, epi=post_epi)

    if p["type"] == "resdown":
        x_cat = conv2d_pallas(x, p["conv1"], stride=2,
                              epilogue="affine_elu", epi=p["conv1_epi"])
    else:  # resup: nearest x2 upsample of the (already activated) input
        x_up = jnp.repeat(jnp.repeat(x, 2, axis=1), 2, axis=2)
        x_cat = conv2d_pallas(x_up, p["conv1"],
                              epilogue="affine_elu", epi=p["conv1_epi"])
    co = p["channel_out"]
    skip = x_cat[..., :co]                           # raw
    h = x_cat[..., co:]                              # already norm2+ELU'd
    return conv2d_pallas(h, p["conv2"], residual=skip,
                         epilogue=epi_name, epi=post_epi)


def _encoder_forward(p, x):
    blocks = p["blocks"]
    look0 = _lookahead_epi(blocks[0]) if blocks else None
    x = conv2d_pallas(x, p["conv_in"],
                      epilogue="affine_elu" if look0 is not None else None,
                      epi=look0)
    for i, blk in enumerate(blocks):
        if i + 1 < len(blocks):
            post = _lookahead_epi(blocks[i + 1])
        else:
            post = _plain_elu_epi(blk["conv2"]["wm"].shape[1])  # trailing ELU
        x = _block_forward(blk, x, post)
    # x is already ELU-activated; conv_mu and conv_log_var share one matmul.
    out = conv2d_pallas(x, p["conv_mu_logvar"], out_dtype=jnp.float32)
    latent = p["latent"]
    mu = out[..., :latent]
    log_var = out[..., latent:]
    # TODO(synk): training-mode reparameterization (randn sampling) not
    # implemented; eval-mode semantics (encoding = mu) are used.
    return mu, mu, log_var


def _decoder_forward(p, x):
    blocks = p["blocks"]
    look0 = _lookahead_epi(blocks[0]) if blocks else None
    x = conv2d_pallas(x, p["conv_in"],
                      epilogue="affine_elu" if look0 is not None else None,
                      epi=look0)
    for i, blk in enumerate(blocks):
        if i + 1 < len(blocks):
            post = _lookahead_epi(blocks[i + 1])
        else:
            post = _plain_elu_epi(blk["conv2"]["wm"].shape[1])  # trailing ELU
        x = _block_forward(blk, x, post)
    # x already ELU-activated; tanh fused into conv_out's epilogue.
    return conv2d_pallas(x, p["conv_out"], epilogue="tanh",
                         out_dtype=jnp.float32)


def vae_forward(prepared, x_nchw):
    x = jnp.transpose(x_nchw, (0, 2, 3, 1))  # NCHW -> NHWC
    encoding, mu, log_var = _encoder_forward(prepared["encoder"], x)
    recon = _decoder_forward(prepared["decoder"], encoding)
    to_nchw = lambda t: jnp.transpose(t, (0, 3, 1, 2))
    return to_nchw(recon), to_nchw(mu), to_nchw(log_var)


# ----------------------------- demo --------------------------------------------

if __name__ == "__main__":
    key = jax.random.PRNGKey(0)
    pkey, xkey = jax.random.split(key)

    # Small config consistent with the module: channel_in=4, ch=8, blocks=(1,2),
    # latent_channels=16, num_res_blocks=1, input 2x4x16x16 (NCHW).
    params = init_vae(pkey, channel_in=4, ch=8, blocks=(1, 2),
                      latent_channels=16, num_res_blocks=1)
    prepared = prepare_params(params)   # one-time weight packing / BN folding
    x = jax.random.normal(xkey, (2, 4, 16, 16), jnp.float32)

    fwd = jax.jit(lambda xx: vae_forward(prepared, xx))
    recon, mu, log_var = fwd(x)
    jax.block_until_ready((recon, mu, log_var))

    assert recon.shape == (2, 4, 16, 16), recon.shape
    assert mu.shape == (2, 16, 4, 4), mu.shape
    assert log_var.shape == (2, 16, 4, 4), log_var.shape
    assert bool(jnp.all(jnp.isfinite(recon)))
    assert bool(jnp.all(jnp.isfinite(mu)))
    assert bool(jnp.all(jnp.isfinite(log_var)))
    print("KERNEL_OK")
</pallas_src>

<mosaic_0001>
module attributes {stable_mosaic.version = 11 : i64} {
  func.func @kernel(%arg0: i32, %arg1: i32, %arg2: i32, %arg3: memref<256x36xbf16, #tpu.memory_space<vmem>>, %arg4: memref<36x128xbf16, #tpu.memory_space<vmem>>, %arg5: memref<1x128xf32, #tpu.memory_space<vmem>>, %arg6: memref<1x128xf32, #tpu.memory_space<vmem>>, %arg7: memref<1x128xf32, #tpu.memory_space<vmem>>, %arg8: memref<1x128xf32, #tpu.memory_space<vmem>>, %arg9: memref<256x128xbf16, #tpu.memory_space<vmem>>, %arg10: memref<256x128xf32, #tpu.memory_space<vmem>>) attributes {dimension_semantics = [#tpu.dimension_semantics<parallel>, #tpu.dimension_semantics<parallel>, #tpu.dimension_semantics<arbitrary>], iteration_bounds = array<i64: 2, 1, 1>, scalar_prefetch = 0 : i64, scratch_operands = 1 : i64, tpu.core_type = #tpu.core_type<tc>, window_params = [{transform_indices = @transform_0, window_bounds = array<i64: 256, 36>}, {transform_indices = @transform_1, window_bounds = array<i64: 36, 128>}, {transform_indices = @transform_2, window_bounds = array<i64: 1, 128>}, {transform_indices = @transform_3, window_bounds = array<i64: 1, 128>}, {transform_indices = @transform_4, window_bounds = array<i64: 1, 128>}, {transform_indices = @transform_5, window_bounds = array<i64: 1, 128>}, {transform_indices = @transform_6, window_bounds = array<i64: 256, 128>}]} {
    %c0_i32 = arith.constant 0 : i32
    %0 = arith.cmpi eq, %arg2, %c0_i32 : i32
    %1 = arith.extui %0 : i1 to i32
    %c0_i32_0 = arith.constant 0 : i32
    %2 = arith.cmpi ne, %1, %c0_i32_0 : i32
    scf.if %2 {
      %cst_10 = arith.constant 0.000000e+00 : f32
      %12 = vector.broadcast %cst_10 : f32 to vector<256x128xf32>
      %c0_11 = arith.constant 0 : index
      %c0_12 = arith.constant 0 : index
      %13 = vector.load %arg10[%c0_11, %c0_12] : memref<256x128xf32, #tpu.memory_space<vmem>>, vector<256x128xf32>
      tpu.vector_store %arg10[%c0_11, %c0_12], %12 {strides = array<i32>} : memref<256x128xf32, #tpu.memory_space<vmem>>, vector<256x128xf32>,
    } else {
    }
    %c0 = arith.constant 0 : index
    %c0_1 = arith.constant 0 : index
    %3 = vector.load %arg10[%c0, %c0_1] : memref<256x128xf32, #tpu.memory_space<vmem>>, vector<256x128xf32>
    %c0_2 = arith.constant 0 : index
    %c0_3 = arith.constant 0 : index
    %4 = vector.load %arg3[%c0_2, %c0_3] : memref<256x36xbf16, #tpu.memory_space<vmem>>, vector<256x36xbf16>
    %c0_4 = arith.constant 0 : index
    %c0_5 = arith.constant 0 : index
    %5 = vector.load %arg4[%c0_4, %c0_5] : memref<36x128xbf16, #tpu.memory_space<vmem>>, vector<36x128xbf16>
    %cst = arith.constant dense<0.000000e+00> : vector<256x128xf32>
    %6 = tpu.matmul %4, %5, %cst {dimension_numbers = #tpu.dot_dimension_numbers<[1], [0], [0], [1], [0, 0, 1, 1], [], []>} : vector<256x36xbf16>, vector<36x128xbf16>, vector<256x128xf32> -> vector<256x128xf32>
    %7 = arith.addf %3, %6 : vector<256x128xf32>
    %c0_6 = arith.constant 0 : index
    %c0_7 = arith.constant 0 : index
    %8 = vector.load %arg10[%c0_6, %c0_7] : memref<256x128xf32, #tpu.memory_space<vmem>>, vector<256x128xf32>
    tpu.vector_store %arg10[%c0_6, %c0_7], %7 {strides = array<i32>} : memref<256x128xf32, #tpu.memory_space<vmem>>, vector<256x128xf32>,
    %c0_i32_8 = arith.constant 0 : i32
    %9 = arith.cmpi eq, %arg2, %c0_i32_8 : i32
    %10 = arith.extui %9 : i1 to i32
    %c0_i32_9 = arith.constant 0 : i32
    %11 = arith.cmpi ne, %10, %c0_i32_9 : i32
    scf.if %11 {
      %c0_10 = arith.constant 0 : index
      %c0_11 = arith.constant 0 : index
      %12 = vector.load %arg10[%c0_10, %c0_11] : memref<256x128xf32, #tpu.memory_space<vmem>>, vector<256x128xf32>
      %c0_12 = arith.constant 0 : index
      %c0_13 = arith.constant 0 : index
      %13 = vector.load %arg5[%c0_12, %c0_13] : memref<1x128xf32, #tpu.memory_space<vmem>>, vector<1x128xf32>
      %14 = vector.broadcast %13 : vector<1x128xf32> to vector<256x128xf32>
      %15 = arith.addf %12, %14 : vector<256x128xf32>
      %c0_14 = arith.constant 0 : index
      %c0_15 = arith.constant 0 : index
      %16 = vector.load %arg6[%c0_14, %c0_15] : memref<1x128xf32, #tpu.memory_space<vmem>>, vector<1x128xf32>
      %17 = vector.broadcast %16 : vector<1x128xf32> to vector<256x128xf32>
      %18 = arith.mulf %15, %17 : vector<256x128xf32>
      %c0_16 = arith.constant 0 : index
      %c0_17 = arith.constant 0 : index
      %19 = vector.load %arg7[%c0_16, %c0_17] : memref<1x128xf32, #tpu.memory_space<vmem>>, vector<1x128xf32>
      %20 = vector.broadcast %19 : vector<1x128xf32> to vector<256x128xf32>
      %21 = arith.addf %18, %20 : vector<256x128xf32>
      %cst_18 = arith.constant 0.000000e+00 : f32
      %22 = vector.broadcast %cst_18 : f32 to vector<256x128xf32>
      %23 = arith.cmpf ogt, %21, %22 : vector<256x128xf32>
      %cst_19 = arith.constant 0.000000e+00 : f32
      %24 = vector.broadcast %cst_19 : f32 to vector<256x128xf32>
      %25 = arith.minimumf %21, %24 : vector<256x128xf32>
      %26 = math.exp %25 : vector<256x128xf32>
      %cst_20 = arith.constant 1.000000e+00 : f32
      %27 = vector.broadcast %cst_20 : f32 to vector<256x128xf32>
      %28 = arith.subf %26, %27 : vector<256x128xf32>
      %29 = arith.select %23, %21, %28 : vector<256x128xi1>, vector<256x128xf32>
      %c0_21 = arith.constant 0 : index
      %c0_22 = arith.constant 0 : index
      %30 = vector.load %arg8[%c0_21, %c0_22] : memref<1x128xf32, #tpu.memory_space<vmem>>, vector<1x128xf32>
      %cst_23 = arith.constant 5.000000e-01 : f32
      %31 = vector.broadcast %cst_23 : f32 to vector<1x128xf32>
      %32 = arith.cmpf ogt, %30, %31 : vector<1x128xf32>
      %33 = vector.shape_cast %32 : vector<1x128xi1> to vector<1x128xi1>
      %34 = vector.broadcast %33 : vector<1x128xi1> to vector<256x128xi1>
      %35 = arith.select %34, %29, %15 : vector<256x128xi1>, vector<256x128xf32>
      %36 = arith.truncf %35 : vector<256x128xf32> to vector<256x128xbf16>
      %c0_24 = arith.constant 0 : index
      %c0_25 = arith.constant 0 : index
      %37 = vector.load %arg9[%c0_24, %c0_25] : memref<256x128xbf16, #tpu.memory_space<vmem>>, vector<256x128xbf16>
      tpu.vector_store %arg9[%c0_24, %c0_25], %36 {strides = array<i32>} : memref<256x128xbf16, #tpu.memory_space<vmem>>, vector<256x128xbf16>,
    } else {
    }
    return
  }
  func.func @transform_0(%arg0: i32, %arg1: i32, %arg2: i32) -> (i32, i32) {
    %c0_i32 = arith.constant 0 : i32
    return %arg0, %arg2 : i32, i32
  }
  func.func @transform_1(%arg0: i32, %arg1: i32, %arg2: i32) -> (i32, i32) {
    %c0_i32 = arith.constant 0 : i32
    return %arg2, %arg1 : i32, i32
  }
  func.func @transform_2(%arg0: i32, %arg1: i32, %arg2: i32) -> (i32, i32) {
    %c0_i32 = arith.constant 0 : i32
    %c0_i32_0 = arith.constant 0 : i32
    return %c0_i32, %arg1 : i32, i32
  }
  func.func @transform_3(%arg0: i32, %arg1: i32, %arg2: i32) -> (i32, i32) {
    %c0_i32 = arith.constant 0 : i32
    %c0_i32_0 = arith.constant 0 : i32
    return %c0_i32, %arg1 : i32, i32
  }
  func.func @transform_4(%arg0: i32, %arg1: i32, %arg2: i32) -> (i32, i32) {
    %c0_i32 = arith.constant 0 : i32
    %c0_i32_0 = arith.constant 0 : i32
    return %c0_i32, %arg1 : i32, i32
  }
  func.func @transform_5(%arg0: i32, %arg1: i32, %arg2: i32) -> (i32, i32) {
    %c0_i32 = arith.constant 0 : i32
    %c0_i32_0 = arith.constant 0 : i32
    return %c0_i32, %arg1 : i32, i32
  }
  func.func @transform_6(%arg0: i32, %arg1: i32, %arg2: i32) -> (i32, i32) {
    %c0_i32 = arith.constant 0 : i32
    return %arg0, %arg1 : i32, i32
  }
}

module attributes {stable_mosaic.version = 11 : i64} {
  func.func @kernel(%arg0: i32, %arg1: i32, %arg2: i32, %arg3: memref<64x72xbf16, #tpu.memory_space<vmem>>, %arg4: memref<72x128xbf16, #tpu.memory_space<vmem>>, %arg5: memref<1x128xf32, #tpu.memory_space<vmem>>, %arg6: memref<1x128xf32, #tpu.memory_space<vmem>>, %arg7: memref<1x128xf32, #tpu.memory_space<vmem>>, %arg8: memref<1x128xf32, #tpu.memory_space<vmem>>, %arg9: memref<64x128xbf16, #tpu.memory_space<vmem>>, %arg10: memref<64x128xf32, #tpu.memory_space<vmem>>) attributes {dimension_semantics = [#tpu.dimension_semantics<parallel>, #tpu.dimension_semantics<parallel>, #tpu.dimension_semantics<arbitrary>], iteration_bounds = array<i64: 2, 1, 1>, scalar_prefetch = 0 : i64, scratch_operands = 1 : i64, tpu.core_type = #tpu.core_type<tc>, window_params = [{transform_indices = @transform_0, window_bounds = array<i64: 64, 72>}, {transform_indices = @transform_1, window_bounds = array<i64: 72, 128>}, {transform_indices = @transform_2, window_bounds = array<i64: 1, 128>}, {transform_indices = @transform_3, window_bounds = array<i64: 1, 128>}, {transform_indices = @transform_4, window_bounds = array<i64: 1, 128>}, {transform_indices = @transform_5, window_bounds = array<i64: 1, 128>}, {transform_indices = @transform_6, window_bounds = array<i64: 64, 128>}]} {
    %c0_i32 = arith.constant 0 : i32
    %0 = arith.cmpi eq, %arg2, %c0_i32 : i32
    %1 = arith.extui %0 : i1 to i32
    %c0_i32_0 = arith.constant 0 : i32
    %2 = arith.cmpi ne, %1, %c0_i32_0 : i32
    scf.if %2 {
      %cst_10 = arith.constant 0.000000e+00 : f32
      %12 = vector.broadcast %cst_10 : f32 to vector<64x128xf32>
      %c0_11 = arith.constant 0 : index
      %c0_12 = arith.constant 0 : index
      %13 = vector.load %arg10[%c0_11, %c0_12] : memref<64x128xf32, #tpu.memory_space<vmem>>, vector<64x128xf32>
      tpu.vector_store %arg10[%c0_11, %c0_12], %12 {strides = array<i32>} : memref<64x128xf32, #tpu.memory_space<vmem>>, vector<64x128xf32>,
    } else {
    }
    %c0 = arith.constant 0 : index
    %c0_1 = arith.constant 0 : index
    %3 = vector.load %arg10[%c0, %c0_1] : memref<64x128xf32, #tpu.memory_space<vmem>>, vector<64x128xf32>
    %c0_2 = arith.constant 0 : index
    %c0_3 = arith.constant 0 : index
    %4 = vector.load %arg3[%c0_2, %c0_3] : memref<64x72xbf16, #tpu.memory_space<vmem>>, vector<64x72xbf16>
    %c0_4 = arith.constant 0 : index
    %c0_5 = arith.constant 0 : index
    %5 = vector.load %arg4[%c0_4, %c0_5] : memref<72x128xbf16, #tpu.memory_space<vmem>>, vector<72x128xbf16>
    %cst = arith.constant dense<0.000000e+00> : vector<64x128xf32>
    %6 = tpu.matmul %4, %5, %cst {dimension_numbers = #tpu.dot_dimension_numbers<[1], [0], [0], [1], [0, 0, 1, 1], [], []>} : vector<64x72xbf16>, vector<72x128xbf16>, vector<64x128xf32> -> vector<64x128xf32>
    %7 = arith.addf %3, %6 : vector<64x128xf32>
    %c0_6 = arith.constant 0 : index
    %c0_7 = arith.constant 0 : index
    %8 = vector.load %arg10[%c0_6, %c0_7] : memref<64x128xf32, #tpu.memory_space<vmem>>, vector<64x128xf32>
    tpu.vector_store %arg10[%c0_6, %c0_7], %7 {strides = array<i32>} : memref<64x128xf32, #tpu.memory_space<vmem>>, vector<64x128xf32>,
    %c0_i32_8 = arith.constant 0 : i32
    %9 = arith.cmpi eq, %arg2, %c0_i32_8 : i32
    %10 = arith.extui %9 : i1 to i32
    %c0_i32_9 = arith.constant 0 : i32
    %11 = arith.cmpi ne, %10, %c0_i32_9 : i32
    scf.if %11 {
      %c0_10 = arith.constant 0 : index
      %c0_11 = arith.constant 0 : index
      %12 = vector.load %arg10[%c0_10, %c0_11] : memref<64x128xf32, #tpu.memory_space<vmem>>, vector<64x128xf32>
      %c0_12 = arith.constant 0 : index
      %c0_13 = arith.constant 0 : index
      %13 = vector.load %arg5[%c0_12, %c0_13] : memref<1x128xf32, #tpu.memory_space<vmem>>, vector<1x128xf32>
      %14 = vector.broadcast %13 : vector<1x128xf32> to vector<64x128xf32>
      %15 = arith.addf %12, %14 : vector<64x128xf32>
      %c0_14 = arith.constant 0 : index
      %c0_15 = arith.constant 0 : index
      %16 = vector.load %arg6[%c0_14, %c0_15] : memref<1x128xf32, #tpu.memory_space<vmem>>, vector<1x128xf32>
      %17 = vector.broadcast %16 : vector<1x128xf32> to vector<64x128xf32>
      %18 = arith.mulf %15, %17 : vector<64x128xf32>
      %c0_16 = arith.constant 0 : index
      %c0_17 = arith.constant 0 : index
      %19 = vector.load %arg7[%c0_16, %c0_17] : memref<1x128xf32, #tpu.memory_space<vmem>>, vector<1x128xf32>
      %20 = vector.broadcast %19 : vector<1x128xf32> to vector<64x128xf32>
      %21 = arith.addf %18, %20 : vector<64x128xf32>
      %cst_18 = arith.constant 0.000000e+00 : f32
      %22 = vector.broadcast %cst_18 : f32 to vector<64x128xf32>
      %23 = arith.cmpf ogt, %21, %22 : vector<64x128xf32>
      %cst_19 = arith.constant 0.000000e+00 : f32
      %24 = vector.broadcast %cst_19 : f32 to vector<64x128xf32>
      %25 = arith.minimumf %21, %24 : vector<64x128xf32>
      %26 = math.exp %25 : vector<64x128xf32>
      %cst_20 = arith.constant 1.000000e+00 : f32
      %27 = vector.broadcast %cst_20 : f32 to vector<64x128xf32>
      %28 = arith.subf %26, %27 : vector<64x128xf32>
      %29 = arith.select %23, %21, %28 : vector<64x128xi1>, vector<64x128xf32>
      %c0_21 = arith.constant 0 : index
      %c0_22 = arith.constant 0 : index
      %30 = vector.load %arg8[%c0_21, %c0_22] : memref<1x128xf32, #tpu.memory_space<vmem>>, vector<1x128xf32>
      %cst_23 = arith.constant 5.000000e-01 : f32
      %31 = vector.broadcast %cst_23 : f32 to vector<1x128xf32>
      %32 = arith.cmpf ogt, %30, %31 : vector<1x128xf32>
      %33 = vector.shape_cast %32 : vector<1x128xi1> to vector<1x128xi1>
      %34 = vector.broadcast %33 : vector<1x128xi1> to vector<64x128xi1>
      %35 = arith.select %34, %29, %15 : vector<64x128xi1>, vector<64x128xf32>
      %36 = arith.truncf %35 : vector<64x128xf32> to vector<64x128xbf16>
      %c0_24 = arith.constant 0 : index
      %c0_25 = arith.constant 0 : index
      %37 = vector.load %arg9[%c0_24, %c0_25] : memref<64x128xbf16, #tpu.memory_space<vmem>>, vector<64x128xbf16>
      tpu.vector_store %arg9[%c0_24, %c0_25], %36 {strides = array<i32>} : memref<64x128xbf16, #tpu.memory_space<vmem>>, vector<64x128xbf16>,
    } else {
    }
    return
  }
  func.func @transform_0(%arg0: i32, %arg1: i32, %arg2: i32) -> (i32, i32) {
    %c0_i32 = arith.constant 0 : i32
    return %arg0, %arg2 : i32, i32
  }
  func.func @transform_1(%arg0: i32, %arg1: i32, %arg2: i32) -> (i32, i32) {
    %c0_i32 = arith.constant 0 : i32
    return %arg2, %arg1 : i32, i32
  }
  func.func @transform_2(%arg0: i32, %arg1: i32, %arg2: i32) -> (i32, i32) {
    %c0_i32 = arith.constant 0 : i32
    %c0_i32_0 = arith.constant 0 : i32
    return %c0_i32, %arg1 : i32, i32
  }
  func.func @transform_3(%arg0: i32, %arg1: i32, %arg2: i32) -> (i32, i32) {
    %c0_i32 = arith.constant 0 : i32
    %c0_i32_0 = arith.constant 0 : i32
    return %c0_i32, %arg1 : i32, i32
  }
  func.func @transform_4(%arg0: i32, %arg1: i32, %arg2: i32) -> (i32, i32) {
    %c0_i32 = arith.constant 0 : i32
    %c0_i32_0 = arith.constant 0 : i32
    return %c0_i32, %arg1 : i32, i32
  }
  func.func @transform_5(%arg0: i32, %arg1: i32, %arg2: i32) -> (i32, i32) {
    %c0_i32 = arith.constant 0 : i32
    %c0_i32_0 = arith.constant 0 : i32
    return %c0_i32, %arg1 : i32, i32
  }
  func.func @transform_6(%arg0: i32, %arg1: i32, %arg2: i32) -> (i32, i32) {
    %c0_i32 = arith.constant 0 : i32
    return %arg0, %arg1 : i32, i32
  }
}

module attributes {stable_mosaic.version = 11 : i64} {
  func.func @kernel(%arg0: i32, %arg1: i32, %arg2: i32, %arg3: memref<64x72xbf16, #tpu.memory_space<vmem>>, %arg4: memref<72x128xbf16, #tpu.memory_space<vmem>>, %arg5: memref<1x128xf32, #tpu.memory_space<vmem>>, %arg6: memref<1x128xf32, #tpu.memory_space<vmem>>, %arg7: memref<1x128xf32, #tpu.memory_space<vmem>>, %arg8: memref<1x128xf32, #tpu.memory_space<vmem>>, %arg9: memref<64x128xbf16, #tpu.memory_space<vmem>>, %arg10: memref<64x128xbf16, #tpu.memory_space<vmem>>, %arg11: memref<64x128xf32, #tpu.memory_space<vmem>>) attributes {dimension_semantics = [#tpu.dimension_semantics<parallel>, #tpu.dimension_semantics<parallel>, #tpu.dimension_semantics<arbitrary>], iteration_bounds = array<i64: 2, 1, 1>, scalar_prefetch = 0 : i64, scratch_operands = 1 : i64, tpu.core_type = #tpu.core_type<tc>, window_params = [{transform_indices = @transform_0, window_bounds = array<i64: 64, 72>}, {transform_indices = @transform_1, window_bounds = array<i64: 72, 128>}, {transform_indices = @transform_2, window_bounds = array<i64: 1, 128>}, {transform_indices = @transform_3, window_bounds = array<i64: 1, 128>}, {transform_indices = @transform_4, window_bounds = array<i64: 1, 128>}, {transform_indices = @transform_5, window_bounds = array<i64: 1, 128>}, {transform_indices = @transform_6, window_bounds = array<i64: 64, 128>}, {transform_indices = @transform_7, window_bounds = array<i64: 64, 128>}]} {
    %c0_i32 = arith.constant 0 : i32
    %0 = arith.cmpi eq, %arg2, %c0_i32 : i32
    %1 = arith.extui %0 : i1 to i32
    %c0_i32_0 = arith.constant 0 : i32
    %2 = arith.cmpi ne, %1, %c0_i32_0 : i32
    scf.if %2 {
      %cst_10 = arith.constant 0.000000e+00 : f32
      %12 = vector.broadcast %cst_10 : f32 to vector<64x128xf32>
      %c0_11 = arith.constant 0 : index
      %c0_12 = arith.constant 0 : index
      %13 = vector.load %arg11[%c0_11, %c0_12] : memref<64x128xf32, #tpu.memory_space<vmem>>, vector<64x128xf32>
      tpu.vector_store %arg11[%c0_11, %c0_12], %12 {strides = array<i32>} : memref<64x128xf32, #tpu.memory_space<vmem>>, vector<64x128xf32>,
    } else {
    }
    %c0 = arith.constant 0 : index
    %c0_1 = arith.constant 0 : index
    %3 = vector.load %arg11[%c0, %c0_1] : memref<64x128xf32, #tpu.memory_space<vmem>>, vector<64x128xf32>
    %c0_2 = arith.constant 0 : index
    %c0_3 = arith.constant 0 : index
    %4 = vector.load %arg3[%c0_2, %c0_3] : memref<64x72xbf16, #tpu.memory_space<vmem>>, vector<64x72xbf16>
    %c0_4 = arith.constant 0 : index
    %c0_5 = arith.constant 0 : index
    %5 = vector.load %arg4[%c0_4, %c0_5] : memref<72x128xbf16, #tpu.memory_space<vmem>>, vector<72x128xbf16>
    %cst = arith.constant dense<0.000000e+00> : vector<64x128xf32>
    %6 = tpu.matmul %4, %5, %cst {dimension_numbers = #tpu.dot_dimension_numbers<[1], [0], [0], [1], [0, 0, 1, 1], [], []>} : vector<64x72xbf16>, vector<72x128xbf16>, vector<64x128xf32> -> vector<64x128xf32>
    %7 = arith.addf %3, %6 : vector<64x128xf32>
    %c0_6 = arith.constant 0 : index
    %c0_7 = arith.constant 0 : index
    %8 = vector.load %arg11[%c0_6, %c0_7] : memref<64x128xf32, #tpu.memory_space<vmem>>, vector<64x128xf32>
    tpu.vector_store %arg11[%c0_6, %c0_7], %7 {strides = array<i32>} : memref<64x128xf32, #tpu.memory_space<vmem>>, vector<64x128xf32>,
    %c0_i32_8 = arith.constant 0 : i32
    %9 = arith.cmpi eq, %arg2, %c0_i32_8 : i32
    %10 = arith.extui %9 : i1 to i32
    %c0_i32_9 = arith.constant 0 : i32
    %11 = arith.cmpi ne, %10, %c0_i32_9 : i32
    scf.if %11 {
      %c0_10 = arith.constant 0 : index
      %c0_11 = arith.constant 0 : index
      %12 = vector.load %arg11[%c0_10, %c0_11] : memref<64x128xf32, #tpu.memory_space<vmem>>, vector<64x128xf32>
      %c0_12 = arith.constant 0 : index
      %c0_13 = arith.constant 0 : index
      %13 = vector.load %arg5[%c0_12, %c0_13] : memref<1x128xf32, #tpu.memory_space<vmem>>, vector<1x128xf32>
      %14 = vector.broadcast %13 : vector<1x128xf32> to vector<64x128xf32>
      %15 = arith.addf %12, %14 : vector<64x128xf32>
      %c0_14 = arith.constant 0 : index
      %c0_15 = arith.constant 0 : index
      %16 = vector.load %arg9[%c0_14, %c0_15] : memref<64x128xbf16, #tpu.memory_space<vmem>>, vector<64x128xbf16>
      %17 = arith.extf %16 : vector<64x128xbf16> to vector<64x128xf32>
      %18 = arith.addf %15, %17 : vector<64x128xf32>
      %c0_16 = arith.constant 0 : index
      %c0_17 = arith.constant 0 : index
      %19 = vector.load %arg6[%c0_16, %c0_17] : memref<1x128xf32, #tpu.memory_space<vmem>>, vector<1x128xf32>
      %20 = vector.broadcast %19 : vector<1x128xf32> to vector<64x128xf32>
      %21 = arith.mulf %18, %20 : vector<64x128xf32>
      %c0_18 = arith.constant 0 : index
      %c0_19 = arith.constant 0 : index
      %22 = vector.load %arg7[%c0_18, %c0_19] : memref<1x128xf32, #tpu.memory_space<vmem>>, vector<1x128xf32>
      %23 = vector.broadcast %22 : vector<1x128xf32> to vector<64x128xf32>
      %24 = arith.addf %21, %23 : vector<64x128xf32>
      %cst_20 = arith.constant 0.000000e+00 : f32
      %25 = vector.broadcast %cst_20 : f32 to vector<64x128xf32>
      %26 = arith.cmpf ogt, %24, %25 : vector<64x128xf32>
      %cst_21 = arith.constant 0.000000e+00 : f32
      %27 = vector.broadcast %cst_21 : f32 to vector<64x128xf32>
      %28 = arith.minimumf %24, %27 : vector<64x128xf32>
      %29 = math.exp %28 : vector<64x128xf32>
      %cst_22 = arith.constant 1.000000e+00 : f32
      %30 = vector.broadcast %cst_22 : f32 to vector<64x128xf32>
      %31 = arith.subf %29, %30 : vector<64x128xf32>
      %32 = arith.select %26, %24, %31 : vector<64x128xi1>, vector<64x128xf32>
      %c0_23 = arith.constant 0 : index
      %c0_24 = arith.constant 0 : index
      %33 = vector.load %arg8[%c0_23, %c0_24] : memref<1x128xf32, #tpu.memory_space<vmem>>, vector<1x128xf32>
      %cst_25 = arith.constant 5.000000e-01 : f32
      %34 = vector.broadcast %cst_25 : f32 to vector<1x128xf32>
      %35 = arith.cmpf ogt, %33, %34 : vector<1x128xf32>
      %36 = vector.shape_cast %35 : vector<1x128xi1> to vector<1x128xi1>
      %37 = vector.broadcast %36 : vector<1x128xi1> to vector<64x128xi1>
      %38 = arith.select %37, %32, %18 : vector<64x128xi1>, vector<64x128xf32>
      %39 = arith.truncf %38 : vector<64x128xf32> to vector<64x128xbf16>
      %c0_26 = arith.constant 0 : index
      %c0_27 = arith.constant 0 : index
      %40 = vector.load %arg10[%c0_26, %c0_27] : memref<64x128xbf16, #tpu.memory_space<vmem>>, vector<64x128xbf16>
      tpu.vector_store %arg10[%c0_26, %c0_27], %39 {strides = array<i32>} : memref<64x128xbf16, #tpu.memory_space<vmem>>, vector<64x128xbf16>,
    } else {
    }
    return
  }
  func.func @transform_0(%arg0: i32, %arg1: i32, %arg2: i32) -> (i32, i32) {
    %c0_i32 = arith.constant 0 : i32
    return %arg0, %arg2 : i32, i32
  }
  func.func @transform_1(%arg0: i32, %arg1: i32, %arg2: i32) -> (i32, i32) {
    %c0_i32 = arith.constant 0 : i32
    return %arg2, %arg1 : i32, i32
  }
  func.func @transform_2(%arg0: i32, %arg1: i32, %arg2: i32) -> (i32, i32) {
    %c0_i32 = arith.constant 0 : i32
    %c0_i32_0 = arith.constant 0 : i32
    return %c0_i32, %arg1 : i32, i32
  }
  func.func @transform_3(%arg0: i32, %arg1: i32, %arg2: i32) -> (i32, i32) {
    %c0_i32 = arith.constant 0 : i32
    %c0_i32_0 = arith.constant 0 : i32
    return %c0_i32, %arg1 : i32, i32
  }
  func.func @transform_4(%arg0: i32, %arg1: i32, %arg2: i32) -> (i32, i32) {
    %c0_i32 = arith.constant 0 : i32
    %c0_i32_0 = arith.constant 0 : i32
    return %c0_i32, %arg1 : i32, i32
  }
  func.func @transform_5(%arg0: i32, %arg1: i32, %arg2: i32) -> (i32, i32) {
    %c0_i32 = arith.constant 0 : i32
    %c0_i32_0 = arith.constant 0 : i32
    return %c0_i32, %arg1 : i32, i32
  }
  func.func @transform_6(%arg0: i32, %arg1: i32, %arg2: i32) -> (i32, i32) {
    %c0_i32 = arith.constant 0 : i32
    return %arg0, %arg1 : i32, i32
  }
  func.func @transform_7(%arg0: i32, %arg1: i32, %arg2: i32) -> (i32, i32) {
    %c0_i32 = arith.constant 0 : i32
    return %arg0, %arg1 : i32, i32
  }
}

module attributes {stable_mosaic.version = 11 : i64} {
  func.func @kernel(%arg0: i32, %arg1: i32, %arg2: i32, %arg3: memref<16x144xbf16, #tpu.memory_space<vmem>>, %arg4: memref<144x128xbf16, #tpu.memory_space<vmem>>, %arg5: memref<1x128xf32, #tpu.memory_space<vmem>>, %arg6: memref<1x128xf32, #tpu.memory_space<vmem>>, %arg7: memref<1x128xf32, #tpu.memory_space<vmem>>, %arg8: memref<1x128xf32, #tpu.memory_space<vmem>>, %arg9: memref<16x128xbf16, #tpu.memory_space<vmem>>, %arg10: memref<16x128xf32, #tpu.memory_space<vmem>>) attributes {dimension_semantics = [#tpu.dimension_semantics<parallel>, #tpu.dimension_semantics<parallel>, #tpu.dimension_semantics<arbitrary>], iteration_bounds = array<i64: 2, 1, 1>, scalar_prefetch = 0 : i64, scratch_operands = 1 : i64, tpu.core_type = #tpu.core_type<tc>, window_params = [{transform_indices = @transform_0, window_bounds = array<i64: 16, 144>}, {transform_indices = @transform_1, window_bounds = array<i64: 144, 128>}, {transform_indices = @transform_2, window_bounds = array<i64: 1, 128>}, {transform_indices = @transform_3, window_bounds = array<i64: 1, 128>}, {transform_indices = @transform_4, window_bounds = array<i64: 1, 128>}, {transform_indices = @transform_5, window_bounds = array<i64: 1, 128>}, {transform_indices = @transform_6, window_bounds = array<i64: 16, 128>}]} {
    %c0_i32 = arith.constant 0 : i32
    %0 = arith.cmpi eq, %arg2, %c0_i32 : i32
    %1 = arith.extui %0 : i1 to i32
    %c0_i32_0 = arith.constant 0 : i32
    %2 = arith.cmpi ne, %1, %c0_i32_0 : i32
    scf.if %2 {
      %cst_10 = arith.constant 0.000000e+00 : f32
      %12 = vector.broadcast %cst_10 : f32 to vector<16x128xf32>
      %c0_11 = arith.constant 0 : index
      %c0_12 = arith.constant 0 : index
      %13 = vector.load %arg10[%c0_11, %c0_12] : memref<16x128xf32, #tpu.memory_space<vmem>>, vector<16x128xf32>
      tpu.vector_store %arg10[%c0_11, %c0_12], %12 {strides = array<i32>} : memref<16x128xf32, #tpu.memory_space<vmem>>, vector<16x128xf32>,
    } else {
    }
    %c0 = arith.constant 0 : index
    %c0_1 = arith.constant 0 : index
    %3 = vector.load %arg10[%c0, %c0_1] : memref<16x128xf32, #tpu.memory_space<vmem>>, vector<16x128xf32>
    %c0_2 = arith.constant 0 : index
    %c0_3 = arith.constant 0 : index
    %4 = vector.load %arg3[%c0_2, %c0_3] : memref<16x144xbf16, #tpu.memory_space<vmem>>, vector<16x144xbf16>
    %c0_4 = arith.constant 0 : index
    %c0_5 = arith.constant 0 : index
    %5 = vector.load %arg4[%c0_4, %c0_5] : memref<144x128xbf16, #tpu.memory_space<vmem>>, vector<144x128xbf16>
    %cst = arith.constant dense<0.000000e+00> : vector<16x128xf32>
    %6 = tpu.matmul %4, %5, %cst {dimension_numbers = #tpu.dot_dimension_numbers<[1], [0], [0], [1], [0, 0, 1, 1], [], []>} : vector<16x144xbf16>, vector<144x128xbf16>, vector<16x128xf32> -> vector<16x128xf32>
    %7 = arith.addf %3, %6 : vector<16x128xf32>
    %c0_6 = arith.constant 0 : index
    %c0_7 = arith.constant 0 : index
    %8 = vector.load %arg10[%c0_6, %c0_7] : memref<16x128xf32, #tpu.memory_space<vmem>>, vector<16x128xf32>
    tpu.vector_store %arg10[%c0_6, %c0_7], %7 {strides = array<i32>} : memref<16x128xf32, #tpu.memory_space<vmem>>, vector<16x128xf32>,
    %c0_i32_8 = arith.constant 0 : i32
    %9 = arith.cmpi eq, %arg2, %c0_i32_8 : i32
    %10 = arith.extui %9 : i1 to i32
    %c0_i32_9 = arith.constant 0 : i32
    %11 = arith.cmpi ne, %10, %c0_i32_9 : i32
    scf.if %11 {
      %c0_10 = arith.constant 0 : index
      %c0_11 = arith.constant 0 : index
      %12 = vector.load %arg10[%c0_10, %c0_11] : memref<16x128xf32, #tpu.memory_space<vmem>>, vector<16x128xf32>
      %c0_12 = arith.constant 0 : index
      %c0_13 = arith.constant 0 : index
      %13 = vector.load %arg5[%c0_12, %c0_13] : memref<1x128xf32, #tpu.memory_space<vmem>>, vector<1x128xf32>
      %14 = vector.broadcast %13 : vector<1x128xf32> to vector<16x128xf32>
      %15 = arith.addf %12, %14 : vector<16x128xf32>
      %c0_14 = arith.constant 0 : index
      %c0_15 = arith.constant 0 : index
      %16 = vector.load %arg6[%c0_14, %c0_15] : memref<1x128xf32, #tpu.memory_space<vmem>>, vector<1x128xf32>
      %17 = vector.broadcast %16 : vector<1x128xf32> to vector<16x128xf32>
      %18 = arith.mulf %15, %17 : vector<16x128xf32>
      %c0_16 = arith.constant 0 : index
      %c0_17 = arith.constant 0 : index
      %19 = vector.load %arg7[%c0_16, %c0_17] : memref<1x128xf32, #tpu.memory_space<vmem>>, vector<1x128xf32>
      %20 = vector.broadcast %19 : vector<1x128xf32> to vector<16x128xf32>
      %21 = arith.addf %18, %20 : vector<16x128xf32>
      %cst_18 = arith.constant 0.000000e+00 : f32
      %22 = vector.broadcast %cst_18 : f32 to vector<16x128xf32>
      %23 = arith.cmpf ogt, %21, %22 : vector<16x128xf32>
      %cst_19 = arith.constant 0.000000e+00 : f32
      %24 = vector.broadcast %cst_19 : f32 to vector<16x128xf32>
      %25 = arith.minimumf %21, %24 : vector<16x128xf32>
      %26 = math.exp %25 : vector<16x128xf32>
      %cst_20 = arith.constant 1.000000e+00 : f32
      %27 = vector.broadcast %cst_20 : f32 to vector<16x128xf32>
      %28 = arith.subf %26, %27 : vector<16x128xf32>
      %29 = arith.select %23, %21, %28 : vector<16x128xi1>, vector<16x128xf32>
      %c0_21 = arith.constant 0 : index
      %c0_22 = arith.constant 0 : index
      %30 = vector.load %arg8[%c0_21, %c0_22] : memref<1x128xf32, #tpu.memory_space<vmem>>, vector<1x128xf32>
      %cst_23 = arith.constant 5.000000e-01 : f32
      %31 = vector.broadcast %cst_23 : f32 to vector<1x128xf32>
      %32 = arith.cmpf ogt, %30, %31 : vector<1x128xf32>
      %33 = vector.shape_cast %32 : vector<1x128xi1> to vector<1x128xi1>
      %34 = vector.broadcast %33 : vector<1x128xi1> to vector<16x128xi1>
      %35 = arith.select %34, %29, %15 : vector<16x128xi1>, vector<16x128xf32>
      %36 = arith.truncf %35 : vector<16x128xf32> to vector<16x128xbf16>
      %c0_24 = arith.constant 0 : index
      %c0_25 = arith.constant 0 : index
      %37 = vector.load %arg9[%c0_24, %c0_25] : memref<16x128xbf16, #tpu.memory_space<vmem>>, vector<16x128xbf16>
      tpu.vector_store %arg9[%c0_24, %c0_25], %36 {strides = array<i32>} : memref<16x128xbf16, #tpu.memory_space<vmem>>, vector<16x128xbf16>,
    } else {
    }
    return
  }
  func.func @transform_0(%arg0: i32, %arg1: i32, %arg2: i32) -> (i32, i32) {
    %c0_i32 = arith.constant 0 : i32
    return %arg0, %arg2 : i32, i32
  }
  func.func @transform_1(%arg0: i32, %arg1: i32, %arg2: i32) -> (i32, i32) {
    %c0_i32 = arith.constant 0 : i32
    return %arg2, %arg1 : i32, i32
  }
  func.func @transform_2(%arg0: i32, %arg1: i32, %arg2: i32) -> (i32, i32) {
    %c0_i32 = arith.constant 0 : i32
    %c0_i32_0 = arith.constant 0 : i32
    return %c0_i32, %arg1 : i32, i32
  }
  func.func @transform_3(%arg0: i32, %arg1: i32, %arg2: i32) -> (i32, i32) {
    %c0_i32 = arith.constant 0 : i32
    %c0_i32_0 = arith.constant 0 : i32
    return %c0_i32, %arg1 : i32, i32
  }
  func.func @transform_4(%arg0: i32, %arg1: i32, %arg2: i32) -> (i32, i32) {
    %c0_i32 = arith.constant 0 : i32
    %c0_i32_0 = arith.constant 0 : i32
    return %c0_i32, %arg1 : i32, i32
  }
  func.func @transform_5(%arg0: i32, %arg1: i32, %arg2: i32) -> (i32, i32) {
    %c0_i32 = arith.constant 0 : i32
    %c0_i32_0 = arith.constant 0 : i32
    return %c0_i32, %arg1 : i32, i32
  }
  func.func @transform_6(%arg0: i32, %arg1: i32, %arg2: i32) -> (i32, i32) {
    %c0_i32 = arith.constant 0 : i32
    return %arg0, %arg1 : i32, i32
  }
}

module attributes {stable_mosaic.version = 11 : i64} {
  func.func @kernel(%arg0: i32, %arg1: i32, %arg2: i32, %arg3: memref<16x144xbf16, #tpu.memory_space<vmem>>, %arg4: memref<144x128xbf16, #tpu.memory_space<vmem>>, %arg5: memref<1x128xf32, #tpu.memory_space<vmem>>, %arg6: memref<16x128xbf16, #tpu.memory_space<vmem>>, %arg7: memref<16x128xbf16, #tpu.memory_space<vmem>>, %arg8: memref<16x128xf32, #tpu.memory_space<vmem>>) attributes {dimension_semantics = [#tpu.dimension_semantics<parallel>, #tpu.dimension_semantics<parallel>, #tpu.dimension_semantics<arbitrary>], iteration_bounds = array<i64: 2, 1, 1>, scalar_prefetch = 0 : i64, scratch_operands = 1 : i64, tpu.core_type = #tpu.core_type<tc>, window_params = [{transform_indices = @transform_0, window_bounds = array<i64: 16, 144>}, {transform_indices = @transform_1, window_bounds = array<i64: 144, 128>}, {transform_indices = @transform_2, window_bounds = array<i64: 1, 128>}, {transform_indices = @transform_3, window_bounds = array<i64: 16, 128>}, {transform_indices = @transform_4, window_bounds = array<i64: 16, 128>}]} {
    %c0_i32 = arith.constant 0 : i32
    %0 = arith.cmpi eq, %arg2, %c0_i32 : i32
    %1 = arith.extui %0 : i1 to i32
    %c0_i32_0 = arith.constant 0 : i32
    %2 = arith.cmpi ne, %1, %c0_i32_0 : i32
    scf.if %2 {
      %cst_10 = arith.constant 0.000000e+00 : f32
      %12 = vector.broadcast %cst_10 : f32 to vector<16x128xf32>
      %c0_11 = arith.constant 0 : index
      %c0_12 = arith.constant 0 : index
      %13 = vector.load %arg8[%c0_11, %c0_12] : memref<16x128xf32, #tpu.memory_space<vmem>>, vector<16x128xf32>
      tpu.vector_store %arg8[%c0_11, %c0_12], %12 {strides = array<i32>} : memref<16x128xf32, #tpu.memory_space<vmem>>, vector<16x128xf32>,
    } else {
    }
    %c0 = arith.constant 0 : index
    %c0_1 = arith.constant 0 : index
    %3 = vector.load %arg8[%c0, %c0_1] : memref<16x128xf32, #tpu.memory_space<vmem>>, vector<16x128xf32>
    %c0_2 = arith.constant 0 : index
    %c0_3 = arith.constant 0 : index
    %4 = vector.load %arg3[%c0_2, %c0_3] : memref<16x144xbf16, #tpu.memory_space<vmem>>, vector<16x144xbf16>
    %c0_4 = arith.constant 0 : index
    %c0_5 = arith.constant 0 : index
    %5 = vector.load %arg4[%c0_4, %c0_5] : memref<144x128xbf16, #tpu.memory_space<vmem>>, vector<144x128xbf16>
    %cst = arith.constant dense<0.000000e+00> : vector<16x128xf32>
    %6 = tpu.matmul %4, %5, %cst {dimension_numbers = #tpu.dot_dimension_numbers<[1], [0], [0], [1], [0, 0, 1, 1], [], []>} : vector<16x144xbf16>, vector<144x128xbf16>, vector<16x128xf32> -> vector<16x128xf32>
    %7 = arith.addf %3, %6 : vector<16x128xf32>
    %c0_6 = arith.constant 0 : index
    %c0_7 = arith.constant 0 : index
    %8 = vector.load %arg8[%c0_6, %c0_7] : memref<16x128xf32, #tpu.memory_space<vmem>>, vector<16x128xf32>
    tpu.vector_store %arg8[%c0_6, %c0_7], %7 {strides = array<i32>} : memref<16x128xf32, #tpu.memory_space<vmem>>, vector<16x128xf32>,
    %c0_i32_8 = arith.constant 0 : i32
    %9 = arith.cmpi eq, %arg2, %c0_i32_8 : i32
    %10 = arith.extui %9 : i1 to i32
    %c0_i32_9 = arith.constant 0 : i32
    %11 = arith.cmpi ne, %10, %c0_i32_9 : i32
    scf.if %11 {
      %c0_10 = arith.constant 0 : index
      %c0_11 = arith.constant 0 : index
      %12 = vector.load %arg8[%c0_10, %c0_11] : memref<16x128xf32, #tpu.memory_space<vmem>>, vector<16x128xf32>
      %c0_12 = arith.constant 0 : index
      %c0_13 = arith.constant 0 : index
      %13 = vector.load %arg5[%c0_12, %c0_13] : memref<1x128xf32, #tpu.memory_space<vmem>>, vector<1x128xf32>
      %14 = vector.broadcast %13 : vector<1x128xf32> to vector<16x128xf32>
      %15 = arith.addf %12, %14 : vector<16x128xf32>
      %c0_14 = arith.constant 0 : index
      %c0_15 = arith.constant 0 : index
      %16 = vector.load %arg6[%c0_14, %c0_15] : memref<16x128xbf16, #tpu.memory_space<vmem>>, vector<16x128xbf16>
      %17 = arith.extf %16 : vector<16x128xbf16> to vector<16x128xf32>
      %18 = arith.addf %15, %17 : vector<16x128xf32>
      %19 = arith.truncf %18 : vector<16x128xf32> to vector<16x128xbf16>
      %c0_16 = arith.constant 0 : index
      %c0_17 = arith.constant 0 : index
      %20 = vector.load %arg7[%c0_16, %c0_17] : memref<16x128xbf16, #tpu.memory_space<vmem>>, vector<16x128xbf16>
      tpu.vector_store %arg7[%c0_16, %c0_17], %19 {strides = array<i32>} : memref<16x128xbf16, #tpu.memory_space<vmem>>, vector<16x128xbf16>,
    } else {
    }
    return
  }
  func.func @transform_0(%arg0: i32, %arg1: i32, %arg2: i32) -> (i32, i32) {
    %c0_i32 = arith.constant 0 : i32
    return %arg0, %arg2 : i32, i32
  }
  func.func @transform_1(%arg0: i32, %arg1: i32, %arg2: i32) -> (i32, i32) {
    %c0_i32 = arith.constant 0 : i32
    return %arg2, %arg1 : i32, i32
  }
  func.func @transform_2(%arg0: i32, %arg1: i32, %arg2: i32) -> (i32, i32) {
    %c0_i32 = arith.constant 0 : i32
    %c0_i32_0 = arith.constant 0 : i32
    return %c0_i32, %arg1 : i32, i32
  }
  func.func @transform_3(%arg0: i32, %arg1: i32, %arg2: i32) -> (i32, i32) {
    %c0_i32 = arith.constant 0 : i32
    return %arg0, %arg1 : i32, i32
  }
  func.func @transform_4(%arg0: i32, %arg1: i32, %arg2: i32) -> (i32, i32) {
    %c0_i32 = arith.constant 0 : i32
    return %arg0, %arg1 : i32, i32
  }
}

module attributes {stable_mosaic.version = 11 : i64} {
  func.func @_affine_elu_kernel(%arg0: i32, %arg1: memref<32x32xbf16, #tpu.memory_space<vmem>>, %arg2: memref<1x32xf32, #tpu.memory_space<vmem>>, %arg3: memref<1x32xf32, #tpu.memory_space<vmem>>, %arg4: memref<32x32xbf16, #tpu.memory_space<vmem>>) attributes {dimension_semantics = [#tpu.dimension_semantics<parallel>], iteration_bounds = array<i64: 1>, scalar_prefetch = 0 : i64, scratch_operands = 0 : i64, tpu.core_type = #tpu.core_type<tc>, window_params = [{transform_indices = @transform_0, window_bounds = array<i64: 32, 32>}, {pipeline_mode = #tpu.pipeline_mode<synchronous>, transform_indices = @transform_1, window_bounds = array<i64: 1, 32>}, {pipeline_mode = #tpu.pipeline_mode<synchronous>, transform_indices = @transform_2, window_bounds = array<i64: 1, 32>}, {transform_indices = @transform_3, window_bounds = array<i64: 32, 32>}]} {
    %c0 = arith.constant 0 : index
    %c0_0 = arith.constant 0 : index
    %0 = vector.load %arg1[%c0, %c0_0] : memref<32x32xbf16, #tpu.memory_space<vmem>>, vector<32x32xbf16>
    %1 = arith.extf %0 : vector<32x32xbf16> to vector<32x32xf32>
    %c0_1 = arith.constant 0 : index
    %c0_2 = arith.constant 0 : index
    %2 = vector.load %arg2[%c0_1, %c0_2] : memref<1x32xf32, #tpu.memory_space<vmem>>, vector<1x32xf32>
    %3 = vector.broadcast %2 : vector<1x32xf32> to vector<32x32xf32>
    %4 = arith.mulf %1, %3 : vector<32x32xf32>
    %c0_3 = arith.constant 0 : index
    %c0_4 = arith.constant 0 : index
    %5 = vector.load %arg3[%c0_3, %c0_4] : memref<1x32xf32, #tpu.memory_space<vmem>>, vector<1x32xf32>
    %6 = vector.broadcast %5 : vector<1x32xf32> to vector<32x32xf32>
    %7 = arith.addf %4, %6 : vector<32x32xf32>
    %cst = arith.constant 0.000000e+00 : f32
    %8 = vector.broadcast %cst : f32 to vector<32x32xf32>
    %9 = arith.cmpf ogt, %7, %8 : vector<32x32xf32>
    %cst_5 = arith.constant 0.000000e+00 : f32
    %10 = vector.broadcast %cst_5 : f32 to vector<32x32xf32>
    %11 = arith.minimumf %7, %10 : vector<32x32xf32>
    %12 = math.exp %11 : vector<32x32xf32>
    %cst_6 = arith.constant 1.000000e+00 : f32
    %13 = vector.broadcast %cst_6 : f32 to vector<32x32xf32>
    %14 = arith.subf %12, %13 : vector<32x32xf32>
    %15 = arith.select %9, %7, %14 : vector<32x32xi1>, vector<32x32xf32>
    %16 = arith.truncf %15 : vector<32x32xf32> to vector<32x32xbf16>
    %c0_7 = arith.constant 0 : index
    %c0_8 = arith.constant 0 : index
    %17 = vector.load %arg4[%c0_7, %c0_8] : memref<32x32xbf16, #tpu.memory_space<vmem>>, vector<32x32xbf16>
    tpu.vector_store %arg4[%c0_7, %c0_8], %16 {strides = array<i32>} : memref<32x32xbf16, #tpu.memory_space<vmem>>, vector<32x32xbf16>,
    return
  }
  func.func @transform_0(%arg0: i32) -> (i32, i32) {
    %c0_i32 = arith.constant 0 : i32
    %c0_i32_0 = arith.constant 0 : i32
    return %arg0, %c0_i32 : i32, i32
  }
  func.func @transform_1(%arg0: i32) -> (i32, i32) {
    %c0_i32 = arith.constant 0 : i32
    %c0_i32_0 = arith.constant 0 : i32
    %c0_i32_1 = arith.constant 0 : i32
    return %c0_i32, %c0_i32_0 : i32, i32
  }
  func.func @transform_2(%arg0: i32) -> (i32, i32) {
    %c0_i32 = arith.constant 0 : i32
    %c0_i32_0 = arith.constant 0 : i32
    %c0_i32_1 = arith.constant 0 : i32
    return %c0_i32, %c0_i32_0 : i32, i32
  }
  func.func @transform_3(%arg0: i32) -> (i32, i32) {
    %c0_i32 = arith.constant 0 : i32
    %c0_i32_0 = arith.constant 0 : i32
    return %arg0, %c0_i32 : i32, i32
  }
}

module attributes {stable_mosaic.version = 11 : i64} {
  func.func @kernel(%arg0: i32, %arg1: i32, %arg2: i32, %arg3: memref<16x288xbf16, #tpu.memory_space<vmem>>, %arg4: memref<288x128xbf16, #tpu.memory_space<vmem>>, %arg5: memref<1x128xf32, #tpu.memory_space<vmem>>, %arg6: memref<1x128xf32, #tpu.memory_space<vmem>>, %arg7: memref<1x128xf32, #tpu.memory_space<vmem>>, %arg8: memref<1x128xf32, #tpu.memory_space<vmem>>, %arg9: memref<16x128xbf16, #tpu.memory_space<vmem>>, %arg10: memref<16x128xf32, #tpu.memory_space<vmem>>) attributes {dimension_semantics = [#tpu.dimension_semantics<parallel>, #tpu.dimension_semantics<parallel>, #tpu.dimension_semantics<arbitrary>], iteration_bounds = array<i64: 2, 1, 1>, scalar_prefetch = 0 : i64, scratch_operands = 1 : i64, tpu.core_type = #tpu.core_type<tc>, window_params = [{transform_indices = @transform_0, window_bounds = array<i64: 16, 288>}, {transform_indices = @transform_1, window_bounds = array<i64: 288, 128>}, {transform_indices = @transform_2, window_bounds = array<i64: 1, 128>}, {transform_indices = @transform_3, window_bounds = array<i64: 1, 128>}, {transform_indices = @transform_4, window_bounds = array<i64: 1, 128>}, {transform_indices = @transform_5, window_bounds = array<i64: 1, 128>}, {transform_indices = @transform_6, window_bounds = array<i64: 16, 128>}]} {
    %c0_i32 = arith.constant 0 : i32
    %0 = arith.cmpi eq, %arg2, %c0_i32 : i32
    %1 = arith.extui %0 : i1 to i32
    %c0_i32_0 = arith.constant 0 : i32
    %2 = arith.cmpi ne, %1, %c0_i32_0 : i32
    scf.if %2 {
      %cst_10 = arith.constant 0.000000e+00 : f32
      %12 = vector.broadcast %cst_10 : f32 to vector<16x128xf32>
      %c0_11 = arith.constant 0 : index
      %c0_12 = arith.constant 0 : index
      %13 = vector.load %arg10[%c0_11, %c0_12] : memref<16x128xf32, #tpu.memory_space<vmem>>, vector<16x128xf32>
      tpu.vector_store %arg10[%c0_11, %c0_12], %12 {strides = array<i32>} : memref<16x128xf32, #tpu.memory_space<vmem>>, vector<16x128xf32>,
    } else {
    }
    %c0 = arith.constant 0 : index
    %c0_1 = arith.constant 0 : index
    %3 = vector.load %arg10[%c0, %c0_1] : memref<16x128xf32, #tpu.memory_space<vmem>>, vector<16x128xf32>
    %c0_2 = arith.constant 0 : index
    %c0_3 = arith.constant 0 : index
    %4 = vector.load %arg3[%c0_2, %c0_3] : memref<16x288xbf16, #tpu.memory_space<vmem>>, vector<16x288xbf16>
    %c0_4 = arith.constant 0 : index
    %c0_5 = arith.constant 0 : index
    %5 = vector.load %arg4[%c0_4, %c0_5] : memref<288x128xbf16, #tpu.memory_space<vmem>>, vector<288x128xbf16>
    %cst = arith.constant dense<0.000000e+00> : vector<16x128xf32>
    %6 = tpu.matmul %4, %5, %cst {dimension_numbers = #tpu.dot_dimension_numbers<[1], [0], [0], [1], [0, 0, 1, 1], [], []>} : vector<16x288xbf16>, vector<288x128xbf16>, vector<16x128xf32> -> vector<16x128xf32>
    %7 = arith.addf %3, %6 : vector<16x128xf32>
    %c0_6 = arith.constant 0 : index
    %c0_7 = arith.constant 0 : index
    %8 = vector.load %arg10[%c0_6, %c0_7] : memref<16x128xf32, #tpu.memory_space<vmem>>, vector<16x128xf32>
    tpu.vector_store %arg10[%c0_6, %c0_7], %7 {strides = array<i32>} : memref<16x128xf32, #tpu.memory_space<vmem>>, vector<16x128xf32>,
    %c0_i32_8 = arith.constant 0 : i32
    %9 = arith.cmpi eq, %arg2, %c0_i32_8 : i32
    %10 = arith.extui %9 : i1 to i32
    %c0_i32_9 = arith.constant 0 : i32
    %11 = arith.cmpi ne, %10, %c0_i32_9 : i32
    scf.if %11 {
      %c0_10 = arith.constant 0 : index
      %c0_11 = arith.constant 0 : index
      %12 = vector.load %arg10[%c0_10, %c0_11] : memref<16x128xf32, #tpu.memory_space<vmem>>, vector<16x128xf32>
      %c0_12 = arith.constant 0 : index
      %c0_13 = arith.constant 0 : index
      %13 = vector.load %arg5[%c0_12, %c0_13] : memref<1x128xf32, #tpu.memory_space<vmem>>, vector<1x128xf32>
      %14 = vector.broadcast %13 : vector<1x128xf32> to vector<16x128xf32>
      %15 = arith.addf %12, %14 : vector<16x128xf32>
      %c0_14 = arith.constant 0 : index
      %c0_15 = arith.constant 0 : index
      %16 = vector.load %arg6[%c0_14, %c0_15] : memref<1x128xf32, #tpu.memory_space<vmem>>, vector<1x128xf32>
      %17 = vector.broadcast %16 : vector<1x128xf32> to vector<16x128xf32>
      %18 = arith.mulf %15, %17 : vector<16x128xf32>
      %c0_16 = arith.constant 0 : index
      %c0_17 = arith.constant 0 : index
      %19 = vector.load %arg7[%c0_16, %c0_17] : memref<1x128xf32, #tpu.memory_space<vmem>>, vector<1x128xf32>
      %20 = vector.broadcast %19 : vector<1x128xf32> to vector<16x128xf32>
      %21 = arith.addf %18, %20 : vector<16x128xf32>
      %cst_18 = arith.constant 0.000000e+00 : f32
      %22 = vector.broadcast %cst_18 : f32 to vector<16x128xf32>
      %23 = arith.cmpf ogt, %21, %22 : vector<16x128xf32>
      %cst_19 = arith.constant 0.000000e+00 : f32
      %24 = vector.broadcast %cst_19 : f32 to vector<16x128xf32>
      %25 = arith.minimumf %21, %24 : vector<16x128xf32>
      %26 = math.exp %25 : vector<16x128xf32>
      %cst_20 = arith.constant 1.000000e+00 : f32
      %27 = vector.broadcast %cst_20 : f32 to vector<16x128xf32>
      %28 = arith.subf %26, %27 : vector<16x128xf32>
      %29 = arith.select %23, %21, %28 : vector<16x128xi1>, vector<16x128xf32>
      %c0_21 = arith.constant 0 : index
      %c0_22 = arith.constant 0 : index
      %30 = vector.load %arg8[%c0_21, %c0_22] : memref<1x128xf32, #tpu.memory_space<vmem>>, vector<1x128xf32>
      %cst_23 = arith.constant 5.000000e-01 : f32
      %31 = vector.broadcast %cst_23 : f32 to vector<1x128xf32>
      %32 = arith.cmpf ogt, %30, %31 : vector<1x128xf32>
      %33 = vector.shape_cast %32 : vector<1x128xi1> to vector<1x128xi1>
      %34 = vector.broadcast %33 : vector<1x128xi1> to vector<16x128xi1>
      %35 = arith.select %34, %29, %15 : vector<16x128xi1>, vector<16x128xf32>
      %36 = arith.truncf %35 : vector<16x128xf32> to vector<16x128xbf16>
      %c0_24 = arith.constant 0 : index
      %c0_25 = arith.constant 0 : index
      %37 = vector.load %arg9[%c0_24, %c0_25] : memref<16x128xbf16, #tpu.memory_space<vmem>>, vector<16x128xbf16>
      tpu.vector_store %arg9[%c0_24, %c0_25], %36 {strides = array<i32>} : memref<16x128xbf16, #tpu.memory_space<vmem>>, vector<16x128xbf16>,
    } else {
    }
    return
  }
  func.func @transform_0(%arg0: i32, %arg1: i32, %arg2: i32) -> (i32, i32) {
    %c0_i32 = arith.constant 0 : i32
    return %arg0, %arg2 : i32, i32
  }
  func.func @transform_1(%arg0: i32, %arg1: i32, %arg2: i32) -> (i32, i32) {
    %c0_i32 = arith.constant 0 : i32
    return %arg2, %arg1 : i32, i32
  }
  func.func @transform_2(%arg0: i32, %arg1: i32, %arg2: i32) -> (i32, i32) {
    %c0_i32 = arith.constant 0 : i32
    %c0_i32_0 = arith.constant 0 : i32
    return %c0_i32, %arg1 : i32, i32
  }
  func.func @transform_3(%arg0: i32, %arg1: i32, %arg2: i32) -> (i32, i32) {
    %c0_i32 = arith.constant 0 : i32
    %c0_i32_0 = arith.constant 0 : i32
    return %c0_i32, %arg1 : i32, i32
  }
  func.func @transform_4(%arg0: i32, %arg1: i32, %arg2: i32) -> (i32, i32) {
    %c0_i32 = arith.constant 0 : i32
    %c0_i32_0 = arith.constant 0 : i32
    return %c0_i32, %arg1 : i32, i32
  }
  func.func @transform_5(%arg0: i32, %arg1: i32, %arg2: i32) -> (i32, i32) {
    %c0_i32 = arith.constant 0 : i32
    %c0_i32_0 = arith.constant 0 : i32
    return %c0_i32, %arg1 : i32, i32
  }
  func.func @transform_6(%arg0: i32, %arg1: i32, %arg2: i32) -> (i32, i32) {
    %c0_i32 = arith.constant 0 : i32
    return %arg0, %arg1 : i32, i32
  }
}

module attributes {stable_mosaic.version = 11 : i64} {
  func.func @kernel(%arg0: i32, %arg1: i32, %arg2: i32, %arg3: memref<16x16xbf16, #tpu.memory_space<vmem>>, %arg4: memref<16x128xbf16, #tpu.memory_space<vmem>>, %arg5: memref<1x128xf32, #tpu.memory_space<vmem>>, %arg6: memref<16x128xbf16, #tpu.memory_space<vmem>>, %arg7: memref<16x128xf32, #tpu.memory_space<vmem>>) attributes {dimension_semantics = [#tpu.dimension_semantics<parallel>, #tpu.dimension_semantics<parallel>, #tpu.dimension_semantics<arbitrary>], iteration_bounds = array<i64: 2, 1, 1>, scalar_prefetch = 0 : i64, scratch_operands = 1 : i64, tpu.core_type = #tpu.core_type<tc>, window_params = [{transform_indices = @transform_0, window_bounds = array<i64: 16, 16>}, {transform_indices = @transform_1, window_bounds = array<i64: 16, 128>}, {transform_indices = @transform_2, window_bounds = array<i64: 1, 128>}, {transform_indices = @transform_3, window_bounds = array<i64: 16, 128>}]} {
    %c0_i32 = arith.constant 0 : i32
    %0 = arith.cmpi eq, %arg2, %c0_i32 : i32
    %1 = arith.extui %0 : i1 to i32
    %c0_i32_0 = arith.constant 0 : i32
    %2 = arith.cmpi ne, %1, %c0_i32_0 : i32
    scf.if %2 {
      %cst_10 = arith.constant 0.000000e+00 : f32
      %12 = vector.broadcast %cst_10 : f32 to vector<16x128xf32>
      %c0_11 = arith.constant 0 : index
      %c0_12 = arith.constant 0 : index
      %13 = vector.load %arg7[%c0_11, %c0_12] : memref<16x128xf32, #tpu.memory_space<vmem>>, vector<16x128xf32>
      tpu.vector_store %arg7[%c0_11, %c0_12], %12 {strides = array<i32>} : memref<16x128xf32, #tpu.memory_space<vmem>>, vector<16x128xf32>,
    } else {
    }
    %c0 = arith.constant 0 : index
    %c0_1 = arith.constant 0 : index
    %3 = vector.load %arg7[%c0, %c0_1] : memref<16x128xf32, #tpu.memory_space<vmem>>, vector<16x128xf32>
    %c0_2 = arith.constant 0 : index
    %c0_3 = arith.constant 0 : index
    %4 = vector.load %arg3[%c0_2, %c0_3] : memref<16x16xbf16, #tpu.memory_space<vmem>>, vector<16x16xbf16>
    %c0_4 = arith.constant 0 : index
    %c0_5 = arith.constant 0 : index
    %5 = vector.load %arg4[%c0_4, %c0_5] : memref<16x128xbf16, #tpu.memory_space<vmem>>, vector<16x128xbf16>
    %cst = arith.constant dense<0.000000e+00> : vector<16x128xf32>
    %6 = tpu.matmul %4, %5, %cst {dimension_numbers = #tpu.dot_dimension_numbers<[1], [0], [0], [1], [0, 0, 1, 1], [], []>} : vector<16x16xbf16>, vector<16x128xbf16>, vector<16x128xf32> -> vector<16x128xf32>
    %7 = arith.addf %3, %6 : vector<16x128xf32>
    %c0_6 = arith.constant 0 : index
    %c0_7 = arith.constant 0 : index
    %8 = vector.load %arg7[%c0_6, %c0_7] : memref<16x128xf32, #tpu.memory_space<vmem>>, vector<16x128xf32>
    tpu.vector_store %arg7[%c0_6, %c0_7], %7 {strides = array<i32>} : memref<16x128xf32, #tpu.memory_space<vmem>>, vector<16x128xf32>,
    %c0_i32_8 = arith.constant 0 : i32
    %9 = arith.cmpi eq, %arg2, %c0_i32_8 : i32
    %10 = arith.extui %9 : i1 to i32
    %c0_i32_9 = arith.constant 0 : i32
    %11 = arith.cmpi ne, %10, %c0_i32_9 : i32
    scf.if %11 {
      %c0_10 = arith.constant 0 : index
      %c0_11 = arith.constant 0 : index
      %12 = vector.load %arg7[%c0_10, %c0_11] : memref<16x128xf32, #tpu.memory_space<vmem>>, vector<16x128xf32>
      %c0_12 = arith.constant 0 : index
      %c0_13 = arith.constant 0 : index
      %13 = vector.load %arg5[%c0_12, %c0_13] : memref<1x128xf32, #tpu.memory_space<vmem>>, vector<1x128xf32>
      %14 = vector.broadcast %13 : vector<1x128xf32> to vector<16x128xf32>
      %15 = arith.addf %12, %14 : vector<16x128xf32>
      %16 = arith.truncf %15 : vector<16x128xf32> to vector<16x128xbf16>
      %c0_14 = arith.constant 0 : index
      %c0_15 = arith.constant 0 : index
      %17 = vector.load %arg6[%c0_14, %c0_15] : memref<16x128xbf16, #tpu.memory_space<vmem>>, vector<16x128xbf16>
      tpu.vector_store %arg6[%c0_14, %c0_15], %16 {strides = array<i32>} : memref<16x128xbf16, #tpu.memory_space<vmem>>, vector<16x128xbf16>,
    } else {
    }
    return
  }
  func.func @transform_0(%arg0: i32, %arg1: i32, %arg2: i32) -> (i32, i32) {
    %c0_i32 = arith.constant 0 : i32
    return %arg0, %arg2 : i32, i32
  }
  func.func @transform_1(%arg0: i32, %arg1: i32, %arg2: i32) -> (i32, i32) {
    %c0_i32 = arith.constant 0 : i32
    return %arg2, %arg1 : i32, i32
  }
  func.func @transform_2(%arg0: i32, %arg1: i32, %arg2: i32) -> (i32, i32) {
    %c0_i32 = arith.constant 0 : i32
    %c0_i32_0 = arith.constant 0 : i32
    return %c0_i32, %arg1 : i32, i32
  }
  func.func @transform_3(%arg0: i32, %arg1: i32, %arg2: i32) -> (i32, i32) {
    %c0_i32 = arith.constant 0 : i32
    return %arg0, %arg1 : i32, i32
  }
}

module attributes {stable_mosaic.version = 11 : i64} {
  func.func @kernel(%arg0: i32, %arg1: i32, %arg2: i32, %arg3: memref<16x32xbf16, #tpu.memory_space<vmem>>, %arg4: memref<32x128xbf16, #tpu.memory_space<vmem>>, %arg5: memref<1x128xf32, #tpu.memory_space<vmem>>, %arg6: memref<16x128xf32, #tpu.memory_space<vmem>>, %arg7: memref<16x128xf32, #tpu.memory_space<vmem>>) attributes {dimension_semantics = [#tpu.dimension_semantics<parallel>, #tpu.dimension_semantics<parallel>, #tpu.dimension_semantics<arbitrary>], iteration_bounds = array<i64: 2, 1, 1>, scalar_prefetch = 0 : i64, scratch_operands = 1 : i64, tpu.core_type = #tpu.core_type<tc>, window_params = [{transform_indices = @transform_0, window_bounds = array<i64: 16, 32>}, {transform_indices = @transform_1, window_bounds = array<i64: 32, 128>}, {transform_indices = @transform_2, window_bounds = array<i64: 1, 128>}, {transform_indices = @transform_3, window_bounds = array<i64: 16, 128>}]} {
    %c0_i32 = arith.constant 0 : i32
    %0 = arith.cmpi eq, %arg2, %c0_i32 : i32
    %1 = arith.extui %0 : i1 to i32
    %c0_i32_0 = arith.constant 0 : i32
    %2 = arith.cmpi ne, %1, %c0_i32_0 : i32
    scf.if %2 {
      %cst_10 = arith.constant 0.000000e+00 : f32
      %12 = vector.broadcast %cst_10 : f32 to vector<16x128xf32>
      %c0_11 = arith.constant 0 : index
      %c0_12 = arith.constant 0 : index
      %13 = vector.load %arg7[%c0_11, %c0_12] : memref<16x128xf32, #tpu.memory_space<vmem>>, vector<16x128xf32>
      tpu.vector_store %arg7[%c0_11, %c0_12], %12 {strides = array<i32>} : memref<16x128xf32, #tpu.memory_space<vmem>>, vector<16x128xf32>,
    } else {
    }
    %c0 = arith.constant 0 : index
    %c0_1 = arith.constant 0 : index
    %3 = vector.load %arg7[%c0, %c0_1] : memref<16x128xf32, #tpu.memory_space<vmem>>, vector<16x128xf32>
    %c0_2 = arith.constant 0 : index
    %c0_3 = arith.constant 0 : index
    %4 = vector.load %arg3[%c0_2, %c0_3] : memref<16x32xbf16, #tpu.memory_space<vmem>>, vector<16x32xbf16>
    %c0_4 = arith.constant 0 : index
    %c0_5 = arith.constant 0 : index
    %5 = vector.load %arg4[%c0_4, %c0_5] : memref<32x128xbf16, #tpu.memory_space<vmem>>, vector<32x128xbf16>
    %cst = arith.constant dense<0.000000e+00> : vector<16x128xf32>
    %6 = tpu.matmul %4, %5, %cst {dimension_numbers = #tpu.dot_dimension_numbers<[1], [0], [0], [1], [0, 0, 1, 1], [], []>} : vector<16x32xbf16>, vector<32x128xbf16>, vector<16x128xf32> -> vector<16x128xf32>
    %7 = arith.addf %3, %6 : vector<16x128xf32>
    %c0_6 = arith.constant 0 : index
    %c0_7 = arith.constant 0 : index
    %8 = vector.load %arg7[%c0_6, %c0_7] : memref<16x128xf32, #tpu.memory_space<vmem>>, vector<16x128xf32>
    tpu.vector_store %arg7[%c0_6, %c0_7], %7 {strides = array<i32>} : memref<16x128xf32, #tpu.memory_space<vmem>>, vector<16x128xf32>,
    %c0_i32_8 = arith.constant 0 : i32
    %9 = arith.cmpi eq, %arg2, %c0_i32_8 : i32
    %10 = arith.extui %9 : i1 to i32
    %c0_i32_9 = arith.constant 0 : i32
    %11 = arith.cmpi ne, %10, %c0_i32_9 : i32
    scf.if %11 {
      %c0_10 = arith.constant 0 : index
      %c0_11 = arith.constant 0 : index
      %12 = vector.load %arg7[%c0_10, %c0_11] : memref<16x128xf32, #tpu.memory_space<vmem>>, vector<16x128xf32>
      %c0_12 = arith.constant 0 : index
      %c0_13 = arith.constant 0 : index
      %13 = vector.load %arg5[%c0_12, %c0_13] : memref<1x128xf32, #tpu.memory_space<vmem>>, vector<1x128xf32>
      %14 = vector.broadcast %13 : vector<1x128xf32> to vector<16x128xf32>
      %15 = arith.addf %12, %14 : vector<16x128xf32>
      %c0_14 = arith.constant 0 : index
      %c0_15 = arith.constant 0 : index
      %16 = vector.load %arg6[%c0_14, %c0_15] : memref<16x128xf32, #tpu.memory_space<vmem>>, vector<16x128xf32>
      tpu.vector_store %arg6[%c0_14, %c0_15], %15 {strides = array<i32>} : memref<16x128xf32, #tpu.memory_space<vmem>>, vector<16x128xf32>,
    } else {
    }
    return
  }
  func.func @transform_0(%arg0: i32, %arg1: i32, %arg2: i32) -> (i32, i32) {
    %c0_i32 = arith.constant 0 : i32
    return %arg0, %arg2 : i32, i32
  }
  func.func @transform_1(%arg0: i32, %arg1: i32, %arg2: i32) -> (i32, i32) {
    %c0_i32 = arith.constant 0 : i32
    return %arg2, %arg1 : i32, i32
  }
  func.func @transform_2(%arg0: i32, %arg1: i32, %arg2: i32) -> (i32, i32) {
    %c0_i32 = arith.constant 0 : i32
    %c0_i32_0 = arith.constant 0 : i32
    return %c0_i32, %arg1 : i32, i32
  }
  func.func @transform_3(%arg0: i32, %arg1: i32, %arg2: i32) -> (i32, i32) {
    %c0_i32 = arith.constant 0 : i32
    return %arg0, %arg1 : i32, i32
  }
}

module attributes {stable_mosaic.version = 11 : i64} {
  func.func @kernel(%arg0: i32, %arg1: i32, %arg2: i32, %arg3: memref<16x144xbf16, #tpu.memory_space<vmem>>, %arg4: memref<144x128xbf16, #tpu.memory_space<vmem>>, %arg5: memref<1x128xf32, #tpu.memory_space<vmem>>, %arg6: memref<1x128xf32, #tpu.memory_space<vmem>>, %arg7: memref<1x128xf32, #tpu.memory_space<vmem>>, %arg8: memref<1x128xf32, #tpu.memory_space<vmem>>, %arg9: memref<16x128xbf16, #tpu.memory_space<vmem>>, %arg10: memref<16x128xbf16, #tpu.memory_space<vmem>>, %arg11: memref<16x128xf32, #tpu.memory_space<vmem>>) attributes {dimension_semantics = [#tpu.dimension_semantics<parallel>, #tpu.dimension_semantics<parallel>, #tpu.dimension_semantics<arbitrary>], iteration_bounds = array<i64: 2, 1, 1>, scalar_prefetch = 0 : i64, scratch_operands = 1 : i64, tpu.core_type = #tpu.core_type<tc>, window_params = [{transform_indices = @transform_0, window_bounds = array<i64: 16, 144>}, {transform_indices = @transform_1, window_bounds = array<i64: 144, 128>}, {transform_indices = @transform_2, window_bounds = array<i64: 1, 128>}, {transform_indices = @transform_3, window_bounds = array<i64: 1, 128>}, {transform_indices = @transform_4, window_bounds = array<i64: 1, 128>}, {transform_indices = @transform_5, window_bounds = array<i64: 1, 128>}, {transform_indices = @transform_6, window_bounds = array<i64: 16, 128>}, {transform_indices = @transform_7, window_bounds = array<i64: 16, 128>}]} {
    %c0_i32 = arith.constant 0 : i32
    %0 = arith.cmpi eq, %arg2, %c0_i32 : i32
    %1 = arith.extui %0 : i1 to i32
    %c0_i32_0 = arith.constant 0 : i32
    %2 = arith.cmpi ne, %1, %c0_i32_0 : i32
    scf.if %2 {
      %cst_10 = arith.constant 0.000000e+00 : f32
      %12 = vector.broadcast %cst_10 : f32 to vector<16x128xf32>
      %c0_11 = arith.constant 0 : index
      %c0_12 = arith.constant 0 : index
      %13 = vector.load %arg11[%c0_11, %c0_12] : memref<16x128xf32, #tpu.memory_space<vmem>>, vector<16x128xf32>
      tpu.vector_store %arg11[%c0_11, %c0_12], %12 {strides = array<i32>} : memref<16x128xf32, #tpu.memory_space<vmem>>, vector<16x128xf32>,
    } else {
    }
    %c0 = arith.constant 0 : index
    %c0_1 = arith.constant 0 : index
    %3 = vector.load %arg11[%c0, %c0_1] : memref<16x128xf32, #tpu.memory_space<vmem>>, vector<16x128xf32>
    %c0_2 = arith.constant 0 : index
    %c0_3 = arith.constant 0 : index
    %4 = vector.load %arg3[%c0_2, %c0_3] : memref<16x144xbf16, #tpu.memory_space<vmem>>, vector<16x144xbf16>
    %c0_4 = arith.constant 0 : index
    %c0_5 = arith.constant 0 : index
    %5 = vector.load %arg4[%c0_4, %c0_5] : memref<144x128xbf16, #tpu.memory_space<vmem>>, vector<144x128xbf16>
    %cst = arith.constant dense<0.000000e+00> : vector<16x128xf32>
    %6 = tpu.matmul %4, %5, %cst {dimension_numbers = #tpu.dot_dimension_numbers<[1], [0], [0], [1], [0, 0, 1, 1], [], []>} : vector<16x144xbf16>, vector<144x128xbf16>, vector<16x128xf32> -> vector<16x128xf32>
    %7 = arith.addf %3, %6 : vector<16x128xf32>
    %c0_6 = arith.constant 0 : index
    %c0_7 = arith.constant 0 : index
    %8 = vector.load %arg11[%c0_6, %c0_7] : memref<16x128xf32, #tpu.memory_space<vmem>>, vector<16x128xf32>
    tpu.vector_store %arg11[%c0_6, %c0_7], %7 {strides = array<i32>} : memref<16x128xf32, #tpu.memory_space<vmem>>, vector<16x128xf32>,
    %c0_i32_8 = arith.constant 0 : i32
    %9 = arith.cmpi eq, %arg2, %c0_i32_8 : i32
    %10 = arith.extui %9 : i1 to i32
    %c0_i32_9 = arith.constant 0 : i32
    %11 = arith.cmpi ne, %10, %c0_i32_9 : i32
    scf.if %11 {
      %c0_10 = arith.constant 0 : index
      %c0_11 = arith.constant 0 : index
      %12 = vector.load %arg11[%c0_10, %c0_11] : memref<16x128xf32, #tpu.memory_space<vmem>>, vector<16x128xf32>
      %c0_12 = arith.constant 0 : index
      %c0_13 = arith.constant 0 : index
      %13 = vector.load %arg5[%c0_12, %c0_13] : memref<1x128xf32, #tpu.memory_space<vmem>>, vector<1x128xf32>
      %14 = vector.broadcast %13 : vector<1x128xf32> to vector<16x128xf32>
      %15 = arith.addf %12, %14 : vector<16x128xf32>
      %c0_14 = arith.constant 0 : index
      %c0_15 = arith.constant 0 : index
      %16 = vector.load %arg9[%c0_14, %c0_15] : memref<16x128xbf16, #tpu.memory_space<vmem>>, vector<16x128xbf16>
      %17 = arith.extf %16 : vector<16x128xbf16> to vector<16x128xf32>
      %18 = arith.addf %15, %17 : vector<16x128xf32>
      %c0_16 = arith.constant 0 : index
      %c0_17 = arith.constant 0 : index
      %19 = vector.load %arg6[%c0_16, %c0_17] : memref<1x128xf32, #tpu.memory_space<vmem>>, vector<1x128xf32>
      %20 = vector.broadcast %19 : vector<1x128xf32> to vector<16x128xf32>
      %21 = arith.mulf %18, %20 : vector<16x128xf32>
      %c0_18 = arith.constant 0 : index
      %c0_19 = arith.constant 0 : index
      %22 = vector.load %arg7[%c0_18, %c0_19] : memref<1x128xf32, #tpu.memory_space<vmem>>, vector<1x128xf32>
      %23 = vector.broadcast %22 : vector<1x128xf32> to vector<16x128xf32>
      %24 = arith.addf %21, %23 : vector<16x128xf32>
      %cst_20 = arith.constant 0.000000e+00 : f32
      %25 = vector.broadcast %cst_20 : f32 to vector<16x128xf32>
      %26 = arith.cmpf ogt, %24, %25 : vector<16x128xf32>
      %cst_21 = arith.constant 0.000000e+00 : f32
      %27 = vector.broadcast %cst_21 : f32 to vector<16x128xf32>
      %28 = arith.minimumf %24, %27 : vector<16x128xf32>
      %29 = math.exp %28 : vector<16x128xf32>
      %cst_22 = arith.constant 1.000000e+00 : f32
      %30 = vector.broadcast %cst_22 : f32 to vector<16x128xf32>
      %31 = arith.subf %29, %30 : vector<16x128xf32>
      %32 = arith.select %26, %24, %31 : vector<16x128xi1>, vector<16x128xf32>
      %c0_23 = arith.constant 0 : index
      %c0_24 = arith.constant 0 : index
      %33 = vector.load %arg8[%c0_23, %c0_24] : memref<1x128xf32, #tpu.memory_space<vmem>>, vector<1x128xf32>
      %cst_25 = arith.constant 5.000000e-01 : f32
      %34 = vector.broadcast %cst_25 : f32 to vector<1x128xf32>
      %35 = arith.cmpf ogt, %33, %34 : vector<1x128xf32>
      %36 = vector.shape_cast %35 : vector<1x128xi1> to vector<1x128xi1>
      %37 = vector.broadcast %36 : vector<1x128xi1> to vector<16x128xi1>
      %38 = arith.select %37, %32, %18 : vector<16x128xi1>, vector<16x128xf32>
      %39 = arith.truncf %38 : vector<16x128xf32> to vector<16x128xbf16>
      %c0_26 = arith.constant 0 : index
      %c0_27 = arith.constant 0 : index
      %40 = vector.load %arg10[%c0_26, %c0_27] : memref<16x128xbf16, #tpu.memory_space<vmem>>, vector<16x128xbf16>
      tpu.vector_store %arg10[%c0_26, %c0_27], %39 {strides = array<i32>} : memref<16x128xbf16, #tpu.memory_space<vmem>>, vector<16x128xbf16>,
    } else {
    }
    return
  }
  func.func @transform_0(%arg0: i32, %arg1: i32, %arg2: i32) -> (i32, i32) {
    %c0_i32 = arith.constant 0 : i32
    return %arg0, %arg2 : i32, i32
  }
  func.func @transform_1(%arg0: i32, %arg1: i32, %arg2: i32) -> (i32, i32) {
    %c0_i32 = arith.constant 0 : i32
    return %arg2, %arg1 : i32, i32
  }
  func.func @transform_2(%arg0: i32, %arg1: i32, %arg2: i32) -> (i32, i32) {
    %c0_i32 = arith.constant 0 : i32
    %c0_i32_0 = arith.constant 0 : i32
    return %c0_i32, %arg1 : i32, i32
  }
  func.func @transform_3(%arg0: i32, %arg1: i32, %arg2: i32) -> (i32, i32) {
    %c0_i32 = arith.constant 0 : i32
    %c0_i32_0 = arith.constant 0 : i32
    return %c0_i32, %arg1 : i32, i32
  }
  func.func @transform_4(%arg0: i32, %arg1: i32, %arg2: i32) -> (i32, i32) {
    %c0_i32 = arith.constant 0 : i32
    %c0_i32_0 = arith.constant 0 : i32
    return %c0_i32, %arg1 : i32, i32
  }
  func.func @transform_5(%arg0: i32, %arg1: i32, %arg2: i32) -> (i32, i32) {
    %c0_i32 = arith.constant 0 : i32
    %c0_i32_0 = arith.constant 0 : i32
    return %c0_i32, %arg1 : i32, i32
  }
  func.func @transform_6(%arg0: i32, %arg1: i32, %arg2: i32) -> (i32, i32) {
    %c0_i32 = arith.constant 0 : i32
    return %arg0, %arg1 : i32, i32
  }
  func.func @transform_7(%arg0: i32, %arg1: i32, %arg2: i32) -> (i32, i32) {
    %c0_i32 = arith.constant 0 : i32
    return %arg0, %arg1 : i32, i32
  }
}

module attributes {stable_mosaic.version = 11 : i64} {
  func.func @kernel(%arg0: i32, %arg1: i32, %arg2: i32, %arg3: memref<64x288xbf16, #tpu.memory_space<vmem>>, %arg4: memref<288x128xbf16, #tpu.memory_space<vmem>>, %arg5: memref<1x128xf32, #tpu.memory_space<vmem>>, %arg6: memref<1x128xf32, #tpu.memory_space<vmem>>, %arg7: memref<1x128xf32, #tpu.memory_space<vmem>>, %arg8: memref<1x128xf32, #tpu.memory_space<vmem>>, %arg9: memref<64x128xbf16, #tpu.memory_space<vmem>>, %arg10: memref<64x128xf32, #tpu.memory_space<vmem>>) attributes {dimension_semantics = [#tpu.dimension_semantics<parallel>, #tpu.dimension_semantics<parallel>, #tpu.dimension_semantics<arbitrary>], iteration_bounds = array<i64: 2, 1, 1>, scalar_prefetch = 0 : i64, scratch_operands = 1 : i64, tpu.core_type = #tpu.core_type<tc>, window_params = [{transform_indices = @transform_0, window_bounds = array<i64: 64, 288>}, {transform_indices = @transform_1, window_bounds = array<i64: 288, 128>}, {transform_indices = @transform_2, window_bounds = array<i64: 1, 128>}, {transform_indices = @transform_3, window_bounds = array<i64: 1, 128>}, {transform_indices = @transform_4, window_bounds = array<i64: 1, 128>}, {transform_indices = @transform_5, window_bounds = array<i64: 1, 128>}, {transform_indices = @transform_6, window_bounds = array<i64: 64, 128>}]} {
    %c0_i32 = arith.constant 0 : i32
    %0 = arith.cmpi eq, %arg2, %c0_i32 : i32
    %1 = arith.extui %0 : i1 to i32
    %c0_i32_0 = arith.constant 0 : i32
    %2 = arith.cmpi ne, %1, %c0_i32_0 : i32
    scf.if %2 {
      %cst_10 = arith.constant 0.000000e+00 : f32
      %12 = vector.broadcast %cst_10 : f32 to vector<64x128xf32>
      %c0_11 = arith.constant 0 : index
      %c0_12 = arith.constant 0 : index
      %13 = vector.load %arg10[%c0_11, %c0_12] : memref<64x128xf32, #tpu.memory_space<vmem>>, vector<64x128xf32>
      tpu.vector_store %arg10[%c0_11, %c0_12], %12 {strides = array<i32>} : memref<64x128xf32, #tpu.memory_space<vmem>>, vector<64x128xf32>,
    } else {
    }
    %c0 = arith.constant 0 : index
    %c0_1 = arith.constant 0 : index
    %3 = vector.load %arg10[%c0, %c0_1] : memref<64x128xf32, #tpu.memory_space<vmem>>, vector<64x128xf32>
    %c0_2 = arith.constant 0 : index
    %c0_3 = arith.constant 0 : index
    %4 = vector.load %arg3[%c0_2, %c0_3] : memref<64x288xbf16, #tpu.memory_space<vmem>>, vector<64x288xbf16>
    %c0_4 = arith.constant 0 : index
    %c0_5 = arith.constant 0 : index
    %5 = vector.load %arg4[%c0_4, %c0_5] : memref<288x128xbf16, #tpu.memory_space<vmem>>, vector<288x128xbf16>
    %cst = arith.constant dense<0.000000e+00> : vector<64x128xf32>
    %6 = tpu.matmul %4, %5, %cst {dimension_numbers = #tpu.dot_dimension_numbers<[1], [0], [0], [1], [0, 0, 1, 1], [], []>} : vector<64x288xbf16>, vector<288x128xbf16>, vector<64x128xf32> -> vector<64x128xf32>
    %7 = arith.addf %3, %6 : vector<64x128xf32>
    %c0_6 = arith.constant 0 : index
    %c0_7 = arith.constant 0 : index
    %8 = vector.load %arg10[%c0_6, %c0_7] : memref<64x128xf32, #tpu.memory_space<vmem>>, vector<64x128xf32>
    tpu.vector_store %arg10[%c0_6, %c0_7], %7 {strides = array<i32>} : memref<64x128xf32, #tpu.memory_space<vmem>>, vector<64x128xf32>,
    %c0_i32_8 = arith.constant 0 : i32
    %9 = arith.cmpi eq, %arg2, %c0_i32_8 : i32
    %10 = arith.extui %9 : i1 to i32
    %c0_i32_9 = arith.constant 0 : i32
    %11 = arith.cmpi ne, %10, %c0_i32_9 : i32
    scf.if %11 {
      %c0_10 = arith.constant 0 : index
      %c0_11 = arith.constant 0 : index
      %12 = vector.load %arg10[%c0_10, %c0_11] : memref<64x128xf32, #tpu.memory_space<vmem>>, vector<64x128xf32>
      %c0_12 = arith.constant 0 : index
      %c0_13 = arith.constant 0 : index
      %13 = vector.load %arg5[%c0_12, %c0_13] : memref<1x128xf32, #tpu.memory_space<vmem>>, vector<1x128xf32>
      %14 = vector.broadcast %13 : vector<1x128xf32> to vector<64x128xf32>
      %15 = arith.addf %12, %14 : vector<64x128xf32>
      %c0_14 = arith.constant 0 : index
      %c0_15 = arith.constant 0 : index
      %16 = vector.load %arg6[%c0_14, %c0_15] : memref<1x128xf32, #tpu.memory_space<vmem>>, vector<1x128xf32>
      %17 = vector.broadcast %16 : vector<1x128xf32> to vector<64x128xf32>
      %18 = arith.mulf %15, %17 : vector<64x128xf32>
      %c0_16 = arith.constant 0 : index
      %c0_17 = arith.constant 0 : index
      %19 = vector.load %arg7[%c0_16, %c0_17] : memref<1x128xf32, #tpu.memory_space<vmem>>, vector<1x128xf32>
      %20 = vector.broadcast %19 : vector<1x128xf32> to vector<64x128xf32>
      %21 = arith.addf %18, %20 : vector<64x128xf32>
      %cst_18 = arith.constant 0.000000e+00 : f32
      %22 = vector.broadcast %cst_18 : f32 to vector<64x128xf32>
      %23 = arith.cmpf ogt, %21, %22 : vector<64x128xf32>
      %cst_19 = arith.constant 0.000000e+00 : f32
      %24 = vector.broadcast %cst_19 : f32 to vector<64x128xf32>
      %25 = arith.minimumf %21, %24 : vector<64x128xf32>
      %26 = math.exp %25 : vector<64x128xf32>
      %cst_20 = arith.constant 1.000000e+00 : f32
      %27 = vector.broadcast %cst_20 : f32 to vector<64x128xf32>
      %28 = arith.subf %26, %27 : vector<64x128xf32>
      %29 = arith.select %23, %21, %28 : vector<64x128xi1>, vector<64x128xf32>
      %c0_21 = arith.constant 0 : index
      %c0_22 = arith.constant 0 : index
      %30 = vector.load %arg8[%c0_21, %c0_22] : memref<1x128xf32, #tpu.memory_space<vmem>>, vector<1x128xf32>
      %cst_23 = arith.constant 5.000000e-01 : f32
      %31 = vector.broadcast %cst_23 : f32 to vector<1x128xf32>
      %32 = arith.cmpf ogt, %30, %31 : vector<1x128xf32>
      %33 = vector.shape_cast %32 : vector<1x128xi1> to vector<1x128xi1>
      %34 = vector.broadcast %33 : vector<1x128xi1> to vector<64x128xi1>
      %35 = arith.select %34, %29, %15 : vector<64x128xi1>, vector<64x128xf32>
      %36 = arith.truncf %35 : vector<64x128xf32> to vector<64x128xbf16>
      %c0_24 = arith.constant 0 : index
      %c0_25 = arith.constant 0 : index
      %37 = vector.load %arg9[%c0_24, %c0_25] : memref<64x128xbf16, #tpu.memory_space<vmem>>, vector<64x128xbf16>
      tpu.vector_store %arg9[%c0_24, %c0_25], %36 {strides = array<i32>} : memref<64x128xbf16, #tpu.memory_space<vmem>>, vector<64x128xbf16>,
    } else {
    }
    return
  }
  func.func @transform_0(%arg0: i32, %arg1: i32, %arg2: i32) -> (i32, i32) {
    %c0_i32 = arith.constant 0 : i32
    return %arg0, %arg2 : i32, i32
  }
  func.func @transform_1(%arg0: i32, %arg1: i32, %arg2: i32) -> (i32, i32) {
    %c0_i32 = arith.constant 0 : i32
    return %arg2, %arg1 : i32, i32
  }
  func.func @transform_2(%arg0: i32, %arg1: i32, %arg2: i32) -> (i32, i32) {
    %c0_i32 = arith.constant 0 : i32
    %c0_i32_0 = arith.constant 0 : i32
    return %c0_i32, %arg1 : i32, i32
  }
  func.func @transform_3(%arg0: i32, %arg1: i32, %arg2: i32) -> (i32, i32) {
    %c0_i32 = arith.constant 0 : i32
    %c0_i32_0 = arith.constant 0 : i32
    return %c0_i32, %arg1 : i32, i32
  }
  func.func @transform_4(%arg0: i32, %arg1: i32, %arg2: i32) -> (i32, i32) {
    %c0_i32 = arith.constant 0 : i32
    %c0_i32_0 = arith.constant 0 : i32
    return %c0_i32, %arg1 : i32, i32
  }
  func.func @transform_5(%arg0: i32, %arg1: i32, %arg2: i32) -> (i32, i32) {
    %c0_i32 = arith.constant 0 : i32
    %c0_i32_0 = arith.constant 0 : i32
    return %c0_i32, %arg1 : i32, i32
  }
  func.func @transform_6(%arg0: i32, %arg1: i32, %arg2: i32) -> (i32, i32) {
    %c0_i32 = arith.constant 0 : i32
    return %arg0, %arg1 : i32, i32
  }
}

module attributes {stable_mosaic.version = 11 : i64} {
  func.func @kernel(%arg0: i32, %arg1: i32, %arg2: i32, %arg3: memref<64x144xbf16, #tpu.memory_space<vmem>>, %arg4: memref<144x128xbf16, #tpu.memory_space<vmem>>, %arg5: memref<1x128xf32, #tpu.memory_space<vmem>>, %arg6: memref<1x128xf32, #tpu.memory_space<vmem>>, %arg7: memref<1x128xf32, #tpu.memory_space<vmem>>, %arg8: memref<1x128xf32, #tpu.memory_space<vmem>>, %arg9: memref<64x128xbf16, #tpu.memory_space<vmem>>, %arg10: memref<64x128xbf16, #tpu.memory_space<vmem>>, %arg11: memref<64x128xf32, #tpu.memory_space<vmem>>) attributes {dimension_semantics = [#tpu.dimension_semantics<parallel>, #tpu.dimension_semantics<parallel>, #tpu.dimension_semantics<arbitrary>], iteration_bounds = array<i64: 2, 1, 1>, scalar_prefetch = 0 : i64, scratch_operands = 1 : i64, tpu.core_type = #tpu.core_type<tc>, window_params = [{transform_indices = @transform_0, window_bounds = array<i64: 64, 144>}, {transform_indices = @transform_1, window_bounds = array<i64: 144, 128>}, {transform_indices = @transform_2, window_bounds = array<i64: 1, 128>}, {transform_indices = @transform_3, window_bounds = array<i64: 1, 128>}, {transform_indices = @transform_4, window_bounds = array<i64: 1, 128>}, {transform_indices = @transform_5, window_bounds = array<i64: 1, 128>}, {transform_indices = @transform_6, window_bounds = array<i64: 64, 128>}, {transform_indices = @transform_7, window_bounds = array<i64: 64, 128>}]} {
    %c0_i32 = arith.constant 0 : i32
    %0 = arith.cmpi eq, %arg2, %c0_i32 : i32
    %1 = arith.extui %0 : i1 to i32
    %c0_i32_0 = arith.constant 0 : i32
    %2 = arith.cmpi ne, %1, %c0_i32_0 : i32
    scf.if %2 {
      %cst_10 = arith.constant 0.000000e+00 : f32
      %12 = vector.broadcast %cst_10 : f32 to vector<64x128xf32>
      %c0_11 = arith.constant 0 : index
      %c0_12 = arith.constant 0 : index
      %13 = vector.load %arg11[%c0_11, %c0_12] : memref<64x128xf32, #tpu.memory_space<vmem>>, vector<64x128xf32>
      tpu.vector_store %arg11[%c0_11, %c0_12], %12 {strides = array<i32>} : memref<64x128xf32, #tpu.memory_space<vmem>>, vector<64x128xf32>,
    } else {
    }
    %c0 = arith.constant 0 : index
    %c0_1 = arith.constant 0 : index
    %3 = vector.load %arg11[%c0, %c0_1] : memref<64x128xf32, #tpu.memory_space<vmem>>, vector<64x128xf32>
    %c0_2 = arith.constant 0 : index
    %c0_3 = arith.constant 0 : index
    %4 = vector.load %arg3[%c0_2, %c0_3] : memref<64x144xbf16, #tpu.memory_space<vmem>>, vector<64x144xbf16>
    %c0_4 = arith.constant 0 : index
    %c0_5 = arith.constant 0 : index
    %5 = vector.load %arg4[%c0_4, %c0_5] : memref<144x128xbf16, #tpu.memory_space<vmem>>, vector<144x128xbf16>
    %cst = arith.constant dense<0.000000e+00> : vector<64x128xf32>
    %6 = tpu.matmul %4, %5, %cst {dimension_numbers = #tpu.dot_dimension_numbers<[1], [0], [0], [1], [0, 0, 1, 1], [], []>} : vector<64x144xbf16>, vector<144x128xbf16>, vector<64x128xf32> -> vector<64x128xf32>
    %7 = arith.addf %3, %6 : vector<64x128xf32>
    %c0_6 = arith.constant 0 : index
    %c0_7 = arith.constant 0 : index
    %8 = vector.load %arg11[%c0_6, %c0_7] : memref<64x128xf32, #tpu.memory_space<vmem>>, vector<64x128xf32>
    tpu.vector_store %arg11[%c0_6, %c0_7], %7 {strides = array<i32>} : memref<64x128xf32, #tpu.memory_space<vmem>>, vector<64x128xf32>,
    %c0_i32_8 = arith.constant 0 : i32
    %9 = arith.cmpi eq, %arg2, %c0_i32_8 : i32
    %10 = arith.extui %9 : i1 to i32
    %c0_i32_9 = arith.constant 0 : i32
    %11 = arith.cmpi ne, %10, %c0_i32_9 : i32
    scf.if %11 {
      %c0_10 = arith.constant 0 : index
      %c0_11 = arith.constant 0 : index
      %12 = vector.load %arg11[%c0_10, %c0_11] : memref<64x128xf32, #tpu.memory_space<vmem>>, vector<64x128xf32>
      %c0_12 = arith.constant 0 : index
      %c0_13 = arith.constant 0 : index
      %13 = vector.load %arg5[%c0_12, %c0_13] : memref<1x128xf32, #tpu.memory_space<vmem>>, vector<1x128xf32>
      %14 = vector.broadcast %13 : vector<1x128xf32> to vector<64x128xf32>
      %15 = arith.addf %12, %14 : vector<64x128xf32>
      %c0_14 = arith.constant 0 : index
      %c0_15 = arith.constant 0 : index
      %16 = vector.load %arg9[%c0_14, %c0_15] : memref<64x128xbf16, #tpu.memory_space<vmem>>, vector<64x128xbf16>
      %17 = arith.extf %16 : vector<64x128xbf16> to vector<64x128xf32>
      %18 = arith.addf %15, %17 : vector<64x128xf32>
      %c0_16 = arith.constant 0 : index
      %c0_17 = arith.constant 0 : index
      %19 = vector.load %arg6[%c0_16, %c0_17] : memref<1x128xf32, #tpu.memory_space<vmem>>, vector<1x128xf32>
      %20 = vector.broadcast %19 : vector<1x128xf32> to vector<64x128xf32>
      %21 = arith.mulf %18, %20 : vector<64x128xf32>
      %c0_18 = arith.constant 0 : index
      %c0_19 = arith.constant 0 : index
      %22 = vector.load %arg7[%c0_18, %c0_19] : memref<1x128xf32, #tpu.memory_space<vmem>>, vector<1x128xf32>
      %23 = vector.broadcast %22 : vector<1x128xf32> to vector<64x128xf32>
      %24 = arith.addf %21, %23 : vector<64x128xf32>
      %cst_20 = arith.constant 0.000000e+00 : f32
      %25 = vector.broadcast %cst_20 : f32 to vector<64x128xf32>
      %26 = arith.cmpf ogt, %24, %25 : vector<64x128xf32>
      %cst_21 = arith.constant 0.000000e+00 : f32
      %27 = vector.broadcast %cst_21 : f32 to vector<64x128xf32>
      %28 = arith.minimumf %24, %27 : vector<64x128xf32>
      %29 = math.exp %28 : vector<64x128xf32>
      %cst_22 = arith.constant 1.000000e+00 : f32
      %30 = vector.broadcast %cst_22 : f32 to vector<64x128xf32>
      %31 = arith.subf %29, %30 : vector<64x128xf32>
      %32 = arith.select %26, %24, %31 : vector<64x128xi1>, vector<64x128xf32>
      %c0_23 = arith.constant 0 : index
      %c0_24 = arith.constant 0 : index
      %33 = vector.load %arg8[%c0_23, %c0_24] : memref<1x128xf32, #tpu.memory_space<vmem>>, vector<1x128xf32>
      %cst_25 = arith.constant 5.000000e-01 : f32
      %34 = vector.broadcast %cst_25 : f32 to vector<1x128xf32>
      %35 = arith.cmpf ogt, %33, %34 : vector<1x128xf32>
      %36 = vector.shape_cast %35 : vector<1x128xi1> to vector<1x128xi1>
      %37 = vector.broadcast %36 : vector<1x128xi1> to vector<64x128xi1>
      %38 = arith.select %37, %32, %18 : vector<64x128xi1>, vector<64x128xf32>
      %39 = arith.truncf %38 : vector<64x128xf32> to vector<64x128xbf16>
      %c0_26 = arith.constant 0 : index
      %c0_27 = arith.constant 0 : index
      %40 = vector.load %arg10[%c0_26, %c0_27] : memref<64x128xbf16, #tpu.memory_space<vmem>>, vector<64x128xbf16>
      tpu.vector_store %arg10[%c0_26, %c0_27], %39 {strides = array<i32>} : memref<64x128xbf16, #tpu.memory_space<vmem>>, vector<64x128xbf16>,
    } else {
    }
    return
  }
  func.func @transform_0(%arg0: i32, %arg1: i32, %arg2: i32) -> (i32, i32) {
    %c0_i32 = arith.constant 0 : i32
    return %arg0, %arg2 : i32, i32
  }
  func.func @transform_1(%arg0: i32, %arg1: i32, %arg2: i32) -> (i32, i32) {
    %c0_i32 = arith.constant 0 : i32
    return %arg2, %arg1 : i32, i32
  }
  func.func @transform_2(%arg0: i32, %arg1: i32, %arg2: i32) -> (i32, i32) {
    %c0_i32 = arith.constant 0 : i32
    %c0_i32_0 = arith.constant 0 : i32
    return %c0_i32, %arg1 : i32, i32
  }
  func.func @transform_3(%arg0: i32, %arg1: i32, %arg2: i32) -> (i32, i32) {
    %c0_i32 = arith.constant 0 : i32
    %c0_i32_0 = arith.constant 0 : i32
    return %c0_i32, %arg1 : i32, i32
  }
  func.func @transform_4(%arg0: i32, %arg1: i32, %arg2: i32) -> (i32, i32) {
    %c0_i32 = arith.constant 0 : i32
    %c0_i32_0 = arith.constant 0 : i32
    return %c0_i32, %arg1 : i32, i32
  }
  func.func @transform_5(%arg0: i32, %arg1: i32, %arg2: i32) -> (i32, i32) {
    %c0_i32 = arith.constant 0 : i32
    %c0_i32_0 = arith.constant 0 : i32
    return %c0_i32, %arg1 : i32, i32
  }
  func.func @transform_6(%arg0: i32, %arg1: i32, %arg2: i32) -> (i32, i32) {
    %c0_i32 = arith.constant 0 : i32
    return %arg0, %arg1 : i32, i32
  }
  func.func @transform_7(%arg0: i32, %arg1: i32, %arg2: i32) -> (i32, i32) {
    %c0_i32 = arith.constant 0 : i32
    return %arg0, %arg1 : i32, i32
  }
}

module attributes {stable_mosaic.version = 11 : i64} {
  func.func @kernel(%arg0: i32, %arg1: i32, %arg2: i32, %arg3: memref<256x144xbf16, #tpu.memory_space<vmem>>, %arg4: memref<144x128xbf16, #tpu.memory_space<vmem>>, %arg5: memref<1x128xf32, #tpu.memory_space<vmem>>, %arg6: memref<1x128xf32, #tpu.memory_space<vmem>>, %arg7: memref<1x128xf32, #tpu.memory_space<vmem>>, %arg8: memref<1x128xf32, #tpu.memory_space<vmem>>, %arg9: memref<256x128xbf16, #tpu.memory_space<vmem>>, %arg10: memref<256x128xf32, #tpu.memory_space<vmem>>) attributes {dimension_semantics = [#tpu.dimension_semantics<parallel>, #tpu.dimension_semantics<parallel>, #tpu.dimension_semantics<arbitrary>], iteration_bounds = array<i64: 2, 1, 1>, scalar_prefetch = 0 : i64, scratch_operands = 1 : i64, tpu.core_type = #tpu.core_type<tc>, window_params = [{transform_indices = @transform_0, window_bounds = array<i64: 256, 144>}, {transform_indices = @transform_1, window_bounds = array<i64: 144, 128>}, {transform_indices = @transform_2, window_bounds = array<i64: 1, 128>}, {transform_indices = @transform_3, window_bounds = array<i64: 1, 128>}, {transform_indices = @transform_4, window_bounds = array<i64: 1, 128>}, {transform_indices = @transform_5, window_bounds = array<i64: 1, 128>}, {transform_indices = @transform_6, window_bounds = array<i64: 256, 128>}]} {
    %c0_i32 = arith.constant 0 : i32
    %0 = arith.cmpi eq, %arg2, %c0_i32 : i32
    %1 = arith.extui %0 : i1 to i32
    %c0_i32_0 = arith.constant 0 : i32
    %2 = arith.cmpi ne, %1, %c0_i32_0 : i32
    scf.if %2 {
      %cst_10 = arith.constant 0.000000e+00 : f32
      %12 = vector.broadcast %cst_10 : f32 to vector<256x128xf32>
      %c0_11 = arith.constant 0 : index
      %c0_12 = arith.constant 0 : index
      %13 = vector.load %arg10[%c0_11, %c0_12] : memref<256x128xf32, #tpu.memory_space<vmem>>, vector<256x128xf32>
      tpu.vector_store %arg10[%c0_11, %c0_12], %12 {strides = array<i32>} : memref<256x128xf32, #tpu.memory_space<vmem>>, vector<256x128xf32>,
    } else {
    }
    %c0 = arith.constant 0 : index
    %c0_1 = arith.constant 0 : index
    %3 = vector.load %arg10[%c0, %c0_1] : memref<256x128xf32, #tpu.memory_space<vmem>>, vector<256x128xf32>
    %c0_2 = arith.constant 0 : index
    %c0_3 = arith.constant 0 : index
    %4 = vector.load %arg3[%c0_2, %c0_3] : memref<256x144xbf16, #tpu.memory_space<vmem>>, vector<256x144xbf16>
    %c0_4 = arith.constant 0 : index
    %c0_5 = arith.constant 0 : index
    %5 = vector.load %arg4[%c0_4, %c0_5] : memref<144x128xbf16, #tpu.memory_space<vmem>>, vector<144x128xbf16>
    %cst = arith.constant dense<0.000000e+00> : vector<256x128xf32>
    %6 = tpu.matmul %4, %5, %cst {dimension_numbers = #tpu.dot_dimension_numbers<[1], [0], [0], [1], [0, 0, 1, 1], [], []>} : vector<256x144xbf16>, vector<144x128xbf16>, vector<256x128xf32> -> vector<256x128xf32>
    %7 = arith.addf %3, %6 : vector<256x128xf32>
    %c0_6 = arith.constant 0 : index
    %c0_7 = arith.constant 0 : index
    %8 = vector.load %arg10[%c0_6, %c0_7] : memref<256x128xf32, #tpu.memory_space<vmem>>, vector<256x128xf32>
    tpu.vector_store %arg10[%c0_6, %c0_7], %7 {strides = array<i32>} : memref<256x128xf32, #tpu.memory_space<vmem>>, vector<256x128xf32>,
    %c0_i32_8 = arith.constant 0 : i32
    %9 = arith.cmpi eq, %arg2, %c0_i32_8 : i32
    %10 = arith.extui %9 : i1 to i32
    %c0_i32_9 = arith.constant 0 : i32
    %11 = arith.cmpi ne, %10, %c0_i32_9 : i32
    scf.if %11 {
      %c0_10 = arith.constant 0 : index
      %c0_11 = arith.constant 0 : index
      %12 = vector.load %arg10[%c0_10, %c0_11] : memref<256x128xf32, #tpu.memory_space<vmem>>, vector<256x128xf32>
      %c0_12 = arith.constant 0 : index
      %c0_13 = arith.constant 0 : index
      %13 = vector.load %arg5[%c0_12, %c0_13] : memref<1x128xf32, #tpu.memory_space<vmem>>, vector<1x128xf32>
      %14 = vector.broadcast %13 : vector<1x128xf32> to vector<256x128xf32>
      %15 = arith.addf %12, %14 : vector<256x128xf32>
      %c0_14 = arith.constant 0 : index
      %c0_15 = arith.constant 0 : index
      %16 = vector.load %arg6[%c0_14, %c0_15] : memref<1x128xf32, #tpu.memory_space<vmem>>, vector<1x128xf32>
      %17 = vector.broadcast %16 : vector<1x128xf32> to vector<256x128xf32>
      %18 = arith.mulf %15, %17 : vector<256x128xf32>
      %c0_16 = arith.constant 0 : index
      %c0_17 = arith.constant 0 : index
      %19 = vector.load %arg7[%c0_16, %c0_17] : memref<1x128xf32, #tpu.memory_space<vmem>>, vector<1x128xf32>
      %20 = vector.broadcast %19 : vector<1x128xf32> to vector<256x128xf32>
      %21 = arith.addf %18, %20 : vector<256x128xf32>
      %cst_18 = arith.constant 0.000000e+00 : f32
      %22 = vector.broadcast %cst_18 : f32 to vector<256x128xf32>
      %23 = arith.cmpf ogt, %21, %22 : vector<256x128xf32>
      %cst_19 = arith.constant 0.000000e+00 : f32
      %24 = vector.broadcast %cst_19 : f32 to vector<256x128xf32>
      %25 = arith.minimumf %21, %24 : vector<256x128xf32>
      %26 = math.exp %25 : vector<256x128xf32>
      %cst_20 = arith.constant 1.000000e+00 : f32
      %27 = vector.broadcast %cst_20 : f32 to vector<256x128xf32>
      %28 = arith.subf %26, %27 : vector<256x128xf32>
      %29 = arith.select %23, %21, %28 : vector<256x128xi1>, vector<256x128xf32>
      %c0_21 = arith.constant 0 : index
      %c0_22 = arith.constant 0 : index
      %30 = vector.load %arg8[%c0_21, %c0_22] : memref<1x128xf32, #tpu.memory_space<vmem>>, vector<1x128xf32>
      %cst_23 = arith.constant 5.000000e-01 : f32
      %31 = vector.broadcast %cst_23 : f32 to vector<1x128xf32>
      %32 = arith.cmpf ogt, %30, %31 : vector<1x128xf32>
      %33 = vector.shape_cast %32 : vector<1x128xi1> to vector<1x128xi1>
      %34 = vector.broadcast %33 : vector<1x128xi1> to vector<256x128xi1>
      %35 = arith.select %34, %29, %15 : vector<256x128xi1>, vector<256x128xf32>
      %36 = arith.truncf %35 : vector<256x128xf32> to vector<256x128xbf16>
      %c0_24 = arith.constant 0 : index
      %c0_25 = arith.constant 0 : index
      %37 = vector.load %arg9[%c0_24, %c0_25] : memref<256x128xbf16, #tpu.memory_space<vmem>>, vector<256x128xbf16>
      tpu.vector_store %arg9[%c0_24, %c0_25], %36 {strides = array<i32>} : memref<256x128xbf16, #tpu.memory_space<vmem>>, vector<256x128xbf16>,
    } else {
    }
    return
  }
  func.func @transform_0(%arg0: i32, %arg1: i32, %arg2: i32) -> (i32, i32) {
    %c0_i32 = arith.constant 0 : i32
    return %arg0, %arg2 : i32, i32
  }
  func.func @transform_1(%arg0: i32, %arg1: i32, %arg2: i32) -> (i32, i32) {
    %c0_i32 = arith.constant 0 : i32
    return %arg2, %arg1 : i32, i32
  }
  func.func @transform_2(%arg0: i32, %arg1: i32, %arg2: i32) -> (i32, i32) {
    %c0_i32 = arith.constant 0 : i32
    %c0_i32_0 = arith.constant 0 : i32
    return %c0_i32, %arg1 : i32, i32
  }
  func.func @transform_3(%arg0: i32, %arg1: i32, %arg2: i32) -> (i32, i32) {
    %c0_i32 = arith.constant 0 : i32
    %c0_i32_0 = arith.constant 0 : i32
    return %c0_i32, %arg1 : i32, i32
  }
  func.func @transform_4(%arg0: i32, %arg1: i32, %arg2: i32) -> (i32, i32) {
    %c0_i32 = arith.constant 0 : i32
    %c0_i32_0 = arith.constant 0 : i32
    return %c0_i32, %arg1 : i32, i32
  }
  func.func @transform_5(%arg0: i32, %arg1: i32, %arg2: i32) -> (i32, i32) {
    %c0_i32 = arith.constant 0 : i32
    %c0_i32_0 = arith.constant 0 : i32
    return %c0_i32, %arg1 : i32, i32
  }
  func.func @transform_6(%arg0: i32, %arg1: i32, %arg2: i32) -> (i32, i32) {
    %c0_i32 = arith.constant 0 : i32
    return %arg0, %arg1 : i32, i32
  }
}

module attributes {stable_mosaic.version = 11 : i64} {
  func.func @kernel(%arg0: i32, %arg1: i32, %arg2: i32, %arg3: memref<256x72xbf16, #tpu.memory_space<vmem>>, %arg4: memref<72x128xbf16, #tpu.memory_space<vmem>>, %arg5: memref<1x128xf32, #tpu.memory_space<vmem>>, %arg6: memref<1x128xf32, #tpu.memory_space<vmem>>, %arg7: memref<1x128xf32, #tpu.memory_space<vmem>>, %arg8: memref<1x128xf32, #tpu.memory_space<vmem>>, %arg9: memref<256x128xbf16, #tpu.memory_space<vmem>>, %arg10: memref<256x128xbf16, #tpu.memory_space<vmem>>, %arg11: memref<256x128xf32, #tpu.memory_space<vmem>>) attributes {dimension_semantics = [#tpu.dimension_semantics<parallel>, #tpu.dimension_semantics<parallel>, #tpu.dimension_semantics<arbitrary>], iteration_bounds = array<i64: 2, 1, 1>, scalar_prefetch = 0 : i64, scratch_operands = 1 : i64, tpu.core_type = #tpu.core_type<tc>, window_params = [{transform_indices = @transform_0, window_bounds = array<i64: 256, 72>}, {transform_indices = @transform_1, window_bounds = array<i64: 72, 128>}, {transform_indices = @transform_2, window_bounds = array<i64: 1, 128>}, {transform_indices = @transform_3, window_bounds = array<i64: 1, 128>}, {transform_indices = @transform_4, window_bounds = array<i64: 1, 128>}, {transform_indices = @transform_5, window_bounds = array<i64: 1, 128>}, {transform_indices = @transform_6, window_bounds = array<i64: 256, 128>}, {transform_indices = @transform_7, window_bounds = array<i64: 256, 128>}]} {
    %c0_i32 = arith.constant 0 : i32
    %0 = arith.cmpi eq, %arg2, %c0_i32 : i32
    %1 = arith.extui %0 : i1 to i32
    %c0_i32_0 = arith.constant 0 : i32
    %2 = arith.cmpi ne, %1, %c0_i32_0 : i32
    scf.if %2 {
      %cst_10 = arith.constant 0.000000e+00 : f32
      %12 = vector.broadcast %cst_10 : f32 to vector<256x128xf32>
      %c0_11 = arith.constant 0 : index
      %c0_12 = arith.constant 0 : index
      %13 = vector.load %arg11[%c0_11, %c0_12] : memref<256x128xf32, #tpu.memory_space<vmem>>, vector<256x128xf32>
      tpu.vector_store %arg11[%c0_11, %c0_12], %12 {strides = array<i32>} : memref<256x128xf32, #tpu.memory_space<vmem>>, vector<256x128xf32>,
    } else {
    }
    %c0 = arith.constant 0 : index
    %c0_1 = arith.constant 0 : index
    %3 = vector.load %arg11[%c0, %c0_1] : memref<256x128xf32, #tpu.memory_space<vmem>>, vector<256x128xf32>
    %c0_2 = arith.constant 0 : index
    %c0_3 = arith.constant 0 : index
    %4 = vector.load %arg3[%c0_2, %c0_3] : memref<256x72xbf16, #tpu.memory_space<vmem>>, vector<256x72xbf16>
    %c0_4 = arith.constant 0 : index
    %c0_5 = arith.constant 0 : index
    %5 = vector.load %arg4[%c0_4, %c0_5] : memref<72x128xbf16, #tpu.memory_space<vmem>>, vector<72x128xbf16>
    %cst = arith.constant dense<0.000000e+00> : vector<256x128xf32>
    %6 = tpu.matmul %4, %5, %cst {dimension_numbers = #tpu.dot_dimension_numbers<[1], [0], [0], [1], [0, 0, 1, 1], [], []>} : vector<256x72xbf16>, vector<72x128xbf16>, vector<256x128xf32> -> vector<256x128xf32>
    %7 = arith.addf %3, %6 : vector<256x128xf32>
    %c0_6 = arith.constant 0 : index
    %c0_7 = arith.constant 0 : index
    %8 = vector.load %arg11[%c0_6, %c0_7] : memref<256x128xf32, #tpu.memory_space<vmem>>, vector<256x128xf32>
    tpu.vector_store %arg11[%c0_6, %c0_7], %7 {strides = array<i32>} : memref<256x128xf32, #tpu.memory_space<vmem>>, vector<256x128xf32>,
    %c0_i32_8 = arith.constant 0 : i32
    %9 = arith.cmpi eq, %arg2, %c0_i32_8 : i32
    %10 = arith.extui %9 : i1 to i32
    %c0_i32_9 = arith.constant 0 : i32
    %11 = arith.cmpi ne, %10, %c0_i32_9 : i32
    scf.if %11 {
      %c0_10 = arith.constant 0 : index
      %c0_11 = arith.constant 0 : index
      %12 = vector.load %arg11[%c0_10, %c0_11] : memref<256x128xf32, #tpu.memory_space<vmem>>, vector<256x128xf32>
      %c0_12 = arith.constant 0 : index
      %c0_13 = arith.constant 0 : index
      %13 = vector.load %arg5[%c0_12, %c0_13] : memref<1x128xf32, #tpu.memory_space<vmem>>, vector<1x128xf32>
      %14 = vector.broadcast %13 : vector<1x128xf32> to vector<256x128xf32>
      %15 = arith.addf %12, %14 : vector<256x128xf32>
      %c0_14 = arith.constant 0 : index
      %c0_15 = arith.constant 0 : index
      %16 = vector.load %arg9[%c0_14, %c0_15] : memref<256x128xbf16, #tpu.memory_space<vmem>>, vector<256x128xbf16>
      %17 = arith.extf %16 : vector<256x128xbf16> to vector<256x128xf32>
      %18 = arith.addf %15, %17 : vector<256x128xf32>
      %c0_16 = arith.constant 0 : index
      %c0_17 = arith.constant 0 : index
      %19 = vector.load %arg6[%c0_16, %c0_17] : memref<1x128xf32, #tpu.memory_space<vmem>>, vector<1x128xf32>
      %20 = vector.broadcast %19 : vector<1x128xf32> to vector<256x128xf32>
      %21 = arith.mulf %18, %20 : vector<256x128xf32>
      %c0_18 = arith.constant 0 : index
      %c0_19 = arith.constant 0 : index
      %22 = vector.load %arg7[%c0_18, %c0_19] : memref<1x128xf32, #tpu.memory_space<vmem>>, vector<1x128xf32>
      %23 = vector.broadcast %22 : vector<1x128xf32> to vector<256x128xf32>
      %24 = arith.addf %21, %23 : vector<256x128xf32>
      %cst_20 = arith.constant 0.000000e+00 : f32
      %25 = vector.broadcast %cst_20 : f32 to vector<256x128xf32>
      %26 = arith.cmpf ogt, %24, %25 : vector<256x128xf32>
      %cst_21 = arith.constant 0.000000e+00 : f32
      %27 = vector.broadcast %cst_21 : f32 to vector<256x128xf32>
      %28 = arith.minimumf %24, %27 : vector<256x128xf32>
      %29 = math.exp %28 : vector<256x128xf32>
      %cst_22 = arith.constant 1.000000e+00 : f32
      %30 = vector.broadcast %cst_22 : f32 to vector<256x128xf32>
      %31 = arith.subf %29, %30 : vector<256x128xf32>
      %32 = arith.select %26, %24, %31 : vector<256x128xi1>, vector<256x128xf32>
      %c0_23 = arith.constant 0 : index
      %c0_24 = arith.constant 0 : index
      %33 = vector.load %arg8[%c0_23, %c0_24] : memref<1x128xf32, #tpu.memory_space<vmem>>, vector<1x128xf32>
      %cst_25 = arith.constant 5.000000e-01 : f32
      %34 = vector.broadcast %cst_25 : f32 to vector<1x128xf32>
      %35 = arith.cmpf ogt, %33, %34 : vector<1x128xf32>
      %36 = vector.shape_cast %35 : vector<1x128xi1> to vector<1x128xi1>
      %37 = vector.broadcast %36 : vector<1x128xi1> to vector<256x128xi1>
      %38 = arith.select %37, %32, %18 : vector<256x128xi1>, vector<256x128xf32>
      %39 = arith.truncf %38 : vector<256x128xf32> to vector<256x128xbf16>
      %c0_26 = arith.constant 0 : index
      %c0_27 = arith.constant 0 : index
      %40 = vector.load %arg10[%c0_26, %c0_27] : memref<256x128xbf16, #tpu.memory_space<vmem>>, vector<256x128xbf16>
      tpu.vector_store %arg10[%c0_26, %c0_27], %39 {strides = array<i32>} : memref<256x128xbf16, #tpu.memory_space<vmem>>, vector<256x128xbf16>,
    } else {
    }
    return
  }
  func.func @transform_0(%arg0: i32, %arg1: i32, %arg2: i32) -> (i32, i32) {
    %c0_i32 = arith.constant 0 : i32
    return %arg0, %arg2 : i32, i32
  }
  func.func @transform_1(%arg0: i32, %arg1: i32, %arg2: i32) -> (i32, i32) {
    %c0_i32 = arith.constant 0 : i32
    return %arg2, %arg1 : i32, i32
  }
  func.func @transform_2(%arg0: i32, %arg1: i32, %arg2: i32) -> (i32, i32) {
    %c0_i32 = arith.constant 0 : i32
    %c0_i32_0 = arith.constant 0 : i32
    return %c0_i32, %arg1 : i32, i32
  }
  func.func @transform_3(%arg0: i32, %arg1: i32, %arg2: i32) -> (i32, i32) {
    %c0_i32 = arith.constant 0 : i32
    %c0_i32_0 = arith.constant 0 : i32
    return %c0_i32, %arg1 : i32, i32
  }
  func.func @transform_4(%arg0: i32, %arg1: i32, %arg2: i32) -> (i32, i32) {
    %c0_i32 = arith.constant 0 : i32
    %c0_i32_0 = arith.constant 0 : i32
    return %c0_i32, %arg1 : i32, i32
  }
  func.func @transform_5(%arg0: i32, %arg1: i32, %arg2: i32) -> (i32, i32) {
    %c0_i32 = arith.constant 0 : i32
    %c0_i32_0 = arith.constant 0 : i32
    return %c0_i32, %arg1 : i32, i32
  }
  func.func @transform_6(%arg0: i32, %arg1: i32, %arg2: i32) -> (i32, i32) {
    %c0_i32 = arith.constant 0 : i32
    return %arg0, %arg1 : i32, i32
  }
  func.func @transform_7(%arg0: i32, %arg1: i32, %arg2: i32) -> (i32, i32) {
    %c0_i32 = arith.constant 0 : i32
    return %arg0, %arg1 : i32, i32
  }
}

module attributes {stable_mosaic.version = 11 : i64} {
  func.func @kernel(%arg0: i32, %arg1: i32, %arg2: i32, %arg3: memref<256x200xbf16, #tpu.memory_space<vmem>>, %arg4: memref<200x128xbf16, #tpu.memory_space<vmem>>, %arg5: memref<1x128xf32, #tpu.memory_space<vmem>>, %arg6: memref<256x128xf32, #tpu.memory_space<vmem>>, %arg7: memref<256x128xf32, #tpu.memory_space<vmem>>) attributes {dimension_semantics = [#tpu.dimension_semantics<parallel>, #tpu.dimension_semantics<parallel>, #tpu.dimension_semantics<arbitrary>], iteration_bounds = array<i64: 2, 1, 1>, scalar_prefetch = 0 : i64, scratch_operands = 1 : i64, tpu.core_type = #tpu.core_type<tc>, window_params = [{transform_indices = @transform_0, window_bounds = array<i64: 256, 200>}, {transform_indices = @transform_1, window_bounds = array<i64: 200, 128>}, {transform_indices = @transform_2, window_bounds = array<i64: 1, 128>}, {transform_indices = @transform_3, window_bounds = array<i64: 256, 128>}]} {
    %c0_i32 = arith.constant 0 : i32
    %0 = arith.cmpi eq, %arg2, %c0_i32 : i32
    %1 = arith.extui %0 : i1 to i32
    %c0_i32_0 = arith.constant 0 : i32
    %2 = arith.cmpi ne, %1, %c0_i32_0 : i32
    scf.if %2 {
      %cst_10 = arith.constant 0.000000e+00 : f32
      %12 = vector.broadcast %cst_10 : f32 to vector<256x128xf32>
      %c0_11 = arith.constant 0 : index
      %c0_12 = arith.constant 0 : index
      %13 = vector.load %arg7[%c0_11, %c0_12] : memref<256x128xf32, #tpu.memory_space<vmem>>, vector<256x128xf32>
      tpu.vector_store %arg7[%c0_11, %c0_12], %12 {strides = array<i32>} : memref<256x128xf32, #tpu.memory_space<vmem>>, vector<256x128xf32>,
    } else {
    }
    %c0 = arith.constant 0 : index
    %c0_1 = arith.constant 0 : index
    %3 = vector.load %arg7[%c0, %c0_1] : memref<256x128xf32, #tpu.memory_space<vmem>>, vector<256x128xf32>
    %c0_2 = arith.constant 0 : index
    %c0_3 = arith.constant 0 : index
    %4 = vector.load %arg3[%c0_2, %c0_3] : memref<256x200xbf16, #tpu.memory_space<vmem>>, vector<256x200xbf16>
    %c0_4 = arith.constant 0 : index
    %c0_5 = arith.constant 0 : index
    %5 = vector.load %arg4[%c0_4, %c0_5] : memref<200x128xbf16, #tpu.memory_space<vmem>>, vector<200x128xbf16>
    %cst = arith.constant dense<0.000000e+00> : vector<256x128xf32>
    %6 = tpu.matmul %4, %5, %cst {dimension_numbers = #tpu.dot_dimension_numbers<[1], [0], [0], [1], [0, 0, 1, 1], [], []>} : vector<256x200xbf16>, vector<200x128xbf16>, vector<256x128xf32> -> vector<256x128xf32>
    %7 = arith.addf %3, %6 : vector<256x128xf32>
    %c0_6 = arith.constant 0 : index
    %c0_7 = arith.constant 0 : index
    %8 = vector.load %arg7[%c0_6, %c0_7] : memref<256x128xf32, #tpu.memory_space<vmem>>, vector<256x128xf32>
    tpu.vector_store %arg7[%c0_6, %c0_7], %7 {strides = array<i32>} : memref<256x128xf32, #tpu.memory_space<vmem>>, vector<256x128xf32>,
    %c0_i32_8 = arith.constant 0 : i32
    %9 = arith.cmpi eq, %arg2, %c0_i32_8 : i32
    %10 = arith.extui %9 : i1 to i32
    %c0_i32_9 = arith.constant 0 : i32
    %11 = arith.cmpi ne, %10, %c0_i32_9 : i32
    scf.if %11 {
      %c0_10 = arith.constant 0 : index
      %c0_11 = arith.constant 0 : index
      %12 = vector.load %arg7[%c0_10, %c0_11] : memref<256x128xf32, #tpu.memory_space<vmem>>, vector<256x128xf32>
      %c0_12 = arith.constant 0 : index
      %c0_13 = arith.constant 0 : index
      %13 = vector.load %arg5[%c0_12, %c0_13] : memref<1x128xf32, #tpu.memory_space<vmem>>, vector<1x128xf32>
      %14 = vector.broadcast %13 : vector<1x128xf32> to vector<256x128xf32>
      %15 = arith.addf %12, %14 : vector<256x128xf32>
      %16 = math.tanh %15 : vector<256x128xf32>
      %c0_14 = arith.constant 0 : index
      %c0_15 = arith.constant 0 : index
      %17 = vector.load %arg6[%c0_14, %c0_15] : memref<256x128xf32, #tpu.memory_space<vmem>>, vector<256x128xf32>
      tpu.vector_store %arg6[%c0_14, %c0_15], %16 {strides = array<i32>} : memref<256x128xf32, #tpu.memory_space<vmem>>, vector<256x128xf32>,
    } else {
    }
    return
  }
  func.func @transform_0(%arg0: i32, %arg1: i32, %arg2: i32) -> (i32, i32) {
    %c0_i32 = arith.constant 0 : i32
    return %arg0, %arg2 : i32, i32
  }
  func.func @transform_1(%arg0: i32, %arg1: i32, %arg2: i32) -> (i32, i32) {
    %c0_i32 = arith.constant 0 : i32
    return %arg2, %arg1 : i32, i32
  }
  func.func @transform_2(%arg0: i32, %arg1: i32, %arg2: i32) -> (i32, i32) {
    %c0_i32 = arith.constant 0 : i32
    %c0_i32_0 = arith.constant 0 : i32
    return %c0_i32, %arg1 : i32, i32
  }
  func.func @transform_3(%arg0: i32, %arg1: i32, %arg2: i32) -> (i32, i32) {
    %c0_i32 = arith.constant 0 : i32
    return %arg0, %arg1 : i32, i32
  }
}

</mosaic_0001>

<bundles_post_ra>
// kernel: _lambda_.18
= control target key start
LH: loop header
LB: loop body
LE: loop exit
PB: predicated region body
PF: predicated region fallthrough
CT: control target
= control target key end

     0   :  { %s2030_s21 = smov 0   ;;  %s2032_s22 = smov 0   ;;  %s2675_s0 = inlined_call_operand.vmem [shape: bf16[512,36], index: 0, kind: input, shape index: {}]   ;;  %s2676_s1 = inlined_call_operand.vmem [shape: bf16[36,128], index: 1, kind: input, shape index: {}]   ;;  %s2677_s2 = inlined_call_operand.vmem [shape: f32[1,128], index: 2, kind: input, shape index: {}]   ;;  %s2678_s3 = inlined_call_operand.vmem [shape: f32[1,128], index: 3, kind: input, shape index: {}]   ;;  %s2679_s4 = inlined_call_operand.vmem [shape: f32[1,128], index: 4, kind: input, shape index: {}]   ;;  %s2680_s5 = inlined_call_operand.vmem [shape: f32[1,128], index: 5, kind: input, shape index: {}]   ;;  %s2681_s6 = inlined_call_operand.vmem [shape: bf16[512,128], index: 6, kind: output, shape index: {}]  }
   0x1   :  { %s2034_s23 = smov 0  }
   0x2 LB: > { %s35_s24 = sadd.s32 1, %s1988_s22  ;;  %p1561_p0 = scmp.ge.s32.totalorder %s1992_s23, 1  ;;  %s1992_s23 = sphi %s2034_s23, %s16_s23   ;;  %s1988_s22 = sphi %s2032_s22, %s2683_s22   ;;  %s1984_s21 = sphi %s2030_s21, %s2682_s21  }
   0x3   : > { %p37_p1 = scmp.ge.s32.totalorder %s35_s24, 2  ;;  %p287_p2 = scmp.lt.s32.totalorder %s1992_s23, 3 }
   0x5   : > { %s2685_s24 = smov (%p37_p1, %s35_s24), 0  ;;  %p288_p3 = pnand %p1561_p0, %p287_p2 }
   0x6   : > { %v1887_v0 = vld [vmem:[%s2676_s1] sm:$0xff] (!%p288_p3)   ;;  %v1888_v1 = vld [vmem:[%s2676_s1 + $0x8] sm:$0xff] (!%p288_p3)   ;;  %s1562_s29 = sshll.u32 (!%p288_p3), %s1984_s21, 5  ;;  %v1889_v2 = vld [vmem:[%s2676_s1 + $0x10] ss:$0 sps:$4 sm:$0x33] (!%p288_p3)   ;;  %v1208_v20 = vlaneseq (!%p288_p3) }
   0x7   : > { %291 = sbr.rel (%p288_p3) target bundleno = 329 (0x149), region = 44  ;;  %1816 = vmatprep.subr.bf16.mxu0 (!%p288_p3), %v1887_v0  ;;  %1854 = vmatprep.subr.bf16.mxu1 (!%p288_p3), %v1887_v0  ;;  %p344_p4 = scmp.lt.s32.totalorder (!%p288_p3), %s1562_s29, 63  ;;  %vm632_vm0 = vcmask (!%p288_p3), 1041408   ;;  %vm583_vm1 = vcmask (!%p288_p3), 293888   ;;  %v2102_v21 = vld [vmem:[%s2677_s2] ss:$0 sm:$0xff] (!%p288_p3) }
   0x8   : > { %1817 = vmatpush3.bf16.msra.mxu0 (!%p288_p3), %v1887_v0  ;;  %1857 = vmatpush3.bf16.msra.mxu1 (!%p288_p3), %v1887_v0  ;;  %v634_v3 = vsel (!%p288_p3), %vm632_vm0, %v1889_v2, 0  ;;  %v1205_v22 = vld [vmem:[%s2680_s5] sm:$0x1] (!%p288_p3)  ;;  %v1209_v27 = vshrl.u32 (!%p288_p3), %v1208_v20, 7  ;;  %v1994_v57 = vmov (!%p288_p3), 0  }
   0x9   : > { %1818 = vmatprep.subr.bf16.mxu0 (!%p288_p3), %v1888_v1  ;;  %1855 = vmatprep.subr.bf16.mxu1 (!%p288_p3), %v1888_v1  ;;  %v2110_v24 = vld [vmem:[%s2678_s3] ss:$0 sm:$0xff] (!%p288_p3)  ;;  %vm1206_vm2 = vcmp.gt.f32.partialorder (!%p288_p3), %v1205_v22, 0.5 }
   0xa   : > { %v2121_v31 = vld [vmem:[%s2679_s4] ss:$0 sm:$0xff] (!%p288_p3)  ;;  %v1210_v55 = vsub.s32 (!%p288_p3), 0, %v1209_v27  ;;  %v1207_v58 = vsel (!%p288_p3), %vm1206_vm2, 1, %v1994_v57 }
   0xc   : > { %1819 = vmatpush3.bf16.msra.mxu0 (!%p288_p3), %v1888_v1  ;;  %1858 = vmatpush3.bf16.msra.mxu1 (!%p288_p3), %v1888_v1 }
   0xd   : > { %1860 = vmatprep.subr.msk.bf16.mxu0 (!%p288_p3), %vm632_vm0, %v1889_v2  ;;  %1861 = vmatprep.subr.msk.bf16.mxu1 (!%p288_p3), %vm632_vm0, %v1889_v2 }
   0xe   : > { %s2687_s29 = smov (!%p344_p4, %s1562_s29), 63 }
   0xf   : > { %s1563_s8 = sshll.u32 %s2687_s29, 2 }
  0x10   : > { %s2065_s11 = scalar_lea.vmem %s2675_s0, %s1563_s8  ;;  %1821 = vmatpush3.bf16.msra.mxu0 %v634_v3  ;;  %1859 = vmatpush3.bf16.msra.mxu1 %v634_v3  ;;  %s2320_s25 = scalar_lea.vmem %s2681_s6, %s1563_s8 }
  0x11   : > { %v1890_v4 = vld [vmem:[%s2065_s11] sm:$0xff]   ;;  %v1892_v6 = vld [vmem:[%s2065_s11 + $0x8] sm:$0xff]   ;;  %v1894_v8 = vld [vmem:[%s2065_s11 + $0x10] sm:$0xff]  }
  0x12   : > { %v1891_v5 = vld [vmem:[%s2065_s11 + $0x40] sm:$0xff]   ;;  %1822 = vmatprep.mubr.msk.bf16.mxu0 %vm583_vm1, %v1890_v4  ;;  %v1893_v7 = vld [vmem:[%s2065_s11 + $0x48] sm:$0xff]   ;;  %v1895_v9 = vld [vmem:[%s2065_s11 + $0x50] sm:$0xff]  }
  0x13   : > { %1838 = vmatprep.mubr.msk.bf16.mxu1 %vm583_vm1, %v1891_v5  ;;  %1823 = vmatmul.mubr.msk.bf16.vlgmr.msra.gmra.mrb[0].mxu0 %vm583_vm1, %v1892_v6  ;;  %v1896_v10 = vld [vmem:[%s2065_s11 + $0x18] sm:$0xff]   ;;  %v1898_v12 = vld [vmem:[%s2065_s11 + $0x20] sm:$0xff]   ;;  %v1900_v14 = vld [vmem:[%s2065_s11 + $0x28] sm:$0xff]  }
  0x14   : > { %1839 = vmatmul.mubr.msk.bf16.vlgmr.msra.gmra.mrb[0].mxu1 %vm583_vm1, %v1893_v7  ;;  %1826 = vmatprep.mubr.msk.bf16.mxu0 %vm583_vm1, %v1894_v8  ;;  %v1897_v11 = vld [vmem:[%s2065_s11 + $0x58] sm:$0xff]   ;;  %v1899_v13 = vld [vmem:[%s2065_s11 + $0x60] sm:$0xff]   ;;  %v1901_v15 = vld [vmem:[%s2065_s11 + $0x68] sm:$0xff]  }
  0x15   : > { %1842 = vmatprep.mubr.msk.bf16.mxu1 %vm583_vm1, %v1895_v9  ;;  %v1902_v16 = vld [vmem:[%s2065_s11 + $0x30] sm:$0xff]   ;;  %v1904_v18 = vld [vmem:[%s2065_s11 + $0x38] sm:$0xff]  }
  0x16   : > { %v1903_v17 = vld [vmem:[%s2065_s11 + $0x70] sm:$0xff]   ;;  %v1905_v19 = vld [vmem:[%s2065_s11 + $0x78] sm:$0xff]  }
  0x1b   : > { %1827 = vmatmul.mubr.msk.bf16.gmra.mrb[4].mxu0 %vm583_vm1, %v1896_v10 }
  0x1c   : > { %1843 = vmatmul.mubr.msk.bf16.gmra.mrb[4].mxu1 %vm583_vm1, %v1897_v11  ;;  %1830 = vmatprep.mubr.msk.bf16.mxu0 %vm583_vm1, %v1898_v12  ;;  %v2186_v11 = vrot.slane %v1207_v58, %v1210_v55 }
  0x1d   : > { %1846 = vmatprep.mubr.msk.bf16.mxu1 %vm583_vm1, %v1899_v13 }
  0x1e   : > { %vm1212_vm4 = vcmp.eq.s32.totalorder %v2186_v11, 1 }
  0x23   : > { %1831 = vmatmul.mubr.msk.bf16.gmra.mrb[8].mxu0 %vm583_vm1, %v1900_v14 }
  0x24   : > { %1847 = vmatmul.mubr.msk.bf16.gmra.mrb[8].mxu1 %vm583_vm1, %v1901_v15  ;;  %1834 = vmatprep.mubr.msk.bf16.mxu0 %vm583_vm1, %v1902_v16 }
  0x25   : > { %1850 = vmatprep.mubr.msk.bf16.mxu1 %vm583_vm1, %v1903_v17 }
  0x2b   : > { %1835 = vmatmul.mubr.msk.bf16.gmra.mrb[12].mxu0 %vm583_vm1, %v1904_v18 }
  0x2c   : > { %1851 = vmatmul.mubr.msk.bf16.gmra.mrb[12].mxu1 %vm583_vm1, %v1905_v19 }
  0xe6   : > { %v1824_v23 = vpop.f32.mrb[0].mxu0 }
  0xe7   : > { %v1840_v25 = vpop.f32.mrb[0].mxu1  ;;  %v2113_v26 = vadd.f32 %v1824_v23, %v2102_v21  ;;  %v670_v29 = vpop.f32.mrb[1].mxu0 }
  0xe8   : > { %v2116_v28 = vadd.f32 %v1840_v25, %v2102_v21  ;;  %v734_v30 = vpop.f32.mrb[1].mxu1  ;;  %v2124_v32 = vadd.f32 %v2102_v21, %v670_v29  ;;  %v1825_v34 = vpop.f32.mrb[2].mxu0 }
  0xe9   : > { %v2127_v33 = vadd.f32 %v2102_v21, %v734_v30  ;;  %v1841_v35 = vpop.f32.mrb[2].mxu1  ;;  %v944_v36 = vmul.f32 %v2110_v24, %v2113_v26  ;;  %v2134_v38 = vadd.f32 %v1825_v34, %v2102_v21  ;;  %v673_v40 = vpop.f32.mrb[3].mxu0 }
  0xea   : > { %v960_v37 = vmul.f32 %v2110_v24, %v2116_v28  ;;  %v2137_v39 = vadd.f32 %v1841_v35, %v2102_v21  ;;  %v737_v41 = vpop.f32.mrb[3].mxu1  ;;  %v942_v42 = vmul.f32 %v2110_v24, %v2124_v32  ;;  %v2144_v44 = vadd.f32 %v2102_v21, %v673_v40 }
  0xeb   : > { %v958_v43 = vmul.f32 %v2110_v24, %v2127_v33  ;;  %v2147_v45 = vadd.f32 %v2102_v21, %v737_v41  ;;  %v2150_v46 = vadd.f32 %v2121_v31, %v944_v36  ;;  %v945_v48 = vmul.f32 %v2110_v24, %v2134_v38 }
  0xec   : > { %v2153_v47 = vadd.f32 %v2121_v31, %v960_v37  ;;  %v961_v49 = vmul.f32 %v2110_v24, %v2137_v39  ;;  %v2160_v50 = vadd.f32 %v2121_v31, %v942_v42  ;;  %v943_v52 = vmul.f32 %v2110_v24, %v2144_v44 }
  0xed   : > { %v2163_v51 = vadd.f32 %v2121_v31, %v958_v43  ;;  %v959_v53 = vmul.f32 %v2110_v24, %v2147_v45  ;;  %v1047_v54 = vmin.f32 %v2150_v46, 0.0  ;;  %v2175_v1 = vadd.f32 %v2121_v31, %v945_v48 }
  0xee   : > { %v1063_v56 = vmin.f32 %v2153_v47, 0.0  ;;  %v1045_v59 = vmin.f32 %v2160_v50, 0.0  ;;  %v1828_v61 = vpop.f32.mrb[4].mxu0  ;;  %v2178_v2 = vadd.f32 %v2121_v31, %v961_v49  ;;  %v2181_v7 = vadd.f32 %v2121_v31, %v943_v52 }
  0xef   : > { %v1061_v60 = vmin.f32 %v2163_v51, 0.0  ;;  %v1844_v62 = vpop.f32.mrb[4].mxu1  ;;  %v1081_v63 = vmul.f32 1.442695, %v1047_v54  ;;  %v686_v3 = vpop.f32.mrb[5].mxu0  ;;  %v2184_v8 = vadd.f32 %v2121_v31, %v959_v53  ;;  %v1048_v12 = vmin.f32 %v2175_v1, 0.0 }
  0xf0   : > { %v1113_v0 = vmul.f32 1.442695, %v1063_v56  ;;  %v750_v4 = vpop.f32.mrb[5].mxu1  ;;  %v1077_v5 = vmul.f32 1.442695, %v1045_v59  ;;  %v1829_v9 = vpop.f32.mrb[6].mxu0  ;;  %v2197_v22 = vadd.f32 %v1828_v61, %v2102_v21  ;;  %v2202_v25 = vadd.f32 %v1844_v62, %v2102_v21 }
  0xf1   : > { %v1109_v6 = vmul.f32 1.442695, %v1061_v60  ;;  %v1845_v10 = vpop.f32.mrb[6].mxu1  ;;  %1906 = vpow2.f32 %v1081_v63  ;;  %v2189_v13 = vpop.f32.mrb[7].mxu0  ;;  %v1064_v15 = vmin.f32 %v2178_v2, 0.0  ;;  %v1046_v16 = vmin.f32 %v2181_v7, 0.0 }
  0xf2   : > { %v2191_v14 = vpop.f32.mrb[7].mxu1  ;;  %1908 = vpow2.f32 %v1113_v0  ;;  %v1083_v17 = vmul.f32 1.442695, %v1048_v12  ;;  %v1062_v18 = vmin.f32 %v2184_v8, 0.0  ;;  %vm1015_vm3 = vcmp.gt.f32.partialorder %v2150_v46, 0.0 }
  0xf3   : > { %1910 = vpow2.f32 %v1077_v5  ;;  %v1115_v19 = vmul.f32 1.442695, %v1064_v15  ;;  %v1079_v20 = vmul.f32 1.442695, %v1046_v16  ;;  %v2205_v27 = vadd.f32 %v2102_v21, %v686_v3 }
  0xf4   : > { %1912 = vpow2.f32 %v1109_v6  ;;  %v1111_v23 = vmul.f32 1.442695, %v1062_v18  ;;  %v948_v29 = vmul.f32 %v2110_v24, %v2197_v22  ;;  %v2210_v30 = vadd.f32 %v2102_v21, %v750_v4 }
  0xf5   : > { %1914 = vpow2.f32 %v1083_v17  ;;  %v2213_v34 = vadd.f32 %v1829_v9, %v2102_v21  ;;  %vm1031_vm5 = vcmp.gt.f32.partialorder %v2153_v47, 0.0  ;;  %v964_v37 = vmul.f32 %v2110_v24, %v2202_v25 }
  0xf6   : > { %1916 = vpow2.f32 %v1115_v19  ;;  %v2215_v35 = vpop.f32.mrb[8].mxu0  ;;  %v946_v40 = vmul.f32 %v2110_v24, %v2205_v27  ;;  %v2229_v43 = vadd.f32 %v2121_v31, %v948_v29  ;;  %v962_v48 = vmul.f32 %v2110_v24, %v2210_v30 }
  0xf7   : > { %v2217_v36 = vpop.f32.mrb[8].mxu1  ;;  %1918 = vpow2.f32 %v1079_v20  ;;  %v2224_v41 = vpop.f32.mrb[9].mxu0  ;;  %v2234_v49 = vadd.f32 %v1845_v10, %v2102_v21  ;;  %vm1013_vm6 = vcmp.gt.f32.partialorder %v2160_v50, 0.0  ;;  %v2242_v54 = vadd.f32 %v2121_v31, %v964_v37 }
  0xf8   : > { %v2226_v42 = vpop.f32.mrb[9].mxu1  ;;  %1920 = vpow2.f32 %v1111_v23  ;;  %v2236_v52 = vpop.f32.mrb[10].mxu0  ;;  %v2245_v55 = vadd.f32 %v2121_v31, %v946_v40  ;;  %v949_v56 = vmul.f32 %v2110_v24, %v2213_v34  ;;  %vm1029_vm7 = vcmp.gt.f32.partialorder %v2163_v51, 0.0 }
  0xf9   : > { %v2238_v53 = vpop.f32.mrb[10].mxu1  ;;  %v2249_v57 = vpop.f32.mrb[11].mxu0  ;;  %vm1016_vm8 = vcmp.gt.f32.partialorder %v2175_v1, 0.0  ;;  %v1051_v59 = vmin.f32 %v2229_v43, 0.0  ;;  %v2257_v60 = vadd.f32 %v2121_v31, %v962_v48  ;;  %vm1032_vm9 = vcmp.gt.f32.partialorder %v2178_v2, 0.0 }
  0xfa   : > { %v2251_v58 = vpop.f32.mrb[11].mxu1  ;;  %vm1014_vm10 = vcmp.gt.f32.partialorder %v2181_v7, 0.0  ;;  %v1067_v62 = vmin.f32 %v2242_v54, 0.0  ;;  %v1049_v63 = vmin.f32 %v2245_v55, 0.0  ;;  %vm1030_vm11 = vcmp.gt.f32.partialorder %v2184_v8, 0.0 }
  0xfb   : > { %v1907_v61 = vpop.eup %1906  ;;  %v1089_v4 = vmul.f32 1.442695, %v1051_v59  ;;  %v1065_v5 = vmin.f32 %v2257_v60, 0.0  ;;  %v965_v6 = vmul.f32 %v2110_v24, %v2234_v49  ;;  %v2268_v16 = vadd.f32 %v2121_v31, %v949_v56 }
  0xfc   : > { %v1909_v0 = vpop.eup %1908  ;;  %v1606_v3 = vadd.f32 -1.0, %v1907_v61  ;;  %v1121_v12 = vmul.f32 1.442695, %v1067_v62  ;;  %v1085_v15 = vmul.f32 1.442695, %v1049_v63  ;;  %v2282_v56 = vadd.f32 %v2102_v21, %v2189_v13 }
  0xfd   : > { %v1911_v9 = vpop.eup %1910  ;;  %v1622_v10 = vadd.f32 -1.0, %v1909_v0  ;;  %1922 = vpow2.f32 %v1089_v4  ;;  %v1117_v20 = vmul.f32 1.442695, %v1065_v5  ;;  %vm1019_vm12 = vcmp.gt.f32.partialorder %v2229_v43, 0.0 }
  0xfe   : > { %v1913_v17 = vpop.eup %1912  ;;  %v1175_v18 = vsel %vm1015_vm3, %v2150_v46, %v1606_v3  ;;  %v1604_v19 = vadd.f32 -1.0, %v1911_v9  ;;  %v2273_v23 = vpop.f32.mrb[12].mxu0  ;;  %1924 = vpow2.f32 %v1121_v12  ;;  %vm1035_vm13 = vcmp.gt.f32.partialorder %v2242_v54, 0.0 }
  0xff   : > { %v2275_v29 = vpop.f32.mrb[12].mxu1  ;;  %v1915_v37 = vpop.eup %1914  ;;  %v1191_v40 = vsel %vm1031_vm5, %v2153_v47, %v1622_v10  ;;  %v1620_v48 = vadd.f32 -1.0, %v1913_v17  ;;  %v1215_v62 = vsel %vm1212_vm4, %v1175_v18, %v2113_v26  ;;  %1926 = vpow2.f32 %v1085_v15 }
 0x100   : > { %v2284_v59 = vpop.f32.mrb[13].mxu0  ;;  %v2286_v46 = vpop.f32.mrb[13].mxu1  ;;  %v1231_v63 = vsel %vm1212_vm4, %v1191_v40, %v2116_v28  ;;  %v1173_v47 = vsel %vm1013_vm6, %v2160_v50, %v1604_v19  ;;  %v1607_v13 = vadd.f32 -1.0, %v1915_v37  ;;  %1928 = vpow2.f32 %v1117_v20 }
 0x101   : > { %v1917_v61 = vpop.eup %1916  ;;  %v2297_v0 = vpop.f32.mrb[14].mxu0  ;;  %v1213_v5 = vsel %vm1212_vm4, %v1173_v47, %v2124_v32  ;;  %v1189_v26 = vsel %vm1029_vm7, %v2163_v51, %v1620_v48  ;;  %v1052_v18 = vmin.f32 %v2268_v16, 0.0  ;;  %v2329_v15 = vadd.f32 %v2121_v31, %v965_v6 }
 0x102   : > { %v2299_v3 = vpop.f32.mrb[14].mxu1  ;;  %v1919_v4 = vpop.eup %1918  ;;  %v1623_v28 = vadd.f32 -1.0, %v1917_v61  ;;  %v1176_v12 = vsel %vm1016_vm8, %v2175_v1, %v1607_v13  ;;  %v2369_v13 = vadd.f32 %v2102_v21, %v2224_v41  ;;  %vm1017_vm14 = vcmp.gt.f32.partialorder %v2245_v55, 0.0 }
 0x103   : > { %v2307_v9 = vpop.f32.mrb[15].mxu0  ;;  %v2309_v50 = vpop.f32.mrb[15].mxu1  ;;  %v1605_v17 = vadd.f32 -1.0, %v1919_v4  ;;  %v1216_v32 = vsel %vm1212_vm4, %v1176_v12, %v2134_v38  ;;  %v1091_v40 = vmul.f32 1.442695, %v1052_v18  ;;  %v1229_v38 = vsel %vm1212_vm4, %v1189_v26, %v2127_v33 }
 0x104   : > { %v1921_v10 = vpop.eup %1920  ;;  %v1192_v51 = vsel %vm1032_vm9, %v2178_v2, %v1623_v28  ;;  %v1710_v19 = vpack.c.bf16 %v1216_v32, %v1215_v62  ;;  %v1068_v61 = vmin.f32 %v2329_v15, 0.0  ;;  %v947_v62 = vmul.f32 %v2110_v24, %v2282_v56 }
 0x105   : > { %v1621_v1 = vadd.f32 -1.0, %v1921_v10  ;;  %v1232_v20 = vsel %vm1212_vm4, %v1192_v51, %v2137_v39  ;;  %v1174_v37 = vsel %vm1014_vm10, %v2181_v7, %v1605_v17  ;;  %1930 = vpow2.f32 %v1091_v40 }
 0x106   : > { %v1750_v2 = vpack.c.bf16 %v1232_v20, %v1231_v63  ;;  %v1214_v6 = vsel %vm1212_vm4, %v1174_v37, %v2144_v44  ;;  %1782 = vst [vmem:[%s2320_s25 + $0x8] sm:$0xff] %v1710_v19   ;;  %v2356_v44 = vadd.f32 %v2102_v21, %v2191_v14  ;;  %v1123_v47 = vmul.f32 1.442695, %v1068_v61 }
 0x107   : > { %v1190_v48 = vsel %vm1030_vm11, %v2184_v8, %v1621_v1  ;;  %v1705_v39 = vpack.c.bf16 %v1214_v6, %v1213_v5  ;;  %v2360_v8 = vadd.f32 %v2215_v35, %v2102_v21  ;;  %v1923_v63 = vpop.eup %1922  ;;  %v2373_v14 = vadd.f32 %v2121_v31, %v947_v62 }
 0x108   : > { %v1230_v7 = vsel %vm1212_vm4, %v1190_v48, %v2147_v45  ;;  %1790 = vst [vmem:[%s2320_s25 + $0x48] sm:$0xff] %v1750_v2   ;;  %v2365_v45 = vadd.f32 %v2217_v36, %v2102_v21  ;;  %v1925_v4 = vpop.eup %1924  ;;  %v1610_v5 = vadd.f32 -1.0, %v1923_v63  ;;  %v963_v35 = vmul.f32 %v2110_v24, %v2356_v44 }
 0x109   : > { %v1745_v33 = vpack.c.bf16 %v1230_v7, %v1229_v38  ;;  %1706 = vst [vmem:[%s2320_s25] sm:$0xff] %v1705_v39   ;;  %v952_v26 = vmul.f32 %v2110_v24, %v2360_v8  ;;  %1932 = vpow2.f32 %v1123_v47  ;;  %v1927_v28 = vpop.eup %1926  ;;  %v1626_v36 = vadd.f32 -1.0, %v1925_v4 }
 0x10a   : > { %v1050_v41 = vmin.f32 %v2373_v14, 0.0  ;;  %v2383_v10 = vadd.f32 %v2102_v21, %v2226_v42  ;;  %v1929_v12 = vpop.eup %1928  ;;  %v1179_v17 = vsel %vm1019_vm12, %v2229_v43, %v1610_v5  ;;  %v2387_v18 = vadd.f32 %v2121_v31, %v963_v35 }
 0x10b   : > { %1789 = vst [vmem:[%s2320_s25 + $0x40] sm:$0xff] %v1745_v33   ;;  %v968_v32 = vmul.f32 %v2110_v24, %v2365_v45  ;;  %v950_v51 = vmul.f32 %v2110_v24, %v2369_v13  ;;  %v2396_v42 = vadd.f32 %v2121_v31, %v952_v26  ;;  %v1608_v19 = vadd.f32 -1.0, %v1927_v28 }
 0x10c   : > { %v1087_v1 = vmul.f32 1.442695, %v1050_v41  ;;  %vm1020_vm15 = vcmp.gt.f32.partialorder %v2268_v16, 0.0  ;;  %vm1036_vm0 = vcmp.gt.f32.partialorder %v2329_v15, 0.0  ;;  %v1066_v43 = vmin.f32 %v2387_v18, 0.0 }
 0x10d   : > { %v1219_v20 = vsel %vm1212_vm4, %v1179_v17, %v2197_v22  ;;  %v1195_v37 = vsel %vm1035_vm13, %v2242_v54, %v1626_v36  ;;  %v1055_v40 = vmin.f32 %v2396_v42, 0.0  ;;  %vm1033_vm1 = vcmp.gt.f32.partialorder %v2257_v60, 0.0 }
 0x10e   : > { %1934 = vpow2.f32 %v1087_v1  ;;  %v1119_v2 = vmul.f32 1.442695, %v1066_v43  ;;  %v2408_v6 = vadd.f32 %v2121_v31, %v968_v32  ;;  %v2411_v48 = vadd.f32 %v2121_v31, %v950_v51 }
 0x10f   : > { %v1931_v38 = vpop.eup %1930  ;;  %v966_v39 = vmul.f32 %v2110_v24, %v2383_v10  ;;  %v1097_v22 = vmul.f32 1.442695, %v1055_v40  ;;  %v2417_v54 = vadd.f32 %v2236_v52, %v2102_v21  ;;  %v2421_v61 = vadd.f32 %v2238_v53, %v2102_v21 }
 0x110   : > { %v1611_v7 = vadd.f32 -1.0, %v1931_v38  ;;  %v1235_v33 = vsel %vm1212_vm4, %v1195_v37, %v2202_v25  ;;  %v1624_v62 = vadd.f32 -1.0, %v1929_v12  ;;  %1936 = vpow2.f32 %v1119_v2 }
 0x111   : > { %v1071_v63 = vmin.f32 %v2408_v6, 0.0  ;;  %vm1018_vm2 = vcmp.gt.f32.partialorder %v2373_v14, 0.0  ;;  %1938 = vpow2.f32 %v1097_v22  ;;  %v1053_v52 = vmin.f32 %v2411_v48, 0.0 }
 0x112   : > { %v1180_v47 = vsel %vm1020_vm15, %v2268_v16, %v1611_v7  ;;  %v2433_v53 = vadd.f32 %v2121_v31, %v966_v39  ;;  %v953_v35 = vmul.f32 %v2110_v24, %v2417_v54  ;;  %v969_v16 = vmul.f32 %v2110_v24, %v2421_v61 }
 0x113   : > { %v1933_v4 = vpop.eup %1932  ;;  %v1220_v25 = vsel %vm1212_vm4, %v1180_v47, %v2213_v34  ;;  %v1129_v5 = vmul.f32 1.442695, %v1071_v63  ;;  %v1177_v26 = vsel %vm1017_vm14, %v2245_v55, %v1608_v19  ;;  %v1093_v41 = vmul.f32 1.442695, %v1053_v52 }
 0x114   : > { %v1720_v28 = vpack.c.bf16 %v1220_v25, %v1219_v20  ;;  %v1627_v36 = vadd.f32 -1.0, %v1933_v4  ;;  %v1069_v12 = vmin.f32 %v2433_v53, 0.0  ;;  %v2447_v17 = vadd.f32 %v2121_v31, %v953_v35 }
 0x115   : > { %1940 = vpow2.f32 %v1129_v5  ;;  %v2450_v34 = vadd.f32 %v2121_v31, %v969_v16  ;;  %v2458_v55 = vadd.f32 %v2102_v21, %v2249_v57  ;;  %v2462_v51 = vadd.f32 %v2102_v21, %v2251_v58 }
 0x116   : > { %1784 = vst [vmem:[%s2320_s25 + $0x18] sm:$0xff] %v1720_v28   ;;  %v1196_v32 = vsel %vm1036_vm0, %v2329_v15, %v1627_v36  ;;  %1942 = vpow2.f32 %v1093_v41  ;;  %v1217_v1 = vsel %vm1212_vm4, %v1177_v26, %v2205_v27  ;;  %v1125_v43 = vmul.f32 1.442695, %v1069_v12 }
 0x117   : > { %v1236_v19 = vsel %vm1212_vm4, %v1196_v32, %v2234_v49  ;;  %v1056_v15 = vmin.f32 %v2447_v17, 0.0  ;;  %v1193_v57 = vsel %vm1033_vm1, %v2257_v60, %v1624_v62  ;;  %v1072_v58 = vmin.f32 %v2450_v34, 0.0 }
 0x118   : > { %v1935_v20 = vpop.eup %1934  ;;  %v1760_v37 = vpack.c.bf16 %v1236_v19, %v1235_v33  ;;  %v951_v40 = vmul.f32 %v2110_v24, %v2458_v55  ;;  %1944 = vpow2.f32 %v1125_v43  ;;  %v967_v49 = vmul.f32 %v2110_v24, %v2462_v51 }
 0x119   : > { %v1609_v38 = vadd.f32 -1.0, %v1935_v20  ;;  %v1099_v27 = vmul.f32 1.442695, %v1056_v15  ;;  %v1131_v2 = vmul.f32 1.442695, %v1072_v58  ;;  %v2485_v60 = vadd.f32 %v2273_v23, %v2102_v21 }
 0x11a   : > { %1792 = vst [vmem:[%s2320_s25 + $0x58] sm:$0xff] %v1760_v37   ;;  %v2481_v39 = vadd.f32 %v2121_v31, %v951_v40  ;;  %v2489_v7 = vadd.f32 %v2275_v29, %v2102_v21  ;;  %v1937_v22 = vpop.eup %1936  ;;  %v2495_v62 = vadd.f32 %v2121_v31, %v967_v49  ;;  %v2499_v63 = vadd.f32 %v2102_v21, %v2284_v59 }
 0x11b   : > { %v1178_v33 = vsel %vm1018_vm2, %v2373_v14, %v1609_v38  ;;  %1946 = vpow2.f32 %v1099_v27  ;;  %v1939_v23 = vpop.eup %1938  ;;  %vm1034_vm3 = vcmp.gt.f32.partialorder %v2387_v18, 0.0  ;;  %v1625_v47 = vadd.f32 -1.0, %v1937_v22 }
 0x11c   : > { %v1218_v29 = vsel %vm1212_vm4, %v1178_v33, %v2282_v56  ;;  %1948 = vpow2.f32 %v1131_v2  ;;  %v1233_v14 = vsel %vm1212_vm4, %v1193_v57, %v2210_v30  ;;  %vm1023_vm5 = vcmp.gt.f32.partialorder %v2396_v42, 0.0 }
 0x11d   : > { %v1715_v52 = vpack.c.bf16 %v1218_v29, %v1217_v1  ;;  %v1054_v4 = vmin.f32 %v2481_v39, 0.0  ;;  %v1194_v59 = vsel %vm1034_vm3, %v2387_v18, %v1625_v47  ;;  %v1070_v25 = vmin.f32 %v2495_v62, 0.0 }
 0x11e   : > { %v956_v56 = vmul.f32 %v2110_v24, %v2485_v60  ;;  %v972_v5 = vmul.f32 %v2110_v24, %v2489_v7  ;;  %v1234_v30 = vsel %vm1212_vm4, %v1194_v59, %v2356_v44  ;;  %v1614_v16 = vadd.f32 -1.0, %v1939_v23 }
 0x11f   : > { %v1941_v35 = vpop.eup %1940  ;;  %1783 = vst [vmem:[%s2320_s25 + $0x10] sm:$0xff] %v1715_v52   ;;  %v1095_v26 = vmul.f32 1.442695, %v1054_v4  ;;  %v954_v18 = vmul.f32 %v2110_v24, %v2499_v63  ;;  %v1755_v36 = vpack.c.bf16 %v1234_v30, %v1233_v14  ;;  %vm1039_vm6 = vcmp.gt.f32.partialorder %v2408_v6, 0.0 }
 0x120   : > { %v1943_v28 = vpop.eup %1942  ;;  %v1630_v41 = vadd.f32 -1.0, %v1941_v35  ;;  %v1127_v12 = vmul.f32 1.442695, %v1070_v25  ;;  %v2524_v1 = vadd.f32 %v2121_v31, %v956_v56  ;;  %v2527_v19 = vadd.f32 %v2121_v31, %v972_v5 }
 0x121   : > { %v1612_v32 = vadd.f32 -1.0, %v1943_v28  ;;  %1950 = vpow2.f32 %v1095_v26  ;;  %1791 = vst [vmem:[%s2320_s25 + $0x50] sm:$0xff] %v1755_v36   ;;  %vm1021_vm7 = vcmp.gt.f32.partialorder %v2411_v48, 0.0  ;;  %v2532_v44 = vadd.f32 %v2121_v31, %v954_v18 }
 0x122   : > { %1952 = vpow2.f32 %v1127_v12  ;;  %v2536_v43 = vadd.f32 %v2102_v21, %v2286_v46  ;;  %v1945_v15 = vpop.eup %1944  ;;  %v1183_v20 = vsel %vm1023_vm5, %v2396_v42, %v1614_v16  ;;  %vm1037_vm8 = vcmp.gt.f32.partialorder %v2433_v53, 0.0 }
 0x123   : > { %vm1024_vm9 = vcmp.gt.f32.partialorder %v2447_v17, 0.0  ;;  %v1059_v57 = vmin.f32 %v2524_v1, 0.0  ;;  %v1199_v37 = vsel %vm1039_vm6, %v2408_v6, %v1630_v41  ;;  %v1181_v58 = vsel %vm1021_vm7, %v2411_v48, %v1612_v32 }
 0x124   : > { %v1628_v40 = vadd.f32 -1.0, %v1945_v15  ;;  %v1075_v46 = vmin.f32 %v2527_v19, 0.0  ;;  %vm1040_vm10 = vcmp.gt.f32.partialorder %v2450_v34, 0.0  ;;  %vm1022_vm11 = vcmp.gt.f32.partialorder %v2481_v39, 0.0 }
 0x125   : > { %v1947_v38 = vpop.eup %1946  ;;  %v1105_v42 = vmul.f32 1.442695, %v1059_v57  ;;  %v970_v27 = vmul.f32 %v2110_v24, %v2536_v43  ;;  %v1223_v2 = vsel %vm1212_vm4, %v1183_v20, %v2360_v8  ;;  %vm1038_vm12 = vcmp.gt.f32.partialorder %v2495_v62, 0.0 }
 0x126   : > { %v1949_v49 = vpop.eup %1948  ;;  %v1615_v6 = vadd.f32 -1.0, %v1947_v38  ;;  %v1057_v48 = vmin.f32 %v2532_v44, 0.0  ;;  %v2560_v22 = vadd.f32 %v2297_v0, %v2102_v21  ;;  %v1239_v33 = vsel %vm1212_vm4, %v1199_v37, %v2365_v45 }
 0x127   : > { %v1221_v23 = vsel %vm1212_vm4, %v1181_v58, %v2369_v13  ;;  %v1197_v8 = vsel %vm1037_vm8, %v2433_v53, %v1628_v40  ;;  %v1631_v29 = vadd.f32 -1.0, %v1949_v49  ;;  %v1137_v14 = vmul.f32 1.442695, %v1075_v46 }
 0x128   : > { %v1184_v47 = vsel %vm1024_vm9, %v2447_v17, %v1615_v6  ;;  %v2575_v0 = vadd.f32 %v2121_v31, %v970_v27  ;;  %v957_v45 = vmul.f32 %v2110_v24, %v2560_v22  ;;  %1954 = vpow2.f32 %v1105_v42 }
 0x129   : > { %v1224_v13 = vsel %vm1212_vm4, %v1184_v47, %v2417_v54  ;;  %v1200_v53 = vsel %vm1040_vm10, %v2450_v34, %v1631_v29  ;;  %v2587_v17 = vadd.f32 %v2299_v3, %v2102_v21  ;;  %v1101_v59 = vmul.f32 1.442695, %v1057_v48 }
 0x12a   : > { %v1730_v52 = vpack.c.bf16 %v1224_v13, %v1223_v2  ;;  %v1240_v4 = vsel %vm1212_vm4, %v1200_v53, %v2421_v61  ;;  %v1073_v25 = vmin.f32 %v2575_v0, 0.0  ;;  %v996_v5 = vadd.f32 %v2121_v31, %v957_v45 }
 0x12b   : > { %v1951_v56 = vpop.eup %1950  ;;  %v1770_v54 = vpack.c.bf16 %v1240_v4, %v1239_v33  ;;  %v973_v34 = vmul.f32 %v2110_v24, %v2587_v17  ;;  %v2598_v3 = vadd.f32 %v2102_v21, %v2307_v9  ;;  %v1237_v30 = vsel %vm1212_vm4, %v1197_v8, %v2383_v10 }
 0x12c   : > { %v1953_v35 = vpop.eup %1952  ;;  %1786 = vst [vmem:[%s2320_s25 + $0x28] sm:$0xff] %v1730_v52   ;;  %v1613_v61 = vadd.f32 -1.0, %v1951_v56  ;;  %v1133_v16 = vmul.f32 1.442695, %v1073_v25  ;;  %v2606_v26 = vadd.f32 %v2102_v21, %v2309_v50  ;;  %1956 = vpow2.f32 %v1137_v14 }
 0x12d   : > { %1794 = vst [vmem:[%s2320_s25 + $0x68] sm:$0xff] %v1770_v54   ;;  %v1629_v18 = vadd.f32 -1.0, %v1953_v35  ;;  %v1060_v28 = vmin.f32 %v996_v5, 0.0  ;;  %v1012_v36 = vadd.f32 %v2121_v31, %v973_v34  ;;  %1958 = vpow2.f32 %v1101_v59 }
 0x12e   : > { %v1182_v9 = vsel %vm1022_vm11, %v2481_v39, %v1613_v61  ;;  %v955_v10 = vmul.f32 %v2110_v24, %v2598_v3  ;;  %v971_v41 = vmul.f32 %v2110_v24, %v2606_v26  ;;  %1960 = vpow2.f32 %v1133_v16 }
 0x12f   : > { %v1222_v21 = vsel %vm1212_vm4, %v1182_v9, %v2458_v55  ;;  %v1198_v50 = vsel %vm1038_vm12, %v2495_v62, %v1629_v18  ;;  %v1107_v12 = vmul.f32 1.442695, %v1060_v28  ;;  %v1076_v15 = vmin.f32 %v1012_v36, 0.0 }
 0x130   : > { %v1725_v32 = vpack.c.bf16 %v1222_v21, %v1221_v23  ;;  %v1238_v39 = vsel %vm1212_vm4, %v1198_v50, %v2462_v51  ;;  %v994_v20 = vadd.f32 %v2121_v31, %v955_v10  ;;  %v1010_v57 = vadd.f32 %v2121_v31, %v971_v41 }
 0x131   : > { %v1765_v24 = vpack.c.bf16 %v1238_v39, %v1237_v30  ;;  %1962 = vpow2.f32 %v1107_v12  ;;  %v1139_v55 = vmul.f32 1.442695, %v1076_v15  ;;  %vm1027_vm13 = vcmp.gt.f32.partialorder %v2524_v1, 0.0 }
 0x132   : > { %1785 = vst [vmem:[%s2320_s25 + $0x20] sm:$0xff] %v1725_v32   ;;  %v1058_v37 = vmin.f32 %v994_v20, 0.0  ;;  %v1955_v58 = vpop.eup %1954  ;;  %v1074_v62 = vmin.f32 %v1010_v57, 0.0  ;;  %vm1028_vm14 = vcmp.gt.f32.partialorder %v996_v5, 0.0  ;;  %vm1043_vm15 = vcmp.gt.f32.partialorder %v2527_v19, 0.0 }
 0x133   : > { %1793 = vst [vmem:[%s2320_s25 + $0x60] sm:$0xff] %v1765_v24   ;;  %1964 = vpow2.f32 %v1139_v55  ;;  %v1618_v42 = vadd.f32 -1.0, %v1955_v58  ;;  %vm1025_vm0 = vcmp.gt.f32.partialorder %v2532_v44, 0.0  ;;  %vm1041_vm1 = vcmp.gt.f32.partialorder %v2575_v0, 0.0 }
 0x134   : > { %v1103_v40 = vmul.f32 1.442695, %v1058_v37  ;;  %v1135_v46 = vmul.f32 1.442695, %v1074_v62  ;;  %vm1044_vm2 = vcmp.gt.f32.partialorder %v1012_v36, 0.0  ;;  %vm1026_vm3 = vcmp.gt.f32.partialorder %v994_v20, 0.0 }
 0x135   : > { %v1187_v31 = vsel %vm1027_vm13, %v2524_v1, %v1618_v42  ;;  %vm1042_vm5 = vcmp.gt.f32.partialorder %v1010_v57, 0.0 }
 0x136   : > { %1966 = vpow2.f32 %v1103_v40  ;;  %v1957_v38 = vpop.eup %1956  ;;  %v1227_v29 = vsel %vm1212_vm4, %v1187_v31, %v2485_v60 }
 0x137   : > { %1968 = vpow2.f32 %v1135_v46  ;;  %v1959_v51 = vpop.eup %1958  ;;  %v1634_v2 = vadd.f32 -1.0, %v1957_v38 }
 0x138   : > { %v1961_v27 = vpop.eup %1960  ;;  %v1616_v48 = vadd.f32 -1.0, %v1959_v51 }
 0x139   : > { %v1632_v23 = vadd.f32 -1.0, %v1961_v27  ;;  %v1203_v47 = vsel %vm1043_vm15, %v2527_v19, %v1634_v2 }
 0x13a   : > { %v1185_v52 = vsel %vm1025_vm0, %v2532_v44, %v1616_v48  ;;  %v1243_v19 = vsel %vm1212_vm4, %v1203_v47, %v2489_v7 }
 0x13b   : > { %v1963_v49 = vpop.eup %1962  ;;  %v1225_v54 = vsel %vm1212_vm4, %v1185_v52, %v2499_v63 }
 0x13c   : > { %v1619_v6 = vadd.f32 -1.0, %v1963_v49 }
 0x13d   : > { %v1965_v33 = vpop.eup %1964 }
 0x13e   : > { %v1188_v8 = vsel %vm1028_vm14, %v996_v5, %v1619_v6  ;;  %v1635_v1 = vadd.f32 -1.0, %v1965_v33 }
 0x13f   : > { %v1228_v14 = vsel %vm1212_vm4, %v1188_v8, %v2560_v22  ;;  %v1201_v22 = vsel %vm1041_vm1, %v2575_v0, %v1632_v23 }
 0x140   : > { %v1967_v45 = vpop.eup %1966  ;;  %v1740_v13 = vpack.c.bf16 %v1228_v14, %v1227_v29  ;;  %v1204_v60 = vsel %vm1044_vm2, %v1012_v36, %v1635_v1  ;;  %v1241_v0 = vsel %vm1212_vm4, %v1201_v22, %v2536_v43 }
 0x141   : > { %v1969_v53 = vpop.eup %1968  ;;  %v1617_v4 = vadd.f32 -1.0, %v1967_v45  ;;  %v1244_v59 = vsel %vm1212_vm4, %v1204_v60, %v2587_v17 }
 0x142   : > { %1788 = vst [vmem:[%s2320_s25 + $0x38] sm:$0xff] %v1740_v13   ;;  %v1633_v25 = vadd.f32 -1.0, %v1969_v53  ;;  %v1780_v56 = vpack.c.bf16 %v1244_v59, %v1243_v19 }
 0x143   : > { %v1186_v44 = vsel %vm1026_vm3, %v994_v20, %v1617_v4 }
 0x144   : > { %v1226_v7 = vsel %vm1212_vm4, %v1186_v44, %v2598_v3  ;;  %v1202_v5 = vsel %vm1042_vm5, %v1010_v57, %v1633_v25  ;;  %1796 = vst [vmem:[%s2320_s25 + $0x78] sm:$0xff] %v1780_v56  }
 0x145   : > { %v1735_v34 = vpack.c.bf16 %v1226_v7, %v1225_v54  ;;  %v1242_v17 = vsel %vm1212_vm4, %v1202_v5, %v2606_v26 }
 0x146   : > { %v1775_v35 = vpack.c.bf16 %v1242_v17, %v1241_v0 }
 0x147   : > { %1787 = vst [vmem:[%s2320_s25 + $0x30] sm:$0xff] %v1735_v34  }
 0x148   : > { %1795 = vst [vmem:[%s2320_s25 + $0x70] sm:$0xff] %v1775_v35  }
 0x149 PF: > { %s16_s23 = sadd.s32 1, %s1992_s23   ;;  %s2682_s21 = smov %s1988_s22 }
 0x14a   : > { %p13_p5 = scmp.ge.s32.totalorder %s16_s23, 4   ;;  %s2683_s22 = smov %s2685_s24 }
 0x14c   :  { %15 = sbr.rel (!%p13_p5) target bundleno = 2 (0x2), region = 97 }

// kernel: _lambda_.19
= control target key start
LH: loop header
LB: loop body
LE: loop exit
PB: predicated region body
PF: predicated region fallthrough
CT: control target
= control target key end

     0   :  { %s1100_s21 = smov 0   ;;  %s1102_s22 = smov 0   ;;  %s1233_s0 = inlined_call_operand.vmem [shape: bf16[128,72], index: 0, kind: input, shape index: {}]   ;;  %s1234_s1 = inlined_call_operand.vmem [shape: bf16[72,128], index: 1, kind: input, shape index: {}]   ;;  %s1235_s2 = inlined_call_operand.vmem [shape: f32[1,128], index: 2, kind: input, shape index: {}]   ;;  %s1236_s3 = inlined_call_operand.vmem [shape: f32[1,128], index: 3, kind: input, shape index: {}]   ;;  %s1237_s4 = inlined_call_operand.vmem [shape: f32[1,128], index: 4, kind: input, shape index: {}]   ;;  %s1238_s5 = inlined_call_operand.vmem [shape: f32[1,128], index: 5, kind: input, shape index: {}]   ;;  %s1239_s6 = inlined_call_operand.vmem [shape: bf16[128,128], index: 6, kind: output, shape index: {}]  }
   0x1   :  { %s1104_s23 = smov 0  }
   0x2 LB: > { %s35_s24 = sadd.s32 1, %s1058_s22  ;;  %p881_p0 = scmp.ge.s32.totalorder %s1062_s23, 1  ;;  %s1062_s23 = sphi %s1104_s23, %s16_s23   ;;  %s1058_s22 = sphi %s1102_s22, %s1241_s22   ;;  %s1054_s21 = sphi %s1100_s21, %s1240_s21  }
   0x3   : > { %p37_p1 = scmp.ge.s32.totalorder %s35_s24, 2  ;;  %p287_p2 = scmp.lt.s32.totalorder %s1062_s23, 3 }
   0x5   : > { %s1243_s24 = smov (%p37_p1, %s35_s24), 0  ;;  %p288_p3 = pnand %p881_p0, %p287_p2 }
   0x6   : > { %v1015_v0 = vld [vmem:[%s1234_s1] sm:$0xff] (!%p288_p3)   ;;  %v1016_v1 = vld [vmem:[%s1234_s1 + $0x8] sm:$0xff] (!%p288_p3)   ;;  %s882_s29 = sshll.u32 (!%p288_p3), %s1054_s21, 3  ;;  %v1017_v2 = vld [vmem:[%s1234_s1 + $0x10] sm:$0xff] (!%p288_p3)   ;;  %vm467_vm0 = vcmask (!%p288_p3), 588800   ;;  %vm480_vm1 = vcmask (!%p288_p3), 1043456   ;;  %v672_v43 = vlaneseq (!%p288_p3) }
   0x7   : > { %291 = sbr.rel (%p288_p3) target bundleno = 274 (0x112), region = 44  ;;  %960 = vmatprep.subr.bf16.mxu0 (!%p288_p3), %v1015_v0  ;;  %978 = vmatprep.subr.bf16.mxu1 (!%p288_p3), %v1015_v0  ;;  %p344_p4 = scmp.lt.s32.totalorder (!%p288_p3), %s882_s29, 15  ;;  %v1018_v3 = vld [vmem:[%s1234_s1 + $0x18] sm:$0xff] (!%p288_p3)   ;;  %v1019_v6 = vld [vmem:[%s1234_s1 + $0x20] ss:$0 sps:$4 sm:$0xff] (!%p288_p3)  }
   0x8   : > { %961 = vmatpush3.bf16.msra.mxu0 (!%p288_p3), %v1015_v0  ;;  %983 = vmatpush3.bf16.msra.mxu1 (!%p288_p3), %v1015_v0  ;;  %v482_v7 = vsel (!%p288_p3), %vm480_vm1, %v1019_v6, 0  ;;  %v899_v10 = vld [vmem:[%s1235_s2] ss:$0 sm:$0xff] (!%p288_p3)  ;;  %v673_v56 = vshrl.u32 (!%p288_p3), %v672_v43, 7 }
   0x9   : > { %962 = vmatprep.subr.bf16.mxu0 (!%p288_p3), %v1016_v1  ;;  %979 = vmatprep.subr.bf16.mxu1 (!%p288_p3), %v1016_v1  ;;  %v900_v12 = vld [vmem:[%s1236_s3] ss:$0 sm:$0xff] (!%p288_p3) }
   0xa   : > { %v901_v18 = vld [vmem:[%s1237_s4] ss:$0 sm:$0xff] (!%p288_p3)  ;;  %v674_v0 = vsub.s32 (!%p288_p3), 0, %v673_v56 }
   0xb   : > { %v669_v50 = vld [vmem:[%s1238_s5] sm:$0x1] (!%p288_p3) }
   0xc   : > { %963 = vmatpush3.bf16.msra.mxu0 (!%p288_p3), %v1016_v1  ;;  %984 = vmatpush3.bf16.msra.mxu1 (!%p288_p3), %v1016_v1  ;;  %vm670_vm2 = vcmp.gt.f32.partialorder (!%p288_p3), %v669_v50, 0.5  ;;  %v1064_v1 = vmov (!%p288_p3), 0  }
   0xd   : > { %964 = vmatprep.subr.bf16.mxu0 (!%p288_p3), %v1017_v2  ;;  %980 = vmatprep.subr.bf16.mxu1 (!%p288_p3), %v1017_v2 }
   0xe   : > { %s1245_s29 = smov (!%p344_p4, %s882_s29), 15 }
   0xf   : > { %s883_s8 = sshll.u32 %s1245_s29, 2 }
  0x10   : > { %s350_s13 = scalar_lea.vmem %s1233_s0, %s883_s8  ;;  %965 = vmatpush3.bf16.msra.mxu0 %v1017_v2  ;;  %985 = vmatpush3.bf16.msra.mxu1 %v1017_v2  ;;  %v671_v2 = vsel %vm670_vm2, 1, %v1064_v1  ;;  %s380_s30 = scalar_lea.vmem %s1239_s6, %s883_s8 }
  0x11   : > { %v1020_v4 = vld [vmem:[%s350_s13] sm:$0xff]   ;;  %v1021_v5 = vld [vmem:[%s350_s13 + $0x10] sm:$0xff]   ;;  %966 = vmatprep.subr.bf16.mxu0 %v1018_v3  ;;  %981 = vmatprep.subr.bf16.mxu1 %v1018_v3  ;;  %v1022_v8 = vld [vmem:[%s350_s13 + $0x8] sm:$0xff]  }
  0x12   : > { %970 = vmatprep.mubr.msk.bf16.mxu0 %vm467_vm0, %v1020_v4  ;;  %974 = vmatprep.mubr.msk.bf16.mxu1 %vm467_vm0, %v1021_v5  ;;  %v1023_v9 = vld [vmem:[%s350_s13 + $0x18] sm:$0xff]  }
  0x14   : > { %967 = vmatpush3.bf16.msra.mxu0 %v1018_v3  ;;  %986 = vmatpush3.bf16.msra.mxu1 %v1018_v3  ;;  %v675_v3 = vrot.slane %v671_v2, %v674_v0 }
  0x15   : > { %988 = vmatprep.subr.msk.bf16.mxu0 %vm480_vm1, %v1019_v6  ;;  %989 = vmatprep.subr.msk.bf16.mxu1 %vm480_vm1, %v1019_v6 }
  0x16   : > { %vm676_vm4 = vcmp.eq.s32.totalorder %v675_v3, 1 }
  0x18   : > { %969 = vmatpush3.bf16.msra.mxu0 %v482_v7  ;;  %987 = vmatpush3.bf16.msra.mxu1 %v482_v7 }
  0x1b   : > { %971 = vmatmul.mubr.msk.bf16.vlgmr.msra.gmra.mrb[0].mxu0 %vm467_vm0, %v1022_v8  ;;  %975 = vmatmul.mubr.msk.bf16.vlgmr.msra.gmra.mrb[0].mxu1 %vm467_vm0, %v1023_v9 }
  0xee   : > { %v972_v11 = vpop.f32.mrb[0].mxu0  ;;  %v976_v13 = vpop.f32.mrb[0].mxu1 }
  0xef   : > { %v1151_v14 = vadd.f32 %v972_v11, %v899_v10  ;;  %v1153_v15 = vadd.f32 %v976_v13, %v899_v10  ;;  %v518_v16 = vpop.f32.mrb[1].mxu0  ;;  %v534_v17 = vpop.f32.mrb[1].mxu1 }
  0xf0   : > { %v1158_v19 = vadd.f32 %v899_v10, %v518_v16  ;;  %v1160_v20 = vadd.f32 %v899_v10, %v534_v17  ;;  %v973_v21 = vpop.f32.mrb[2].mxu0  ;;  %v977_v22 = vpop.f32.mrb[2].mxu1 }
  0xf1   : > { %v600_v23 = vmul.f32 %v900_v12, %v1151_v14  ;;  %v604_v24 = vmul.f32 %v900_v12, %v1153_v15  ;;  %v1164_v25 = vadd.f32 %v973_v21, %v899_v10  ;;  %v1166_v26 = vadd.f32 %v977_v22, %v899_v10  ;;  %v521_v27 = vpop.f32.mrb[3].mxu0  ;;  %v537_v28 = vpop.f32.mrb[3].mxu1 }
  0xf2   : > { %v598_v29 = vmul.f32 %v900_v12, %v1158_v19  ;;  %v602_v30 = vmul.f32 %v900_v12, %v1160_v20  ;;  %v1170_v31 = vadd.f32 %v899_v10, %v521_v27  ;;  %v1172_v32 = vadd.f32 %v899_v10, %v537_v28 }
  0xf3   : > { %v615_v33 = vadd.f32 %v901_v18, %v600_v23  ;;  %v1174_v34 = vadd.f32 %v901_v18, %v604_v24  ;;  %v601_v35 = vmul.f32 %v900_v12, %v1164_v25  ;;  %v605_v36 = vmul.f32 %v900_v12, %v1166_v26 }
  0xf4   : > { %v1178_v37 = vadd.f32 %v901_v18, %v598_v29  ;;  %v1180_v38 = vadd.f32 %v901_v18, %v602_v30  ;;  %v599_v39 = vmul.f32 %v900_v12, %v1170_v31  ;;  %v603_v40 = vmul.f32 %v900_v12, %v1172_v32 }
  0xf5   : > { %v631_v41 = vmin.f32 %v615_v33, 0.0  ;;  %v635_v42 = vmin.f32 %v1174_v34, 0.0  ;;  %v616_v48 = vadd.f32 %v901_v18, %v601_v35  ;;  %v620_v49 = vadd.f32 %v901_v18, %v605_v36 }
  0xf6   : > { %v629_v44 = vmin.f32 %v1178_v37, 0.0  ;;  %v633_v45 = vmin.f32 %v1180_v38, 0.0  ;;  %v614_v53 = vadd.f32 %v901_v18, %v599_v39  ;;  %v1190_v54 = vadd.f32 %v901_v18, %v603_v40 }
  0xf7   : > { %v641_v46 = vmul.f32 1.442695, %v631_v41  ;;  %v649_v47 = vmul.f32 1.442695, %v635_v42  ;;  %v632_v55 = vmin.f32 %v616_v48, 0.0  ;;  %v636_v57 = vmin.f32 %v620_v49, 0.0 }
  0xf8   : > { %v637_v51 = vmul.f32 1.442695, %v629_v44  ;;  %v645_v52 = vmul.f32 1.442695, %v633_v45  ;;  %v630_v58 = vmin.f32 %v614_v53, 0.0  ;;  %v634_v60 = vmin.f32 %v1190_v54, 0.0 }
  0xf9   : > { %1024 = vpow2.f32 %v641_v46  ;;  %v643_v59 = vmul.f32 1.442695, %v632_v55  ;;  %v651_v61 = vmul.f32 1.442695, %v636_v57  ;;  %vm623_vm3 = vcmp.gt.f32.partialorder %v615_v33, 0.0 }
  0xfa   : > { %1026 = vpow2.f32 %v649_v47  ;;  %v639_v62 = vmul.f32 1.442695, %v630_v58  ;;  %v647_v63 = vmul.f32 1.442695, %v634_v60  ;;  %vm627_vm5 = vcmp.gt.f32.partialorder %v1174_v34, 0.0 }
  0xfb   : > { %1028 = vpow2.f32 %v637_v51  ;;  %vm621_vm6 = vcmp.gt.f32.partialorder %v1178_v37, 0.0  ;;  %vm625_vm7 = vcmp.gt.f32.partialorder %v1180_v38, 0.0  ;;  %vm624_vm8 = vcmp.gt.f32.partialorder %v616_v48, 0.0 }
  0xfc   : > { %1030 = vpow2.f32 %v645_v52  ;;  %vm628_vm9 = vcmp.gt.f32.partialorder %v620_v49, 0.0  ;;  %vm622_vm10 = vcmp.gt.f32.partialorder %v614_v53, 0.0  ;;  %vm626_vm11 = vcmp.gt.f32.partialorder %v1190_v54, 0.0 }
  0xfd   : > { %1032 = vpow2.f32 %v643_v59 }
  0xfe   : > { %1034 = vpow2.f32 %v651_v61 }
  0xff   : > { %1036 = vpow2.f32 %v639_v62 }
 0x100   : > { %1038 = vpow2.f32 %v647_v63 }
 0x103   : > { %v1025_v4 = vpop.eup %1024 }
 0x104   : > { %v1027_v5 = vpop.eup %1026  ;;  %v904_v6 = vadd.f32 -1.0, %v1025_v4 }
 0x105   : > { %v1029_v7 = vpop.eup %1028  ;;  %v908_v8 = vadd.f32 -1.0, %v1027_v5 }
 0x106   : > { %v1031_v9 = vpop.eup %1030  ;;  %v902_v10 = vadd.f32 -1.0, %v1029_v7  ;;  %v663_v12 = vsel %vm623_vm3, %v615_v33, %v904_v6 }
 0x107   : > { %v1033_v11 = vpop.eup %1032  ;;  %v906_v13 = vadd.f32 -1.0, %v1031_v9  ;;  %v667_v21 = vsel %vm627_vm5, %v1174_v34, %v908_v8  ;;  %v679_v24 = vsel %vm676_vm4, %v663_v12, %v1151_v14 }
 0x108   : > { %v1035_v16 = vpop.eup %1034  ;;  %v905_v17 = vadd.f32 -1.0, %v1033_v11  ;;  %v661_v27 = vsel %vm621_vm6, %v1178_v37, %v902_v10  ;;  %v683_v36 = vsel %vm676_vm4, %v667_v21, %v1153_v15 }
 0x109   : > { %v1037_v18 = vpop.eup %1036  ;;  %v909_v22 = vadd.f32 -1.0, %v1035_v16  ;;  %v665_v30 = vsel %vm625_vm7, %v1180_v38, %v906_v13  ;;  %v677_v38 = vsel %vm676_vm4, %v661_v27, %v1158_v19 }
 0x10a   : > { %v1039_v23 = vpop.eup %1038  ;;  %v664_v28 = vsel %vm624_vm8, %v616_v48, %v905_v17  ;;  %v903_v29 = vadd.f32 -1.0, %v1037_v18  ;;  %v681_v42 = vsel %vm676_vm4, %v665_v30, %v1160_v20 }
 0x10b   : > { %v680_v33 = vsel %vm676_vm4, %v664_v28, %v1164_v25  ;;  %v668_v34 = vsel %vm628_vm9, %v620_v49, %v909_v22  ;;  %v907_v35 = vadd.f32 -1.0, %v1039_v23 }
 0x10c   : > { %v936_v14 = vpack.c.bf16 %v680_v33, %v679_v24  ;;  %v684_v37 = vsel %vm676_vm4, %v668_v34, %v1166_v26  ;;  %v662_v39 = vsel %vm622_vm10, %v614_v53, %v903_v29 }
 0x10d   : > { %v946_v40 = vpack.c.bf16 %v684_v37, %v683_v36  ;;  %v678_v41 = vsel %vm676_vm4, %v662_v39, %v1170_v31  ;;  %v666_v25 = vsel %vm626_vm11, %v1190_v54, %v907_v35 }
 0x10e   : > { %948 = vst [vmem:[%s380_s30 + $0x8] sm:$0xff] %v936_v14   ;;  %v931_v15 = vpack.c.bf16 %v678_v41, %v677_v38  ;;  %v682_v26 = vsel %vm676_vm4, %v666_v25, %v1172_v32 }
 0x10f   : > { %950 = vst [vmem:[%s380_s30 + $0x18] sm:$0xff] %v946_v40   ;;  %v941_v43 = vpack.c.bf16 %v682_v26, %v681_v42 }
 0x110   : > { %932 = vst [vmem:[%s380_s30] sm:$0xff] %v931_v15  }
 0x111   : > { %949 = vst [vmem:[%s380_s30 + $0x10] sm:$0xff] %v941_v43  }
 0x112 PF: > { %s16_s23 = sadd.s32 1, %s1062_s23   ;;  %s1240_s21 = smov %s1058_s22 }
 0x113   : > { %p13_p5 = scmp.ge.s32.totalorder %s16_s23, 4   ;;  %s1241_s22 = smov %s1243_s24 }
 0x115   :  { %15 = sbr.rel (!%p13_p5) target bundleno = 2 (0x2), region = 97 }

// kernel: _lambda_.21
= control target key start
LH: loop header
LB: loop body
LE: loop exit
PB: predicated region body
PF: predicated region fallthrough
CT: control target
= control target key end

     0   :  { %s890_s21 = smov 0   ;;  %s892_s22 = smov 0   ;;  %s966_s0 = inlined_call_operand.vmem [shape: bf16[32,144], index: 0, kind: input, shape index: {}]   ;;  %s967_s1 = inlined_call_operand.vmem [shape: bf16[144,128], index: 1, kind: input, shape index: {}]   ;;  %s968_s2 = inlined_call_operand.vmem [shape: f32[1,128], index: 2, kind: input, shape index: {}]   ;;  %s969_s3 = inlined_call_operand.vmem [shape: f32[1,128], index: 3, kind: input, shape index: {}]   ;;  %s970_s4 = inlined_call_operand.vmem [shape: f32[1,128], index: 4, kind: input, shape index: {}]   ;;  %s971_s5 = inlined_call_operand.vmem [shape: f32[1,128], index: 5, kind: input, shape index: {}]   ;;  %s972_s6 = inlined_call_operand.vmem [shape: bf16[32,128], index: 6, kind: output, shape index: {}]  }
   0x1   :  { %s894_s23 = smov 0  }
   0x2 LB: > { %s35_s24 = sadd.s32 1, %s848_s22  ;;  %p754_p0 = scmp.ge.s32.totalorder %s852_s23, 1  ;;  %s852_s23 = sphi %s894_s23, %s16_s23   ;;  %s848_s22 = sphi %s892_s22, %s974_s22   ;;  %s844_s21 = sphi %s890_s21, %s973_s21  }
   0x3   : > { %p37_p1 = scmp.ge.s32.totalorder %s35_s24, 2  ;;  %p290_p2 = scmp.lt.s32.totalorder %s852_s23, 3 }
   0x5   : > { %s976_s24 = smov (%p37_p1, %s35_s24), 0  ;;  %p291_p3 = pnand %p754_p0, %p290_p2 }
   0x6   : > { %v814_v0 = vld [vmem:[%s967_s1] sm:$0xff] (!%p291_p3)   ;;  %v854_v1 = vmov (!%p291_p3), 0   ;;  %s755_s27 = sshll.u32 (!%p291_p3), %s844_s21, 1  ;;  %v815_v2 = vld [vmem:[%s967_s1 + $0x8] sm:$0xff] (!%p291_p3)   ;;  %v816_v3 = vld [vmem:[%s967_s1 + $0x10] sm:$0xff] (!%p291_p3)   ;;  %vm482_vm0 = vcmask (!%p291_p3), 130048   ;;  %v578_v26 = vlaneseq (!%p291_p3) }
   0x7   : > { %294 = sbr.rel (%p291_p3) target bundleno = 285 (0x11d), region = 44  ;;  %486 = vmatprep.subr.bf16.mxu0 (!%p291_p3), %v854_v1  ;;  %p350_p4 = scmp.lt.s32.totalorder (!%p291_p3), %s755_s27, 3  ;;  %v817_v4 = vld [vmem:[%s967_s1 + $0x18] sm:$0xff] (!%p291_p3)   ;;  %v818_v6 = vld [vmem:[%s967_s1 + $0x20] sm:$0xff] (!%p291_p3)   ;;  %v819_v7 = vld [vmem:[%s967_s1 + $0x28] sm:$0xff] (!%p291_p3)  }
   0x8   : > { %487 = vmatpush1.bf16.msra.mxu0 (!%p291_p3), %v814_v0  ;;  %v820_v8 = vld [vmem:[%s967_s1 + $0x30] sm:$0xff] (!%p291_p3)   ;;  %v821_v9 = vld [vmem:[%s967_s1 + $0x38] sm:$0xff] (!%p291_p3)   ;;  %v822_v10 = vld [vmem:[%s967_s1 + $0x40] sm:$0xff] (!%p291_p3)   ;;  %v579_v31 = vshrl.u32 (!%p291_p3), %v578_v26, 7 }
   0x9   : > { %488 = vmatprep.subr.bf16.mxu0 (!%p291_p3), %v854_v1  ;;  %v772_v12 = vld [vmem:[%s968_s2] ss:$0 sm:$0xff] (!%p291_p3) }
   0xa   : > { %v773_v14 = vld [vmem:[%s969_s3] ss:$0 sm:$0xff] (!%p291_p3)  ;;  %v580_v32 = vsub.s32 (!%p291_p3), 0, %v579_v31 }
   0xb   : > { %v774_v17 = vld [vmem:[%s970_s4] ss:$0 sm:$0xff] (!%p291_p3) }
   0xc   : > { %489 = vmatpush1.bf16.msra.mxu0 (!%p291_p3), %v815_v2  ;;  %v575_v29 = vld [vmem:[%s971_s5] sm:$0x1] (!%p291_p3) }
   0xd   : > { %490 = vmatprep.subr.bf16.mxu0 (!%p291_p3), %v854_v1  ;;  %vm576_vm1 = vcmp.gt.f32.partialorder (!%p291_p3), %v575_v29, 0.5 }
   0xe   : > { %s978_s27 = smov (!%p350_p4, %s755_s27), 3  ;;  %v577_v33 = vsel %vm576_vm1, 1, %v854_v1 }
   0xf   : > { %s781_s8 = sshll.u32 %s978_s27, 3  ;;  %v581_v34 = vrot.slane %v577_v33, %v580_v32  ;;  %s759_s12 = sshll.u32 %s978_s27, 2 }
  0x10   : > { %s357_s11 = scalar_lea.vmem %s966_s0, %s781_s8  ;;  %491 = vmatpush1.bf16.msra.mxu0 %v816_v3  ;;  %s388_s15 = scalar_lea.vmem %s972_s6, %s759_s12 }
  0x11   : > { %v825_v5 = vld [vmem:[%s357_s11 + $0x4] ss:$8 sps:$4 sm:$0xff]   ;;  %492 = vmatprep.subr.bf16.mxu0 %v854_v1  ;;  %v823_v11 = vld [vmem:[%s357_s11] ss:$8 sps:$4 sm:$0xff]   ;;  %vm582_vm3 = vcmp.eq.s32.totalorder %v581_v34, 1 }
  0x12   : > { %771 = vmatprep.mubr.msk.bf16.mxu0 %vm482_vm0, %v825_v5 }
  0x14   : > { %493 = vmatpush1.bf16.msra.mxu0 %v817_v4 }
  0x15   : > { %494 = vmatprep.subr.bf16.mxu0 %v854_v1 }
  0x18   : > { %495 = vmatpush1.bf16.msra.mxu0 %v818_v6 }
  0x19   : > { %496 = vmatprep.subr.bf16.mxu0 %v854_v1 }
  0x1c   : > { %497 = vmatpush1.bf16.msra.mxu0 %v819_v7 }
  0x1d   : > { %498 = vmatprep.subr.bf16.mxu0 %v854_v1 }
  0x20   : > { %499 = vmatpush1.bf16.msra.mxu0 %v820_v8 }
  0x21   : > { %500 = vmatprep.subr.bf16.mxu0 %v854_v1 }
  0x24   : > { %501 = vmatpush1.bf16.msra.mxu0 %v821_v9 }
  0x25   : > { %502 = vmatprep.subr.bf16.mxu0 %v854_v1 }
  0x28   : > { %503 = vmatpush1.bf16.msra.mxu0 %v822_v10 }
  0x2b   : > { %519 = vmatmul.mubr.bf16.vlgmr.msra.gmra.mrb[0].mxu0 %v823_v11 }
  0xfe   : > { %v520_v13 = vpop.f32.mrb[0].mxu0 }
  0xff   : > { %v543_v15 = vadd.f32 %v772_v12, %v520_v13  ;;  %v522_v16 = vpop.f32.mrb[1].mxu0 }
 0x100   : > { %v523_v18 = vpop.f32.mrb[2].mxu0 }
 0x101   : > { %v552_v19 = vmul.f32 %v773_v14, %v543_v15  ;;  %v544_v20 = vadd.f32 %v772_v12, %v523_v18  ;;  %v525_v21 = vpop.f32.mrb[3].mxu0 }
 0x103   : > { %v561_v22 = vadd.f32 %v774_v17, %v552_v19  ;;  %v553_v23 = vmul.f32 %v773_v14, %v544_v20 }
 0x105   : > { %v565_v24 = vmin.f32 %v561_v22, 0.0  ;;  %v562_v25 = vadd.f32 %v774_v17, %v553_v23  ;;  %vm563_vm2 = vcmp.gt.f32.partialorder %v561_v22, 0.0 }
 0x107   : > { %v567_v27 = vmul.f32 1.442695, %v565_v24  ;;  %v566_v28 = vmin.f32 %v562_v25, 0.0  ;;  %vm564_vm4 = vcmp.gt.f32.partialorder %v562_v25, 0.0 }
 0x109   : > { %826 = vpow2.f32 %v567_v27  ;;  %v569_v30 = vmul.f32 1.442695, %v566_v28 }
 0x10b   : > { %828 = vpow2.f32 %v569_v30 }
 0x113   : > { %v827_v35 = vpop.eup %826 }
 0x114   : > { %v775_v36 = vadd.f32 -1.0, %v827_v35 }
 0x115   : > { %v829_v37 = vpop.eup %828 }
 0x116   : > { %v573_v38 = vsel %vm563_vm2, %v561_v22, %v775_v36  ;;  %v776_v39 = vadd.f32 -1.0, %v829_v37 }
 0x117   : > { %v583_v41 = vsel %vm582_vm3, %v573_v38, %v543_v15 }
 0x118   : > { %v574_v40 = vsel %vm564_vm4, %v562_v25, %v776_v39 }
 0x119   : > { %v584_v42 = vsel %vm582_vm3, %v574_v40, %v544_v20 }
 0x11a   : > { %v787_v43 = vpack.c.bf16 %v584_v42, %v583_v41 }
 0x11c   : > { %788 = vst [vmem:[%s388_s15] sm:$0xff] %v787_v43  }
 0x11d PF: > { %s16_s23 = sadd.s32 1, %s852_s23   ;;  %s973_s21 = smov %s848_s22 }
 0x11e   : > { %p13_p5 = scmp.ge.s32.totalorder %s16_s23, 4   ;;  %s974_s22 = smov %s976_s24 }
 0x120   :  { %15 = sbr.rel (!%p13_p5) target bundleno = 2 (0x2), region = 97 }

// kernel: _lambda_.20
= control target key start
LH: loop header
LB: loop body
LE: loop exit
PB: predicated region body
PF: predicated region fallthrough
CT: control target
= control target key end

     0   :  { %s1225_s24 = smov 0   ;;  %s1227_s25 = smov 0   ;;  %s1359_s0 = inlined_call_operand.vmem [shape: bf16[128,72], index: 0, kind: input, shape index: {}]   ;;  %s1360_s1 = inlined_call_operand.vmem [shape: bf16[72,128], index: 1, kind: input, shape index: {}]   ;;  %s1361_s2 = inlined_call_operand.vmem [shape: f32[1,128], index: 2, kind: input, shape index: {}]   ;;  %s1362_s3 = inlined_call_operand.vmem [shape: f32[1,128], index: 3, kind: input, shape index: {}]   ;;  %s1363_s4 = inlined_call_operand.vmem [shape: f32[1,128], index: 4, kind: input, shape index: {}]   ;;  %s1364_s5 = inlined_call_operand.vmem [shape: f32[1,128], index: 5, kind: input, shape index: {}]   ;;  %s1365_s6 = inlined_call_operand.vmem [shape: bf16[128,128], index: 6, kind: input, shape index: {}]   ;;  %s1366_s7 = inlined_call_operand.vmem [shape: bf16[128,128], index: 7, kind: output, shape index: {}]  }
   0x1   :  { %s1229_s26 = smov 0  }
   0x2 LB: > { %s36_s27 = sadd.s32 1, %s1178_s25  ;;  %p980_p0 = scmp.ge.s32.totalorder %s1182_s26, 1  ;;  %s1182_s26 = sphi %s1229_s26, %s17_s26   ;;  %s1178_s25 = sphi %s1227_s25, %s1368_s25   ;;  %s1174_s24 = sphi %s1225_s24, %s1367_s24  }
   0x3   : > { %p38_p1 = scmp.ge.s32.totalorder %s36_s27, 2  ;;  %p328_p2 = scmp.lt.s32.totalorder %s1182_s26, 3 }
   0x5   : > { %s1370_s27 = smov (%p38_p1, %s36_s27), 0  ;;  %p329_p3 = pnand %p980_p0, %p328_p2 }
   0x6   : > { %v1135_v0 = vld [vmem:[%s1360_s1] sm:$0xff] (!%p329_p3)   ;;  %v1136_v1 = vld [vmem:[%s1360_s1 + $0x8] sm:$0xff] (!%p329_p3)   ;;  %s981_s9 = sshll.u32 (!%p329_p3), %s1174_s24, 3  ;;  %v1137_v2 = vld [vmem:[%s1360_s1 + $0x10] sm:$0xff] (!%p329_p3)   ;;  %vm527_vm0 = vcmask (!%p329_p3), 588800   ;;  %vm540_vm1 = vcmask (!%p329_p3), 1043456   ;;  %v756_v63 = vlaneseq (!%p329_p3) }
   0x7   : > { %332 = sbr.rel (%p329_p3) target bundleno = 276 (0x114), region = 48  ;;  %1080 = vmatprep.subr.bf16.mxu0 (!%p329_p3), %v1135_v0  ;;  %1098 = vmatprep.subr.bf16.mxu1 (!%p329_p3), %v1135_v0  ;;  %p395_p4 = scmp.lt.s32.totalorder (!%p329_p3), %s981_s9, 15  ;;  %v1138_v3 = vld [vmem:[%s1360_s1 + $0x18] sm:$0xff] (!%p329_p3)   ;;  %v1139_v6 = vld [vmem:[%s1360_s1 + $0x20] ss:$0 sps:$4 sm:$0xff] (!%p329_p3)  }
   0x8   : > { %1081 = vmatpush3.bf16.msra.mxu0 (!%p329_p3), %v1135_v0  ;;  %1103 = vmatpush3.bf16.msra.mxu1 (!%p329_p3), %v1135_v0  ;;  %v542_v7 = vsel (!%p329_p3), %vm540_vm1, %v1139_v6, 0  ;;  %v1000_v14 = vld [vmem:[%s1361_s2] ss:$0 sm:$0xff] (!%p329_p3) }
   0x9   : > { %1082 = vmatprep.subr.bf16.mxu0 (!%p329_p3), %v1136_v1  ;;  %1099 = vmatprep.subr.bf16.mxu1 (!%p329_p3), %v1136_v1  ;;  %v1001_v27 = vld [vmem:[%s1362_s3] ss:$0 sm:$0xff] (!%p329_p3) }
   0xa   : > { %v1002_v40 = vld [vmem:[%s1363_s4] ss:$0 sm:$0xff] (!%p329_p3) }
   0xc   : > { %1083 = vmatpush3.bf16.msra.mxu0 (!%p329_p3), %v1136_v1  ;;  %1104 = vmatpush3.bf16.msra.mxu1 (!%p329_p3), %v1136_v1 }
   0xd   : > { %1084 = vmatprep.subr.bf16.mxu0 (!%p329_p3), %v1137_v2  ;;  %1100 = vmatprep.subr.bf16.mxu1 (!%p329_p3), %v1137_v2 }
   0xe   : > { %s1372_s9 = smov (!%p395_p4, %s981_s9), 15 }
   0xf   : > { %s1252_s12 = sshll.u32 %s1372_s9, 2 }
  0x10   : > { %s401_s17 = scalar_lea.vmem %s1359_s0, %s1252_s12  ;;  %1085 = vmatpush3.bf16.msra.mxu0 %v1137_v2  ;;  %1105 = vmatpush3.bf16.msra.mxu1 %v1137_v2  ;;  %s431_s22 = scalar_lea.vmem %s1365_s6, %s1252_s12 }
  0x11   : > { %v1140_v4 = vld [vmem:[%s401_s17] sm:$0xff]   ;;  %v1141_v5 = vld [vmem:[%s401_s17 + $0x10] sm:$0xff]   ;;  %1086 = vmatprep.subr.bf16.mxu0 %v1138_v3  ;;  %1101 = vmatprep.subr.bf16.mxu1 %v1138_v3  ;;  %v1142_v8 = vld [vmem:[%s401_s17 + $0x8] sm:$0xff]   ;;  %s440_s14 = scalar_lea.vmem %s1366_s7, %s1252_s12 }
  0x12   : > { %1090 = vmatprep.mubr.msk.bf16.mxu0 %vm527_vm0, %v1140_v4  ;;  %1094 = vmatprep.mubr.msk.bf16.mxu1 %vm527_vm0, %v1141_v5  ;;  %v1143_v9 = vld [vmem:[%s401_s17 + $0x18] sm:$0xff]   ;;  %v1065_v10 = vld [vmem:[%s431_s22 + $0x8] sm:$0xff]   ;;  %v1030_v12 = vld [vmem:[%s431_s22] sm:$0xff]  }
  0x13   : > { %v1067_v11 = vld [vmem:[%s431_s22 + $0x18] sm:$0xff]   ;;  %v1066_v13 = vld [vmem:[%s431_s22 + $0x10] sm:$0xff]   ;;  %v1035_v15 = vunpack.c.l.bf16 %v1065_v10  ;;  %v1031_v19 = vunpack.c.l.bf16 %v1030_v12  ;;  %v1036_v25 = vunpack.c.h.bf16 %v1065_v10  ;;  %v1032_v32 = vunpack.c.h.bf16 %v1030_v12 }
  0x14   : > { %1087 = vmatpush3.bf16.msra.mxu0 %v1138_v3  ;;  %1106 = vmatpush3.bf16.msra.mxu1 %v1138_v3  ;;  %v1043_v16 = vunpack.c.l.bf16 %v1067_v11  ;;  %v1039_v20 = vunpack.c.l.bf16 %v1066_v13  ;;  %v1044_v26 = vunpack.c.h.bf16 %v1067_v11  ;;  %v1040_v33 = vunpack.c.h.bf16 %v1066_v13 }
  0x15   : > { %1108 = vmatprep.subr.msk.bf16.mxu0 %vm540_vm1, %v1139_v6  ;;  %1109 = vmatprep.subr.msk.bf16.mxu1 %vm540_vm1, %v1139_v6  ;;  %v753_v6 = vld [vmem:[%s1364_s5] sm:$0x1]  ;;  %v757_v12 = vshrl.u32 %v756_v63, 7 }
  0x16   : > { %vm754_vm2 = vcmp.gt.f32.partialorder %v753_v6, 0.5 }
  0x18   : > { %1089 = vmatpush3.bf16.msra.mxu0 %v542_v7  ;;  %1107 = vmatpush3.bf16.msra.mxu1 %v542_v7 }
  0x1b   : > { %1091 = vmatmul.mubr.msk.bf16.vlgmr.msra.gmra.mrb[0].mxu0 %vm527_vm0, %v1142_v8  ;;  %1095 = vmatmul.mubr.msk.bf16.vlgmr.msra.gmra.mrb[0].mxu1 %vm527_vm0, %v1143_v9 }
  0xee   : > { %v1092_v17 = vpop.f32.mrb[0].mxu0  ;;  %v1096_v18 = vpop.f32.mrb[0].mxu1 }
  0xef   : > { %v645_v21 = vadd.f32 %v1092_v17, %v1000_v14  ;;  %v649_v22 = vadd.f32 %v1096_v18, %v1000_v14  ;;  %v578_v23 = vpop.f32.mrb[1].mxu0  ;;  %v594_v24 = vpop.f32.mrb[1].mxu1 }
  0xf0   : > { %v643_v28 = vadd.f32 %v1000_v14, %v578_v23  ;;  %v647_v29 = vadd.f32 %v1000_v14, %v594_v24  ;;  %v1093_v30 = vpop.f32.mrb[2].mxu0  ;;  %v1097_v31 = vpop.f32.mrb[2].mxu1 }
  0xf1   : > { %v1278_v34 = vadd.f32 %v1035_v15, %v645_v21  ;;  %v1280_v35 = vadd.f32 %v1043_v16, %v649_v22  ;;  %v646_v36 = vadd.f32 %v1093_v30, %v1000_v14  ;;  %v650_v37 = vadd.f32 %v1097_v31, %v1000_v14  ;;  %v581_v38 = vpop.f32.mrb[3].mxu0  ;;  %v597_v39 = vpop.f32.mrb[3].mxu1 }
  0xf2   : > { %v1285_v41 = vadd.f32 %v1031_v19, %v643_v28  ;;  %v1287_v42 = vadd.f32 %v1039_v20, %v647_v29  ;;  %v644_v43 = vadd.f32 %v1000_v14, %v581_v38  ;;  %v648_v44 = vadd.f32 %v1000_v14, %v597_v39 }
  0xf3   : > { %v684_v45 = vmul.f32 %v1001_v27, %v1278_v34  ;;  %v688_v46 = vmul.f32 %v1001_v27, %v1280_v35  ;;  %v1291_v47 = vadd.f32 %v1036_v25, %v646_v36  ;;  %v1293_v48 = vadd.f32 %v1044_v26, %v650_v37 }
  0xf4   : > { %v682_v49 = vmul.f32 %v1001_v27, %v1285_v41  ;;  %v686_v50 = vmul.f32 %v1001_v27, %v1287_v42  ;;  %v1297_v51 = vadd.f32 %v1032_v32, %v644_v43  ;;  %v1299_v52 = vadd.f32 %v1040_v33, %v648_v44 }
  0xf5   : > { %v699_v53 = vadd.f32 %v1002_v40, %v684_v45  ;;  %v1301_v54 = vadd.f32 %v1002_v40, %v688_v46  ;;  %v685_v55 = vmul.f32 %v1001_v27, %v1291_v47  ;;  %v689_v56 = vmul.f32 %v1001_v27, %v1293_v48 }
  0xf6   : > { %v1305_v57 = vadd.f32 %v1002_v40, %v682_v49  ;;  %v1307_v58 = vadd.f32 %v1002_v40, %v686_v50  ;;  %v683_v59 = vmul.f32 %v1001_v27, %v1297_v51  ;;  %v687_v60 = vmul.f32 %v1001_v27, %v1299_v52 }
  0xf7   : > { %v715_v61 = vmin.f32 %v699_v53, 0.0  ;;  %v719_v62 = vmin.f32 %v1301_v54, 0.0  ;;  %v700_v4 = vadd.f32 %v1002_v40, %v685_v55  ;;  %v704_v5 = vadd.f32 %v1002_v40, %v689_v56 }
  0xf8   : > { %v713_v0 = vmin.f32 %v1305_v57, 0.0  ;;  %v717_v1 = vmin.f32 %v1307_v58, 0.0  ;;  %v698_v9 = vadd.f32 %v1002_v40, %v683_v59  ;;  %v1317_v10 = vadd.f32 %v1002_v40, %v687_v60 }
  0xf9   : > { %v725_v2 = vmul.f32 1.442695, %v715_v61  ;;  %v733_v3 = vmul.f32 1.442695, %v719_v62  ;;  %v716_v11 = vmin.f32 %v700_v4, 0.0  ;;  %v720_v13 = vmin.f32 %v704_v5, 0.0 }
  0xfa   : > { %v721_v7 = vmul.f32 1.442695, %v713_v0  ;;  %v729_v8 = vmul.f32 1.442695, %v717_v1  ;;  %v714_v14 = vmin.f32 %v698_v9, 0.0  ;;  %v718_v16 = vmin.f32 %v1317_v10, 0.0 }
  0xfb   : > { %1144 = vpow2.f32 %v725_v2  ;;  %v727_v15 = vmul.f32 1.442695, %v716_v11  ;;  %v735_v17 = vmul.f32 1.442695, %v720_v13  ;;  %v758_v20 = vsub.s32 0, %v757_v12 }
  0xfc   : > { %1146 = vpow2.f32 %v733_v3  ;;  %v723_v18 = vmul.f32 1.442695, %v714_v14  ;;  %v731_v19 = vmul.f32 1.442695, %v718_v16  ;;  %v1184_v21 = vmov 0  }
  0xfd   : > { %1148 = vpow2.f32 %v721_v7  ;;  %v755_v22 = vsel %vm754_vm2, 1, %v1184_v21  ;;  %vm707_vm3 = vcmp.gt.f32.partialorder %v699_v53, 0.0  ;;  %vm711_vm5 = vcmp.gt.f32.partialorder %v1301_v54, 0.0 }
  0xfe   : > { %1150 = vpow2.f32 %v729_v8  ;;  %v759_v23 = vrot.slane %v755_v22, %v758_v20  ;;  %vm705_vm6 = vcmp.gt.f32.partialorder %v1305_v57, 0.0  ;;  %vm709_vm7 = vcmp.gt.f32.partialorder %v1307_v58, 0.0 }
  0xff   : > { %1152 = vpow2.f32 %v727_v15  ;;  %vm708_vm8 = vcmp.gt.f32.partialorder %v700_v4, 0.0  ;;  %vm712_vm9 = vcmp.gt.f32.partialorder %v704_v5, 0.0  ;;  %vm706_vm10 = vcmp.gt.f32.partialorder %v698_v9, 0.0 }
 0x100   : > { %1154 = vpow2.f32 %v735_v17  ;;  %vm760_vm4 = vcmp.eq.s32.totalorder %v759_v23, 1  ;;  %vm710_vm11 = vcmp.gt.f32.partialorder %v1317_v10, 0.0 }
 0x101   : > { %1156 = vpow2.f32 %v723_v18 }
 0x102   : > { %1158 = vpow2.f32 %v731_v19 }
 0x105   : > { %v1145_v24 = vpop.eup %1144 }
 0x106   : > { %v1147_v25 = vpop.eup %1146  ;;  %v1005_v26 = vadd.f32 -1.0, %v1145_v24 }
 0x107   : > { %v1149_v27 = vpop.eup %1148  ;;  %v1009_v28 = vadd.f32 -1.0, %v1147_v25 }
 0x108   : > { %v1151_v29 = vpop.eup %1150  ;;  %v1003_v30 = vadd.f32 -1.0, %v1149_v27  ;;  %v747_v32 = vsel %vm707_vm3, %v699_v53, %v1005_v26 }
 0x109   : > { %v1153_v31 = vpop.eup %1152  ;;  %v1007_v33 = vadd.f32 -1.0, %v1151_v29  ;;  %v751_v39 = vsel %vm711_vm5, %v1301_v54, %v1009_v28  ;;  %v763_v44 = vsel %vm760_vm4, %v747_v32, %v1278_v34 }
 0x10a   : > { %v1155_v36 = vpop.eup %1154  ;;  %v1006_v37 = vadd.f32 -1.0, %v1153_v31  ;;  %v745_v45 = vsel %vm705_vm6, %v1305_v57, %v1003_v30  ;;  %v767_v56 = vsel %vm760_vm4, %v751_v39, %v1280_v35 }
 0x10b   : > { %v1157_v38 = vpop.eup %1156  ;;  %v1010_v40 = vadd.f32 -1.0, %v1155_v36  ;;  %v749_v50 = vsel %vm709_vm7, %v1307_v58, %v1007_v33  ;;  %v761_v58 = vsel %vm760_vm4, %v745_v45, %v1285_v41 }
 0x10c   : > { %v1159_v43 = vpop.eup %1158  ;;  %v748_v46 = vsel %vm708_vm8, %v700_v4, %v1006_v37  ;;  %v1004_v49 = vadd.f32 -1.0, %v1157_v38  ;;  %v765_v62 = vsel %vm760_vm4, %v749_v50, %v1287_v42 }
 0x10d   : > { %v764_v53 = vsel %vm760_vm4, %v748_v46, %v1291_v47  ;;  %v752_v54 = vsel %vm712_vm9, %v704_v5, %v1010_v40  ;;  %v1008_v55 = vadd.f32 -1.0, %v1159_v43 }
 0x10e   : > { %v1053_v59 = vpack.c.bf16 %v764_v53, %v763_v44  ;;  %v768_v34 = vsel %vm760_vm4, %v752_v54, %v1293_v48  ;;  %v746_v57 = vsel %vm706_vm10, %v698_v9, %v1004_v49 }
 0x10f   : > { %v1063_v60 = vpack.c.bf16 %v768_v34, %v767_v56  ;;  %v762_v61 = vsel %vm760_vm4, %v746_v57, %v1297_v51  ;;  %v750_v47 = vsel %vm710_vm11, %v1317_v10, %v1008_v55 }
 0x110   : > { %1068 = vst [vmem:[%s440_s14 + $0x8] sm:$0xff] %v1053_v59   ;;  %v1048_v35 = vpack.c.bf16 %v762_v61, %v761_v58  ;;  %v766_v48 = vsel %vm760_vm4, %v750_v47, %v1299_v52 }
 0x111   : > { %1070 = vst [vmem:[%s440_s14 + $0x18] sm:$0xff] %v1063_v60   ;;  %v1058_v63 = vpack.c.bf16 %v766_v48, %v765_v62 }
 0x112   : > { %1049 = vst [vmem:[%s440_s14] sm:$0xff] %v1048_v35  }
 0x113   : > { %1069 = vst [vmem:[%s440_s14 + $0x10] sm:$0xff] %v1058_v63  }
 0x114 PF: > { %s17_s26 = sadd.s32 1, %s1182_s26   ;;  %s1367_s24 = smov %s1178_s25 }
 0x115   : > { %p14_p5 = scmp.ge.s32.totalorder %s17_s26, 4   ;;  %s1368_s25 = smov %s1370_s27 }
 0x117   :  { %16 = sbr.rel (!%p14_p5) target bundleno = 2 (0x2), region = 104 }

// kernel: _lambda_.22
= control target key start
LH: loop header
LB: loop body
LE: loop exit
PB: predicated region body
PF: predicated region fallthrough
CT: control target
= control target key end

     0   :  { %s757_s15 = smov 0   ;;  %s759_s16 = smov 0   ;;  %s827_s0 = inlined_call_operand.vmem [shape: bf16[32,144], index: 0, kind: input, shape index: {}]   ;;  %s828_s1 = inlined_call_operand.vmem [shape: bf16[144,128], index: 1, kind: input, shape index: {}]   ;;  %s829_s2 = inlined_call_operand.vmem [shape: f32[1,128], index: 2, kind: input, shape index: {}]   ;;  %s830_s3 = inlined_call_operand.vmem [shape: bf16[32,128], index: 3, kind: input, shape index: {}]   ;;  %s831_s4 = inlined_call_operand.vmem [shape: bf16[32,128], index: 4, kind: output, shape index: {}]  }
   0x1   :  { %s761_s17 = smov 0  }
   0x2 LB: > { %s33_s18 = sadd.s32 1, %s725_s16  ;;  %p633_p0 = scmp.ge.s32.totalorder %s729_s17, 1  ;;  %s729_s17 = sphi %s761_s17, %s14_s17   ;;  %s725_s16 = sphi %s759_s16, %s833_s16   ;;  %s721_s15 = sphi %s757_s15, %s832_s15  }
   0x3   : > { %p35_p1 = scmp.ge.s32.totalorder %s33_s18, 2  ;;  %p232_p2 = scmp.lt.s32.totalorder %s729_s17, 3 }
   0x5   : > { %s835_s18 = smov (%p35_p1, %s33_s18), 0  ;;  %p233_p3 = pnand %p633_p0, %p232_p2 }
   0x6   : > { %v695_v0 = vld [vmem:[%s828_s1] sm:$0xff] (!%p233_p3)   ;;  %v731_v1 = vmov (!%p233_p3), 0   ;;  %s634_s21 = sshll.u32 (!%p233_p3), %s721_s15, 1  ;;  %v696_v2 = vld [vmem:[%s828_s1 + $0x8] sm:$0xff] (!%p233_p3)   ;;  %v697_v3 = vld [vmem:[%s828_s1 + $0x10] sm:$0xff] (!%p233_p3)   ;;  %vm419_vm0 = vcmask (!%p233_p3), 130048  }
   0x7   : > { %236 = sbr.rel (%p233_p3) target bundleno = 264 (0x108), region = 36  ;;  %423 = vmatprep.subr.bf16.mxu0 (!%p233_p3), %v731_v1  ;;  %p287_p4 = scmp.lt.s32.totalorder (!%p233_p3), %s634_s21, 3  ;;  %v698_v4 = vld [vmem:[%s828_s1 + $0x18] sm:$0xff] (!%p233_p3)   ;;  %v699_v6 = vld [vmem:[%s828_s1 + $0x20] sm:$0xff] (!%p233_p3)   ;;  %v700_v7 = vld [vmem:[%s828_s1 + $0x28] sm:$0xff] (!%p233_p3)  }
   0x8   : > { %424 = vmatpush1.bf16.msra.mxu0 (!%p233_p3), %v695_v0  ;;  %v701_v8 = vld [vmem:[%s828_s1 + $0x30] sm:$0xff] (!%p233_p3)   ;;  %v702_v9 = vld [vmem:[%s828_s1 + $0x38] sm:$0xff] (!%p233_p3)   ;;  %v703_v10 = vld [vmem:[%s828_s1 + $0x40] sm:$0xff] (!%p233_p3)  }
   0x9   : > { %425 = vmatprep.subr.bf16.mxu0 (!%p233_p3), %v731_v1  ;;  %v653_v13 = vld [vmem:[%s829_s2] ss:$0 sm:$0xff] (!%p233_p3) }
   0xc   : > { %426 = vmatpush1.bf16.msra.mxu0 (!%p233_p3), %v696_v2 }
   0xd   : > { %427 = vmatprep.subr.bf16.mxu0 (!%p233_p3), %v731_v1 }
   0xe   : > { %s837_s21 = smov (!%p287_p4, %s634_s21), 3 }
   0xf   : > { %s658_s26 = sshll.u32 %s837_s21, 3  ;;  %s638_s19 = sshll.u32 %s837_s21, 2 }
  0x10   : > { %s294_s29 = scalar_lea.vmem %s827_s0, %s658_s26  ;;  %428 = vmatpush1.bf16.msra.mxu0 %v697_v3  ;;  %s316_s23 = scalar_lea.vmem %s830_s3, %s638_s19 }
  0x11   : > { %v706_v5 = vld [vmem:[%s294_s29 + $0x4] ss:$8 sps:$4 sm:$0xff]   ;;  %429 = vmatprep.subr.bf16.mxu0 %v731_v1  ;;  %v704_v11 = vld [vmem:[%s294_s29] ss:$8 sps:$4 sm:$0xff]   ;;  %s325_s27 = scalar_lea.vmem %s831_s4, %s638_s19 }
  0x12   : > { %652 = vmatprep.mubr.msk.bf16.mxu0 %vm419_vm0, %v706_v5  ;;  %v662_v12 = vld [vmem:[%s316_s23] sm:$0xff]  }
  0x13   : > { %v663_v14 = vunpack.c.l.bf16 %v662_v12  ;;  %v664_v18 = vunpack.c.h.bf16 %v662_v12 }
  0x14   : > { %430 = vmatpush1.bf16.msra.mxu0 %v698_v4 }
  0x15   : > { %431 = vmatprep.subr.bf16.mxu0 %v731_v1 }
  0x18   : > { %432 = vmatpush1.bf16.msra.mxu0 %v699_v6 }
  0x19   : > { %433 = vmatprep.subr.bf16.mxu0 %v731_v1 }
  0x1c   : > { %434 = vmatpush1.bf16.msra.mxu0 %v700_v7 }
  0x1d   : > { %435 = vmatprep.subr.bf16.mxu0 %v731_v1 }
  0x20   : > { %436 = vmatpush1.bf16.msra.mxu0 %v701_v8 }
  0x21   : > { %437 = vmatprep.subr.bf16.mxu0 %v731_v1 }
  0x24   : > { %438 = vmatpush1.bf16.msra.mxu0 %v702_v9 }
  0x25   : > { %439 = vmatprep.subr.bf16.mxu0 %v731_v1 }
  0x28   : > { %440 = vmatpush1.bf16.msra.mxu0 %v703_v10 }
  0x2b   : > { %456 = vmatmul.mubr.bf16.vlgmr.msra.gmra.mrb[0].mxu0 %v704_v11 }
  0xfe   : > { %v457_v15 = vpop.f32.mrb[0].mxu0 }
  0xff   : > { %v480_v16 = vadd.f32 %v653_v13, %v457_v15  ;;  %v459_v17 = vpop.f32.mrb[1].mxu0 }
 0x100   : > { %v460_v19 = vpop.f32.mrb[2].mxu0 }
 0x101   : > { %v486_v20 = vadd.f32 %v663_v14, %v480_v16  ;;  %v481_v21 = vadd.f32 %v653_v13, %v460_v19  ;;  %v462_v22 = vpop.f32.mrb[3].mxu0 }
 0x103   : > { %v487_v23 = vadd.f32 %v664_v18, %v481_v21 }
 0x105   : > { %v668_v24 = vpack.c.bf16 %v487_v23, %v486_v20 }
 0x107   : > { %669 = vst [vmem:[%s325_s27] sm:$0xff] %v668_v24  }
 0x108 PF: > { %s14_s17 = sadd.s32 1, %s729_s17   ;;  %s832_s15 = smov %s725_s16 }
 0x109   : > { %p11_p5 = scmp.ge.s32.totalorder %s14_s17, 4   ;;  %s833_s16 = smov %s835_s18 }
 0x10b   :  { %13 = sbr.rel (!%p11_p5) target bundleno = 2 (0x2), region = 83 }

// kernel: _lambda_.23
= control target key start
LH: loop header
LB: loop body
LE: loop exit
PB: predicated region body
PF: predicated region fallthrough
CT: control target
= control target key end

     0   :  { %vm84_vm3 = vcmask 257024   ;;  %s168_s0 = inlined_call_operand.vmem [shape: bf16[32,32], index: 0, kind: input, shape index: {}]   ;;  %s169_s1 = inlined_call_operand.vmem [shape: f32[1,32], index: 1, kind: input, shape index: {}]   ;;  %s170_s2 = inlined_call_operand.vmem [shape: f32[1,32], index: 2, kind: input, shape index: {}]   ;;  %s171_s3 = inlined_call_operand.vmem [shape: bf16[32,32], index: 3, kind: output, shape index: {}]  }
   0x1   :  { %v108_v0 = vld [vmem:[%s168_s0] sm:$0xff]   ;;  %v115_v4 = vld [vmem:[%s168_s0 + $0x8] sm:$0xff]  }
   0x2   :  { %v93_v1 = vld [vmem:[%s169_s1] ss:$0 sm:$0xff]  ;;  %v109_v2 = vunpack.c.l.bf16 %v108_v0  ;;  %v110_v3 = vunpack.c.h.bf16 %v108_v0  ;;  %v113_v6 = vunpack.c.l.bf16 %v115_v4  ;;  %v114_v7 = vunpack.c.h.bf16 %v115_v4 }
   0x3   :  { %v94_v5 = vld [vmem:[%s170_s2] ss:$0 sm:$0xff] }
   0x4   :  { %v29_v8 = vmul.f32 %v109_v2, %v93_v1  ;;  %v30_v9 = vmul.f32 %v110_v3, %v93_v1  ;;  %v31_v10 = vmul.f32 %v113_v6, %v93_v1  ;;  %v32_v11 = vmul.f32 %v114_v7, %v93_v1 }
   0x6   :  { %v40_v12 = vadd.f32 %v94_v5, %v29_v8  ;;  %v41_v13 = vadd.f32 %v94_v5, %v30_v9  ;;  %v42_v14 = vadd.f32 %v94_v5, %v31_v10  ;;  %v43_v15 = vadd.f32 %v94_v5, %v32_v11 }
   0x8   :  { %v48_v16 = vmin.f32 %v40_v12, 0.0  ;;  %v49_v17 = vmin.f32 %v41_v13, 0.0  ;;  %v50_v18 = vmin.f32 %v42_v14, 0.0  ;;  %v51_v19 = vmin.f32 %v43_v15, 0.0 }
   0x9   :  { %vm44_vm0 = vcmp.gt.f32.partialorder %v40_v12, 0.0  ;;  %vm45_vm1 = vcmp.gt.f32.partialorder %v41_v13, 0.0  ;;  %vm46_vm2 = vcmp.gt.f32.partialorder %v42_v14, 0.0  ;;  %vm47_vm4 = vcmp.gt.f32.partialorder %v43_v15, 0.0 }
   0xa   :  { %v52_v20 = vmul.f32 1.442695, %v48_v16  ;;  %v54_v21 = vmul.f32 1.442695, %v49_v17  ;;  %v56_v22 = vmul.f32 1.442695, %v50_v18 }
   0xb   :  { %v58_v23 = vmul.f32 1.442695, %v51_v19 }
   0xc   :  { %116 = vpow2.f32 %v52_v20 }
   0xd   :  { %118 = vpow2.f32 %v54_v21 }
   0xe   :  { %120 = vpow2.f32 %v56_v22 }
   0xf   :  { %122 = vpow2.f32 %v58_v23 }
  0x16   :  { %v117_v24 = vpop.eup %116 }
  0x17   :  { %v119_v25 = vpop.eup %118  ;;  %v95_v26 = vadd.f32 -1.0, %v117_v24 }
  0x18   :  { %v121_v27 = vpop.eup %120  ;;  %v96_v28 = vadd.f32 -1.0, %v119_v25 }
  0x19   :  { %v123_v29 = vpop.eup %122  ;;  %v64_v30 = vsel %vm44_vm0, %v40_v12, %v95_v26  ;;  %v97_v31 = vadd.f32 -1.0, %v121_v27 }
  0x1a   :  { %v103_v32 = vpack.c.bf16 %v64_v30, %v64_v30  ;;  %v65_v33 = vsel %vm45_vm1, %v41_v13, %v96_v28  ;;  %v98_v34 = vadd.f32 -1.0, %v123_v29 }
  0x1b   :  { %v104_v35 = vpack.c.bf16 %v65_v33, %v65_v33  ;;  %v66_v36 = vsel %vm46_vm2, %v42_v14, %v97_v31 }
  0x1c   :  { %85 = vst.msk [vmem:[%s171_s3] sm:$0xf] %vm84_vm3, %v103_v32  ;;  %v105_v37 = vpack.c.bf16 %v66_v36, %v66_v36  ;;  %v67_v38 = vsel %vm47_vm4, %v43_v15, %v98_v34 }
  0x1d   :  { %86 = vst.msk [vmem:[%s171_s3 + $0x4] sm:$0xf] %vm84_vm3, %v104_v35  ;;  %v106_v39 = vpack.c.bf16 %v67_v38, %v67_v38 }
  0x1e   :  { %87 = vst.msk [vmem:[%s171_s3 + $0x8] sm:$0xf] %vm84_vm3, %v105_v37 }
  0x1f   :  { %88 = vst.msk [vmem:[%s171_s3 + $0xc] sm:$0xf] %vm84_vm3, %v106_v39 }

// kernel: _lambda_.27
= control target key start
LH: loop header
LB: loop body
LE: loop exit
PB: predicated region body
PF: predicated region fallthrough
CT: control target
= control target key end

     0   :  { %s575_s12 = smov 0   ;;  %s577_s13 = smov 0   ;;  %s614_s0 = inlined_call_operand.vmem [shape: bf16[32,16], index: 0, kind: input, shape index: {}]   ;;  %s615_s1 = inlined_call_operand.vmem [shape: bf16[16,128], index: 1, kind: input, shape index: {}]   ;;  %s616_s2 = inlined_call_operand.vmem [shape: f32[1,128], index: 2, kind: input, shape index: {}]   ;;  %s617_s3 = inlined_call_operand.vmem [shape: bf16[32,128], index: 3, kind: output, shape index: {}]  }
   0x1   :  { %s579_s14 = smov 0  }
   0x2 LB: > { %s32_s15 = sadd.s32 1, %s547_s13  ;;  %p473_p0 = scmp.ge.s32.totalorder %s551_s14, 1  ;;  %s551_s14 = sphi %s579_s14, %s13_s14   ;;  %s547_s13 = sphi %s577_s13, %s619_s13   ;;  %s543_s12 = sphi %s575_s12, %s618_s12  }
   0x3   : > { %p34_p1 = scmp.ge.s32.totalorder %s32_s15, 2  ;;  %p188_p2 = scmp.lt.s32.totalorder %s551_s14, 3 }
   0x5   : > { %s621_s15 = smov (%p34_p1, %s32_s15), 0  ;;  %p189_p3 = pnand %p473_p0, %p188_p2 }
   0x6   : > { %v527_v0 = vld [vmem:[%s615_s1] sm:$0xff] (!%p189_p3)   ;;  %v553_v1 = vmov (!%p189_p3), 0.0   ;;  %s474_s18 = sshll.u32 (!%p189_p3), %s543_s12, 1  ;;  %vm554_vm0 = vmmov (!%p189_p3), 0   ;;  %vm283_vm1 = vcmask (!%p189_p3), 130048  }
   0x7   : > { %192 = sbr.rel (%p189_p3) target bundleno = 237 (0xed), region = 32  ;;  %495 = vmatprep.subr.bf16.mxu0 (!%p189_p3), %v553_v1  ;;  %497 = vmatprep.mubr.msk.bf16.mxu0 (!%p189_p3), %vm554_vm0, %v553_v1  ;;  %p230_p4 = scmp.lt.s32.totalorder (!%p189_p3), %s474_s18, 3  ;;  %v481_v4 = vld [vmem:[%s616_s2] ss:$0 sm:$0xff] (!%p189_p3) }
   0x8   : > { %496 = vmatpush3.bf16.msra.mxu0 (!%p189_p3), %v527_v0 }
   0xe   : > { %s623_s18 = smov (!%p230_p4, %s474_s18), 3 }
   0xf   : > { %s475_s19 = sshll.u32 %s623_s18, 2 }
  0x10   : > { %s236_s22 = scalar_lea.vmem %s614_s0, %s475_s19  ;;  %s257_s27 = scalar_lea.vmem %s617_s3, %s475_s19 }
  0x11   : > { %v528_v2 = vld [vmem:[%s236_s22] sm:$0xff]  }
  0x12   : > { %498 = vmatmul.mubr.msk.bf16.vlgmr.msra.gmra.mrb[0].mxu0 %vm283_vm1, %v528_v2 }
  0xe5   : > { %v321_v3 = vpop.f32.mrb[0].mxu0 }
  0xe6   : > { %v499_v5 = vpop.f32.mrb[1].mxu0  ;;  %v344_v7 = vadd.f32 %v481_v4, %v321_v3 }
  0xe7   : > { %v324_v6 = vpop.f32.mrb[2].mxu0 }
  0xe8   : > { %v345_v8 = vadd.f32 %v481_v4, %v324_v6  ;;  %v500_v9 = vpop.f32.mrb[3].mxu0 }
  0xea   : > { %v491_v10 = vpack.c.bf16 %v345_v8, %v344_v7 }
  0xec   : > { %492 = vst [vmem:[%s257_s27] sm:$0xff] %v491_v10  }
  0xed PF: > { %s13_s14 = sadd.s32 1, %s551_s14   ;;  %s618_s12 = smov %s547_s13 }
  0xee   : > { %p10_p5 = scmp.ge.s32.totalorder %s13_s14, 4   ;;  %s619_s13 = smov %s621_s15 }
  0xf0   :  { %12 = sbr.rel (!%p10_p5) target bundleno = 2 (0x2), region = 76 }

// kernel: _lambda_.24
= control target key start
LH: loop header
LB: loop body
LE: loop exit
PB: predicated region body
PF: predicated region fallthrough
CT: control target
= control target key end

     0   :  { %s1067_s21 = smov 0   ;;  %s1069_s22 = smov 0   ;;  %s1170_s0 = inlined_call_operand.vmem [shape: bf16[32,288], index: 0, kind: input, shape index: {}]   ;;  %s1171_s1 = inlined_call_operand.vmem [shape: bf16[288,128], index: 1, kind: input, shape index: {}]   ;;  %s1172_s2 = inlined_call_operand.vmem [shape: f32[1,128], index: 2, kind: input, shape index: {}]   ;;  %s1173_s3 = inlined_call_operand.vmem [shape: f32[1,128], index: 3, kind: input, shape index: {}]   ;;  %s1174_s4 = inlined_call_operand.vmem [shape: f32[1,128], index: 4, kind: input, shape index: {}]   ;;  %s1175_s5 = inlined_call_operand.vmem [shape: f32[1,128], index: 5, kind: input, shape index: {}]   ;;  %s1176_s6 = inlined_call_operand.vmem [shape: bf16[32,128], index: 6, kind: output, shape index: {}]  }
   0x1   :  { %s1071_s23 = smov 0  }
   0x2 LB: > { %s35_s24 = sadd.s32 1, %s1023_s22  ;;  %p875_p0 = scmp.ge.s32.totalorder %s1027_s23, 1  ;;  %s1027_s23 = sphi %s1071_s23, %s16_s23   ;;  %s1023_s22 = sphi %s1069_s22, %s1178_s22   ;;  %s1019_s21 = sphi %s1067_s21, %s1177_s21  }
   0x3   : > { %p37_p1 = scmp.ge.s32.totalorder %s35_s24, 2  ;;  %p290_p2 = scmp.lt.s32.totalorder %s1027_s23, 3 }
   0x5   : > { %s1180_s24 = smov (%p37_p1, %s35_s24), 0  ;;  %p291_p3 = pnand %p875_p0, %p290_p2 }
   0x6   : > { %v979_v0 = vld [vmem:[%s1171_s1 + $0x40] sm:$0xff] (!%p291_p3)   ;;  %v1029_v2 = vmov (!%p291_p3), 0.0   ;;  %s876_s29 = sshll.u32 (!%p291_p3), %s1019_s21, 1  ;;  %v981_v3 = vld [vmem:[%s1171_s1 + $0x48] sm:$0xff] (!%p291_p3)   ;;  %v983_v5 = vld [vmem:[%s1171_s1 + $0x50] sm:$0xff] (!%p291_p3)   ;;  %vm1030_vm0 = vmmov (!%p291_p3), 0   ;;  %v699_v44 = vlaneseq (!%p291_p3) }
   0x7   : > { %294 = sbr.rel (%p291_p3) target bundleno = 286 (0x11e), region = 44  ;;  %v980_v1 = vld [vmem:[%s1171_s1] sm:$0xff] (!%p291_p3)   ;;  %943 = vmatprep.subr.bf16.mxu1 (!%p291_p3), %v1029_v2  ;;  %918 = vmatprep.subr.bf16.mxu0 (!%p291_p3), %v979_v0  ;;  %v982_v4 = vld [vmem:[%s1171_s1 + $0x8] sm:$0xff] (!%p291_p3)   ;;  %p350_p4 = scmp.lt.s32.totalorder (!%p291_p3), %s876_s29, 3  ;;  %v984_v6 = vld [vmem:[%s1171_s1 + $0x10] sm:$0xff] (!%p291_p3)   ;;  %vm562_vm1 = vcmask (!%p291_p3), 261120  }
   0x8   : > { %919 = vmatpush3.bf16.msra.mxu0 (!%p291_p3), %v980_v1  ;;  %947 = vmatprep.mubr.msk.bf16.mxu1 (!%p291_p3), %vm1030_vm0, %v1029_v2  ;;  %v985_v7 = vld [vmem:[%s1171_s1 + $0x58] sm:$0xff] (!%p291_p3)   ;;  %v987_v9 = vld [vmem:[%s1171_s1 + $0x60] sm:$0xff] (!%p291_p3)   ;;  %v989_v12 = vld [vmem:[%s1171_s1 + $0x68] sm:$0xff] (!%p291_p3)   ;;  %v700_v49 = vshrl.u32 (!%p291_p3), %v699_v44, 7  ;;  %v1031_v51 = vmov (!%p291_p3), 0  }
   0x9   : > { %920 = vmatprep.subr.bf16.mxu0 (!%p291_p3), %v981_v3  ;;  %v986_v8 = vld [vmem:[%s1171_s1 + $0x18] sm:$0xff] (!%p291_p3)   ;;  %v993_v10 = vld [vmem:[%s1171_s1 + $0x80] sm:$0xff] (!%p291_p3)   ;;  %v996_v13 = vld [vmem:[%s1171_s1 + $0x88] sm:$0xff] (!%p291_p3)  }
   0xa   : > { %v988_v11 = vld [vmem:[%s1171_s1 + $0x20] sm:$0xff] (!%p291_p3)   ;;  %944 = vmatpush3.bf16.msra.mxu1 (!%p291_p3), %v993_v10  ;;  %v990_v14 = vld [vmem:[%s1171_s1 + $0x28] sm:$0xff] (!%p291_p3)   ;;  %v991_v16 = vld [vmem:[%s1171_s1 + $0x70] sm:$0xff] (!%p291_p3)   ;;  %v701_v50 = vsub.s32 (!%p291_p3), 0, %v700_v49 }
   0xb   : > { %945 = vmatprep.subr.bf16.mxu1 (!%p291_p3), %v1029_v2  ;;  %v992_v18 = vld [vmem:[%s1171_s1 + $0x30] sm:$0xff] (!%p291_p3)   ;;  %v994_v19 = vld [vmem:[%s1171_s1 + $0x78] sm:$0xff] (!%p291_p3)   ;;  %v902_v30 = vld [vmem:[%s1172_s2] ss:$0 sm:$0xff] (!%p291_p3) }
   0xc   : > { %921 = vmatpush3.bf16.msra.mxu0 (!%p291_p3), %v982_v4  ;;  %v995_v20 = vld [vmem:[%s1171_s1 + $0x38] sm:$0xff] (!%p291_p3)   ;;  %v903_v34 = vld [vmem:[%s1173_s3] ss:$0 sm:$0xff] (!%p291_p3) }
   0xd   : > { %922 = vmatprep.subr.bf16.mxu0 (!%p291_p3), %v983_v5  ;;  %v904_v37 = vld [vmem:[%s1174_s4] ss:$0 sm:$0xff] (!%p291_p3) }
   0xe   : > { %s1182_s29 = smov (!%p350_p4, %s876_s29), 3  ;;  %946 = vmatpush3.bf16.msra.mxu1 %v996_v13  ;;  %v696_v47 = vld [vmem:[%s1175_s5] sm:$0x1] }
   0xf   : > { %s951_s20 = smul.u32 12, %s1182_s29  ;;  %vm697_vm2 = vcmp.gt.f32.partialorder %v696_v47, 0.5  ;;  %s879_s10 = sshll.u32 %s1182_s29, 2 }
  0x10   : > { %923 = vmatpush3.bf16.msra.mxu0 %v984_v6  ;;  %v698_v52 = vsel %vm697_vm2, 1, %v1031_v51  ;;  %s388_s13 = scalar_lea.vmem %s1176_s6, %s879_s10 }
  0x11   : > { %924 = vmatprep.subr.bf16.mxu0 %v985_v7  ;;  %s357_s9 = scalar_lea.vmem %s1170_s0, %s951_s20  ;;  %v702_v53 = vrot.slane %v698_v52, %v701_v50 }
  0x12   : > { %v999_v15 = vld [vmem:[%s357_s9 + $0x4] ss:$12 sps:$4 sm:$0xff]   ;;  %v1000_v17 = vld [vmem:[%s357_s9 + $0x8] ss:$12 sps:$4 sm:$0xff]   ;;  %v997_v21 = vld [vmem:[%s357_s9] ss:$12 sps:$4 sm:$0xff]  }
  0x13   : > { %598 = vmatprep.mubr.bf16.mxu0 %v999_v15  ;;  %948 = vmatmul.mubr.msk.bf16.vlgmr.msra.gmra.mrb[0].mxu1 %vm562_vm1, %v1000_v17  ;;  %vm703_vm4 = vcmp.eq.s32.totalorder %v702_v53, 1 }
  0x14   : > { %925 = vmatpush3.bf16.msra.mxu0 %v986_v8 }
  0x15   : > { %926 = vmatprep.subr.bf16.mxu0 %v987_v9 }
  0x18   : > { %927 = vmatpush3.bf16.msra.mxu0 %v988_v11 }
  0x19   : > { %928 = vmatprep.subr.bf16.mxu0 %v989_v12 }
  0x1c   : > { %929 = vmatpush3.bf16.msra.mxu0 %v990_v14 }
  0x1d   : > { %930 = vmatprep.subr.bf16.mxu0 %v991_v16 }
  0x20   : > { %931 = vmatpush3.bf16.msra.mxu0 %v992_v18 }
  0x21   : > { %932 = vmatprep.subr.bf16.mxu0 %v994_v19 }
  0x24   : > { %933 = vmatpush3.bf16.msra.mxu0 %v995_v20 }
  0x27   : > { %599 = vmatmul.mubr.bf16.vlgmr.msra.gmra.mrb[0].mxu0 %v997_v21 }
  0xe6   : > { %v641_v22 = vpop.f32.mrb[0].mxu1 }
  0xe7   : > { %v949_v23 = vpop.f32.mrb[1].mxu1 }
  0xe8   : > { %v644_v24 = vpop.f32.mrb[2].mxu1 }
  0xe9   : > { %v950_v25 = vpop.f32.mrb[3].mxu1 }
  0xfa   : > { %v934_v26 = vpop.f32.mrb[0].mxu0 }
  0xfb   : > { %v935_v27 = vpop.f32.mrb[1].mxu0 }
  0xfc   : > { %v936_v28 = vadd.f32 %v935_v27, %v934_v26  ;;  %v937_v29 = vpop.f32.mrb[2].mxu0 }
  0xfd   : > { %v938_v31 = vpop.f32.mrb[3].mxu0 }
  0xfe   : > { %v642_v32 = vadd.f32 %v936_v28, %v641_v22  ;;  %v939_v33 = vadd.f32 %v938_v31, %v937_v29 }
 0x100   : > { %v664_v35 = vadd.f32 %v902_v30, %v642_v32  ;;  %v645_v36 = vadd.f32 %v939_v33, %v644_v24 }
 0x102   : > { %v673_v38 = vmul.f32 %v903_v34, %v664_v35  ;;  %v665_v39 = vadd.f32 %v902_v30, %v645_v36 }
 0x104   : > { %v682_v40 = vadd.f32 %v904_v37, %v673_v38  ;;  %v674_v41 = vmul.f32 %v903_v34, %v665_v39 }
 0x106   : > { %v686_v42 = vmin.f32 %v682_v40, 0.0  ;;  %v683_v43 = vadd.f32 %v904_v37, %v674_v41  ;;  %vm684_vm3 = vcmp.gt.f32.partialorder %v682_v40, 0.0 }
 0x108   : > { %v688_v45 = vmul.f32 1.442695, %v686_v42  ;;  %v687_v46 = vmin.f32 %v683_v43, 0.0  ;;  %vm685_vm5 = vcmp.gt.f32.partialorder %v683_v43, 0.0 }
 0x10a   : > { %1001 = vpow2.f32 %v688_v45  ;;  %v690_v48 = vmul.f32 1.442695, %v687_v46 }
 0x10c   : > { %1003 = vpow2.f32 %v690_v48 }
 0x114   : > { %v1002_v54 = vpop.eup %1001 }
 0x115   : > { %v905_v55 = vadd.f32 -1.0, %v1002_v54 }
 0x116   : > { %v1004_v56 = vpop.eup %1003 }
 0x117   : > { %v694_v57 = vsel %vm684_vm3, %v682_v40, %v905_v55  ;;  %v906_v58 = vadd.f32 -1.0, %v1004_v56 }
 0x118   : > { %v704_v60 = vsel %vm703_vm4, %v694_v57, %v664_v35 }
 0x119   : > { %v695_v59 = vsel %vm685_vm5, %v683_v43, %v906_v58 }
 0x11a   : > { %v705_v61 = vsel %vm703_vm4, %v695_v59, %v665_v39 }
 0x11b   : > { %v916_v62 = vpack.c.bf16 %v705_v61, %v704_v60 }
 0x11d   : > { %917 = vst [vmem:[%s388_s13] sm:$0xff] %v916_v62  }
 0x11e PF: > { %s16_s23 = sadd.s32 1, %s1027_s23   ;;  %s1177_s21 = smov %s1023_s22 }
 0x11f   : > { %p13_p5 = scmp.ge.s32.totalorder %s16_s23, 4   ;;  %s1178_s22 = smov %s1180_s24 }
 0x121   :  { %15 = sbr.rel (!%p13_p5) target bundleno = 2 (0x2), region = 97 }

// kernel: _lambda_.26
= control target key start
LH: loop header
LB: loop body
LE: loop exit
PB: predicated region body
PF: predicated region fallthrough
CT: control target
= control target key end

     0   :  { %s571_s12 = smov 0   ;;  %s573_s13 = smov 0   ;;  %s613_s0 = inlined_call_operand.vmem [shape: bf16[32,32], index: 0, kind: input, shape index: {}]   ;;  %s614_s1 = inlined_call_operand.vmem [shape: bf16[32,128], index: 1, kind: input, shape index: {}]   ;;  %s615_s2 = inlined_call_operand.vmem [shape: f32[1,128], index: 2, kind: input, shape index: {}]   ;;  %s616_s3 = inlined_call_operand.vmem [shape: f32[32,128], index: 3, kind: output, shape index: {}]  }
   0x1   :  { %s575_s14 = smov 0  }
   0x2 LB: > { %s32_s15 = sadd.s32 1, %s543_s13  ;;  %p473_p0 = scmp.ge.s32.totalorder %s547_s14, 1  ;;  %s547_s14 = sphi %s575_s14, %s13_s14   ;;  %s543_s13 = sphi %s573_s13, %s618_s13   ;;  %s539_s12 = sphi %s571_s12, %s617_s12  }
   0x3   : > { %p34_p1 = scmp.ge.s32.totalorder %s32_s15, 2  ;;  %p188_p2 = scmp.lt.s32.totalorder %s547_s14, 3 }
   0x5   : > { %s620_s15 = smov (%p34_p1, %s32_s15), 0  ;;  %p189_p3 = pnand %p473_p0, %p188_p2 }
   0x6   : > { %v522_v0 = vld [vmem:[%s614_s1] sm:$0xff] (!%p189_p3)   ;;  %v549_v1 = vmov (!%p189_p3), 0.0   ;;  %v523_v2 = vld [vmem:[%s614_s1 + $0x8] sm:$0xff] (!%p189_p3)   ;;  %vm550_vm0 = vmmov (!%p189_p3), 0   ;;  %s474_s20 = sshll.u32 (!%p189_p3), %s539_s12, 1  ;;  %vm291_vm1 = vcmask (!%p189_p3), 261120  }
   0x7   : > { %192 = sbr.rel (%p189_p3) target bundleno = 235 (0xeb), region = 32  ;;  %488 = vmatprep.subr.bf16.mxu0 (!%p189_p3), %v549_v1  ;;  %492 = vmatprep.mubr.msk.bf16.mxu0 (!%p189_p3), %vm550_vm0, %v549_v1  ;;  %p230_p4 = scmp.lt.s32.totalorder (!%p189_p3), %s474_s20, 3  ;;  %v482_v4 = vld [vmem:[%s615_s2] ss:$0 sm:$0xff] (!%p189_p3) }
   0x8   : > { %489 = vmatpush3.bf16.msra.mxu0 (!%p189_p3), %v522_v0 }
   0x9   : > { %490 = vmatprep.subr.bf16.mxu0 (!%p189_p3), %v549_v1 }
   0xc   : > { %491 = vmatpush3.bf16.msra.mxu0 (!%p189_p3), %v523_v2 }
   0xe   : > { %s622_s20 = smov (!%p230_p4, %s474_s20), 3 }
   0xf   : > { %s475_s21 = sshll.u32 %s622_s20, 2  ;;  %s477_s25 = sshll.u32 %s622_s20, 3 }
  0x10   : > { %s236_s24 = scalar_lea.vmem %s613_s0, %s475_s21  ;;  %s257_s30 = scalar_lea.vmem %s616_s3, %s477_s25 }
  0x11   : > { %v524_v3 = vld [vmem:[%s236_s24] sm:$0xff]  }
  0x12   : > { %493 = vmatmul.mubr.msk.bf16.vlgmr.msra.gmra.mrb[0].mxu0 %vm291_vm1, %v524_v3 }
  0xe5   : > { %v329_v5 = vpop.f32.mrb[0].mxu0 }
  0xe6   : > { %v352_v6 = vadd.f32 %v482_v4, %v329_v5  ;;  %v494_v7 = vpop.f32.mrb[1].mxu0 }
  0xe7   : > { %v332_v8 = vpop.f32.mrb[2].mxu0 }
  0xe8   : > { %354 = vst [vmem:[%s257_s30] sm:$0xff] %v352_v6  ;;  %v353_v9 = vadd.f32 %v482_v4, %v332_v8  ;;  %v495_v10 = vpop.f32.mrb[3].mxu0 }
  0xea   : > { %355 = vst [vmem:[%s257_s30 + $0x8] sm:$0xff] %v353_v9 }
  0xeb PF: > { %s13_s14 = sadd.s32 1, %s547_s14   ;;  %s617_s12 = smov %s543_s13 }
  0xec   : > { %p10_p5 = scmp.ge.s32.totalorder %s13_s14, 4   ;;  %s618_s13 = smov %s620_s15 }
  0xee   :  { %12 = sbr.rel (!%p10_p5) target bundleno = 2 (0x2), region = 76 }

// kernel: _lambda_.25
= control target key start
LH: loop header
LB: loop body
LE: loop exit
PB: predicated region body
PF: predicated region fallthrough
CT: control target
= control target key end

     0   :  { %s982_s24 = smov 0   ;;  %s984_s25 = smov 0   ;;  %s1075_s0 = inlined_call_operand.vmem [shape: bf16[32,144], index: 0, kind: input, shape index: {}]   ;;  %s1076_s1 = inlined_call_operand.vmem [shape: bf16[144,128], index: 1, kind: input, shape index: {}]   ;;  %s1077_s2 = inlined_call_operand.vmem [shape: f32[1,128], index: 2, kind: input, shape index: {}]   ;;  %s1078_s3 = inlined_call_operand.vmem [shape: f32[1,128], index: 3, kind: input, shape index: {}, may-alias: {3,5}]   ;;  %s1079_s4 = inlined_call_operand.vmem [shape: f32[1,128], index: 4, kind: input, shape index: {}]   ;;  %s1080_s5 = inlined_call_operand.vmem [shape: f32[1,128], index: 5, kind: input, shape index: {}, may-alias: {3,5}]   ;;  %s1081_s6 = inlined_call_operand.vmem [shape: bf16[32,128], index: 6, kind: input, shape index: {}]   ;;  %s1082_s7 = inlined_call_operand.vmem [shape: bf16[32,128], index: 7, kind: output, shape index: {}]  }
   0x1   :  { %s986_s26 = smov 0  }
   0x2 LB: > { %s36_s27 = sadd.s32 1, %s935_s25  ;;  %p835_p0 = scmp.ge.s32.totalorder %s939_s26, 1  ;;  %s939_s26 = sphi %s986_s26, %s17_s26   ;;  %s935_s25 = sphi %s984_s25, %s1084_s25   ;;  %s931_s24 = sphi %s982_s24, %s1083_s24  }
   0x3   : > { %p38_p1 = scmp.ge.s32.totalorder %s36_s27, 2  ;;  %p331_p2 = scmp.lt.s32.totalorder %s939_s26, 3 }
   0x5   : > { %s1086_s27 = smov (%p38_p1, %s36_s27), 0  ;;  %p332_p3 = pnand %p835_p0, %p331_p2 }
   0x6   : > { %v901_v0 = vld [vmem:[%s1076_s1] sm:$0xff] (!%p332_p3)   ;;  %v941_v1 = vmov (!%p332_p3), 0   ;;  %s836_s30 = sshll.u32 (!%p332_p3), %s931_s24, 1  ;;  %v902_v2 = vld [vmem:[%s1076_s1 + $0x8] sm:$0xff] (!%p332_p3)   ;;  %v903_v3 = vld [vmem:[%s1076_s1 + $0x10] sm:$0xff] (!%p332_p3)   ;;  %vm542_vm0 = vcmask (!%p332_p3), 130048   ;;  %v644_v31 = vlaneseq (!%p332_p3) }
   0x7   : > { %335 = sbr.rel (%p332_p3) target bundleno = 287 (0x11f), region = 48  ;;  %546 = vmatprep.subr.bf16.mxu0 (!%p332_p3), %v941_v1  ;;  %p401_p4 = scmp.lt.s32.totalorder (!%p332_p3), %s836_s30, 3  ;;  %v904_v4 = vld [vmem:[%s1076_s1 + $0x18] sm:$0xff] (!%p332_p3)   ;;  %v905_v6 = vld [vmem:[%s1076_s1 + $0x20] sm:$0xff] (!%p332_p3)   ;;  %v906_v7 = vld [vmem:[%s1076_s1 + $0x28] sm:$0xff] (!%p332_p3)  }
   0x8   : > { %547 = vmatpush1.bf16.msra.mxu0 (!%p332_p3), %v901_v0  ;;  %v907_v8 = vld [vmem:[%s1076_s1 + $0x30] sm:$0xff] (!%p332_p3)   ;;  %v908_v9 = vld [vmem:[%s1076_s1 + $0x38] sm:$0xff] (!%p332_p3)   ;;  %v909_v10 = vld [vmem:[%s1076_s1 + $0x40] sm:$0xff] (!%p332_p3)   ;;  %v645_v36 = vshrl.u32 (!%p332_p3), %v644_v31, 7 }
   0x9   : > { %548 = vmatprep.subr.bf16.mxu0 (!%p332_p3), %v941_v1  ;;  %v855_v13 = vld [vmem:[%s1077_s2] ss:$0 sm:$0xff] (!%p332_p3) }
   0xa   : > { %v856_v19 = vld [vmem:[%s1078_s3] ss:$0 sm:$0xff] (!%p332_p3)  ;;  %v646_v37 = vsub.s32 (!%p332_p3), 0, %v645_v36 }
   0xb   : > { %v857_v24 = vld [vmem:[%s1079_s4] ss:$0 sm:$0xff] (!%p332_p3) }
   0xc   : > { %549 = vmatpush1.bf16.msra.mxu0 (!%p332_p3), %v902_v2  ;;  %v641_v34 = vld [vmem:[%s1080_s5] sm:$0x1] (!%p332_p3) }
   0xd   : > { %550 = vmatprep.subr.bf16.mxu0 (!%p332_p3), %v941_v1  ;;  %vm642_vm1 = vcmp.gt.f32.partialorder (!%p332_p3), %v641_v34, 0.5 }
   0xe   : > { %s1088_s30 = smov (!%p401_p4, %s836_s30), 3  ;;  %v643_v38 = vsel %vm642_vm1, 1, %v941_v1 }
   0xf   : > { %s864_s12 = sshll.u32 %s1088_s30, 3  ;;  %s840_s9 = sshll.u32 %s1088_s30, 2  ;;  %v647_v39 = vrot.slane %v643_v38, %v646_v37 }
  0x10   : > { %s408_s15 = scalar_lea.vmem %s1075_s0, %s864_s12  ;;  %551 = vmatpush1.bf16.msra.mxu0 %v903_v3  ;;  %s439_s12 = scalar_lea.vmem %s1081_s6, %s840_s9 }
  0x11   : > { %v912_v5 = vld [vmem:[%s408_s15 + $0x4] ss:$8 sps:$4 sm:$0xff]   ;;  %552 = vmatprep.subr.bf16.mxu0 %v941_v1  ;;  %v910_v11 = vld [vmem:[%s408_s15] ss:$8 sps:$4 sm:$0xff]   ;;  %vm648_vm3 = vcmp.eq.s32.totalorder %v647_v39, 1  ;;  %s448_s23 = scalar_lea.vmem %s1082_s7, %s840_s9 }
  0x12   : > { %854 = vmatprep.mubr.msk.bf16.mxu0 %vm542_vm0, %v912_v5  ;;  %v868_v12 = vld [vmem:[%s439_s12] sm:$0xff]  }
  0x13   : > { %v869_v14 = vunpack.c.l.bf16 %v868_v12  ;;  %v870_v18 = vunpack.c.h.bf16 %v868_v12 }
  0x14   : > { %553 = vmatpush1.bf16.msra.mxu0 %v904_v4 }
  0x15   : > { %554 = vmatprep.subr.bf16.mxu0 %v941_v1 }
  0x18   : > { %555 = vmatpush1.bf16.msra.mxu0 %v905_v6 }
  0x19   : > { %556 = vmatprep.subr.bf16.mxu0 %v941_v1 }
  0x1c   : > { %557 = vmatpush1.bf16.msra.mxu0 %v906_v7 }
  0x1d   : > { %558 = vmatprep.subr.bf16.mxu0 %v941_v1 }
  0x20   : > { %559 = vmatpush1.bf16.msra.mxu0 %v907_v8 }
  0x21   : > { %560 = vmatprep.subr.bf16.mxu0 %v941_v1 }
  0x24   : > { %561 = vmatpush1.bf16.msra.mxu0 %v908_v9 }
  0x25   : > { %562 = vmatprep.subr.bf16.mxu0 %v941_v1 }
  0x28   : > { %563 = vmatpush1.bf16.msra.mxu0 %v909_v10 }
  0x2b   : > { %579 = vmatmul.mubr.bf16.vlgmr.msra.gmra.mrb[0].mxu0 %v910_v11 }
  0xfe   : > { %v580_v15 = vpop.f32.mrb[0].mxu0 }
  0xff   : > { %v603_v16 = vadd.f32 %v855_v13, %v580_v15  ;;  %v582_v17 = vpop.f32.mrb[1].mxu0 }
 0x100   : > { %v583_v20 = vpop.f32.mrb[2].mxu0 }
 0x101   : > { %v609_v21 = vadd.f32 %v869_v14, %v603_v16  ;;  %v604_v22 = vadd.f32 %v855_v13, %v583_v20  ;;  %v585_v23 = vpop.f32.mrb[3].mxu0 }
 0x103   : > { %v618_v25 = vmul.f32 %v856_v19, %v609_v21  ;;  %v610_v26 = vadd.f32 %v870_v18, %v604_v22 }
 0x105   : > { %v627_v27 = vadd.f32 %v857_v24, %v618_v25  ;;  %v619_v28 = vmul.f32 %v856_v19, %v610_v26 }
 0x107   : > { %v631_v29 = vmin.f32 %v627_v27, 0.0  ;;  %v628_v30 = vadd.f32 %v857_v24, %v619_v28  ;;  %vm629_vm2 = vcmp.gt.f32.partialorder %v627_v27, 0.0 }
 0x109   : > { %v633_v32 = vmul.f32 1.442695, %v631_v29  ;;  %v632_v33 = vmin.f32 %v628_v30, 0.0  ;;  %vm630_vm4 = vcmp.gt.f32.partialorder %v628_v30, 0.0 }
 0x10b   : > { %913 = vpow2.f32 %v633_v32  ;;  %v635_v35 = vmul.f32 1.442695, %v632_v33 }
 0x10d   : > { %915 = vpow2.f32 %v635_v35 }
 0x115   : > { %v914_v40 = vpop.eup %913 }
 0x116   : > { %v858_v41 = vadd.f32 -1.0, %v914_v40 }
 0x117   : > { %v916_v42 = vpop.eup %915 }
 0x118   : > { %v639_v43 = vsel %vm629_vm2, %v627_v27, %v858_v41  ;;  %v859_v44 = vadd.f32 -1.0, %v916_v42 }
 0x119   : > { %v649_v46 = vsel %vm648_vm3, %v639_v43, %v609_v21 }
 0x11a   : > { %v640_v45 = vsel %vm630_vm4, %v628_v30, %v859_v44 }
 0x11b   : > { %v650_v47 = vsel %vm648_vm3, %v640_v45, %v610_v26 }
 0x11c   : > { %v874_v48 = vpack.c.bf16 %v650_v47, %v649_v46 }
 0x11e   : > { %875 = vst [vmem:[%s448_s23] sm:$0xff] %v874_v48  }
 0x11f PF: > { %s17_s26 = sadd.s32 1, %s939_s26   ;;  %s1083_s24 = smov %s935_s25 }
 0x120   : > { %p14_p5 = scmp.ge.s32.totalorder %s17_s26, 4   ;;  %s1084_s25 = smov %s1086_s27 }
 0x122   :  { %16 = sbr.rel (!%p14_p5) target bundleno = 2 (0x2), region = 104 }

// kernel: _lambda_.31
= control target key start
LH: loop header
LB: loop body
LE: loop exit
PB: predicated region body
PF: predicated region fallthrough
CT: control target
= control target key end

     0   :  { %s1410_s21 = smov 0   ;;  %s1412_s22 = smov 0   ;;  %s1632_s0 = inlined_call_operand.vmem [shape: bf16[128,288], index: 0, kind: input, shape index: {}]   ;;  %s1633_s1 = inlined_call_operand.vmem [shape: bf16[288,128], index: 1, kind: input, shape index: {}]   ;;  %s1634_s2 = inlined_call_operand.vmem [shape: f32[1,128], index: 2, kind: input, shape index: {}]   ;;  %s1635_s3 = inlined_call_operand.vmem [shape: f32[1,128], index: 3, kind: input, shape index: {}]   ;;  %s1636_s4 = inlined_call_operand.vmem [shape: f32[1,128], index: 4, kind: input, shape index: {}]   ;;  %s1637_s5 = inlined_call_operand.vmem [shape: f32[1,128], index: 5, kind: input, shape index: {}]   ;;  %s1638_s6 = inlined_call_operand.vmem [shape: bf16[128,128], index: 6, kind: output, shape index: {}]  }
   0x1   :  { %s1414_s23 = smov 0  }
   0x2 LB: > { %s35_s24 = sadd.s32 1, %s1368_s22  ;;  %p1109_p0 = scmp.ge.s32.totalorder %s1372_s23, 1  ;;  %s1372_s23 = sphi %s1414_s23, %s16_s23   ;;  %s1368_s22 = sphi %s1412_s22, %s1640_s22   ;;  %s1364_s21 = sphi %s1410_s21, %s1639_s21  }
   0x3   : > { %p37_p1 = scmp.ge.s32.totalorder %s35_s24, 2  ;;  %p290_p2 = scmp.lt.s32.totalorder %s1372_s23, 3 }
   0x5   : > { %s1642_s24 = smov (%p37_p1, %s35_s24), 0  ;;  %p291_p3 = pnand %p1109_p0, %p290_p2 }
   0x6   : > { %v1300_v0 = vld [vmem:[%s1633_s1 + $0x40] sm:$0xff] (!%p291_p3)   ;;  %s1110_s27 = sshll.u32 (!%p291_p3), %s1364_s21, 3  ;;  %v1302_v2 = vld [vmem:[%s1633_s1 + $0x48] sm:$0xff] (!%p291_p3)   ;;  %v1304_v4 = vld [vmem:[%s1633_s1 + $0x50] sm:$0xff] (!%p291_p3)   ;;  %vm631_vm0 = vcmask (!%p291_p3), 261120  }
   0x7   : > { %294 = sbr.rel (%p291_p3) target bundleno = 304 (0x130), region = 44  ;;  %v1301_v1 = vld [vmem:[%s1633_s1] sm:$0xff] (!%p291_p3)   ;;  %1200 = vmatprep.subr.bf16.mxu0 (!%p291_p3), %v1300_v0  ;;  %1258 = vmatprep.subr.bf16.mxu1 (!%p291_p3), %v1300_v0  ;;  %p350_p4 = scmp.lt.s32.totalorder (!%p291_p3), %s1110_s27, 15  ;;  %v1303_v3 = vld [vmem:[%s1633_s1 + $0x8] sm:$0xff] (!%p291_p3)   ;;  %v1305_v5 = vld [vmem:[%s1633_s1 + $0x10] sm:$0xff] (!%p291_p3)  }
   0x8   : > { %1201 = vmatpush3.bf16.msra.mxu0 (!%p291_p3), %v1301_v1  ;;  %1266 = vmatpush3.bf16.msra.mxu1 (!%p291_p3), %v1301_v1  ;;  %v1306_v6 = vld [vmem:[%s1633_s1 + $0x58] sm:$0xff] (!%p291_p3)   ;;  %v1308_v8 = vld [vmem:[%s1633_s1 + $0x60] sm:$0xff] (!%p291_p3)   ;;  %v1310_v10 = vld [vmem:[%s1633_s1 + $0x68] sm:$0xff] (!%p291_p3)  }
   0x9   : > { %1202 = vmatprep.subr.bf16.mxu0 (!%p291_p3), %v1302_v2  ;;  %1259 = vmatprep.subr.bf16.mxu1 (!%p291_p3), %v1302_v2  ;;  %v1307_v7 = vld [vmem:[%s1633_s1 + $0x18] sm:$0xff] (!%p291_p3)   ;;  %v1309_v9 = vld [vmem:[%s1633_s1 + $0x20] sm:$0xff] (!%p291_p3)   ;;  %v1311_v13 = vld [vmem:[%s1633_s1 + $0x28] sm:$0xff] (!%p291_p3)  }
   0xa   : > { %v1312_v14 = vld [vmem:[%s1633_s1 + $0x70] sm:$0xff] (!%p291_p3)   ;;  %v1314_v16 = vld [vmem:[%s1633_s1 + $0x78] sm:$0xff] (!%p291_p3)   ;;  %v1322_v18 = vld [vmem:[%s1633_s1 + $0x80] sm:$0xff] (!%p291_p3)  }
   0xb   : > { %v1313_v15 = vld [vmem:[%s1633_s1 + $0x30] sm:$0xff] (!%p291_p3)   ;;  %v1315_v17 = vld [vmem:[%s1633_s1 + $0x38] sm:$0xff] (!%p291_p3)   ;;  %v1323_v22 = vld [vmem:[%s1633_s1 + $0x88] sm:$0xff] (!%p291_p3)  }
   0xc   : > { %1203 = vmatpush3.bf16.msra.mxu0 (!%p291_p3), %v1303_v3  ;;  %1267 = vmatpush3.bf16.msra.mxu1 (!%p291_p3), %v1303_v3  ;;  %v1509_v45 = vld [vmem:[%s1634_s2] ss:$0 sm:$0xff] (!%p291_p3) }
   0xd   : > { %1204 = vmatprep.subr.bf16.mxu0 (!%p291_p3), %v1304_v4  ;;  %1260 = vmatprep.subr.bf16.mxu1 (!%p291_p3), %v1304_v4  ;;  %v1514_v51 = vld [vmem:[%s1635_s3] ss:$0 sm:$0xff] (!%p291_p3) }
   0xe   : > { %s1644_s27 = smov (!%p350_p4, %s1110_s27), 15  ;;  %v1522_v58 = vld [vmem:[%s1636_s4] ss:$0 sm:$0xff] }
   0xf   : > { %s1274_s16 = smul.u32 12, %s1644_s27  ;;  %s1113_s10 = sshll.u32 %s1644_s27, 2 }
  0x10   : > { %1205 = vmatpush3.bf16.msra.mxu0 %v1305_v5  ;;  %1268 = vmatpush3.bf16.msra.mxu1 %v1305_v5  ;;  %s1600_s27 = scalar_lea.vmem %s1638_s6, %s1113_s10 }
  0x11   : > { %1206 = vmatprep.subr.bf16.mxu0 %v1306_v6  ;;  %1261 = vmatprep.subr.bf16.mxu1 %v1306_v6  ;;  %s1461_s26 = scalar_lea.vmem %s1632_s0, %s1274_s16 }
  0x12   : > { %v1318_v11 = vld [vmem:[%s1461_s26 + $0x4] ss:$12 sps:$4 sm:$0xff]   ;;  %v1321_v12 = vld [vmem:[%s1461_s26 + $0x4c] ss:$12 sps:$4 sm:$0xff]   ;;  %v1319_v20 = vld [vmem:[%s1461_s26 + $0x48] ss:$12 sps:$4 sm:$0xff]  }
  0x13   : > { %676 = vmatprep.mubr.bf16.mxu0 %v1318_v11  ;;  %700 = vmatprep.mubr.bf16.mxu1 %v1321_v12  ;;  %v1316_v19 = vld [vmem:[%s1461_s26] ss:$12 sps:$4 sm:$0xff]   ;;  %v1324_v21 = vld [vmem:[%s1461_s26 + $0x1c] ss:$12 sps:$4 sm:$0xff]   ;;  %v1327_v24 = vld [vmem:[%s1461_s26 + $0x18] ss:$12 sps:$4 sm:$0xff]  }
  0x14   : > { %1207 = vmatpush3.bf16.msra.mxu0 %v1307_v7  ;;  %1269 = vmatpush3.bf16.msra.mxu1 %v1307_v7  ;;  %v1326_v23 = vld [vmem:[%s1461_s26 + $0x8] ss:$12 sps:$4 sm:$0xff]   ;;  %v1328_v25 = vld [vmem:[%s1461_s26 + $0x20] ss:$12 sps:$4 sm:$0xff]   ;;  %v1331_v27 = vld [vmem:[%s1461_s26 + $0x38] ss:$12 sps:$4 sm:$0xff]  }
  0x15   : > { %1208 = vmatprep.subr.bf16.mxu0 %v1308_v8  ;;  %1262 = vmatprep.subr.bf16.mxu1 %v1308_v8  ;;  %v1329_v26 = vld [vmem:[%s1461_s26 + $0x34] ss:$12 sps:$4 sm:$0xff]   ;;  %v1332_v28 = vld [vmem:[%s1461_s26 + $0x30] ss:$12 sps:$4 sm:$0xff]  }
  0x16   : > { %v1333_v29 = vld [vmem:[%s1461_s26 + $0x50] ss:$12 sps:$4 sm:$0xff]  }
  0x18   : > { %1209 = vmatpush3.bf16.msra.mxu0 %v1309_v9  ;;  %1270 = vmatpush3.bf16.msra.mxu1 %v1309_v9  ;;  %v897_v9 = vlaneseq }
  0x19   : > { %1210 = vmatprep.subr.bf16.mxu0 %v1310_v10  ;;  %1263 = vmatprep.subr.bf16.mxu1 %v1310_v10 }
  0x1c   : > { %1211 = vmatpush3.bf16.msra.mxu0 %v1311_v13  ;;  %1271 = vmatpush3.bf16.msra.mxu1 %v1311_v13 }
  0x1d   : > { %1212 = vmatprep.subr.bf16.mxu0 %v1312_v14  ;;  %1264 = vmatprep.subr.bf16.mxu1 %v1312_v14 }
  0x20   : > { %1213 = vmatpush3.bf16.msra.mxu0 %v1313_v15  ;;  %1272 = vmatpush3.bf16.msra.mxu1 %v1313_v15 }
  0x21   : > { %1214 = vmatprep.subr.bf16.mxu0 %v1314_v16  ;;  %1265 = vmatprep.subr.bf16.mxu1 %v1314_v16 }
  0x24   : > { %1215 = vmatpush3.bf16.msra.mxu0 %v1315_v17  ;;  %1273 = vmatpush3.bf16.msra.mxu1 %v1315_v17 }
  0x25   : > { %1246 = vmatprep.subr.bf16.mxu1 %v1322_v18 }
  0x27   : > { %677 = vmatmul.mubr.bf16.vlgmr.msra.gmra.mrb[0].mxu0 %v1316_v19  ;;  %701 = vmatmul.mubr.bf16.vlgmr.msra.gmra.mrb[0].mxu1 %v1319_v20 }
  0x28   : > { %1247 = vmatpush3.bf16.msra.mxu1 %v1322_v18  ;;  %684 = vmatprep.mubr.bf16.mxu0 %v1324_v21 }
  0x29   : > { %1248 = vmatprep.subr.bf16.mxu1 %v1323_v22  ;;  %1250 = vmatprep.mubr.msk.bf16.mxu1 %vm631_vm0, %v1326_v23  ;;  %v894_v23 = vld [vmem:[%s1637_s5] sm:$0x1] }
  0x2a   : > { %vm895_vm1 = vcmp.gt.f32.partialorder %v894_v23, 0.5 }
  0x2c   : > { %1249 = vmatpush3.bf16.msra.mxu1 %v1323_v22 }
  0x2f   : > { %685 = vmatmul.mubr.bf16.gmra.mrb[4].mxu0 %v1327_v24  ;;  %1251 = vmatmul.mubr.msk.bf16.vlgmr.msra.gmra.mrb[4].mxu1 %vm631_vm0, %v1328_v25 }
  0x30   : > { %692 = vmatprep.mubr.bf16.mxu0 %v1329_v26  ;;  %1254 = vmatprep.mubr.msk.bf16.mxu1 %vm631_vm0, %v1331_v27 }
  0x37   : > { %693 = vmatmul.mubr.bf16.gmra.mrb[8].mxu0 %v1332_v28  ;;  %1255 = vmatmul.mubr.msk.bf16.gmra.mrb[8].mxu1 %vm631_vm0, %v1333_v29  ;;  %v898_v28 = vshrl.u32 %v897_v9, 7 }
  0xfa   : > { %v1216_v30 = vpop.f32.mrb[0].mxu0  ;;  %v1234_v31 = vpop.f32.mrb[0].mxu1 }
  0xfb   : > { %v1217_v32 = vpop.f32.mrb[1].mxu0  ;;  %v1235_v33 = vpop.f32.mrb[1].mxu1 }
  0xfc   : > { %v1218_v34 = vadd.f32 %v1217_v32, %v1216_v30  ;;  %v1236_v35 = vadd.f32 %v1235_v33, %v1234_v31  ;;  %v1219_v36 = vpop.f32.mrb[2].mxu0  ;;  %v1237_v37 = vpop.f32.mrb[2].mxu1 }
  0xfd   : > { %v1220_v38 = vpop.f32.mrb[3].mxu0  ;;  %v1238_v39 = vpop.f32.mrb[3].mxu1 }
  0xfe   : > { %v1221_v40 = vadd.f32 %v1220_v38, %v1219_v36  ;;  %v1239_v41 = vadd.f32 %v1238_v39, %v1237_v37 }
 0x102   : > { %v1222_v42 = vpop.f32.mrb[4].mxu0  ;;  %v1252_v43 = vpop.f32.mrb[4].mxu1 }
 0x103   : > { %v1223_v44 = vpop.f32.mrb[5].mxu0  ;;  %v743_v46 = vpop.f32.mrb[5].mxu1 }
 0x104   : > { %v1224_v47 = vadd.f32 %v1223_v44, %v1222_v42  ;;  %v744_v48 = vadd.f32 %v1218_v34, %v743_v46  ;;  %v1225_v49 = vpop.f32.mrb[6].mxu0  ;;  %v1253_v50 = vpop.f32.mrb[6].mxu1 }
 0x105   : > { %v1226_v52 = vpop.f32.mrb[7].mxu0  ;;  %v746_v53 = vpop.f32.mrb[7].mxu1 }
 0x106   : > { %v752_v54 = vadd.f32 %v1252_v43, %v1224_v47  ;;  %v1517_v55 = vadd.f32 %v1509_v45, %v744_v48  ;;  %v1227_v56 = vadd.f32 %v1226_v52, %v1225_v49  ;;  %v747_v57 = vadd.f32 %v1221_v40, %v746_v53 }
 0x107   : > { %v899_v40 = vsub.s32 0, %v898_v28  ;;  %v1374_v43 = vmov 0  }
 0x108   : > { %v1525_v59 = vadd.f32 %v1509_v45, %v752_v54  ;;  %v823_v60 = vmul.f32 %v1514_v51, %v1517_v55  ;;  %v755_v61 = vadd.f32 %v1253_v50, %v1227_v56  ;;  %v1530_v62 = vadd.f32 %v1509_v45, %v747_v57 }
 0x109   : > { %v896_v44 = vsel %vm895_vm1, 1, %v1374_v43 }
 0x10a   : > { %v825_v63 = vmul.f32 %v1514_v51, %v1525_v59  ;;  %v1535_v0 = vadd.f32 %v1522_v58, %v823_v60  ;;  %v1538_v1 = vadd.f32 %v1509_v45, %v755_v61  ;;  %v824_v2 = vmul.f32 %v1514_v51, %v1530_v62  ;;  %v1228_v3 = vpop.f32.mrb[8].mxu0  ;;  %v1256_v4 = vpop.f32.mrb[8].mxu1 }
 0x10b   : > { %v768_v5 = vadd.f32 %v1256_v4, %v1236_v35  ;;  %v1229_v6 = vpop.f32.mrb[9].mxu0  ;;  %v759_v7 = vpop.f32.mrb[9].mxu1  ;;  %v900_v52 = vrot.slane %v896_v44, %v899_v40 }
 0x10c   : > { %v1543_v8 = vadd.f32 %v1522_v58, %v825_v63  ;;  %v854_v10 = vmin.f32 %v1535_v0, 0.0  ;;  %v826_v11 = vmul.f32 %v1514_v51, %v1538_v1  ;;  %v1231_v12 = vpop.f32.mrb[10].mxu0  ;;  %v1257_v13 = vpop.f32.mrb[10].mxu1  ;;  %v1549_v14 = vadd.f32 %v1522_v58, %v824_v2 }
 0x10d   : > { %v1552_v15 = vadd.f32 %v1509_v45, %v768_v5  ;;  %v1230_v16 = vadd.f32 %v1229_v6, %v1228_v3  ;;  %v771_v17 = vadd.f32 %v1257_v13, %v1239_v41  ;;  %v1232_v18 = vpop.f32.mrb[11].mxu0  ;;  %v762_v19 = vpop.f32.mrb[11].mxu1  ;;  %vm901_vm2 = vcmp.eq.s32.totalorder %v900_v52, 1 }
 0x10e   : > { %v856_v20 = vmin.f32 %v1543_v8, 0.0  ;;  %v862_v21 = vmul.f32 1.442695, %v854_v10  ;;  %v1556_v22 = vadd.f32 %v1522_v58, %v826_v11  ;;  %v855_v24 = vmin.f32 %v1549_v14, 0.0 }
 0x10f   : > { %v829_v25 = vmul.f32 %v1514_v51, %v1552_v15  ;;  %v760_v26 = vadd.f32 %v1230_v16, %v759_v7  ;;  %v1572_v33 = vadd.f32 %v1509_v45, %v771_v17  ;;  %v1233_v35 = vadd.f32 %v1232_v18, %v1231_v12 }
 0x110   : > { %v866_v27 = vmul.f32 1.442695, %v856_v20  ;;  %1334 = vpow2.f32 %v862_v21  ;;  %v857_v29 = vmin.f32 %v1556_v22, 0.0  ;;  %v864_v30 = vmul.f32 1.442695, %v855_v24 }
 0x111   : > { %v1566_v31 = vadd.f32 %v1522_v58, %v829_v25  ;;  %v1569_v32 = vadd.f32 %v1509_v45, %v760_v26  ;;  %v830_v38 = vmul.f32 %v1514_v51, %v1572_v33  ;;  %v763_v39 = vadd.f32 %v1233_v35, %v762_v19 }
 0x112   : > { %1336 = vpow2.f32 %v866_v27  ;;  %v868_v34 = vmul.f32 1.442695, %v857_v29  ;;  %vm846_vm3 = vcmp.gt.f32.partialorder %v1535_v0, 0.0  ;;  %vm848_vm4 = vcmp.gt.f32.partialorder %v1543_v8, 0.0 }
 0x113   : > { %1338 = vpow2.f32 %v864_v30  ;;  %v860_v36 = vmin.f32 %v1566_v31, 0.0  ;;  %v827_v37 = vmul.f32 %v1514_v51, %v1569_v32  ;;  %v845_v46 = vadd.f32 %v1522_v58, %v830_v38 }
 0x114   : > { %1340 = vpow2.f32 %v868_v34  ;;  %v1582_v47 = vadd.f32 %v1509_v45, %v763_v39  ;;  %vm847_vm5 = vcmp.gt.f32.partialorder %v1549_v14, 0.0  ;;  %vm849_vm6 = vcmp.gt.f32.partialorder %v1556_v22, 0.0 }
 0x115   : > { %v874_v41 = vmul.f32 1.442695, %v860_v36  ;;  %v842_v42 = vadd.f32 %v1522_v58, %v827_v37  ;;  %v861_v49 = vmin.f32 %v845_v46, 0.0  ;;  %vm852_vm7 = vcmp.gt.f32.partialorder %v1566_v31, 0.0 }
 0x116   : > { %v828_v50 = vmul.f32 %v1514_v51, %v1582_v47  ;;  %vm853_vm8 = vcmp.gt.f32.partialorder %v845_v46, 0.0 }
 0x117   : > { %1342 = vpow2.f32 %v874_v41  ;;  %v858_v48 = vmin.f32 %v842_v42, 0.0  ;;  %v876_v56 = vmul.f32 1.442695, %v861_v49  ;;  %vm850_vm9 = vcmp.gt.f32.partialorder %v842_v42, 0.0 }
 0x118   : > { %v843_v57 = vadd.f32 %v1522_v58, %v828_v50 }
 0x119   : > { %v870_v53 = vmul.f32 1.442695, %v858_v48 }
 0x11a   : > { %v1335_v54 = vpop.eup %1334  ;;  %v859_v63 = vmin.f32 %v843_v57, 0.0  ;;  %vm851_vm10 = vcmp.gt.f32.partialorder %v843_v57, 0.0 }
 0x11b   : > { %v1151_v60 = vadd.f32 -1.0, %v1335_v54  ;;  %1344 = vpow2.f32 %v870_v53 }
 0x11c   : > { %v1337_v61 = vpop.eup %1336  ;;  %1346 = vpow2.f32 %v876_v56  ;;  %v872_v5 = vmul.f32 1.442695, %v859_v63 }
 0x11d   : > { %v1339_v45 = vpop.eup %1338  ;;  %v1153_v2 = vadd.f32 -1.0, %v1337_v61  ;;  %v886_v51 = vsel %vm846_vm3, %v1535_v0, %v1151_v60 }
 0x11e   : > { %v1341_v3 = vpop.eup %1340  ;;  %v1152_v4 = vadd.f32 -1.0, %v1339_v45  ;;  %1348 = vpow2.f32 %v872_v5  ;;  %v902_v10 = vsel %vm901_vm2, %v886_v51, %v1517_v55 }
 0x11f   : > { %v888_v58 = vsel %vm848_vm4, %v1543_v8, %v1153_v2  ;;  %v1154_v6 = vadd.f32 -1.0, %v1341_v3 }
 0x120   : > { %v887_v7 = vsel %vm847_vm5, %v1549_v14, %v1152_v4  ;;  %v904_v11 = vsel %vm901_vm2, %v888_v58, %v1525_v59 }
 0x121   : > { %v1343_v9 = vpop.eup %1342  ;;  %v889_v0 = vsel %vm849_vm6, %v1556_v22, %v1154_v6  ;;  %v903_v8 = vsel %vm901_vm2, %v887_v7, %v1530_v62 }
 0x122   : > { %v905_v12 = vsel %vm901_vm2, %v889_v0, %v1538_v1  ;;  %v1180_v13 = vpack.c.bf16 %v903_v8, %v902_v10  ;;  %v1157_v14 = vadd.f32 -1.0, %v1343_v9 }
 0x123   : > { %v1185_v55 = vpack.c.bf16 %v905_v12, %v904_v11 }
 0x124   : > { %1181 = vst [vmem:[%s1600_s27] sm:$0xff] %v1180_v13   ;;  %v892_v18 = vsel %vm852_vm7, %v1566_v31, %v1157_v14 }
 0x125   : > { %v1345_v16 = vpop.eup %1344  ;;  %1197 = vst [vmem:[%s1600_s27 + $0x8] sm:$0xff] %v1185_v55   ;;  %v908_v1 = vsel %vm901_vm2, %v892_v18, %v1552_v15 }
 0x126   : > { %v1347_v17 = vpop.eup %1346  ;;  %v1155_v19 = vadd.f32 -1.0, %v1345_v16 }
 0x127   : > { %v1158_v62 = vadd.f32 -1.0, %v1347_v17 }
 0x128   : > { %v1349_v20 = vpop.eup %1348  ;;  %v890_v22 = vsel %vm850_vm9, %v842_v42, %v1155_v19 }
 0x129   : > { %v893_v59 = vsel %vm853_vm8, %v845_v46, %v1158_v62  ;;  %v1156_v24 = vadd.f32 -1.0, %v1349_v20  ;;  %v906_v26 = vsel %vm901_vm2, %v890_v22, %v1569_v32 }
 0x12a   : > { %v909_v21 = vsel %vm901_vm2, %v893_v59, %v1572_v33 }
 0x12b   : > { %v1195_v23 = vpack.c.bf16 %v909_v21, %v908_v1  ;;  %v891_v25 = vsel %vm851_vm10, %v843_v57, %v1156_v24 }
 0x12c   : > { %v907_v27 = vsel %vm901_vm2, %v891_v25, %v1582_v47 }
 0x12d   : > { %1199 = vst [vmem:[%s1600_s27 + $0x18] sm:$0xff] %v1195_v23   ;;  %v1190_v28 = vpack.c.bf16 %v907_v27, %v906_v26 }
 0x12f   : > { %1198 = vst [vmem:[%s1600_s27 + $0x10] sm:$0xff] %v1190_v28  }
 0x130 PF: > { %s16_s23 = sadd.s32 1, %s1372_s23   ;;  %s1639_s21 = smov %s1368_s22 }
 0x131   : > { %p13_p5 = scmp.ge.s32.totalorder %s16_s23, 4   ;;  %s1640_s22 = smov %s1642_s24 }
 0x133   :  { %15 = sbr.rel (!%p13_p5) target bundleno = 2 (0x2), region = 97 }

// kernel: _lambda_.32
= control target key start
LH: loop header
LB: loop body
LE: loop exit
PB: predicated region body
PF: predicated region fallthrough
CT: control target
= control target key end

     0   :  { %s1285_s24 = smov 0   ;;  %s1287_s25 = smov 0   ;;  %s1467_s0 = inlined_call_operand.vmem [shape: bf16[128,144], index: 0, kind: input, shape index: {}]   ;;  %s1468_s1 = inlined_call_operand.vmem [shape: bf16[144,128], index: 1, kind: input, shape index: {}]   ;;  %s1469_s2 = inlined_call_operand.vmem [shape: f32[1,128], index: 2, kind: input, shape index: {}]   ;;  %s1470_s3 = inlined_call_operand.vmem [shape: f32[1,128], index: 3, kind: input, shape index: {}]   ;;  %s1471_s4 = inlined_call_operand.vmem [shape: f32[1,128], index: 4, kind: input, shape index: {}]   ;;  %s1472_s5 = inlined_call_operand.vmem [shape: f32[1,128], index: 5, kind: input, shape index: {}]   ;;  %s1473_s6 = inlined_call_operand.vmem [shape: bf16[128,128], index: 6, kind: input, shape index: {}]   ;;  %s1474_s7 = inlined_call_operand.vmem [shape: bf16[128,128], index: 7, kind: output, shape index: {}]  }
   0x1   :  { %s1289_s26 = smov 0  }
   0x2 LB: > { %s36_s27 = sadd.s32 1, %s1238_s25  ;;  %p1039_p0 = scmp.ge.s32.totalorder %s1242_s26, 1  ;;  %s1242_s26 = sphi %s1289_s26, %s17_s26   ;;  %s1238_s25 = sphi %s1287_s25, %s1476_s25   ;;  %s1234_s24 = sphi %s1285_s24, %s1475_s24  }
   0x3   : > { %p38_p1 = scmp.ge.s32.totalorder %s36_s27, 2  ;;  %p331_p2 = scmp.lt.s32.totalorder %s1242_s26, 3 }
   0x5   : > { %s1478_s27 = smov (%p38_p1, %s36_s27), 0  ;;  %p332_p3 = pnand %p1039_p0, %p331_p2 }
   0x6   : > { %v1183_v0 = vld [vmem:[%s1468_s1] sm:$0xff] (!%p332_p3)   ;;  %v1244_v1 = vmov (!%p332_p3), 0   ;;  %s1040_s30 = sshll.u32 (!%p332_p3), %s1234_s24, 3  ;;  %v1184_v2 = vld [vmem:[%s1468_s1 + $0x8] sm:$0xff] (!%p332_p3)   ;;  %v1185_v3 = vld [vmem:[%s1468_s1 + $0x10] sm:$0xff] (!%p332_p3)   ;;  %vm587_vm0 = vcmask (!%p332_p3), 130048   ;;  %v812_v57 = vlaneseq (!%p332_p3) }
   0x7   : > { %335 = sbr.rel (%p332_p3) target bundleno = 297 (0x129), region = 48  ;;  %600 = vmatprep.subr.bf16.mxu0 (!%p332_p3), %v1244_v1  ;;  %1140 = vmatprep.subr.bf16.mxu1 (!%p332_p3), %v1244_v1  ;;  %p401_p4 = scmp.lt.s32.totalorder (!%p332_p3), %s1040_s30, 15  ;;  %v1186_v4 = vld [vmem:[%s1468_s1 + $0x18] sm:$0xff] (!%p332_p3)   ;;  %v1187_v7 = vld [vmem:[%s1468_s1 + $0x20] sm:$0xff] (!%p332_p3)   ;;  %v1188_v8 = vld [vmem:[%s1468_s1 + $0x28] sm:$0xff] (!%p332_p3)  }
   0x8   : > { %601 = vmatpush1.bf16.msra.mxu0 (!%p332_p3), %v1183_v0  ;;  %1149 = vmatpush1.bf16.msra.mxu1 (!%p332_p3), %v1183_v0  ;;  %v1189_v9 = vld [vmem:[%s1468_s1 + $0x30] sm:$0xff] (!%p332_p3)   ;;  %v1190_v10 = vld [vmem:[%s1468_s1 + $0x38] sm:$0xff] (!%p332_p3)   ;;  %v1191_v11 = vld [vmem:[%s1468_s1 + $0x40] sm:$0xff] (!%p332_p3)  }
   0x9   : > { %602 = vmatprep.subr.bf16.mxu0 (!%p332_p3), %v1244_v1  ;;  %1141 = vmatprep.subr.bf16.mxu1 (!%p332_p3), %v1244_v1  ;;  %v1068_v20 = vld [vmem:[%s1469_s2] ss:$0 sm:$0xff] (!%p332_p3) }
   0xa   : > { %v1069_v31 = vld [vmem:[%s1470_s3] ss:$0 sm:$0xff] (!%p332_p3) }
   0xb   : > { %v1070_v40 = vld [vmem:[%s1471_s4] ss:$0 sm:$0xff] (!%p332_p3) }
   0xc   : > { %603 = vmatpush1.bf16.msra.mxu0 (!%p332_p3), %v1184_v2  ;;  %1150 = vmatpush1.bf16.msra.mxu1 (!%p332_p3), %v1184_v2 }
   0xd   : > { %604 = vmatprep.subr.bf16.mxu0 (!%p332_p3), %v1244_v1  ;;  %1142 = vmatprep.subr.bf16.mxu1 (!%p332_p3), %v1244_v1 }
   0xe   : > { %s1480_s30 = smov (!%p401_p4, %s1040_s30), 15 }
   0xf   : > { %s1089_s12 = sshll.u32 %s1480_s30, 3  ;;  %s1044_s9 = sshll.u32 %s1480_s30, 2 }
  0x10   : > { %s1324_s15 = scalar_lea.vmem %s1467_s0, %s1089_s12  ;;  %605 = vmatpush1.bf16.msra.mxu0 %v1185_v3  ;;  %1151 = vmatpush1.bf16.msra.mxu1 %v1185_v3  ;;  %s439_s12 = scalar_lea.vmem %s1473_s6, %s1044_s9 }
  0x11   : > { %v1194_v5 = vld [vmem:[%s1324_s15 + $0x4] ss:$8 sps:$4 sm:$0xff]   ;;  %606 = vmatprep.subr.bf16.mxu0 %v1244_v1  ;;  %1143 = vmatprep.subr.bf16.mxu1 %v1244_v1  ;;  %v1192_v12 = vld [vmem:[%s1324_s15] ss:$8 sps:$4 sm:$0xff]   ;;  %v1198_v14 = vld [vmem:[%s1324_s15 + $0x14] ss:$8 sps:$4 sm:$0xff]   ;;  %s1435_s23 = scalar_lea.vmem %s1474_s7, %s1044_s9 }
  0x12   : > { %v1197_v6 = vld [vmem:[%s1324_s15 + $0x24] ss:$8 sps:$4 sm:$0xff]   ;;  %1064 = vmatprep.mubr.msk.bf16.mxu0 %vm587_vm0, %v1194_v5  ;;  %v1195_v13 = vld [vmem:[%s1324_s15 + $0x20] ss:$8 sps:$4 sm:$0xff]   ;;  %v1200_v15 = vld [vmem:[%s1324_s15 + $0x34] ss:$8 sps:$4 sm:$0xff]  }
  0x13   : > { %1066 = vmatprep.mubr.msk.bf16.mxu1 %vm587_vm0, %v1197_v6  ;;  %v1202_v16 = vld [vmem:[%s1324_s15 + $0x10] ss:$8 sps:$4 sm:$0xff]   ;;  %v1099_v18 = vld [vmem:[%s439_s12] sm:$0xff]   ;;  %v1134_v45 = vld [vmem:[%s439_s12 + $0x8] sm:$0xff]  }
  0x14   : > { %607 = vmatpush1.bf16.msra.mxu0 %v1186_v4  ;;  %1152 = vmatpush1.bf16.msra.mxu1 %v1186_v4  ;;  %v1203_v17 = vld [vmem:[%s1324_s15 + $0x30] ss:$8 sps:$4 sm:$0xff]   ;;  %v1100_v21 = vunpack.c.l.bf16 %v1099_v18  ;;  %v1101_v29 = vunpack.c.h.bf16 %v1099_v18  ;;  %v1104_v52 = vunpack.c.l.bf16 %v1134_v45  ;;  %v1105_v55 = vunpack.c.h.bf16 %v1134_v45 }
  0x15   : > { %608 = vmatprep.subr.bf16.mxu0 %v1244_v1  ;;  %1144 = vmatprep.subr.bf16.mxu1 %v1244_v1  ;;  %v1135_v19 = vld [vmem:[%s439_s12 + $0x10] sm:$0xff]   ;;  %v1136_v46 = vld [vmem:[%s439_s12 + $0x18] sm:$0xff]  }
  0x16   : > { %v1108_v22 = vunpack.c.l.bf16 %v1135_v19  ;;  %v1109_v30 = vunpack.c.h.bf16 %v1135_v19  ;;  %v1112_v54 = vunpack.c.l.bf16 %v1136_v46  ;;  %v1113_v61 = vunpack.c.h.bf16 %v1136_v46 }
  0x18   : > { %609 = vmatpush1.bf16.msra.mxu0 %v1187_v7  ;;  %1153 = vmatpush1.bf16.msra.mxu1 %v1187_v7 }
  0x19   : > { %610 = vmatprep.subr.bf16.mxu0 %v1244_v1  ;;  %1145 = vmatprep.subr.bf16.mxu1 %v1244_v1 }
  0x1c   : > { %611 = vmatpush1.bf16.msra.mxu0 %v1188_v8  ;;  %1154 = vmatpush1.bf16.msra.mxu1 %v1188_v8 }
  0x1d   : > { %612 = vmatprep.subr.bf16.mxu0 %v1244_v1  ;;  %1146 = vmatprep.subr.bf16.mxu1 %v1244_v1 }
  0x20   : > { %613 = vmatpush1.bf16.msra.mxu0 %v1189_v9  ;;  %1155 = vmatpush1.bf16.msra.mxu1 %v1189_v9 }
  0x21   : > { %614 = vmatprep.subr.bf16.mxu0 %v1244_v1  ;;  %1147 = vmatprep.subr.bf16.mxu1 %v1244_v1 }
  0x24   : > { %615 = vmatpush1.bf16.msra.mxu0 %v1190_v10  ;;  %1156 = vmatpush1.bf16.msra.mxu1 %v1190_v10 }
  0x25   : > { %616 = vmatprep.subr.bf16.mxu0 %v1244_v1  ;;  %1148 = vmatprep.subr.bf16.mxu1 %v1244_v1 }
  0x28   : > { %617 = vmatpush1.bf16.msra.mxu0 %v1191_v11  ;;  %1157 = vmatpush1.bf16.msra.mxu1 %v1191_v11 }
  0x2b   : > { %633 = vmatmul.mubr.bf16.vlgmr.msra.gmra.mrb[0].mxu0 %v1192_v12  ;;  %649 = vmatmul.mubr.bf16.vlgmr.msra.gmra.mrb[0].mxu1 %v1195_v13  ;;  %v809_v13 = vld [vmem:[%s1472_s5] sm:$0x1] }
  0x2c   : > { %1065 = vmatprep.mubr.msk.bf16.mxu0 %vm587_vm0, %v1198_v14  ;;  %1067 = vmatprep.mubr.msk.bf16.mxu1 %vm587_vm0, %v1200_v15  ;;  %vm810_vm1 = vcmp.gt.f32.partialorder %v809_v13, 0.5 }
  0x33   : > { %641 = vmatmul.mubr.bf16.gmra.mrb[4].mxu0 %v1202_v16  ;;  %657 = vmatmul.mubr.bf16.gmra.mrb[4].mxu1 %v1203_v17 }
  0xfe   : > { %v634_v23 = vpop.f32.mrb[0].mxu0  ;;  %v650_v24 = vpop.f32.mrb[0].mxu1 }
  0xff   : > { %v699_v25 = vadd.f32 %v1068_v20, %v634_v23  ;;  %v703_v26 = vadd.f32 %v1068_v20, %v650_v24  ;;  %v636_v27 = vpop.f32.mrb[1].mxu0  ;;  %v652_v28 = vpop.f32.mrb[1].mxu1 }
 0x100   : > { %v637_v32 = vpop.f32.mrb[2].mxu0  ;;  %v653_v33 = vpop.f32.mrb[2].mxu1 }
 0x101   : > { %v1380_v34 = vadd.f32 %v1100_v21, %v699_v25  ;;  %v1382_v35 = vadd.f32 %v1108_v22, %v703_v26  ;;  %v700_v36 = vadd.f32 %v1068_v20, %v637_v32  ;;  %v704_v37 = vadd.f32 %v1068_v20, %v653_v33  ;;  %v639_v38 = vpop.f32.mrb[3].mxu0  ;;  %v655_v39 = vpop.f32.mrb[3].mxu1 }
 0x102   : > { %v811_v33 = vsel %vm810_vm1, 1, %v1244_v1 }
 0x103   : > { %v738_v41 = vmul.f32 %v1069_v31, %v1380_v34  ;;  %v742_v42 = vmul.f32 %v1069_v31, %v1382_v35  ;;  %v1389_v43 = vadd.f32 %v1101_v29, %v700_v36  ;;  %v1391_v44 = vadd.f32 %v1109_v30, %v704_v37 }
 0x105   : > { %v1393_v47 = vadd.f32 %v1070_v40, %v738_v41  ;;  %v1395_v48 = vadd.f32 %v1070_v40, %v742_v42  ;;  %v739_v49 = vmul.f32 %v1069_v31, %v1389_v43  ;;  %v743_v50 = vmul.f32 %v1069_v31, %v1391_v44 }
 0x106   : > { %v642_v51 = vpop.f32.mrb[4].mxu0  ;;  %v658_v53 = vpop.f32.mrb[4].mxu1 }
 0x107   : > { %v769_v56 = vmin.f32 %v1393_v47, 0.0  ;;  %v773_v58 = vmin.f32 %v1395_v48, 0.0  ;;  %v644_v59 = vpop.f32.mrb[5].mxu0  ;;  %v660_v60 = vpop.f32.mrb[5].mxu1  ;;  %v1401_v62 = vadd.f32 %v1070_v40, %v739_v49  ;;  %v1403_v63 = vadd.f32 %v1070_v40, %v743_v50 }
 0x108   : > { %v701_v0 = vadd.f32 %v1068_v20, %v642_v51  ;;  %v705_v2 = vadd.f32 %v1068_v20, %v658_v53  ;;  %v645_v3 = vpop.f32.mrb[6].mxu0  ;;  %v661_v4 = vpop.f32.mrb[6].mxu1  ;;  %vm761_vm2 = vcmp.gt.f32.partialorder %v1393_v47, 0.0  ;;  %vm765_vm4 = vcmp.gt.f32.partialorder %v1395_v48, 0.0 }
 0x109   : > { %v777_v5 = vmul.f32 1.442695, %v769_v56  ;;  %v785_v6 = vmul.f32 1.442695, %v773_v58  ;;  %v702_v7 = vadd.f32 %v1068_v20, %v645_v3  ;;  %v706_v8 = vadd.f32 %v1068_v20, %v661_v4  ;;  %v647_v9 = vpop.f32.mrb[7].mxu0  ;;  %v663_v10 = vpop.f32.mrb[7].mxu1 }
 0x10a   : > { %v770_v11 = vmin.f32 %v1401_v62, 0.0  ;;  %v774_v12 = vmin.f32 %v1403_v63, 0.0  ;;  %v1410_v14 = vadd.f32 %v1104_v52, %v701_v0  ;;  %v1412_v15 = vadd.f32 %v1112_v54, %v705_v2 }
 0x10b   : > { %1204 = vpow2.f32 %v777_v5  ;;  %v1414_v16 = vadd.f32 %v1105_v55, %v702_v7  ;;  %v1416_v19 = vadd.f32 %v1113_v61, %v706_v8  ;;  %v813_v20 = vshrl.u32 %v812_v57, 7 }
 0x10c   : > { %1206 = vpow2.f32 %v785_v6  ;;  %v779_v17 = vmul.f32 1.442695, %v770_v11  ;;  %v787_v18 = vmul.f32 1.442695, %v774_v12  ;;  %v740_v21 = vmul.f32 %v1069_v31, %v1410_v14 }
 0x10d   : > { %v744_v22 = vmul.f32 %v1069_v31, %v1412_v15  ;;  %v741_v23 = vmul.f32 %v1069_v31, %v1414_v16  ;;  %v745_v24 = vmul.f32 %v1069_v31, %v1416_v19  ;;  %v814_v29 = vsub.s32 0, %v813_v20 }
 0x10e   : > { %1208 = vpow2.f32 %v779_v17  ;;  %v755_v25 = vadd.f32 %v1070_v40, %v740_v21  ;;  %vm762_vm5 = vcmp.gt.f32.partialorder %v1401_v62, 0.0  ;;  %vm766_vm6 = vcmp.gt.f32.partialorder %v1403_v63, 0.0 }
 0x10f   : > { %1210 = vpow2.f32 %v787_v18  ;;  %v759_v26 = vadd.f32 %v1070_v40, %v744_v22  ;;  %v756_v27 = vadd.f32 %v1070_v40, %v741_v23  ;;  %v760_v28 = vadd.f32 %v1070_v40, %v745_v24 }
 0x110   : > { %v771_v30 = vmin.f32 %v755_v25, 0.0  ;;  %v815_v46 = vrot.slane %v811_v33, %v814_v29  ;;  %vm763_vm7 = vcmp.gt.f32.partialorder %v755_v25, 0.0 }
 0x111   : > { %v775_v32 = vmin.f32 %v759_v26, 0.0  ;;  %v772_v36 = vmin.f32 %v756_v27, 0.0  ;;  %v776_v37 = vmin.f32 %v760_v28, 0.0  ;;  %vm767_vm8 = vcmp.gt.f32.partialorder %v759_v26, 0.0 }
 0x112   : > { %v781_v38 = vmul.f32 1.442695, %v771_v30  ;;  %vm816_vm3 = vcmp.eq.s32.totalorder %v815_v46, 1  ;;  %vm764_vm9 = vcmp.gt.f32.partialorder %v756_v27, 0.0  ;;  %vm768_vm10 = vcmp.gt.f32.partialorder %v760_v28, 0.0 }
 0x113   : > { %v789_v39 = vmul.f32 1.442695, %v775_v32  ;;  %v783_v41 = vmul.f32 1.442695, %v772_v36  ;;  %v791_v42 = vmul.f32 1.442695, %v776_v37 }
 0x114   : > { %1212 = vpow2.f32 %v781_v38 }
 0x115   : > { %v1205_v45 = vpop.eup %1204  ;;  %1214 = vpow2.f32 %v789_v39 }
 0x116   : > { %v1207_v31 = vpop.eup %1206  ;;  %v1071_v49 = vadd.f32 -1.0, %v1205_v45  ;;  %1216 = vpow2.f32 %v783_v41 }
 0x117   : > { %v1075_v50 = vadd.f32 -1.0, %v1207_v31  ;;  %1218 = vpow2.f32 %v791_v42 }
 0x118   : > { %v1209_v40 = vpop.eup %1208  ;;  %v801_v51 = vsel %vm761_vm2, %v1393_v47, %v1071_v49 }
 0x119   : > { %v1211_v1 = vpop.eup %1210  ;;  %v1072_v52 = vadd.f32 -1.0, %v1209_v40  ;;  %v805_v53 = vsel %vm765_vm4, %v1395_v48, %v1075_v50  ;;  %v817_v47 = vsel %vm816_vm3, %v801_v51, %v1380_v34 }
 0x11a   : > { %v1076_v54 = vadd.f32 -1.0, %v1211_v1  ;;  %v821_v57 = vsel %vm816_vm3, %v805_v53, %v1382_v35 }
 0x11b   : > { %v802_v55 = vsel %vm762_vm5, %v1401_v62, %v1072_v52 }
 0x11c   : > { %v818_v48 = vsel %vm816_vm3, %v802_v55, %v1389_v43  ;;  %v806_v56 = vsel %vm766_vm6, %v1403_v63, %v1076_v54 }
 0x11d   : > { %v1117_v58 = vpack.c.bf16 %v818_v48, %v817_v47  ;;  %v822_v59 = vsel %vm816_vm3, %v806_v56, %v1391_v44 }
 0x11e   : > { %v1127_v60 = vpack.c.bf16 %v822_v59, %v821_v57  ;;  %v1213_v61 = vpop.eup %1212 }
 0x11f   : > { %1118 = vst [vmem:[%s1435_s23] sm:$0xff] %v1117_v58   ;;  %v1215_v62 = vpop.eup %1214  ;;  %v1073_v0 = vadd.f32 -1.0, %v1213_v61 }
 0x120   : > { %1138 = vst [vmem:[%s1435_s23 + $0x10] sm:$0xff] %v1127_v60   ;;  %v1217_v2 = vpop.eup %1216  ;;  %v1077_v34 = vadd.f32 -1.0, %v1215_v62 }
 0x121   : > { %v1219_v3 = vpop.eup %1218  ;;  %v803_v43 = vsel %vm763_vm7, %v755_v25, %v1073_v0  ;;  %v1074_v63 = vadd.f32 -1.0, %v1217_v2 }
 0x122   : > { %v807_v35 = vsel %vm767_vm8, %v759_v26, %v1077_v34  ;;  %v1078_v4 = vadd.f32 -1.0, %v1219_v3  ;;  %v819_v44 = vsel %vm816_vm3, %v803_v43, %v1410_v14 }
 0x123   : > { %v804_v5 = vsel %vm764_vm9, %v756_v27, %v1074_v63  ;;  %v823_v8 = vsel %vm816_vm3, %v807_v35, %v1412_v15 }
 0x124   : > { %v820_v6 = vsel %vm816_vm3, %v804_v5, %v1414_v16  ;;  %v808_v7 = vsel %vm768_vm10, %v760_v28, %v1078_v4 }
 0x125   : > { %v1122_v9 = vpack.c.bf16 %v820_v6, %v819_v44  ;;  %v824_v10 = vsel %vm816_vm3, %v808_v7, %v1416_v19 }
 0x126   : > { %v1132_v11 = vpack.c.bf16 %v824_v10, %v823_v8 }
 0x127   : > { %1137 = vst [vmem:[%s1435_s23 + $0x8] sm:$0xff] %v1122_v9  }
 0x128   : > { %1139 = vst [vmem:[%s1435_s23 + $0x18] sm:$0xff] %v1132_v11  }
 0x129 PF: > { %s17_s26 = sadd.s32 1, %s1242_s26   ;;  %s1475_s24 = smov %s1238_s25 }
 0x12a   : > { %p14_p5 = scmp.ge.s32.totalorder %s17_s26, 4   ;;  %s1476_s25 = smov %s1478_s27 }
 0x12c   :  { %16 = sbr.rel (!%p14_p5) target bundleno = 2 (0x2), region = 104 }

// kernel: _lambda_.33
= control target key start
LH: loop header
LB: loop body
LE: loop exit
PB: predicated region body
PF: predicated region fallthrough
CT: control target
= control target key end

     0   :  { %s2168_s21 = smov 0   ;;  %s2170_s22 = smov 0   ;;  %s2825_s0 = inlined_call_operand.vmem [shape: bf16[512,144], index: 0, kind: input, shape index: {}]   ;;  %s2826_s1 = inlined_call_operand.vmem [shape: bf16[144,128], index: 1, kind: input, shape index: {}]   ;;  %s2827_s2 = inlined_call_operand.vmem [shape: f32[1,128], index: 2, kind: input, shape index: {}]   ;;  %s2828_s3 = inlined_call_operand.vmem [shape: f32[1,128], index: 3, kind: input, shape index: {}]   ;;  %s2829_s4 = inlined_call_operand.vmem [shape: f32[1,128], index: 4, kind: input, shape index: {}]   ;;  %s2830_s5 = inlined_call_operand.vmem [shape: f32[1,128], index: 5, kind: input, shape index: {}]   ;;  %s2831_s6 = inlined_call_operand.vmem [shape: bf16[512,128], index: 6, kind: output, shape index: {}]  }
   0x1   :  { %s2172_s23 = smov 0  }
   0x2 LB: > { %s35_s24 = sadd.s32 1, %s2126_s22  ;;  %p1684_p0 = scmp.ge.s32.totalorder %s2130_s23, 1  ;;  %s2130_s23 = sphi %s2172_s23, %s16_s23   ;;  %s2126_s22 = sphi %s2170_s22, %s2833_s22   ;;  %s2122_s21 = sphi %s2168_s21, %s2832_s21  }
   0x3   : > { %p37_p1 = scmp.ge.s32.totalorder %s35_s24, 2  ;;  %p290_p2 = scmp.lt.s32.totalorder %s2130_s23, 3 }
   0x5   : > { %s2835_s24 = smov (%p37_p1, %s35_s24), 0  ;;  %p291_p3 = pnand %p1684_p0, %p290_p2 }
   0x6   : > { %v1987_v0 = vld [vmem:[%s2826_s1] sm:$0xff] (!%p291_p3)   ;;  %v2132_v1 = vmov (!%p291_p3), 0   ;;  %s1685_s27 = sshll.u32 (!%p291_p3), %s2122_s21, 5  ;;  %v1988_v2 = vld [vmem:[%s2826_s1 + $0x8] sm:$0xff] (!%p291_p3)   ;;  %v1989_v3 = vld [vmem:[%s2826_s1 + $0x10] sm:$0xff] (!%p291_p3)   ;;  %vm707_vm0 = vcmask (!%p291_p3), 130048   ;;  %v1328_v45 = vlaneseq (!%p291_p3) }
   0x7   : > { %294 = sbr.rel (%p291_p3) target bundleno = 356 (0x164), region = 44  ;;  %756 = vmatprep.subr.bf16.mxu0 (!%p291_p3), %v2132_v1  ;;  %1944 = vmatprep.subr.bf16.mxu1 (!%p291_p3), %v2132_v1  ;;  %p350_p4 = scmp.lt.s32.totalorder (!%p291_p3), %s1685_s27, 63  ;;  %v1990_v4 = vld [vmem:[%s2826_s1 + $0x18] sm:$0xff] (!%p291_p3)   ;;  %v1991_v7 = vld [vmem:[%s2826_s1 + $0x20] sm:$0xff] (!%p291_p3)   ;;  %v1992_v8 = vld [vmem:[%s2826_s1 + $0x28] sm:$0xff] (!%p291_p3)  }
   0x8   : > { %757 = vmatpush1.bf16.msra.mxu0 (!%p291_p3), %v1987_v0  ;;  %1953 = vmatpush1.bf16.msra.mxu1 (!%p291_p3), %v1987_v0  ;;  %v1993_v9 = vld [vmem:[%s2826_s1 + $0x30] sm:$0xff] (!%p291_p3)   ;;  %v1994_v10 = vld [vmem:[%s2826_s1 + $0x38] sm:$0xff] (!%p291_p3)   ;;  %v1995_v11 = vld [vmem:[%s2826_s1 + $0x40] sm:$0xff] (!%p291_p3)   ;;  %v1329_v61 = vshrl.u32 (!%p291_p3), %v1328_v45, 7 }
   0x9   : > { %758 = vmatprep.subr.bf16.mxu0 (!%p291_p3), %v2132_v1  ;;  %1945 = vmatprep.subr.bf16.mxu1 (!%p291_p3), %v2132_v1  ;;  %v2290_v42 = vld [vmem:[%s2827_s2] ss:$0 sm:$0xff] (!%p291_p3) }
   0xa   : > { %v2295_v44 = vld [vmem:[%s2828_s3] ss:$0 sm:$0xff] (!%p291_p3) }
   0xb   : > { %v2306_v51 = vld [vmem:[%s2829_s4] ss:$0 sm:$0xff] (!%p291_p3) }
   0xc   : > { %759 = vmatpush1.bf16.msra.mxu0 (!%p291_p3), %v1988_v2  ;;  %1954 = vmatpush1.bf16.msra.mxu1 (!%p291_p3), %v1988_v2  ;;  %v1325_v60 = vld [vmem:[%s2830_s5] sm:$0x1] (!%p291_p3) }
   0xd   : > { %760 = vmatprep.subr.bf16.mxu0 (!%p291_p3), %v2132_v1  ;;  %1946 = vmatprep.subr.bf16.mxu1 (!%p291_p3), %v2132_v1  ;;  %vm1326_vm1 = vcmp.gt.f32.partialorder (!%p291_p3), %v1325_v60, 0.5 }
   0xe   : > { %s2837_s27 = smov (!%p350_p4, %s1685_s27), 63 }
   0xf   : > { %s1816_s8 = sshll.u32 %s2837_s27, 3  ;;  %s1689_s12 = sshll.u32 %s2837_s27, 2 }
  0x10   : > { %s2207_s11 = scalar_lea.vmem %s2825_s0, %s1816_s8  ;;  %761 = vmatpush1.bf16.msra.mxu0 %v1989_v3  ;;  %1955 = vmatpush1.bf16.msra.mxu1 %v1989_v3  ;;  %s2439_s14 = scalar_lea.vmem %s2831_s6, %s1689_s12 }
  0x11   : > { %v1998_v5 = vld [vmem:[%s2207_s11 + $0x4] ss:$8 sps:$4 sm:$0xff]   ;;  %762 = vmatprep.subr.bf16.mxu0 %v2132_v1  ;;  %1947 = vmatprep.subr.bf16.mxu1 %v2132_v1  ;;  %v1996_v12 = vld [vmem:[%s2207_s11] ss:$8 sps:$4 sm:$0xff]   ;;  %v2002_v14 = vld [vmem:[%s2207_s11 + $0x14] ss:$8 sps:$4 sm:$0xff]  }
  0x12   : > { %v2001_v6 = vld [vmem:[%s2207_s11 + $0x84] ss:$8 sps:$4 sm:$0xff]   ;;  %1731 = vmatprep.mubr.msk.bf16.mxu0 %vm707_vm0, %v1998_v5  ;;  %v1999_v13 = vld [vmem:[%s2207_s11 + $0x80] ss:$8 sps:$4 sm:$0xff]   ;;  %v2004_v15 = vld [vmem:[%s2207_s11 + $0x94] ss:$8 sps:$4 sm:$0xff]  }
  0x13   : > { %1739 = vmatprep.mubr.msk.bf16.mxu1 %vm707_vm0, %v2001_v6  ;;  %v2006_v16 = vld [vmem:[%s2207_s11 + $0x10] ss:$8 sps:$4 sm:$0xff]   ;;  %v2008_v18 = vld [vmem:[%s2207_s11 + $0x24] ss:$8 sps:$4 sm:$0xff]   ;;  %v2012_v20 = vld [vmem:[%s2207_s11 + $0x20] ss:$8 sps:$4 sm:$0xff]  }
  0x14   : > { %763 = vmatpush1.bf16.msra.mxu0 %v1990_v4  ;;  %1956 = vmatpush1.bf16.msra.mxu1 %v1990_v4  ;;  %v2007_v17 = vld [vmem:[%s2207_s11 + $0x90] ss:$8 sps:$4 sm:$0xff]   ;;  %v2010_v19 = vld [vmem:[%s2207_s11 + $0xa4] ss:$8 sps:$4 sm:$0xff]   ;;  %v2013_v21 = vld [vmem:[%s2207_s11 + $0xa0] ss:$8 sps:$4 sm:$0xff]  }
  0x15   : > { %764 = vmatprep.subr.bf16.mxu0 %v2132_v1  ;;  %1948 = vmatprep.subr.bf16.mxu1 %v2132_v1  ;;  %v2014_v22 = vld [vmem:[%s2207_s11 + $0x34] ss:$8 sps:$4 sm:$0xff]   ;;  %v2018_v24 = vld [vmem:[%s2207_s11 + $0x30] ss:$8 sps:$4 sm:$0xff]   ;;  %v2020_v26 = vld [vmem:[%s2207_s11 + $0x44] ss:$8 sps:$4 sm:$0xff]  }
  0x16   : > { %v2016_v23 = vld [vmem:[%s2207_s11 + $0xb4] ss:$8 sps:$4 sm:$0xff]   ;;  %v2019_v25 = vld [vmem:[%s2207_s11 + $0xb0] ss:$8 sps:$4 sm:$0xff]   ;;  %v2022_v27 = vld [vmem:[%s2207_s11 + $0xc4] ss:$8 sps:$4 sm:$0xff]  }
  0x17   : > { %v2024_v28 = vld [vmem:[%s2207_s11 + $0x40] ss:$8 sps:$4 sm:$0xff]   ;;  %v2026_v30 = vld [vmem:[%s2207_s11 + $0x54] ss:$8 sps:$4 sm:$0xff]   ;;  %v2030_v32 = vld [vmem:[%s2207_s11 + $0x50] ss:$8 sps:$4 sm:$0xff]  }
  0x18   : > { %765 = vmatpush1.bf16.msra.mxu0 %v1991_v7  ;;  %1957 = vmatpush1.bf16.msra.mxu1 %v1991_v7  ;;  %v2025_v29 = vld [vmem:[%s2207_s11 + $0xc0] ss:$8 sps:$4 sm:$0xff]   ;;  %v2028_v31 = vld [vmem:[%s2207_s11 + $0xd4] ss:$8 sps:$4 sm:$0xff]   ;;  %v2031_v33 = vld [vmem:[%s2207_s11 + $0xd0] ss:$8 sps:$4 sm:$0xff]  }
  0x19   : > { %766 = vmatprep.subr.bf16.mxu0 %v2132_v1  ;;  %1949 = vmatprep.subr.bf16.mxu1 %v2132_v1  ;;  %v2032_v34 = vld [vmem:[%s2207_s11 + $0x64] ss:$8 sps:$4 sm:$0xff]   ;;  %v2036_v36 = vld [vmem:[%s2207_s11 + $0x60] ss:$8 sps:$4 sm:$0xff]   ;;  %v2038_v38 = vld [vmem:[%s2207_s11 + $0x74] ss:$8 sps:$4 sm:$0xff]  }
  0x1a   : > { %v2034_v35 = vld [vmem:[%s2207_s11 + $0xe4] ss:$8 sps:$4 sm:$0xff]   ;;  %v2037_v37 = vld [vmem:[%s2207_s11 + $0xe0] ss:$8 sps:$4 sm:$0xff]   ;;  %v2040_v39 = vld [vmem:[%s2207_s11 + $0xf4] ss:$8 sps:$4 sm:$0xff]  }
  0x1b   : > { %v2042_v40 = vld [vmem:[%s2207_s11 + $0x70] ss:$8 sps:$4 sm:$0xff]   ;;  %v1330_v5 = vsub.s32 0, %v1329_v61 }
  0x1c   : > { %767 = vmatpush1.bf16.msra.mxu0 %v1992_v8  ;;  %1958 = vmatpush1.bf16.msra.mxu1 %v1992_v8  ;;  %v2043_v41 = vld [vmem:[%s2207_s11 + $0xf0] ss:$8 sps:$4 sm:$0xff]  }
  0x1d   : > { %768 = vmatprep.subr.bf16.mxu0 %v2132_v1  ;;  %1950 = vmatprep.subr.bf16.mxu1 %v2132_v1 }
  0x20   : > { %769 = vmatpush1.bf16.msra.mxu0 %v1993_v9  ;;  %1959 = vmatpush1.bf16.msra.mxu1 %v1993_v9 }
  0x21   : > { %770 = vmatprep.subr.bf16.mxu0 %v2132_v1  ;;  %1951 = vmatprep.subr.bf16.mxu1 %v2132_v1 }
  0x24   : > { %771 = vmatpush1.bf16.msra.mxu0 %v1994_v10  ;;  %1960 = vmatpush1.bf16.msra.mxu1 %v1994_v10 }
  0x25   : > { %772 = vmatprep.subr.bf16.mxu0 %v2132_v1  ;;  %1952 = vmatprep.subr.bf16.mxu1 %v2132_v1 }
  0x28   : > { %773 = vmatpush1.bf16.msra.mxu0 %v1995_v11  ;;  %1961 = vmatpush1.bf16.msra.mxu1 %v1995_v11 }
  0x2b   : > { %789 = vmatmul.mubr.bf16.vlgmr.msra.gmra.mrb[0].mxu0 %v1996_v12  ;;  %853 = vmatmul.mubr.bf16.vlgmr.msra.gmra.mrb[0].mxu1 %v1999_v13 }
  0x2c   : > { %1732 = vmatprep.mubr.msk.bf16.mxu0 %vm707_vm0, %v2002_v14  ;;  %1740 = vmatprep.mubr.msk.bf16.mxu1 %vm707_vm0, %v2004_v15 }
  0x33   : > { %797 = vmatmul.mubr.bf16.gmra.mrb[4].mxu0 %v2006_v16  ;;  %861 = vmatmul.mubr.bf16.gmra.mrb[4].mxu1 %v2007_v17  ;;  %v1327_v16 = vsel %vm1326_vm1, 1, %v2132_v1 }
  0x34   : > { %1733 = vmatprep.mubr.msk.bf16.mxu0 %vm707_vm0, %v2008_v18  ;;  %1741 = vmatprep.mubr.msk.bf16.mxu1 %vm707_vm0, %v2010_v19 }
  0x3b   : > { %805 = vmatmul.mubr.bf16.gmra.mrb[8].mxu0 %v2012_v20  ;;  %869 = vmatmul.mubr.bf16.gmra.mrb[8].mxu1 %v2013_v21 }
  0x3c   : > { %1734 = vmatprep.mubr.msk.bf16.mxu0 %vm707_vm0, %v2014_v22  ;;  %1742 = vmatprep.mubr.msk.bf16.mxu1 %vm707_vm0, %v2016_v23 }
  0x43   : > { %813 = vmatmul.mubr.bf16.gmra.mrb[12].mxu0 %v2018_v24  ;;  %877 = vmatmul.mubr.bf16.gmra.mrb[12].mxu1 %v2019_v25 }
  0x44   : > { %1735 = vmatprep.mubr.msk.bf16.mxu0 %vm707_vm0, %v2020_v26  ;;  %1743 = vmatprep.mubr.msk.bf16.mxu1 %vm707_vm0, %v2022_v27 }
  0x4b   : > { %821 = vmatmul.mubr.bf16.gmra.mrb[16].mxu0 %v2024_v28  ;;  %885 = vmatmul.mubr.bf16.gmra.mrb[16].mxu1 %v2025_v29  ;;  %v2358_v28 = vrot.slane %v1327_v16, %v1330_v5 }
  0x4c   : > { %1736 = vmatprep.mubr.msk.bf16.mxu0 %vm707_vm0, %v2026_v30  ;;  %1744 = vmatprep.mubr.msk.bf16.mxu1 %vm707_vm0, %v2028_v31 }
  0x4d   : > { %vm1332_vm2 = vcmp.eq.s32.totalorder %v2358_v28, 1 }
  0x53   : > { %829 = vmatmul.mubr.bf16.gmra.mrb[20].mxu0 %v2030_v32  ;;  %893 = vmatmul.mubr.bf16.gmra.mrb[20].mxu1 %v2031_v33 }
  0x54   : > { %1737 = vmatprep.mubr.msk.bf16.mxu0 %vm707_vm0, %v2032_v34  ;;  %1745 = vmatprep.mubr.msk.bf16.mxu1 %vm707_vm0, %v2034_v35 }
  0x5b   : > { %837 = vmatmul.mubr.bf16.gmra.mrb[24].mxu0 %v2036_v36  ;;  %901 = vmatmul.mubr.bf16.gmra.mrb[24].mxu1 %v2037_v37 }
  0x5c   : > { %1738 = vmatprep.mubr.msk.bf16.mxu0 %vm707_vm0, %v2038_v38  ;;  %1746 = vmatprep.mubr.msk.bf16.mxu1 %vm707_vm0, %v2040_v39 }
  0x63   : > { %845 = vmatmul.mubr.bf16.gmra.mrb[28].mxu0 %v2042_v40  ;;  %909 = vmatmul.mubr.bf16.gmra.mrb[28].mxu1 %v2043_v41 }
  0xfe   : > { %v790_v43 = vpop.f32.mrb[0].mxu0  ;;  %v854_v46 = vpop.f32.mrb[0].mxu1 }
  0xff   : > { %v2298_v47 = vadd.f32 %v2290_v42, %v790_v43  ;;  %v2301_v48 = vadd.f32 %v2290_v42, %v854_v46  ;;  %v792_v49 = vpop.f32.mrb[1].mxu0  ;;  %v856_v50 = vpop.f32.mrb[1].mxu1 }
 0x100   : > { %v793_v52 = vpop.f32.mrb[2].mxu0  ;;  %v857_v53 = vpop.f32.mrb[2].mxu1 }
 0x101   : > { %v1062_v54 = vmul.f32 %v2295_v44, %v2298_v47  ;;  %v1078_v55 = vmul.f32 %v2295_v44, %v2301_v48  ;;  %v2313_v56 = vadd.f32 %v2290_v42, %v793_v52  ;;  %v2316_v57 = vadd.f32 %v2290_v42, %v857_v53  ;;  %v795_v58 = vpop.f32.mrb[3].mxu0  ;;  %v859_v59 = vpop.f32.mrb[3].mxu1 }
 0x103   : > { %v2322_v62 = vadd.f32 %v2306_v51, %v1062_v54  ;;  %v2325_v63 = vadd.f32 %v2306_v51, %v1078_v55  ;;  %v1063_v0 = vmul.f32 %v2295_v44, %v2313_v56  ;;  %v1079_v2 = vmul.f32 %v2295_v44, %v2316_v57 }
 0x105   : > { %v1165_v3 = vmin.f32 %v2322_v62, 0.0  ;;  %v1181_v4 = vmin.f32 %v2325_v63, 0.0  ;;  %v2334_v6 = vadd.f32 %v2306_v51, %v1063_v0  ;;  %v2337_v7 = vadd.f32 %v2306_v51, %v1079_v2 }
 0x106   : > { %v798_v8 = vpop.f32.mrb[4].mxu0  ;;  %v862_v9 = vpop.f32.mrb[4].mxu1  ;;  %vm1133_vm3 = vcmp.gt.f32.partialorder %v2322_v62, 0.0  ;;  %vm1149_vm4 = vcmp.gt.f32.partialorder %v2325_v63, 0.0 }
 0x107   : > { %v1197_v10 = vmul.f32 1.442695, %v1165_v3  ;;  %v1229_v11 = vmul.f32 1.442695, %v1181_v4  ;;  %v2340_v12 = vadd.f32 %v2290_v42, %v798_v8  ;;  %v2343_v13 = vadd.f32 %v2290_v42, %v862_v9  ;;  %v800_v14 = vpop.f32.mrb[5].mxu0  ;;  %v864_v15 = vpop.f32.mrb[5].mxu1 }
 0x108   : > { %v1166_v17 = vmin.f32 %v2334_v6, 0.0  ;;  %v1182_v18 = vmin.f32 %v2337_v7, 0.0  ;;  %v801_v19 = vpop.f32.mrb[6].mxu0  ;;  %v865_v20 = vpop.f32.mrb[6].mxu1  ;;  %vm1134_vm5 = vcmp.gt.f32.partialorder %v2334_v6, 0.0  ;;  %vm1150_vm6 = vcmp.gt.f32.partialorder %v2337_v7, 0.0 }
 0x109   : > { %2044 = vpow2.f32 %v1197_v10  ;;  %v1064_v21 = vmul.f32 %v2295_v44, %v2340_v12  ;;  %v1080_v22 = vmul.f32 %v2295_v44, %v2343_v13  ;;  %v2353_v23 = vadd.f32 %v2290_v42, %v801_v19  ;;  %v803_v24 = vpop.f32.mrb[7].mxu0  ;;  %v867_v25 = vpop.f32.mrb[7].mxu1 }
 0x10a   : > { %2046 = vpow2.f32 %v1229_v11  ;;  %v1199_v1 = vmul.f32 1.442695, %v1166_v17  ;;  %v1231_v26 = vmul.f32 1.442695, %v1182_v18  ;;  %v2356_v27 = vadd.f32 %v2290_v42, %v865_v20 }
 0x10b   : > { %v2361_v29 = vadd.f32 %v2306_v51, %v1064_v21  ;;  %v2364_v30 = vadd.f32 %v2306_v51, %v1080_v22  ;;  %v1065_v31 = vmul.f32 %v2295_v44, %v2353_v23 }
 0x10c   : > { %2048 = vpow2.f32 %v1199_v1  ;;  %v1081_v32 = vmul.f32 %v2295_v44, %v2356_v27 }
 0x10d   : > { %2050 = vpow2.f32 %v1231_v26  ;;  %v1167_v33 = vmin.f32 %v2361_v29, 0.0  ;;  %v1183_v34 = vmin.f32 %v2364_v30, 0.0  ;;  %v2373_v35 = vadd.f32 %v2306_v51, %v1065_v31 }
 0x10e   : > { %v2376_v36 = vadd.f32 %v2306_v51, %v1081_v32  ;;  %v806_v37 = vpop.f32.mrb[8].mxu0  ;;  %v870_v38 = vpop.f32.mrb[8].mxu1  ;;  %vm1135_vm7 = vcmp.gt.f32.partialorder %v2361_v29, 0.0  ;;  %vm1151_vm8 = vcmp.gt.f32.partialorder %v2364_v30, 0.0 }
 0x10f   : > { %v1201_v39 = vmul.f32 1.442695, %v1167_v33  ;;  %v2380_v40 = vadd.f32 %v2290_v42, %v806_v37  ;;  %v2383_v41 = vadd.f32 %v2290_v42, %v870_v38  ;;  %v808_v43 = vpop.f32.mrb[9].mxu0  ;;  %v872_v45 = vpop.f32.mrb[9].mxu1  ;;  %v1233_v46 = vmul.f32 1.442695, %v1183_v34 }
 0x110   : > { %v1168_v49 = vmin.f32 %v2373_v35, 0.0  ;;  %v809_v50 = vpop.f32.mrb[10].mxu0  ;;  %v1184_v52 = vmin.f32 %v2376_v36, 0.0  ;;  %v873_v55 = vpop.f32.mrb[10].mxu1  ;;  %vm1136_vm9 = vcmp.gt.f32.partialorder %v2373_v35, 0.0  ;;  %vm1152_vm10 = vcmp.gt.f32.partialorder %v2376_v36, 0.0 }
 0x111   : > { %2052 = vpow2.f32 %v1201_v39  ;;  %v1066_v53 = vmul.f32 %v2295_v44, %v2380_v40  ;;  %v1082_v54 = vmul.f32 %v2295_v44, %v2383_v41  ;;  %v811_v58 = vpop.f32.mrb[11].mxu0  ;;  %v2394_v60 = vadd.f32 %v2290_v42, %v809_v50  ;;  %v875_v0 = vpop.f32.mrb[11].mxu1 }
 0x112   : > { %2054 = vpow2.f32 %v1233_v46  ;;  %v1203_v59 = vmul.f32 1.442695, %v1168_v49  ;;  %v2397_v61 = vadd.f32 %v2290_v42, %v873_v55  ;;  %v1235_v3 = vmul.f32 1.442695, %v1184_v52 }
 0x113   : > { %v2045_v2 = vpop.eup %2044  ;;  %v2401_v4 = vadd.f32 %v2306_v51, %v1066_v53  ;;  %v2404_v5 = vadd.f32 %v2306_v51, %v1082_v54  ;;  %v1067_v10 = vmul.f32 %v2295_v44, %v2394_v60 }
 0x114   : > { %v2047_v8 = vpop.eup %2046  ;;  %v1750_v9 = vadd.f32 -1.0, %v2045_v2  ;;  %2056 = vpow2.f32 %v1203_v59  ;;  %v1083_v15 = vmul.f32 %v2295_v44, %v2397_v61 }
 0x115   : > { %v1766_v11 = vadd.f32 -1.0, %v2047_v8  ;;  %2058 = vpow2.f32 %v1235_v3  ;;  %v1169_v14 = vmin.f32 %v2401_v4, 0.0  ;;  %v1185_v18 = vmin.f32 %v2404_v5, 0.0 }
 0x116   : > { %v2049_v16 = vpop.eup %2048  ;;  %v1293_v17 = vsel %vm1133_vm3, %v2322_v62, %v1750_v9  ;;  %v2419_v19 = vadd.f32 %v2306_v51, %v1067_v10  ;;  %v814_v20 = vpop.f32.mrb[12].mxu0  ;;  %v2434_v43 = vadd.f32 %v2306_v51, %v1083_v15  ;;  %vm1137_vm11 = vcmp.gt.f32.partialorder %v2401_v4, 0.0 }
 0x117   : > { %v878_v21 = vpop.f32.mrb[12].mxu1  ;;  %v2051_v22 = vpop.eup %2050  ;;  %v1751_v24 = vadd.f32 -1.0, %v2049_v16  ;;  %v1205_v25 = vmul.f32 1.442695, %v1169_v14  ;;  %v1333_v62 = vsel %vm1332_vm2, %v1293_v17, %v2298_v47  ;;  %v1309_v31 = vsel %vm1149_vm4, %v2325_v63, %v1766_v11 }
 0x118   : > { %v816_v1 = vpop.f32.mrb[13].mxu0  ;;  %v880_v26 = vpop.f32.mrb[13].mxu1  ;;  %v1767_v32 = vadd.f32 -1.0, %v2051_v22  ;;  %v1237_v33 = vmul.f32 1.442695, %v1185_v18  ;;  %v1170_v39 = vmin.f32 %v2419_v19, 0.0  ;;  %v2448_v46 = vadd.f32 %v2290_v42, %v814_v20 }
 0x119   : > { %v817_v34 = vpop.f32.mrb[14].mxu0  ;;  %v881_v37 = vpop.f32.mrb[14].mxu1  ;;  %v1294_v38 = vsel %vm1134_vm5, %v2334_v6, %v1751_v24  ;;  %2060 = vpow2.f32 %v1205_v25  ;;  %v1349_v50 = vsel %vm1332_vm2, %v1309_v31, %v2301_v48  ;;  %v2461_v2 = vadd.f32 %v2290_v42, %v878_v21 }
 0x11a   : > { %v819_v47 = vpop.f32.mrb[15].mxu0  ;;  %v883_v45 = vpop.f32.mrb[15].mxu1  ;;  %v1334_v63 = vsel %vm1332_vm2, %v1294_v38, %v2313_v56  ;;  %v1310_v6 = vsel %vm1150_vm6, %v2337_v7, %v1767_v32  ;;  %2062 = vpow2.f32 %v1237_v33  ;;  %v1207_v56 = vmul.f32 1.442695, %v1170_v39 }
 0x11b   : > { %v2053_v49 = vpop.eup %2052  ;;  %v1852_v52 = vpack.c.bf16 %v1334_v63, %v1333_v62  ;;  %v1350_v53 = vsel %vm1332_vm2, %v1310_v6, %v2316_v57  ;;  %v1186_v7 = vmin.f32 %v2434_v43, 0.0  ;;  %v1068_v59 = vmul.f32 %v2295_v44, %v2448_v46 }
 0x11c   : > { %v2055_v54 = vpop.eup %2054  ;;  %v1892_v55 = vpack.c.bf16 %v1350_v53, %v1349_v50  ;;  %v1752_v58 = vadd.f32 -1.0, %v2053_v49  ;;  %2064 = vpow2.f32 %v1207_v56  ;;  %v2464_v48 = vadd.f32 %v2290_v42, %v817_v34 }
 0x11d   : > { %1853 = vst [vmem:[%s2439_s14] sm:$0xff] %v1852_v52   ;;  %v1768_v0 = vadd.f32 -1.0, %v2055_v54  ;;  %v1239_v8 = vmul.f32 1.442695, %v1186_v7  ;;  %v2471_v9 = vadd.f32 %v2306_v51, %v1068_v59  ;;  %v2474_v10 = vadd.f32 %v2290_v42, %v881_v37 }
 0x11e   : > { %v2057_v3 = vpop.eup %2056  ;;  %1936 = vst [vmem:[%s2439_s14 + $0x40] sm:$0xff] %v1892_v55   ;;  %v1295_v57 = vsel %vm1135_vm7, %v2361_v29, %v1752_v58  ;;  %v822_v11 = vpop.f32.mrb[16].mxu0  ;;  %v1084_v17 = vmul.f32 %v2295_v44, %v2461_v2  ;;  %vm1153_vm12 = vcmp.gt.f32.partialorder %v2404_v5, 0.0  ;;  %vm1138_vm13 = vcmp.gt.f32.partialorder %v2419_v19, 0.0 }
 0x11f   : > { %v886_v14 = vpop.f32.mrb[16].mxu1  ;;  %v2059_v15 = vpop.eup %2058  ;;  %v1753_v16 = vadd.f32 -1.0, %v2057_v3  ;;  %v1335_v20 = vsel %vm1332_vm2, %v1295_v57, %v2340_v12  ;;  %v1311_v21 = vsel %vm1151_vm8, %v2364_v30, %v1768_v0  ;;  %2066 = vpow2.f32 %v1239_v8 }
 0x120   : > { %v824_v18 = vpop.f32.mrb[17].mxu0  ;;  %v888_v29 = vpop.f32.mrb[17].mxu1  ;;  %v1769_v22 = vadd.f32 -1.0, %v2059_v15  ;;  %v1171_v26 = vmin.f32 %v2471_v9, 0.0  ;;  %v2491_v62 = vadd.f32 %v2306_v51, %v1084_v17  ;;  %v1069_v12 = vmul.f32 %v2295_v44, %v2464_v48 }
 0x121   : > { %v825_v24 = vpop.f32.mrb[18].mxu0  ;;  %v889_v25 = vpop.f32.mrb[18].mxu1  ;;  %v1296_v1 = vsel %vm1136_vm9, %v2373_v35, %v1753_v16  ;;  %v1085_v35 = vmul.f32 %v2295_v44, %v2474_v10  ;;  %v2504_v34 = vadd.f32 %v2290_v42, %v822_v11  ;;  %v1351_v38 = vsel %vm1332_vm2, %v1311_v21, %v2343_v13 }
 0x122   : > { %v827_v31 = vpop.f32.mrb[19].mxu0  ;;  %v891_v32 = vpop.f32.mrb[19].mxu1  ;;  %v1336_v30 = vsel %vm1332_vm2, %v1296_v1, %v2353_v23  ;;  %v1312_v33 = vsel %vm1152_vm10, %v2376_v36, %v1769_v22  ;;  %v1209_v47 = vmul.f32 1.442695, %v1171_v26  ;;  %v1187_v6 = vmin.f32 %v2491_v62, 0.0 }
 0x123   : > { %v2061_v37 = vpop.eup %2060  ;;  %v1857_v39 = vpack.c.bf16 %v1336_v30, %v1335_v20  ;;  %v1352_v23 = vsel %vm1332_vm2, %v1312_v33, %v2356_v27  ;;  %v2514_v49 = vadd.f32 %v2306_v51, %v1069_v12  ;;  %v2518_v52 = vadd.f32 %v2306_v51, %v1085_v35 }
 0x124   : > { %v2063_v45 = vpop.eup %2062  ;;  %v1897_v36 = vpack.c.bf16 %v1352_v23, %v1351_v38  ;;  %v1754_v63 = vadd.f32 -1.0, %v2061_v37  ;;  %2068 = vpow2.f32 %v1209_v47  ;;  %v1070_v13 = vmul.f32 %v2295_v44, %v2504_v34 }
 0x125   : > { %1929 = vst [vmem:[%s2439_s14 + $0x8] sm:$0xff] %v1857_v39   ;;  %v1770_v50 = vadd.f32 -1.0, %v2063_v45  ;;  %v1241_v53 = vmul.f32 1.442695, %v1187_v6  ;;  %v1172_v56 = vmin.f32 %v2514_v49, 0.0  ;;  %vm1154_vm14 = vcmp.gt.f32.partialorder %v2434_v43, 0.0 }
 0x126   : > { %1937 = vst [vmem:[%s2439_s14 + $0x48] sm:$0xff] %v1897_v36   ;;  %v1297_v27 = vsel %vm1137_vm11, %v2401_v4, %v1754_v63  ;;  %v830_v54 = vpop.f32.mrb[20].mxu0  ;;  %v894_v55 = vpop.f32.mrb[20].mxu1  ;;  %v1188_v59 = vmin.f32 %v2518_v52, 0.0  ;;  %v2543_v17 = vadd.f32 %v2290_v42, %v886_v14  ;;  %v2546_v18 = vadd.f32 %v2290_v42, %v825_v24 }
 0x127   : > { %v2065_v58 = vpop.eup %2064  ;;  %v1337_v7 = vsel %vm1332_vm2, %v1297_v27, %v2380_v40  ;;  %v832_v0 = vpop.f32.mrb[21].mxu0  ;;  %v1313_v3 = vsel %vm1153_vm12, %v2404_v5, %v1770_v50  ;;  %2070 = vpow2.f32 %v1241_v53  ;;  %v1211_v8 = vmul.f32 1.442695, %v1172_v56 }
 0x128   : > { %v896_v4 = vpop.f32.mrb[21].mxu1  ;;  %v1755_v57 = vadd.f32 -1.0, %v2065_v58  ;;  %v2535_v11 = vpop.f32.mrb[22].mxu0  ;;  %v1243_v16 = vmul.f32 1.442695, %v1188_v59  ;;  %v2540_v40 = vadd.f32 %v2306_v51, %v1070_v13  ;;  %v2552_v22 = vadd.f32 %v2290_v42, %v889_v25 }
 0x129   : > { %v2537_v15 = vpop.f32.mrb[22].mxu1  ;;  %v835_v29 = vpop.f32.mrb[23].mxu0  ;;  %2072 = vpow2.f32 %v1211_v8  ;;  %v2555_v1 = vadd.f32 %v2290_v42, %v830_v54  ;;  %v1353_v14 = vsel %vm1332_vm2, %v1313_v3, %v2383_v41  ;;  %v1086_v25 = vmul.f32 %v2295_v44, %v2543_v17 }
 0x12a   : > { %v899_v20 = vpop.f32.mrb[23].mxu1  ;;  %v2067_v5 = vpop.eup %2066  ;;  %v1298_v21 = vsel %vm1138_vm13, %v2419_v19, %v1755_v57  ;;  %2074 = vpow2.f32 %v1243_v16  ;;  %v1173_v19 = vmin.f32 %v2540_v40, 0.0  ;;  %v1071_v31 = vmul.f32 %v2295_v44, %v2546_v18 }
 0x12b   : > { %v1338_v24 = vsel %vm1332_vm2, %v1298_v21, %v2394_v60  ;;  %v1771_v26 = vadd.f32 -1.0, %v2067_v5  ;;  %v1087_v41 = vmul.f32 %v2295_v44, %v2552_v22  ;;  %v1072_v60 = vmul.f32 %v2295_v44, %v2555_v1 }
 0x12c   : > { %v1862_v12 = vpack.c.bf16 %v1338_v24, %v1337_v7  ;;  %v2576_v30 = vadd.f32 %v2290_v42, %v894_v55  ;;  %v1213_v35 = vmul.f32 1.442695, %v1173_v19  ;;  %v2583_v37 = vadd.f32 %v2306_v51, %v1086_v25 }
 0x12d   : > { %v1314_v32 = vsel %vm1154_vm14, %v2434_v43, %v1771_v26  ;;  %v2586_v43 = vadd.f32 %v2306_v51, %v1071_v31  ;;  %v2591_v45 = vadd.f32 %v2306_v51, %v1087_v41  ;;  %v2594_v36 = vadd.f32 %v2306_v51, %v1072_v60 }
 0x12e   : > { %1930 = vst [vmem:[%s2439_s14 + $0x10] sm:$0xff] %v1862_v12   ;;  %v1354_v33 = vsel %vm1332_vm2, %v1314_v32, %v2397_v61  ;;  %v838_v38 = vpop.f32.mrb[24].mxu0  ;;  %v2588_v39 = vpop.f32.mrb[24].mxu1  ;;  %2076 = vpow2.f32 %v1213_v35  ;;  %v1189_v50 = vmin.f32 %v2583_v37, 0.0  ;;  %v1088_v13 = vmul.f32 %v2295_v44, %v2576_v30 }
 0x12f   : > { %v2069_v23 = vpop.eup %2068  ;;  %v1902_v47 = vpack.c.bf16 %v1354_v33, %v1353_v14  ;;  %v840_v61 = vpop.f32.mrb[25].mxu0  ;;  %vm1139_vm15 = vcmp.gt.f32.partialorder %v2471_v9, 0.0  ;;  %vm1155_vm0 = vcmp.gt.f32.partialorder %v2491_v62, 0.0  ;;  %v1174_v56 = vmin.f32 %v2586_v43, 0.0 }
 0x130   : > { %v904_v63 = vpop.f32.mrb[25].mxu1  ;;  %v1756_v6 = vadd.f32 -1.0, %v2069_v23  ;;  %v2599_v27 = vpop.f32.mrb[26].mxu0  ;;  %v1190_v54 = vmin.f32 %v2591_v45, 0.0  ;;  %vm1140_vm1 = vcmp.gt.f32.partialorder %v2514_v49, 0.0  ;;  %vm1156_vm3 = vcmp.gt.f32.partialorder %v2518_v52, 0.0 }
 0x131   : > { %v2601_v53 = vpop.f32.mrb[26].mxu1  ;;  %1938 = vst [vmem:[%s2439_s14 + $0x50] sm:$0xff] %v1902_v47   ;;  %v843_v55 = vpop.f32.mrb[27].mxu0  ;;  %v1245_v59 = vmul.f32 1.442695, %v1189_v50  ;;  %v1175_v0 = vmin.f32 %v2594_v36, 0.0  ;;  %v2613_v20 = vadd.f32 %v2306_v51, %v1088_v13  ;;  %v2617_v5 = vadd.f32 %v2290_v42, %v2535_v11 }
 0x132   : > { %v907_v58 = vpop.f32.mrb[27].mxu1  ;;  %v2071_v7 = vpop.eup %2070  ;;  %v1299_v4 = vsel %vm1139_vm15, %v2471_v9, %v1756_v6  ;;  %v1215_v57 = vmul.f32 1.442695, %v1174_v56  ;;  %v1247_v8 = vmul.f32 1.442695, %v1190_v54  ;;  %v2624_v9 = vadd.f32 %v2290_v42, %v2537_v15 }
 0x133   : > { %v1772_v3 = vadd.f32 -1.0, %v2071_v7  ;;  %v2073_v16 = vpop.eup %2072  ;;  %2078 = vpow2.f32 %v1245_v59  ;;  %v1217_v29 = vmul.f32 1.442695, %v1175_v0  ;;  %v1339_v26 = vsel %vm1332_vm2, %v1299_v4, %v2448_v46 }
 0x134   : > { %v2075_v21 = vpop.eup %2074  ;;  %v1757_v24 = vadd.f32 -1.0, %v2073_v16  ;;  %2080 = vpow2.f32 %v1215_v57  ;;  %v1191_v15 = vmin.f32 %v2613_v20, 0.0  ;;  %v1073_v46 = vmul.f32 %v2295_v44, %v2617_v5 }
 0x135   : > { %v1315_v14 = vsel %vm1155_vm0, %v2491_v62, %v1772_v3  ;;  %v1773_v12 = vadd.f32 -1.0, %v2075_v21  ;;  %2082 = vpow2.f32 %v1247_v8  ;;  %v2651_v60 = vadd.f32 %v2290_v42, %v838_v38 }
 0x136   : > { %v1355_v11 = vsel %vm1332_vm2, %v1315_v14, %v2461_v2  ;;  %v2632_v19 = vpop.f32.mrb[28].mxu0  ;;  %v2634_v25 = vpop.f32.mrb[28].mxu1  ;;  %v1300_v62 = vsel %vm1140_vm1, %v2514_v49, %v1757_v24  ;;  %2084 = vpow2.f32 %v1217_v29  ;;  %v1089_v49 = vmul.f32 %v2295_v44, %v2624_v9 }
 0x137   : > { %v848_v31 = vpop.f32.mrb[29].mxu0  ;;  %v912_v32 = vpop.f32.mrb[29].mxu1  ;;  %v1340_v2 = vsel %vm1332_vm2, %v1300_v62, %v2464_v48  ;;  %v1316_v41 = vsel %vm1156_vm3, %v2518_v52, %v1773_v12  ;;  %v1249_v47 = vmul.f32 1.442695, %v1191_v15  ;;  %v2661_v52 = vadd.f32 %v2306_v51, %v1073_v46 }
 0x138   : > { %v2653_v33 = vpop.f32.mrb[30].mxu0  ;;  %v2655_v35 = vpop.f32.mrb[30].mxu1  ;;  %v1867_v23 = vpack.c.bf16 %v1340_v2, %v1339_v26  ;;  %v1356_v48 = vsel %vm1332_vm2, %v1316_v41, %v2474_v10  ;;  %v2664_v38 = vadd.f32 %v2306_v51, %v1089_v49  ;;  %v1074_v13 = vmul.f32 %v2295_v44, %v2651_v60 }
 0x139   : > { %v851_v61 = vpop.f32.mrb[31].mxu0  ;;  %v915_v63 = vpop.f32.mrb[31].mxu1  ;;  %v1907_v50 = vpack.c.bf16 %v1356_v48, %v1355_v11  ;;  %v2670_v56 = vadd.f32 %v2290_v42, %v2588_v39  ;;  %2086 = vpow2.f32 %v1249_v47  ;;  %v1176_v54 = vmin.f32 %v2661_v52, 0.0 }
 0x13a   : > { %v2077_v6 = vpop.eup %2076  ;;  %1931 = vst [vmem:[%s2439_s14 + $0x18] sm:$0xff] %v1867_v23   ;;  %v1192_v55 = vmin.f32 %v2664_v38, 0.0  ;;  %v2677_v58 = vadd.f32 %v2306_v51, %v1074_v13  ;;  %vm1141_vm4 = vcmp.gt.f32.partialorder %v2540_v40, 0.0  ;;  %v2684_v39 = vadd.f32 %v2290_v42, %v2599_v27 }
 0x13b   : > { %v1758_v10 = vadd.f32 -1.0, %v2077_v6  ;;  %1939 = vst [vmem:[%s2439_s14 + $0x58] sm:$0xff] %v1907_v50   ;;  %v1090_v7 = vmul.f32 %v2295_v44, %v2670_v56  ;;  %v1219_v59 = vmul.f32 1.442695, %v1176_v54  ;;  %v2688_v0 = vadd.f32 %v2290_v42, %v2601_v53 }
 0x13c   : > { %vm1157_vm5 = vcmp.gt.f32.partialorder %v2583_v37, 0.0  ;;  %v1251_v57 = vmul.f32 1.442695, %v1192_v55  ;;  %v1177_v8 = vmin.f32 %v2677_v58, 0.0  ;;  %v1075_v27 = vmul.f32 %v2295_v44, %v2684_v39 }
 0x13d   : > { %v2079_v4 = vpop.eup %2078  ;;  %v1301_v3 = vsel %vm1141_vm4, %v2540_v40, %v1758_v10  ;;  %2088 = vpow2.f32 %v1219_v59  ;;  %v2694_v21 = vadd.f32 %v2306_v51, %v1090_v7  ;;  %v1091_v40 = vmul.f32 %v2295_v44, %v2688_v0 }
 0x13e   : > { %v2081_v16 = vpop.eup %2080  ;;  %v1774_v29 = vadd.f32 -1.0, %v2079_v4  ;;  %2090 = vpow2.f32 %v1251_v57  ;;  %v1221_v24 = vmul.f32 1.442695, %v1177_v8  ;;  %vm1142_vm6 = vcmp.gt.f32.partialorder %v2586_v43, 0.0 }
 0x13f   : > { %v2083_v14 = vpop.eup %2082  ;;  %v1759_v53 = vadd.f32 -1.0, %v2081_v16  ;;  %v1193_v62 = vmin.f32 %v2694_v21, 0.0  ;;  %v1341_v15 = vsel %vm1332_vm2, %v1301_v3, %v2504_v34  ;;  %vm1158_vm7 = vcmp.gt.f32.partialorder %v2591_v45, 0.0 }
 0x140   : > { %v2085_v26 = vpop.eup %2084  ;;  %v1317_v11 = vsel %vm1157_vm5, %v2583_v37, %v1774_v29  ;;  %v1775_v12 = vadd.f32 -1.0, %v2083_v14  ;;  %v2716_v41 = vadd.f32 %v2306_v51, %v1075_v27  ;;  %2092 = vpow2.f32 %v1221_v24 }
 0x141   : > { %v1357_v46 = vsel %vm1332_vm2, %v1317_v11, %v2543_v17  ;;  %v1302_v31 = vsel %vm1142_vm6, %v2586_v43, %v1759_v53  ;;  %v1253_v2 = vmul.f32 1.442695, %v1193_v62  ;;  %v2722_v43 = vadd.f32 %v2306_v51, %v1091_v40 }
 0x142   : > { %v1342_v37 = vsel %vm1332_vm2, %v1302_v31, %v2546_v18  ;;  %v1318_v32 = vsel %vm1158_vm7, %v2591_v45, %v1775_v12  ;;  %v1760_v48 = vadd.f32 -1.0, %v2085_v26  ;;  %vm1143_vm8 = vcmp.gt.f32.partialorder %v2594_v36, 0.0 }
 0x143   : > { %v1872_v34 = vpack.c.bf16 %v1342_v37, %v1341_v15  ;;  %v1358_v17 = vsel %vm1332_vm2, %v1318_v32, %v2552_v22  ;;  %v2087_v49 = vpop.eup %2086  ;;  %2094 = vpow2.f32 %v1253_v2  ;;  %v1178_v45 = vmin.f32 %v2716_v41, 0.0 }
 0x144   : > { %v1912_v23 = vpack.c.bf16 %v1358_v17, %v1357_v46  ;;  %v1776_v18 = vadd.f32 -1.0, %v2087_v49  ;;  %v1194_v47 = vmin.f32 %v2722_v43, 0.0  ;;  %v2731_v22 = vadd.f32 %v2290_v42, %v2632_v19 }
 0x145   : > { %1932 = vst [vmem:[%s2439_s14 + $0x20] sm:$0xff] %v1872_v34   ;;  %v2735_v61 = vadd.f32 %v2290_v42, %v2634_v25  ;;  %v2739_v63 = vadd.f32 %v2290_v42, %v2653_v33  ;;  %v2743_v6 = vadd.f32 %v2290_v42, %v2655_v35  ;;  %vm1159_vm9 = vcmp.gt.f32.partialorder %v2613_v20, 0.0 }
 0x146   : > { %1940 = vst [vmem:[%s2439_s14 + $0x60] sm:$0xff] %v1912_v23   ;;  %vm1144_vm10 = vcmp.gt.f32.partialorder %v2661_v52, 0.0  ;;  %v1223_v50 = vmul.f32 1.442695, %v1178_v45  ;;  %v1255_v13 = vmul.f32 1.442695, %v1194_v47  ;;  %v1303_v10 = vsel %vm1143_vm8, %v2594_v36, %v1760_v48 }
 0x147   : > { %v2089_v19 = vpop.eup %2088  ;;  %v1076_v25 = vmul.f32 %v2295_v44, %v2731_v22  ;;  %v1092_v33 = vmul.f32 %v2295_v44, %v2735_v61  ;;  %v1077_v54 = vmul.f32 %v2295_v44, %v2739_v63  ;;  %v1319_v35 = vsel %vm1159_vm9, %v2613_v20, %v1776_v18 }
 0x148   : > { %v2091_v42 = vpop.eup %2090  ;;  %v1761_v55 = vadd.f32 -1.0, %v2089_v19  ;;  %2096 = vpow2.f32 %v1223_v50  ;;  %v1093_v7 = vmul.f32 %v2295_v44, %v2743_v6  ;;  %vm1160_vm11 = vcmp.gt.f32.partialorder %v2664_v38, 0.0 }
 0x149   : > { %v1777_v59 = vadd.f32 -1.0, %v2091_v42  ;;  %2098 = vpow2.f32 %v1255_v13  ;;  %v1115_v36 = vadd.f32 %v2306_v51, %v1076_v25  ;;  %v1131_v4 = vadd.f32 %v2306_v51, %v1092_v33 }
 0x14a   : > { %v1304_v3 = vsel %vm1144_vm10, %v2661_v52, %v1761_v55  ;;  %v1116_v20 = vadd.f32 %v2306_v51, %v1077_v54  ;;  %v1343_v44 = vsel %vm1332_vm2, %v1303_v10, %v2555_v1  ;;  %v1132_v16 = vadd.f32 %v2306_v51, %v1093_v7  ;;  %v2093_v29 = vpop.eup %2092 }
 0x14b   : > { %v1344_v57 = vsel %vm1332_vm2, %v1304_v3, %v2617_v5  ;;  %v1320_v8 = vsel %vm1160_vm11, %v2664_v38, %v1777_v59  ;;  %v1359_v52 = vsel %vm1332_vm2, %v1319_v35, %v2576_v30  ;;  %v1179_v53 = vmin.f32 %v1115_v36, 0.0 }
 0x14c   : > { %v1877_v27 = vpack.c.bf16 %v1344_v57, %v1343_v44  ;;  %v1360_v14 = vsel %vm1332_vm2, %v1320_v8, %v2624_v9  ;;  %v1195_v40 = vmin.f32 %v1131_v4, 0.0  ;;  %v1180_v26 = vmin.f32 %v1116_v20, 0.0 }
 0x14d   : > { %v2095_v1 = vpop.eup %2094  ;;  %v1917_v24 = vpack.c.bf16 %v1360_v14, %v1359_v52  ;;  %v1225_v5 = vmul.f32 1.442695, %v1179_v53  ;;  %v1762_v38 = vadd.f32 -1.0, %v2093_v29  ;;  %v1196_v11 = vmin.f32 %v1132_v16, 0.0 }
 0x14e   : > { %1933 = vst [vmem:[%s2439_s14 + $0x28] sm:$0xff] %v1877_v27   ;;  %v1257_v51 = vmul.f32 1.442695, %v1195_v40  ;;  %v1778_v12 = vadd.f32 -1.0, %v2095_v1  ;;  %v1227_v62 = vmul.f32 1.442695, %v1180_v26 }
 0x14f   : > { %1941 = vst [vmem:[%s2439_s14 + $0x68] sm:$0xff] %v1917_v24   ;;  %2100 = vpow2.f32 %v1225_v5  ;;  %v1259_v30 = vmul.f32 1.442695, %v1196_v11  ;;  %vm1145_vm12 = vcmp.gt.f32.partialorder %v2677_v58, 0.0  ;;  %vm1161_vm13 = vcmp.gt.f32.partialorder %v2694_v21, 0.0 }
 0x150   : > { %2102 = vpow2.f32 %v1257_v51  ;;  %v1305_v46 = vsel %vm1145_vm12, %v2677_v58, %v1762_v38  ;;  %v1321_v37 = vsel %vm1161_vm13, %v2694_v21, %v1778_v12  ;;  %vm1146_vm14 = vcmp.gt.f32.partialorder %v2716_v41, 0.0 }
 0x151   : > { %2104 = vpow2.f32 %v1227_v62  ;;  %vm1162_vm15 = vcmp.gt.f32.partialorder %v2722_v43, 0.0  ;;  %v1345_v34 = vsel %vm1332_vm2, %v1305_v46, %v2651_v60  ;;  %v1361_v21 = vsel %vm1332_vm2, %v1321_v37, %v2670_v56 }
 0x152   : > { %v2097_v15 = vpop.eup %2096  ;;  %2106 = vpow2.f32 %v1259_v30  ;;  %vm1147_vm0 = vcmp.gt.f32.partialorder %v1115_v36, 0.0  ;;  %vm1163_vm1 = vcmp.gt.f32.partialorder %v1131_v4, 0.0  ;;  %vm1148_vm3 = vcmp.gt.f32.partialorder %v1116_v20, 0.0 }
 0x153   : > { %v2099_v9 = vpop.eup %2098  ;;  %v1763_v31 = vadd.f32 -1.0, %v2097_v15  ;;  %vm1164_vm4 = vcmp.gt.f32.partialorder %v1132_v16, 0.0 }
 0x154   : > { %v1779_v32 = vadd.f32 -1.0, %v2099_v9 }
 0x155   : > { %v1306_v2 = vsel %vm1146_vm14, %v2716_v41, %v1763_v31 }
 0x156   : > { %v1346_v58 = vsel %vm1332_vm2, %v1306_v2, %v2684_v39  ;;  %v1322_v17 = vsel %vm1162_vm15, %v2722_v43, %v1779_v32 }
 0x157   : > { %v1882_v49 = vpack.c.bf16 %v1346_v58, %v1345_v34  ;;  %v1362_v41 = vsel %vm1332_vm2, %v1322_v17, %v2688_v0 }
 0x158   : > { %v1922_v23 = vpack.c.bf16 %v1362_v41, %v1361_v21 }
 0x159   : > { %1934 = vst [vmem:[%s2439_s14 + $0x30] sm:$0xff] %v1882_v49   ;;  %v2101_v48 = vpop.eup %2100 }
 0x15a   : > { %1942 = vst [vmem:[%s2439_s14 + $0x70] sm:$0xff] %v1922_v23   ;;  %v2103_v60 = vpop.eup %2102  ;;  %v1764_v18 = vadd.f32 -1.0, %v2101_v48 }
 0x15b   : > { %v2105_v45 = vpop.eup %2104  ;;  %v1780_v39 = vadd.f32 -1.0, %v2103_v60 }
 0x15c   : > { %v2107_v47 = vpop.eup %2106  ;;  %v1307_v43 = vsel %vm1147_vm0, %v1115_v36, %v1764_v18  ;;  %v1765_v56 = vadd.f32 -1.0, %v2105_v45 }
 0x15d   : > { %v1323_v50 = vsel %vm1163_vm1, %v1131_v4, %v1780_v39  ;;  %v1781_v13 = vadd.f32 -1.0, %v2107_v47  ;;  %v1347_v0 = vsel %vm1332_vm2, %v1307_v43, %v2731_v22 }
 0x15e   : > { %v1308_v19 = vsel %vm1148_vm3, %v1116_v20, %v1765_v56  ;;  %v1363_v33 = vsel %vm1332_vm2, %v1323_v50, %v2735_v61 }
 0x15f   : > { %v1348_v10 = vsel %vm1332_vm2, %v1308_v19, %v2739_v63  ;;  %v1324_v25 = vsel %vm1164_vm4, %v1132_v16, %v1781_v13 }
 0x160   : > { %v1887_v54 = vpack.c.bf16 %v1348_v10, %v1347_v0  ;;  %v1364_v42 = vsel %vm1332_vm2, %v1324_v25, %v2743_v6 }
 0x161   : > { %v1927_v35 = vpack.c.bf16 %v1364_v42, %v1363_v33 }
 0x162   : > { %1935 = vst [vmem:[%s2439_s14 + $0x38] sm:$0xff] %v1887_v54  }
 0x163   : > { %1943 = vst [vmem:[%s2439_s14 + $0x78] sm:$0xff] %v1927_v35  }
 0x164 PF: > { %s16_s23 = sadd.s32 1, %s2130_s23   ;;  %s2832_s21 = smov %s2126_s22 }
 0x165   : > { %p13_p5 = scmp.ge.s32.totalorder %s16_s23, 4   ;;  %s2833_s22 = smov %s2835_s24 }
 0x167   :  { %15 = sbr.rel (!%p13_p5) target bundleno = 2 (0x2), region = 97 }

// kernel: _lambda_.34
= control target key start
LH: loop header
LB: loop body
LE: loop exit
PB: predicated region body
PF: predicated region fallthrough
CT: control target
= control target key end

     0   :  { %s2317_s24 = smov 0   ;;  %s2319_s25 = smov 0   ;;  %s3077_s0 = inlined_call_operand.vmem [shape: bf16[512,72], index: 0, kind: input, shape index: {}]   ;;  %s3078_s1 = inlined_call_operand.vmem [shape: bf16[72,128], index: 1, kind: input, shape index: {}]   ;;  %s3079_s2 = inlined_call_operand.vmem [shape: f32[1,128], index: 2, kind: input, shape index: {}]   ;;  %s3080_s3 = inlined_call_operand.vmem [shape: f32[1,128], index: 3, kind: input, shape index: {}, may-alias: {3,5}]   ;;  %s3081_s4 = inlined_call_operand.vmem [shape: f32[1,128], index: 4, kind: input, shape index: {}]   ;;  %s3082_s5 = inlined_call_operand.vmem [shape: f32[1,128], index: 5, kind: input, shape index: {}, may-alias: {3,5}]   ;;  %s3083_s6 = inlined_call_operand.vmem [shape: bf16[512,128], index: 6, kind: input, shape index: {}]   ;;  %s3084_s7 = inlined_call_operand.vmem [shape: bf16[512,128], index: 7, kind: output, shape index: {}]  }
   0x1   :  { %s2321_s26 = smov 0  }
   0x2 LB: > { %s36_s27 = sadd.s32 1, %s2270_s25  ;;  %p1748_p0 = scmp.ge.s32.totalorder %s2274_s26, 1  ;;  %s2274_s26 = sphi %s2321_s26, %s17_s26   ;;  %s2270_s25 = sphi %s2319_s25, %s3106_s25   ;;  %s2266_s24 = sphi %s2317_s24, %s3105_s24  }
   0x3   : > { %p38_p1 = scmp.ge.s32.totalorder %s36_s27, 2  ;;  %p328_p2 = scmp.lt.s32.totalorder %s2274_s26, 3 }
   0x5   : > { %s3108_s27 = smov (%p38_p1, %s36_s27), 0  ;;  %p329_p3 = pnand %p1748_p0, %p328_p2 }
   0x7   : > { %332 = sbr.rel (%p329_p3) target bundleno = 359 (0x167), region = 48 }
   0xe   : > { %v2167_v0 = vld [vmem:[%s3078_s1] sm:$0xff]   ;;  %v2168_v1 = vld [vmem:[%s3078_s1 + $0x8] sm:$0xff]   ;;  %s1749_s9 = sshll.u32 %s2266_s24, 5  ;;  %v2169_v2 = vld [vmem:[%s3078_s1 + $0x10] sm:$0xff]   ;;  %vm659_vm0 = vcmask 588800   ;;  %vm708_vm1 = vcmask 1043456   ;;  %v1380_v22 = vlaneseq }
   0xf   : > { %2088 = vmatprep.subr.bf16.mxu0 %v2167_v0  ;;  %2130 = vmatprep.subr.bf16.mxu1 %v2167_v0  ;;  %p395_p4 = scmp.lt.s32.totalorder %s1749_s9, 63  ;;  %v2170_v3 = vld [vmem:[%s3078_s1 + $0x18] sm:$0xff]   ;;  %v2171_v6 = vld [vmem:[%s3078_s1 + $0x20] ss:$0 sps:$4 sm:$0xff]   ;;  %v2276_v35 = vmov 0  }
  0x10   : > { %2089 = vmatpush3.bf16.msra.mxu0 %v2167_v0  ;;  %2135 = vmatpush3.bf16.msra.mxu1 %v2167_v0  ;;  %v710_v7 = vsel %vm708_vm1, %v2171_v6, 0  ;;  %v1377_v23 = vld [vmem:[%s3082_s5] sm:$0x1]  ;;  %v1381_v24 = vshrl.u32 %v1380_v22, 7 }
  0x11   : > { %2090 = vmatprep.subr.bf16.mxu0 %v2168_v1  ;;  %2131 = vmatprep.subr.bf16.mxu1 %v2168_v1  ;;  %s3110_s9 = smov (!%p395_p4, %s1749_s9), 63  ;;  %vm1378_vm2 = vcmp.gt.f32.partialorder %v1377_v23, 0.5  ;;  %v2415_v33 = vld [vmem:[%s3079_s2] ss:$0 sm:$0xff] }
  0x12   : > { %s2344_s12 = sshll.u32 %s3110_s9, 2  ;;  %v1382_v29 = vsub.s32 0, %v1381_v24  ;;  %v1379_v36 = vsel %vm1378_vm2, 1, %v2276_v35  ;;  %v2431_v56 = vld [vmem:[%s3080_s3] ss:$0 sm:$0xff] }
  0x13   : > { %s2353_s17 = scalar_lea.vmem %s3077_s0, %s2344_s12  ;;  %s2394_s22 = scalar_lea.vmem %s3083_s6, %s2344_s12 }
  0x14   : > { %2091 = vmatpush3.bf16.msra.mxu0 %v2168_v1  ;;  %2136 = vmatpush3.bf16.msra.mxu1 %v2168_v1  ;;  %v2172_v4 = vld [vmem:[%s2353_s17] sm:$0xff]   ;;  %v2174_v8 = vld [vmem:[%s2353_s17 + $0x8] sm:$0xff]   ;;  %v2176_v10 = vld [vmem:[%s2353_s17 + $0x10] sm:$0xff]   ;;  %v2424_v51 = vrot.slane %v1379_v36, %v1382_v29  ;;  %s2668_s14 = scalar_lea.vmem %s3084_s7, %s2344_s12 }
  0x15   : > { %2092 = vmatprep.subr.bf16.mxu0 %v2169_v2  ;;  %2132 = vmatprep.subr.bf16.mxu1 %v2169_v2  ;;  %v2173_v5 = vld [vmem:[%s2353_s17 + $0x40] sm:$0xff]   ;;  %v2175_v9 = vld [vmem:[%s2353_s17 + $0x48] sm:$0xff]   ;;  %v2177_v11 = vld [vmem:[%s2353_s17 + $0x50] sm:$0xff]  }
  0x16   : > { %2098 = vmatprep.mubr.msk.bf16.mxu0 %vm659_vm0, %v2172_v4  ;;  %2114 = vmatprep.mubr.msk.bf16.mxu1 %vm659_vm0, %v2173_v5  ;;  %v2178_v12 = vld [vmem:[%s2353_s17 + $0x18] sm:$0xff]   ;;  %v2180_v14 = vld [vmem:[%s2353_s17 + $0x20] sm:$0xff]   ;;  %v2182_v16 = vld [vmem:[%s2353_s17 + $0x28] sm:$0xff]   ;;  %vm1384_vm4 = vcmp.eq.s32.totalorder %v2424_v51, 1 }
  0x17   : > { %v2179_v13 = vld [vmem:[%s2353_s17 + $0x58] sm:$0xff]   ;;  %v2181_v15 = vld [vmem:[%s2353_s17 + $0x60] sm:$0xff]   ;;  %v2183_v17 = vld [vmem:[%s2353_s17 + $0x68] sm:$0xff]  }
  0x18   : > { %2093 = vmatpush3.bf16.msra.mxu0 %v2169_v2  ;;  %2137 = vmatpush3.bf16.msra.mxu1 %v2169_v2  ;;  %v2184_v18 = vld [vmem:[%s2353_s17 + $0x30] sm:$0xff]   ;;  %v2186_v20 = vld [vmem:[%s2353_s17 + $0x38] sm:$0xff]   ;;  %v2037_v25 = vld [vmem:[%s2394_s22 + $0x8] sm:$0xff]  }
  0x19   : > { %2094 = vmatprep.subr.bf16.mxu0 %v2170_v3  ;;  %2133 = vmatprep.subr.bf16.mxu1 %v2170_v3  ;;  %v2185_v19 = vld [vmem:[%s2353_s17 + $0x70] sm:$0xff]   ;;  %v2187_v21 = vld [vmem:[%s2353_s17 + $0x78] sm:$0xff]   ;;  %v2045_v26 = vld [vmem:[%s2394_s22 + $0x48] sm:$0xff]   ;;  %v1899_v34 = vunpack.c.l.bf16 %v2037_v25  ;;  %v1900_v41 = vunpack.c.h.bf16 %v2037_v25 }
  0x1a   : > { %v1894_v27 = vld [vmem:[%s2394_s22] sm:$0xff]   ;;  %v2404_v30 = vld [vmem:[%s2394_s22 + $0x18] sm:$0xff]   ;;  %v2410_v32 = vld [vmem:[%s2394_s22 + $0x10] sm:$0xff]   ;;  %v1931_v37 = vunpack.c.l.bf16 %v2045_v26  ;;  %v1932_v42 = vunpack.c.h.bf16 %v2045_v26 }
  0x1b   : > { %v2044_v28 = vld [vmem:[%s2394_s22 + $0x40] sm:$0xff]   ;;  %v2407_v31 = vld [vmem:[%s2394_s22 + $0x58] sm:$0xff]   ;;  %v1895_v38 = vunpack.c.l.bf16 %v1894_v27  ;;  %v2418_v39 = vld [vmem:[%s2394_s22 + $0x50] sm:$0xff]   ;;  %v1896_v43 = vunpack.c.h.bf16 %v1894_v27  ;;  %v1907_v47 = vunpack.c.l.bf16 %v2404_v30  ;;  %v1903_v49 = vunpack.c.l.bf16 %v2410_v32 }
  0x1c   : > { %2095 = vmatpush3.bf16.msra.mxu0 %v2170_v3  ;;  %2138 = vmatpush3.bf16.msra.mxu1 %v2170_v3  ;;  %v1927_v40 = vunpack.c.l.bf16 %v2044_v28  ;;  %v1928_v46 = vunpack.c.h.bf16 %v2044_v28  ;;  %v1939_v48 = vunpack.c.l.bf16 %v2407_v31  ;;  %v1935_v55 = vunpack.c.l.bf16 %v2418_v39  ;;  %v2446_v5 = vld [vmem:[%s3081_s4] ss:$0 sm:$0xff]  ;;  %v2481_v22 = vld [vmem:[%s2394_s22 + $0x28] sm:$0xff]  }
  0x1d   : > { %2140 = vmatprep.subr.msk.bf16.mxu0 %vm708_vm1, %v2171_v6  ;;  %2141 = vmatprep.subr.msk.bf16.mxu1 %vm708_vm1, %v2171_v6  ;;  %v1908_v61 = vunpack.c.h.bf16 %v2404_v30  ;;  %v1940_v62 = vunpack.c.h.bf16 %v2407_v31  ;;  %v2484_v23 = vld [vmem:[%s2394_s22 + $0x68] sm:$0xff]  }
  0x20   : > { %2097 = vmatpush3.bf16.msra.mxu0 %v710_v7  ;;  %2139 = vmatpush3.bf16.msra.mxu1 %v710_v7 }
  0x23   : > { %2099 = vmatmul.mubr.msk.bf16.vlgmr.msra.gmra.mrb[0].mxu0 %vm659_vm0, %v2174_v8  ;;  %2115 = vmatmul.mubr.msk.bf16.vlgmr.msra.gmra.mrb[0].mxu1 %vm659_vm0, %v2175_v9 }
  0x24   : > { %2102 = vmatprep.mubr.msk.bf16.mxu0 %vm659_vm0, %v2176_v10  ;;  %2118 = vmatprep.mubr.msk.bf16.mxu1 %vm659_vm0, %v2177_v11 }
  0x2b   : > { %2103 = vmatmul.mubr.msk.bf16.gmra.mrb[4].mxu0 %vm659_vm0, %v2178_v12  ;;  %2119 = vmatmul.mubr.msk.bf16.gmra.mrb[4].mxu1 %vm659_vm0, %v2179_v13 }
  0x2c   : > { %2106 = vmatprep.mubr.msk.bf16.mxu0 %vm659_vm0, %v2180_v14  ;;  %2122 = vmatprep.mubr.msk.bf16.mxu1 %vm659_vm0, %v2181_v15 }
  0x33   : > { %2107 = vmatmul.mubr.msk.bf16.gmra.mrb[8].mxu0 %vm659_vm0, %v2182_v16  ;;  %2123 = vmatmul.mubr.msk.bf16.gmra.mrb[8].mxu1 %vm659_vm0, %v2183_v17 }
  0x34   : > { %2110 = vmatprep.mubr.msk.bf16.mxu0 %vm659_vm0, %v2184_v18  ;;  %2126 = vmatprep.mubr.msk.bf16.mxu1 %vm659_vm0, %v2185_v19 }
  0x3b   : > { %2111 = vmatmul.mubr.msk.bf16.gmra.mrb[12].mxu0 %vm659_vm0, %v2186_v20  ;;  %2127 = vmatmul.mubr.msk.bf16.gmra.mrb[12].mxu1 %vm659_vm0, %v2187_v21 }
  0xf6   : > { %v2100_v44 = vpop.f32.mrb[0].mxu0  ;;  %v2116_v45 = vpop.f32.mrb[0].mxu1 }
  0xf7   : > { %v981_v50 = vadd.f32 %v2100_v44, %v2415_v33  ;;  %v997_v52 = vadd.f32 %v2116_v45, %v2415_v33  ;;  %v746_v53 = vpop.f32.mrb[1].mxu0  ;;  %v810_v54 = vpop.f32.mrb[1].mxu1 }
  0xf8   : > { %v979_v57 = vadd.f32 %v2415_v33, %v746_v53  ;;  %v995_v58 = vadd.f32 %v2415_v33, %v810_v54  ;;  %v2101_v59 = vpop.f32.mrb[2].mxu0  ;;  %v2117_v60 = vpop.f32.mrb[2].mxu1 }
  0xf9   : > { %v2437_v63 = vadd.f32 %v1899_v34, %v981_v50  ;;  %v2439_v0 = vadd.f32 %v1931_v37, %v997_v52  ;;  %v982_v1 = vadd.f32 %v2101_v59, %v2415_v33  ;;  %v998_v2 = vadd.f32 %v2117_v60, %v2415_v33  ;;  %v749_v3 = vpop.f32.mrb[3].mxu0  ;;  %v813_v4 = vpop.f32.mrb[3].mxu1  ;;  %v2505_v50 = vld [vmem:[%s2394_s22 + $0x20] sm:$0xff]  }
  0xfa   : > { %v2448_v6 = vadd.f32 %v1895_v38, %v979_v57  ;;  %v2450_v7 = vadd.f32 %v1927_v40, %v995_v58  ;;  %v980_v8 = vadd.f32 %v2415_v33, %v749_v3  ;;  %v996_v9 = vadd.f32 %v2415_v33, %v813_v4  ;;  %v2508_v52 = vld [vmem:[%s2394_s22 + $0x60] sm:$0xff]  }
  0xfb   : > { %v1116_v10 = vmul.f32 %v2431_v56, %v2437_v63  ;;  %v1132_v11 = vmul.f32 %v2431_v56, %v2439_v0  ;;  %v2458_v12 = vadd.f32 %v1900_v41, %v982_v1  ;;  %v2460_v13 = vadd.f32 %v1932_v42, %v998_v2 }
  0xfc   : > { %v1114_v14 = vmul.f32 %v2431_v56, %v2448_v6  ;;  %v1130_v15 = vmul.f32 %v2431_v56, %v2450_v7  ;;  %v2466_v16 = vadd.f32 %v1896_v43, %v980_v8  ;;  %v2468_v17 = vadd.f32 %v1928_v46, %v996_v9 }
  0xfd   : > { %v2471_v18 = vadd.f32 %v2446_v5, %v1116_v10  ;;  %v2474_v19 = vadd.f32 %v2446_v5, %v1132_v11  ;;  %v1117_v20 = vmul.f32 %v2431_v56, %v2458_v12  ;;  %v1133_v21 = vmul.f32 %v2431_v56, %v2460_v13 }
  0xfe   : > { %v2487_v24 = vadd.f32 %v2446_v5, %v1114_v14  ;;  %v2490_v25 = vadd.f32 %v2446_v5, %v1130_v15  ;;  %v1115_v26 = vmul.f32 %v2431_v56, %v2466_v16  ;;  %v1131_v27 = vmul.f32 %v2431_v56, %v2468_v17  ;;  %v2104_v28 = vpop.f32.mrb[4].mxu0  ;;  %v2120_v29 = vpop.f32.mrb[4].mxu1 }
  0xff   : > { %v1219_v34 = vmin.f32 %v2471_v18, 0.0  ;;  %v1235_v35 = vmin.f32 %v2474_v19, 0.0  ;;  %v762_v36 = vpop.f32.mrb[5].mxu0  ;;  %v826_v37 = vpop.f32.mrb[5].mxu1  ;;  %v1904_v38 = vunpack.c.h.bf16 %v2410_v32  ;;  %v2511_v57 = vadd.f32 %v2446_v5, %v1117_v20 }
 0x100   : > { %v1217_v41 = vmin.f32 %v2487_v24, 0.0  ;;  %v1233_v42 = vmin.f32 %v2490_v25, 0.0  ;;  %v2105_v43 = vpop.f32.mrb[6].mxu0  ;;  %v2121_v44 = vpop.f32.mrb[6].mxu1  ;;  %v2514_v58 = vadd.f32 %v2446_v5, %v1133_v21  ;;  %v2519_v3 = vadd.f32 %v2446_v5, %v1115_v26 }
 0x101   : > { %v1253_v53 = vmul.f32 1.442695, %v1219_v34  ;;  %v1285_v54 = vmul.f32 1.442695, %v1235_v35  ;;  %v765_v59 = vpop.f32.mrb[7].mxu0  ;;  %v2516_v60 = vpop.f32.mrb[7].mxu1  ;;  %v2522_v4 = vadd.f32 %v2446_v5, %v1131_v27  ;;  %v985_v35 = vadd.f32 %v2104_v28, %v2415_v33 }
 0x102   : > { %v1249_v1 = vmul.f32 1.442695, %v1217_v41  ;;  %v1281_v2 = vmul.f32 1.442695, %v1233_v42  ;;  %v1220_v8 = vmin.f32 %v2511_v57, 0.0  ;;  %v1236_v11 = vmin.f32 %v2514_v58, 0.0 }
 0x103   : > { %2188 = vpow2.f32 %v1253_v53  ;;  %v1218_v14 = vmin.f32 %v2519_v3, 0.0  ;;  %v1234_v21 = vmin.f32 %v2522_v4, 0.0  ;;  %vm1187_vm3 = vcmp.gt.f32.partialorder %v2471_v18, 0.0 }
 0x104   : > { %2190 = vpow2.f32 %v1285_v54  ;;  %v1255_v20 = vmul.f32 1.442695, %v1220_v8  ;;  %v1287_v27 = vmul.f32 1.442695, %v1236_v11  ;;  %v1001_v54 = vadd.f32 %v2120_v29, %v2415_v33 }
 0x105   : > { %2192 = vpow2.f32 %v1249_v1  ;;  %v1251_v34 = vmul.f32 1.442695, %v1218_v14  ;;  %v1283_v53 = vmul.f32 1.442695, %v1234_v21  ;;  %v983_v1 = vadd.f32 %v2415_v33, %v762_v36 }
 0x106   : > { %2194 = vpow2.f32 %v1281_v2  ;;  %v2533_v41 = vpop.f32.mrb[8].mxu0  ;;  %v2535_v42 = vpop.f32.mrb[8].mxu1  ;;  %vm1203_vm5 = vcmp.gt.f32.partialorder %v2474_v19, 0.0  ;;  %v2548_v28 = vadd.f32 %v1907_v47, %v985_v35  ;;  %v999_v11 = vadd.f32 %v2415_v33, %v826_v37 }
 0x107   : > { %2196 = vpow2.f32 %v1255_v20  ;;  %v2541_v8 = vpop.f32.mrb[9].mxu0  ;;  %v2543_v2 = vpop.f32.mrb[9].mxu1  ;;  %v986_v14 = vadd.f32 %v2105_v43, %v2415_v33  ;;  %vm1185_vm6 = vcmp.gt.f32.partialorder %v2487_v24, 0.0  ;;  %v2559_v36 = vadd.f32 %v1939_v48, %v1001_v54 }
 0x108   : > { %2198 = vpow2.f32 %v1287_v27  ;;  %v2552_v20 = vpop.f32.mrb[10].mxu0  ;;  %v2554_v29 = vpop.f32.mrb[10].mxu1  ;;  %v2563_v21 = vadd.f32 %v1903_v49, %v983_v1  ;;  %v1002_v47 = vadd.f32 %v2121_v44, %v2415_v33  ;;  %v1120_v27 = vmul.f32 %v2431_v56, %v2548_v28 }
 0x109   : > { %2200 = vpow2.f32 %v1251_v34  ;;  %v2566_v37 = vpop.f32.mrb[11].mxu0  ;;  %v2568_v43 = vpop.f32.mrb[11].mxu1  ;;  %v2574_v34 = vadd.f32 %v1935_v55, %v999_v11  ;;  %v2578_v48 = vadd.f32 %v1908_v61, %v986_v14  ;;  %v1136_v49 = vmul.f32 %v2431_v56, %v2559_v36 }
 0x10a   : > { %2202 = vpow2.f32 %v1283_v53  ;;  %v1118_v44 = vmul.f32 %v2431_v56, %v2563_v21  ;;  %v2586_v35 = vadd.f32 %v1940_v62, %v1002_v47  ;;  %v984_v53 = vadd.f32 %v2415_v33, %v765_v59 }
 0x10b   : > { %3086 = vst [vmem:[#allocation3_spill] sm:$0xff] %v2574_v34  ;;  %vm1201_vm7 = vcmp.gt.f32.partialorder %v2490_v25, 0.0  ;;  %vm1188_vm8 = vcmp.gt.f32.partialorder %v2511_v57, 0.0  ;;  %vm1204_vm9 = vcmp.gt.f32.partialorder %v2514_v58, 0.0  ;;  %v2593_v30 = vadd.f32 %v2446_v5, %v1120_v27 }
 0x10c   : > { %vm1186_vm10 = vcmp.gt.f32.partialorder %v2519_v3, 0.0  ;;  %v2597_v61 = vadd.f32 %v2446_v5, %v1136_v49  ;;  %v2600_v31 = vadd.f32 %v2446_v5, %v1118_v44  ;;  %v1134_v62 = vmul.f32 %v2431_v56, %v2574_v34 }
 0x10d   : > { %v2189_v55 = vpop.eup %2188  ;;  %vm1202_vm11 = vcmp.gt.f32.partialorder %v2522_v4, 0.0  ;;  %v1223_v1 = vmin.f32 %v2593_v30, 0.0  ;;  %v1121_v11 = vmul.f32 %v2431_v56, %v2578_v48  ;;  %v1000_v14 = vadd.f32 %v2415_v33, %v2516_v60 }
 0x10e   : > { %v2191_v59 = vpop.eup %2190  ;;  %v1797_v54 = vadd.f32 -1.0, %v2189_v55  ;;  %v2610_v47 = vpop.f32.mrb[12].mxu0  ;;  %v1239_v26 = vmin.f32 %v2597_v61, 0.0  ;;  %v1137_v55 = vmul.f32 %v2431_v56, %v2586_v35  ;;  %v2619_v15 = vadd.f32 %v1904_v38, %v984_v53 }
 0x10f   : > { %3087 = vst [vmem:[#allocation4_spill] sm:$0xff] %v2610_v47  ;;  %v2612_v27 = vpop.f32.mrb[12].mxu1  ;;  %v2193_v49 = vpop.eup %2192  ;;  %v1813_v44 = vadd.f32 -1.0, %v2191_v59  ;;  %v1261_v59 = vmul.f32 1.442695, %v1223_v1  ;;  %v1221_v40 = vmin.f32 %v2600_v31, 0.0 }
 0x110   : > { %3088 = vst [vmem:[#allocation5_spill] sm:$0xff] %v2612_v27  ;;  %v2621_v10 = vpop.f32.mrb[13].mxu0  ;;  %v2623_v9 = vpop.f32.mrb[13].mxu1  ;;  %v1347_v46 = vsel %vm1187_vm3, %v2471_v18, %v1797_v54  ;;  %v1795_v45 = vadd.f32 -1.0, %v2193_v49  ;;  %vm1191_vm12 = vcmp.gt.f32.partialorder %v2593_v30, 0.0  ;;  %vm1207_vm13 = vcmp.gt.f32.partialorder %v2597_v61, 0.0 }
 0x111   : > { %3089 = vst [vmem:[#allocation6_spill] sm:$0xff] %v2621_v10  ;;  %3090 = vst [vmem:[#allocation7_spill] sm:$0xff] %v2623_v9  ;;  %v2195_v60 = vpop.eup %2194  ;;  %v2629_v27 = vpop.f32.mrb[14].mxu0  ;;  %v1363_v38 = vsel %vm1203_vm5, %v2474_v19, %v1813_v44  ;;  %v1293_v9 = vmul.f32 1.442695, %v1239_v26  ;;  %v2637_v10 = vadd.f32 %v2446_v5, %v1134_v62  ;;  %v1387_v1 = vsel %vm1384_vm4, %v1347_v46, %v2437_v63 }
 0x112   : > { %v2631_v47 = vpop.f32.mrb[14].mxu1  ;;  %v2197_v32 = vpop.eup %2196  ;;  %v1811_v53 = vadd.f32 -1.0, %v2195_v60  ;;  %v1345_v49 = vsel %vm1185_vm6, %v2487_v24, %v1795_v45  ;;  %2204 = vpow2.f32 %v1261_v59  ;;  %v1403_v62 = vsel %vm1384_vm4, %v1363_v38, %v2439_v0 }
 0x113   : > { %v2639_v34 = vpop.f32.mrb[15].mxu0  ;;  %v2641_v18 = vpop.f32.mrb[15].mxu1  ;;  %v1798_v19 = vadd.f32 -1.0, %v2197_v32  ;;  %2206 = vpow2.f32 %v1293_v9  ;;  %v1385_v63 = vsel %vm1384_vm4, %v1345_v49, %v2448_v6  ;;  %v1257_v46 = vmul.f32 1.442695, %v1221_v40  ;;  %v2707_v49 = vld [vmem:[%s2394_s22 + $0x38] sm:$0xff]  }
 0x114   : > { %3091 = vst [vmem:[#allocation8_spill] sm:$0xff] %v2641_v18  ;;  %v2199_v54 = vpop.eup %2198  ;;  %v1361_v44 = vsel %vm1201_vm7, %v2490_v25, %v1811_v53  ;;  %v1237_v32 = vmin.f32 %v2637_v10, 0.0  ;;  %v2694_v38 = vadd.f32 %v2446_v5, %v1121_v11  ;;  %vm1189_vm14 = vcmp.gt.f32.partialorder %v2600_v31, 0.0 }
 0x115   : > { %v2201_v26 = vpop.eup %2200  ;;  %v1814_v60 = vadd.f32 -1.0, %v2199_v54  ;;  %v1348_v24 = vsel %vm1188_vm8, %v2511_v57, %v1798_v19  ;;  %v1401_v0 = vsel %vm1384_vm4, %v1361_v44, %v2450_v7  ;;  %2208 = vpow2.f32 %v1257_v46 }
 0x116   : > { %v2203_v18 = vpop.eup %2202  ;;  %v1796_v45 = vadd.f32 -1.0, %v2201_v26  ;;  %v1388_v6 = vsel %vm1384_vm4, %v1348_v24, %v2458_v12  ;;  %v3092_v54 = vunpack.c.h.bf16 %v2418_v39  ;;  %v1944_v19 = vunpack.c.h.bf16 %v2508_v52  ;;  %v2715_v26 = vld [vmem:[%s2394_s22 + $0x78] sm:$0xff]  }
 0x117   : > { %v1364_v25 = vsel %vm1204_vm9, %v2514_v58, %v1814_v60  ;;  %v1812_v40 = vadd.f32 -1.0, %v2203_v18  ;;  %v1965_v57 = vpack.c.bf16 %v1388_v6, %v1387_v1  ;;  %v1119_v18 = vmul.f32 %v2431_v56, %v2619_v15 }
 0x118   : > { %v1404_v7 = vsel %vm1384_vm4, %v1364_v25, %v2460_v13  ;;  %v1346_v9 = vsel %vm1186_vm10, %v2519_v3, %v1796_v45  ;;  %v2704_v1 = vadd.f32 %v3092_v54, %v1000_v14  ;;  %v989_v44 = vadd.f32 %v2533_v41, %v2415_v33 }
 0x119   : > { %v2005_v59 = vpack.c.bf16 %v1404_v7, %v1403_v62  ;;  %v1386_v12 = vsel %vm1384_vm4, %v1346_v9, %v2466_v16  ;;  %v1362_v58 = vsel %vm1202_vm11, %v2522_v4, %v1812_v40  ;;  %2052 = vst [vmem:[%s2668_s14 + $0x8] sm:$0xff] %v1965_v57   ;;  %v2697_v16 = vadd.f32 %v2446_v5, %v1137_v55  ;;  %v2718_v62 = vld [vmem:[%s2394_s22 + $0x30] sm:$0xff]  }
 0x11a   : > { %v1960_v13 = vpack.c.bf16 %v1386_v12, %v1385_v63  ;;  %v1402_v3 = vsel %vm1384_vm4, %v1362_v58, %v2468_v17  ;;  %v1289_v4 = vmul.f32 1.442695, %v1237_v32  ;;  %v1224_v17 = vmin.f32 %v2694_v38, 0.0 }
 0x11b   : > { %2060 = vst [vmem:[%s2668_s14 + $0x48] sm:$0xff] %v2005_v59   ;;  %v2000_v53 = vpack.c.bf16 %v1402_v3, %v1401_v0  ;;  %v1240_v11 = vmin.f32 %v2697_v16, 0.0  ;;  %v1912_v55 = vunpack.c.h.bf16 %v2505_v50  ;;  %v2722_v39 = vadd.f32 %v2446_v5, %v1119_v18 }
 0x11c   : > { %1961 = vst [vmem:[%s2668_s14] sm:$0xff] %v1960_v13   ;;  %2210 = vpow2.f32 %v1289_v4  ;;  %v1135_v14 = vmul.f32 %v2431_v56, %v2704_v1  ;;  %v2205_v60 = vpop.eup %2204  ;;  %v1263_v63 = vmul.f32 1.442695, %v1224_v17  ;;  %v1005_v45 = vadd.f32 %v2535_v42, %v2415_v33 }
 0x11d   : > { %2059 = vst [vmem:[%s2668_s14 + $0x40] sm:$0xff] %v2000_v53   ;;  %v1295_v24 = vmul.f32 1.442695, %v1240_v11  ;;  %v1923_v46 = vunpack.c.l.bf16 %v2707_v49  ;;  %v2207_v0 = vpop.eup %2206  ;;  %v1222_v6 = vmin.f32 %v2722_v39, 0.0  ;;  %v1955_v40 = vunpack.c.l.bf16 %v2715_v26 }
 0x11e   : > { %v2733_v25 = vadd.f32 %v2446_v5, %v1135_v14  ;;  %v1919_v57 = vunpack.c.l.bf16 %v2718_v62  ;;  %2212 = vpow2.f32 %v1263_v63  ;;  %v3093_v41 = vunpack.c.l.bf16 %v2481_v22 }
 0x11f   : > { %v3094_v9 = vunpack.c.l.bf16 %v2484_v23  ;;  %v987_v59 = vadd.f32 %v2415_v33, %v2541_v8  ;;  %2214 = vpow2.f32 %v1295_v24  ;;  %v1259_v12 = vmul.f32 1.442695, %v1222_v6  ;;  %v2209_v58 = vpop.eup %2208 }
 0x120   : > { %v2739_v7 = vadd.f32 %v3093_v41, %v989_v44  ;;  %v1801_v32 = vadd.f32 -1.0, %v2205_v60  ;;  %v1817_v13 = vadd.f32 -1.0, %v2207_v0  ;;  %v1238_v3 = vmin.f32 %v2733_v25, 0.0 }
 0x121   : > { %v2743_v42 = vadd.f32 %v3094_v9, %v1005_v45  ;;  %vm1205_vm15 = vcmp.gt.f32.partialorder %v2637_v10, 0.0  ;;  %2216 = vpow2.f32 %v1259_v12  ;;  %vm1192_vm0 = vcmp.gt.f32.partialorder %v2694_v38, 0.0 }
 0x122   : > { %v1124_v53 = vmul.f32 %v2431_v56, %v2739_v7  ;;  %v1291_v4 = vmul.f32 1.442695, %v1238_v3  ;;  %v3095_v54 = vunpack.c.l.bf16 %v2505_v50  ;;  %v1003_v11 = vadd.f32 %v2415_v33, %v2543_v2 }
 0x123   : > { %v1140_v8 = vmul.f32 %v2431_v56, %v2743_v42  ;;  %vm1208_vm1 = vcmp.gt.f32.partialorder %v2697_v16, 0.0  ;;  %v990_v44 = vadd.f32 %v2552_v20, %v2415_v33  ;;  %v1006_v60 = vadd.f32 %v2554_v29, %v2415_v33 }
 0x124   : > { %v2758_v18 = vadd.f32 %v2446_v5, %v1124_v53  ;;  %v2762_v17 = vadd.f32 %v3095_v54, %v987_v59  ;;  %v1351_v63 = vsel %vm1191_vm12, %v2593_v30, %v1801_v32  ;;  %v1367_v24 = vsel %vm1207_vm13, %v2597_v61, %v1817_v13 }
 0x125   : > { %v2768_v14 = vadd.f32 %v2446_v5, %v1140_v8  ;;  %2218 = vpow2.f32 %v1291_v4  ;;  %v1799_v0 = vadd.f32 -1.0, %v2209_v58  ;;  %vm1190_vm2 = vcmp.gt.f32.partialorder %v2722_v39, 0.0 }
 0x126   : > { %v1227_v2 = vmin.f32 %v2758_v18, 0.0  ;;  %v2211_v45 = vpop.eup %2210  ;;  %v1122_v29 = vmul.f32 %v2431_v56, %v2762_v17  ;;  %v3096_v6 = vunpack.c.l.bf16 %v2508_v52  ;;  %v3097_v61 = vunpack.c.h.bf16 %v2481_v22 }
 0x127   : > { %v1243_v20 = vmin.f32 %v2768_v14, 0.0  ;;  %v1815_v30 = vadd.f32 -1.0, %v2211_v45  ;;  %v3098_v12 = vunpack.c.h.bf16 %v2484_v23  ;;  %v988_v53 = vadd.f32 %v2415_v33, %v2566_v37 }
 0x128   : > { %v2787_v41 = vadd.f32 %v3096_v6, %v1003_v11  ;;  %v1269_v9 = vmul.f32 1.442695, %v1227_v2  ;;  %v2791_v59 = vadd.f32 %v3097_v61, %v990_v44  ;;  %v2798_v13 = vadd.f32 %v2446_v5, %v1122_v29  ;;  %v2213_v8 = vpop.eup %2212 }
 0x129   : > { %v2795_v58 = vadd.f32 %v3098_v12, %v1006_v60  ;;  %v1301_v32 = vmul.f32 1.442695, %v1243_v20  ;;  %v1391_v22 = vsel %vm1384_vm4, %v1351_v63, %v2548_v28  ;;  %v1407_v23 = vsel %vm1384_vm4, %v1367_v24, %v2559_v36  ;;  %v2215_v11 = vpop.eup %2214 }
 0x12a   : > { %v1138_v3 = vmul.f32 %v2431_v56, %v2787_v41  ;;  %v1125_v4 = vmul.f32 %v2431_v56, %v2791_v59  ;;  %v1349_v37 = vsel %vm1189_vm14, %v2600_v31, %v1799_v0  ;;  %v1365_v44 = vsel %vm1205_vm15, %v2637_v10, %v1815_v30 }
 0x12b   : > { %v1141_v54 = vmul.f32 %v2431_v56, %v2795_v58  ;;  %v1802_v28 = vadd.f32 -1.0, %v2213_v8  ;;  %2220 = vpow2.f32 %v1269_v9  ;;  %v1818_v60 = vadd.f32 -1.0, %v2215_v11  ;;  %v2217_v24 = vpop.eup %2216 }
 0x12c   : > { %2222 = vpow2.f32 %v1301_v32  ;;  %v1225_v36 = vmin.f32 %v2798_v13, 0.0  ;;  %v2822_v63 = vadd.f32 %v2446_v5, %v1138_v3  ;;  %v2828_v31 = vadd.f32 %v2446_v5, %v1125_v4  ;;  %v3099_v32 = vld [vmem:[#allocation3_spill] sm:$0xff] }
 0x12d   : > { %v1352_v2 = vsel %vm1192_vm0, %v2694_v38, %v1802_v28  ;;  %v2831_v45 = vadd.f32 %v2446_v5, %v1141_v54  ;;  %v2835_v10 = vadd.f32 %v1912_v55, %v988_v53  ;;  %v1368_v20 = vsel %vm1208_vm1, %v2697_v16, %v1818_v60 }
 0x12e   : > { %v1392_v0 = vsel %vm1384_vm4, %v1352_v2, %v2578_v48  ;;  %v1800_v38 = vadd.f32 -1.0, %v2217_v24  ;;  %v1265_v29 = vmul.f32 1.442695, %v1225_v36  ;;  %v1408_v30 = vsel %vm1384_vm4, %v1368_v20, %v2586_v35 }
 0x12f   : > { %v1975_v6 = vpack.c.bf16 %v1392_v0, %v1391_v22  ;;  %v1241_v50 = vmin.f32 %v2822_v63, 0.0  ;;  %v1004_v55 = vadd.f32 %v2415_v33, %v2568_v43  ;;  %v2219_v9 = vpop.eup %2218  ;;  %v2015_v48 = vpack.c.bf16 %v1408_v30, %v1407_v23  ;;  %v3102_v30 = vld [vmem:[#allocation6_spill] sm:$0xff] }
 0x130   : > { %v1350_v16 = vsel %vm1190_vm2, %v2722_v39, %v1800_v38  ;;  %vm1206_vm3 = vcmp.gt.f32.partialorder %v2733_v25, 0.0  ;;  %2224 = vpow2.f32 %v1265_v29  ;;  %v1389_v35 = vsel %vm1384_vm4, %v1349_v37, %v2563_v21  ;;  %v2869_v21 = vld [vmem:[%s2394_s22 + $0x70] sm:$0xff]  }
 0x131   : > { %2054 = vst [vmem:[%s2668_s14 + $0x18] sm:$0xff] %v1975_v6   ;;  %v1390_v43 = vsel %vm1384_vm4, %v1350_v16, %v2619_v15  ;;  %v1816_v61 = vadd.f32 -1.0, %v2219_v9  ;;  %v1228_v12 = vmin.f32 %v2828_v31, 0.0  ;;  %v1405_v39 = vsel %vm1384_vm4, %v1365_v44, %v3099_v32  ;;  %2062 = vst [vmem:[%s2668_s14 + $0x58] sm:$0xff] %v2015_v48   ;;  %v3100_v44 = vld [vmem:[#allocation4_spill] sm:$0xff]  ;;  %v3101_v38 = vld [vmem:[#allocation5_spill] sm:$0xff] }
 0x132   : > { %v1970_v3 = vpack.c.bf16 %v1390_v43, %v1389_v35  ;;  %v1244_v53 = vmin.f32 %v2831_v45, 0.0  ;;  %v1123_v8 = vmul.f32 %v2431_v56, %v2835_v10  ;;  %v1297_v23 = vmul.f32 1.442695, %v1241_v50 }
 0x133   : > { %v1366_v22 = vsel %vm1206_vm3, %v2733_v25, %v1816_v61  ;;  %v1271_v15 = vmul.f32 1.442695, %v1228_v12  ;;  %v2874_v4 = vadd.f32 %v1944_v19, %v1004_v55  ;;  %v993_v28 = vadd.f32 %v3100_v44, %v2415_v33  ;;  %v3103_v61 = vld [vmem:[#allocation7_spill] sm:$0xff] }
 0x134   : > { %2053 = vst [vmem:[%s2668_s14 + $0x10] sm:$0xff] %v1970_v3   ;;  %v1406_v54 = vsel %vm1384_vm4, %v1366_v22, %v2704_v1  ;;  %v1303_v11 = vmul.f32 1.442695, %v1244_v53  ;;  %v2881_v37 = vadd.f32 %v2446_v5, %v1123_v8  ;;  %v1951_v19 = vunpack.c.l.bf16 %v2869_v21 }
 0x135   : > { %v2221_v25 = vpop.eup %2220  ;;  %v2010_v60 = vpack.c.bf16 %v1406_v54, %v1405_v39  ;;  %2226 = vpow2.f32 %v1271_v15  ;;  %v1139_v52 = vmul.f32 %v2431_v56, %v2874_v4  ;;  %v1924_v1 = vunpack.c.h.bf16 %v2707_v49 }
 0x136   : > { %v2223_v36 = vpop.eup %2222  ;;  %2228 = vpow2.f32 %v1303_v11  ;;  %v1226_v24 = vmin.f32 %v2881_v37, 0.0  ;;  %v1956_v2 = vunpack.c.h.bf16 %v2715_v26  ;;  %v2897_v20 = vadd.f32 %v1923_v46, %v993_v28 }
 0x137   : > { %2061 = vst [vmem:[%s2668_s14 + $0x50] sm:$0xff] %v2010_v60   ;;  %2230 = vpow2.f32 %v1297_v23  ;;  %v2893_v0 = vadd.f32 %v2446_v5, %v1139_v52  ;;  %v1009_v29 = vadd.f32 %v3101_v38, %v2415_v33  ;;  %v991_v50 = vadd.f32 %v2415_v33, %v3102_v30 }
 0x138   : > { %v1267_v6 = vmul.f32 1.442695, %v1226_v24  ;;  %v1920_v55 = vunpack.c.h.bf16 %v2718_v62  ;;  %v1952_v9 = vunpack.c.h.bf16 %v2869_v21  ;;  %vm1195_vm5 = vcmp.gt.f32.partialorder %v2758_v18, 0.0 }
 0x139   : > { %v1805_v48 = vadd.f32 -1.0, %v2221_v25  ;;  %v1242_v16 = vmin.f32 %v2893_v0, 0.0  ;;  %v1128_v49 = vmul.f32 %v2431_v56, %v2897_v20  ;;  %v2911_v35 = vadd.f32 %v1955_v40, %v1009_v29 }
 0x13a   : > { %v2225_v46 = vpop.eup %2224  ;;  %2232 = vpow2.f32 %v1267_v6  ;;  %v2915_v43 = vadd.f32 %v1919_v57, %v991_v50  ;;  %v1007_v12 = vadd.f32 %v2415_v33, %v3103_v61  ;;  %vm1211_vm6 = vcmp.gt.f32.partialorder %v2768_v14, 0.0 }
 0x13b   : > { %v1299_v32 = vmul.f32 1.442695, %v1242_v16  ;;  %v2921_v39 = vadd.f32 %v2446_v5, %v1128_v49  ;;  %v994_v3 = vadd.f32 %v2629_v27, %v2415_v33  ;;  %v1821_v53 = vadd.f32 -1.0, %v2223_v36 }
 0x13c   : > { %v1144_v26 = vmul.f32 %v2431_v56, %v2911_v35  ;;  %v2927_v40 = vadd.f32 %v1951_v19, %v1007_v12  ;;  %v1010_v57 = vadd.f32 %v2631_v47, %v2415_v33  ;;  %v1355_v8 = vsel %vm1195_vm5, %v2758_v18, %v1805_v48 }
 0x13d   : > { %v1803_v22 = vadd.f32 -1.0, %v2225_v46  ;;  %2234 = vpow2.f32 %v1299_v32  ;;  %v1126_v23 = vmul.f32 %v2431_v56, %v2915_v43  ;;  %vm1193_vm7 = vcmp.gt.f32.partialorder %v2798_v13, 0.0 }
 0x13e   : > { %vm1196_vm8 = vcmp.gt.f32.partialorder %v2828_v31, 0.0  ;;  %v1231_v27 = vmin.f32 %v2921_v39, 0.0  ;;  %v2940_v15 = vadd.f32 %v2446_v5, %v1144_v26  ;;  %vm1209_vm9 = vcmp.gt.f32.partialorder %v2822_v63, 0.0 }
 0x13f   : > { %v2227_v54 = vpop.eup %2226  ;;  %vm1212_vm10 = vcmp.gt.f32.partialorder %v2831_v45, 0.0  ;;  %v1142_v47 = vmul.f32 %v2431_v56, %v2927_v40  ;;  %v2946_v18 = vadd.f32 %v1924_v1, %v994_v3  ;;  %v2948_v11 = vadd.f32 %v1956_v2, %v1010_v57 }
 0x140   : > { %v2229_v44 = vpop.eup %2228  ;;  %v1395_v28 = vsel %vm1384_vm4, %v1355_v8, %v2739_v7  ;;  %v1806_v25 = vadd.f32 -1.0, %v2227_v54  ;;  %vm1194_vm11 = vcmp.gt.f32.partialorder %v2881_v37, 0.0  ;;  %v1247_v60 = vmin.f32 %v2940_v15, 0.0 }
 0x141   : > { %v2231_v52 = vpop.eup %2230  ;;  %v1371_v19 = vsel %vm1211_vm6, %v2768_v14, %v1821_v53  ;;  %v1353_v36 = vsel %vm1193_vm7, %v2798_v13, %v1803_v22  ;;  %v1822_v24 = vadd.f32 -1.0, %v2229_v44  ;;  %v2962_v1 = vadd.f32 %v2446_v5, %v1126_v23  ;;  %v3104_v53 = vld [vmem:[#allocation8_spill] sm:$0xff] }
 0x142   : > { %v1356_v7 = vsel %vm1196_vm8, %v2828_v31, %v1806_v25  ;;  %v1277_v2 = vmul.f32 1.442695, %v1231_v27  ;;  %v1309_v38 = vmul.f32 1.442695, %v1247_v60  ;;  %v2968_v29 = vadd.f32 %v2446_v5, %v1142_v47 }
 0x143   : > { %v1396_v14 = vsel %vm1384_vm4, %v1356_v7, %v2791_v59  ;;  %v1372_v13 = vsel %vm1212_vm10, %v2831_v45, %v1822_v24  ;;  %v1129_v6 = vmul.f32 %v2431_v56, %v2946_v18  ;;  %v1145_v31 = vmul.f32 %v2431_v56, %v2948_v11 }
 0x144   : > { %v2233_v30 = vpop.eup %2232  ;;  %v1411_v50 = vsel %vm1384_vm4, %v1371_v19, %v2743_v42  ;;  %v1819_v48 = vadd.f32 -1.0, %v2231_v52  ;;  %v1985_v16 = vpack.c.bf16 %v1396_v14, %v1395_v28  ;;  %v1412_v59 = vsel %vm1384_vm4, %v1372_v13, %v2795_v58 }
 0x145   : > { %v1393_v45 = vsel %vm1384_vm4, %v1353_v36, %v2762_v17  ;;  %v2025_v49 = vpack.c.bf16 %v1412_v59, %v1411_v50  ;;  %v1804_v46 = vadd.f32 -1.0, %v2233_v30  ;;  %v1229_v61 = vmin.f32 %v2962_v1, 0.0 }
 0x146   : > { %2056 = vst [vmem:[%s2668_s14 + $0x28] sm:$0xff] %v1985_v16   ;;  %2236 = vpow2.f32 %v1277_v2  ;;  %v1168_v12 = vadd.f32 %v2446_v5, %v1129_v6  ;;  %v1184_v42 = vadd.f32 %v2446_v5, %v1145_v31  ;;  %v992_v32 = vadd.f32 %v2415_v33, %v2639_v34 }
 0x147   : > { %v2235_v3 = vpop.eup %2234  ;;  %2064 = vst [vmem:[%s2668_s14 + $0x68] sm:$0xff] %v2025_v49   ;;  %v1354_v58 = vsel %vm1194_vm11, %v2881_v37, %v1804_v46  ;;  %2238 = vpow2.f32 %v1309_v38  ;;  %v1245_v17 = vmin.f32 %v2968_v29, 0.0  ;;  %v1008_v26 = vadd.f32 %v2415_v33, %v3104_v53 }
 0x148   : > { %v1369_v57 = vsel %vm1209_vm9, %v2822_v63, %v1819_v48  ;;  %v1394_v34 = vsel %vm1384_vm4, %v1354_v58, %v2835_v10  ;;  %v1820_v8 = vadd.f32 -1.0, %v2235_v3  ;;  %v1232_v22 = vmin.f32 %v1168_v12, 0.0 }
 0x149   : > { %v1980_v23 = vpack.c.bf16 %v1394_v34, %v1393_v45  ;;  %vm1210_vm12 = vcmp.gt.f32.partialorder %v2893_v0, 0.0  ;;  %v1273_v37 = vmul.f32 1.442695, %v1229_v61  ;;  %v1248_v27 = vmin.f32 %v1184_v42, 0.0 }
 0x14a   : > { %v1370_v54 = vsel %vm1210_vm12, %v2893_v0, %v1820_v8  ;;  %v1279_v47 = vmul.f32 1.442695, %v1232_v22  ;;  %v3012_v33 = vadd.f32 %v1920_v55, %v992_v32  ;;  %v3016_v63 = vadd.f32 %v1952_v9, %v1008_v26 }
 0x14b   : > { %v1409_v10 = vsel %vm1384_vm4, %v1369_v57, %v2787_v41  ;;  %2055 = vst [vmem:[%s2668_s14 + $0x20] sm:$0xff] %v1980_v23   ;;  %v1410_v44 = vsel %vm1384_vm4, %v1370_v54, %v2874_v4  ;;  %v1305_v28 = vmul.f32 1.442695, %v1245_v17  ;;  %v1311_v0 = vmul.f32 1.442695, %v1248_v27 }
 0x14c   : > { %v2020_v25 = vpack.c.bf16 %v1410_v44, %v1409_v10  ;;  %2240 = vpow2.f32 %v1279_v47  ;;  %v1127_v62 = vmul.f32 %v2431_v56, %v3012_v33  ;;  %v1143_v21 = vmul.f32 %v2431_v56, %v3016_v63 }
 0x14d   : > { %2242 = vpow2.f32 %v1311_v0  ;;  %vm1199_vm13 = vcmp.gt.f32.partialorder %v2921_v39, 0.0  ;;  %vm1215_vm14 = vcmp.gt.f32.partialorder %v2940_v15, 0.0  ;;  %vm1200_vm15 = vcmp.gt.f32.partialorder %v1168_v12, 0.0 }
 0x14e   : > { %2063 = vst [vmem:[%s2668_s14 + $0x60] sm:$0xff] %v2020_v25   ;;  %2244 = vpow2.f32 %v1273_v37  ;;  %v1166_v41 = vadd.f32 %v2446_v5, %v1127_v62  ;;  %v1182_v55 = vadd.f32 %v2446_v5, %v1143_v21  ;;  %vm1216_vm0 = vcmp.gt.f32.partialorder %v1184_v42, 0.0 }
 0x14f   : > { %2246 = vpow2.f32 %v1305_v28  ;;  %vm1197_vm1 = vcmp.gt.f32.partialorder %v2962_v1, 0.0  ;;  %vm1213_vm2 = vcmp.gt.f32.partialorder %v2968_v29, 0.0 }
 0x150   : > { %v2237_v9 = vpop.eup %2236  ;;  %v1230_v4 = vmin.f32 %v1166_v41, 0.0  ;;  %v1246_v52 = vmin.f32 %v1182_v55, 0.0  ;;  %vm1198_vm3 = vcmp.gt.f32.partialorder %v1166_v41, 0.0  ;;  %vm1214_vm5 = vcmp.gt.f32.partialorder %v1182_v55, 0.0 }
 0x151   : > { %v2239_v60 = vpop.eup %2238  ;;  %v1809_v36 = vadd.f32 -1.0, %v2237_v9 }
 0x152   : > { %v1275_v19 = vmul.f32 1.442695, %v1230_v4  ;;  %v1307_v24 = vmul.f32 1.442695, %v1246_v52  ;;  %v1825_v7 = vadd.f32 -1.0, %v2239_v60 }
 0x153   : > { %v1359_v38 = vsel %vm1199_vm13, %v2921_v39, %v1809_v36 }
 0x154   : > { %2248 = vpow2.f32 %v1275_v19  ;;  %v1375_v13 = vsel %vm1215_vm14, %v2940_v15, %v1825_v7  ;;  %v1399_v50 = vsel %vm1384_vm4, %v1359_v38, %v2897_v20 }
 0x155   : > { %2250 = vpow2.f32 %v1307_v24  ;;  %v1415_v16 = vsel %vm1384_vm4, %v1375_v13, %v2911_v35 }
 0x156   : > { %v2241_v2 = vpop.eup %2240 }
 0x157   : > { %v2243_v56 = vpop.eup %2242  ;;  %v1810_v14 = vadd.f32 -1.0, %v2241_v2 }
 0x158   : > { %v2245_v5 = vpop.eup %2244  ;;  %v1826_v6 = vadd.f32 -1.0, %v2243_v56 }
 0x159   : > { %v2247_v31 = vpop.eup %2246  ;;  %v1360_v30 = vsel %vm1200_vm15, %v1168_v12, %v1810_v14  ;;  %v1807_v15 = vadd.f32 -1.0, %v2245_v5 }
 0x15a   : > { %v1400_v39 = vsel %vm1384_vm4, %v1360_v30, %v2946_v18  ;;  %v1376_v48 = vsel %vm1216_vm0, %v1184_v42, %v1826_v6  ;;  %v1823_v49 = vadd.f32 -1.0, %v2247_v31 }
 0x15b   : > { %v1995_v59 = vpack.c.bf16 %v1400_v39, %v1399_v50  ;;  %v1416_v45 = vsel %vm1384_vm4, %v1376_v48, %v2948_v11  ;;  %v1357_v18 = vsel %vm1197_vm1, %v2962_v1, %v1807_v15 }
 0x15c   : > { %v2035_v46 = vpack.c.bf16 %v1416_v45, %v1415_v16  ;;  %v1373_v12 = vsel %vm1213_vm2, %v2968_v29, %v1823_v49  ;;  %v1397_v32 = vsel %vm1384_vm4, %v1357_v18, %v2915_v43 }
 0x15d   : > { %2058 = vst [vmem:[%s2668_s14 + $0x38] sm:$0xff] %v1995_v59   ;;  %v1413_v1 = vsel %vm1384_vm4, %v1373_v12, %v2927_v40 }
 0x15e   : > { %v2249_v61 = vpop.eup %2248  ;;  %2066 = vst [vmem:[%s2668_s14 + $0x78] sm:$0xff] %v2035_v46  }
 0x15f   : > { %v2251_v20 = vpop.eup %2250  ;;  %v1808_v35 = vadd.f32 -1.0, %v2249_v61 }
 0x160   : > { %v1824_v42 = vadd.f32 -1.0, %v2251_v20 }
 0x161   : > { %v1358_v11 = vsel %vm1198_vm3, %v1166_v41, %v1808_v35 }
 0x162   : > { %v1398_v3 = vsel %vm1384_vm4, %v1358_v11, %v3012_v33  ;;  %v1374_v58 = vsel %vm1214_vm5, %v1182_v55, %v1824_v42 }
 0x163   : > { %v1990_v17 = vpack.c.bf16 %v1398_v3, %v1397_v32  ;;  %v1414_v29 = vsel %vm1384_vm4, %v1374_v58, %v3016_v63 }
 0x164   : > { %v2030_v53 = vpack.c.bf16 %v1414_v29, %v1413_v1 }
 0x165   : > { %2057 = vst [vmem:[%s2668_s14 + $0x30] sm:$0xff] %v1990_v17  }
 0x166   : > { %2065 = vst [vmem:[%s2668_s14 + $0x70] sm:$0xff] %v2030_v53  }
 0x167 PF: > { %s17_s26 = sadd.s32 1, %s2274_s26   ;;  %s3105_s24 = smov %s2270_s25 }
 0x168   : > { %p14_p5 = scmp.ge.s32.totalorder %s17_s26, 4   ;;  %s3106_s25 = smov %s3108_s27 }
 0x16a   :  { %16 = sbr.rel (!%p14_p5) target bundleno = 2 (0x2), region = 104 }

// kernel: _lambda_.35
= control target key start
LH: loop header
LB: loop body
LE: loop exit
PB: predicated region body
PF: predicated region fallthrough
CT: control target
= control target key end

     0   :  { %s1440_s12 = smov 0   ;;  %s1442_s13 = smov 0   ;;  %s1666_s0 = inlined_call_operand.vmem [shape: bf16[512,200], index: 0, kind: input, shape index: {}]   ;;  %s1667_s1 = inlined_call_operand.vmem [shape: bf16[200,128], index: 1, kind: input, shape index: {}]   ;;  %s1668_s2 = inlined_call_operand.vmem [shape: f32[1,128], index: 2, kind: input, shape index: {}]   ;;  %s1669_s3 = inlined_call_operand.vmem [shape: f32[512,128], index: 3, kind: output, shape index: {}]  }
   0x1   :  { %s1444_s14 = smov 0  }
   0x2 LB: > { %s32_s15 = sadd.s32 1, %s1413_s13  ;;  %p1148_p0 = scmp.ge.s32.totalorder %s1417_s14, 1  ;;  %s1417_s14 = sphi %s1444_s14, %s13_s14   ;;  %s1413_s13 = sphi %s1442_s13, %s1671_s13   ;;  %s1409_s12 = sphi %s1440_s12, %s1670_s12  }
   0x3   : > { %p34_p1 = scmp.ge.s32.totalorder %s32_s15, 2  ;;  %p191_p2 = scmp.lt.s32.totalorder %s1417_s14, 3 }
   0x5   : > { %s1673_s15 = smov (%p34_p1, %s32_s15), 0  ;;  %p192_p3 = pnand %p1148_p0, %p191_p2 }
   0x6   : > { %v1270_v0 = vld [vmem:[%s1667_s1] sm:$0xff] (!%p192_p3)   ;;  %v1419_v1 = vmov (!%p192_p3), 0   ;;  %v1271_v2 = vld [vmem:[%s1667_s1 + $0x8] sm:$0xff] (!%p192_p3)   ;;  %s1149_s20 = sshll.u32 (!%p192_p3), %s1409_s12, 5  ;;  %v1272_v3 = vld [vmem:[%s1667_s1 + $0x10] sm:$0xff] (!%p192_p3)   ;;  %vm612_vm0 = vcmask (!%p192_p3), 588800  }
   0x7   : > { %195 = sbr.rel (%p192_p3) target bundleno = 344 (0x158), region = 32  ;;  %665 = vmatprep.subr.bf16.mxu0 (!%p192_p3), %v1419_v1  ;;  %1219 = vmatprep.subr.bf16.mxu1 (!%p192_p3), %v1419_v1  ;;  %p236_p4 = scmp.lt.s32.totalorder (!%p192_p3), %s1149_s20, 63  ;;  %v1273_v4 = vld [vmem:[%s1667_s1 + $0x18] sm:$0xff] (!%p192_p3)   ;;  %v1274_v6 = vld [vmem:[%s1667_s1 + $0x20] sm:$0xff] (!%p192_p3)   ;;  %v1275_v8 = vld [vmem:[%s1667_s1 + $0x28] sm:$0xff] (!%p192_p3)   ;;  %vm661_vm1 = vcmask (!%p192_p3), 1043456  }
   0x8   : > { %666 = vmatpush1.bf16.msra.mxu0 (!%p192_p3), %v1270_v0  ;;  %1232 = vmatpush1.bf16.msra.mxu1 (!%p192_p3), %v1270_v0  ;;  %v1276_v9 = vld [vmem:[%s1667_s1 + $0x30] sm:$0xff] (!%p192_p3)   ;;  %v1277_v10 = vld [vmem:[%s1667_s1 + $0x38] sm:$0xff] (!%p192_p3)   ;;  %v1278_v11 = vld [vmem:[%s1667_s1 + $0x40] sm:$0xff] (!%p192_p3)  }
   0x9   : > { %667 = vmatprep.subr.bf16.mxu0 (!%p192_p3), %v1419_v1  ;;  %1220 = vmatprep.subr.bf16.mxu1 (!%p192_p3), %v1419_v1  ;;  %v1279_v12 = vld [vmem:[%s1667_s1 + $0x48] sm:$0xff] (!%p192_p3)   ;;  %v1280_v13 = vld [vmem:[%s1667_s1 + $0x50] sm:$0xff] (!%p192_p3)   ;;  %v1281_v14 = vld [vmem:[%s1667_s1 + $0x58] sm:$0xff] (!%p192_p3)  }
   0xa   : > { %v1282_v15 = vld [vmem:[%s1667_s1 + $0x60] ss:$0 sps:$4 sm:$0xff] (!%p192_p3)  }
   0xb   : > { %v663_v16 = vsel (!%p192_p3), %vm661_vm1, %v1282_v15, 0  ;;  %v1584_v47 = vld [vmem:[%s1668_s2] ss:$0 sm:$0xff] (!%p192_p3) }
   0xc   : > { %668 = vmatpush1.bf16.msra.mxu0 (!%p192_p3), %v1271_v2  ;;  %1233 = vmatpush1.bf16.msra.mxu1 (!%p192_p3), %v1271_v2 }
   0xd   : > { %669 = vmatprep.subr.bf16.mxu0 (!%p192_p3), %v1419_v1  ;;  %1221 = vmatprep.subr.bf16.mxu1 (!%p192_p3), %v1419_v1 }
   0xe   : > { %s1675_s20 = smov (!%p236_p4, %s1149_s20), 63 }
   0xf   : > { %s1218_s23 = sshll.u32 %s1675_s20, 3 }
  0x10   : > { %670 = vmatpush1.bf16.msra.mxu0 %v1272_v3  ;;  %1234 = vmatpush1.bf16.msra.mxu1 %v1272_v3  ;;  %s1484_s28 = scalar_lea.vmem %s1666_s0, %s1218_s23  ;;  %s1597_s29 = scalar_lea.vmem %s1669_s3, %s1218_s23 }
  0x11   : > { %671 = vmatprep.subr.bf16.mxu0 %v1419_v1  ;;  %1222 = vmatprep.subr.bf16.mxu1 %v1419_v1  ;;  %v1285_v5 = vld [vmem:[%s1484_s28 + $0x4] ss:$8 sps:$4 sm:$0xff]   ;;  %v1283_v17 = vld [vmem:[%s1484_s28] ss:$8 sps:$4 sm:$0xff]   ;;  %v1289_v19 = vld [vmem:[%s1484_s28 + $0x14] ss:$8 sps:$4 sm:$0xff]  }
  0x12   : > { %v1288_v7 = vld [vmem:[%s1484_s28 + $0x84] ss:$8 sps:$4 sm:$0xff]   ;;  %1199 = vmatprep.mubr.msk.bf16.mxu0 %vm612_vm0, %v1285_v5  ;;  %v1286_v18 = vld [vmem:[%s1484_s28 + $0x80] ss:$8 sps:$4 sm:$0xff]   ;;  %v1291_v20 = vld [vmem:[%s1484_s28 + $0x94] ss:$8 sps:$4 sm:$0xff]  }
  0x13   : > { %1207 = vmatprep.mubr.msk.bf16.mxu1 %vm612_vm0, %v1288_v7  ;;  %v1293_v21 = vld [vmem:[%s1484_s28 + $0x10] ss:$8 sps:$4 sm:$0xff]   ;;  %v1295_v23 = vld [vmem:[%s1484_s28 + $0x24] ss:$8 sps:$4 sm:$0xff]   ;;  %v1299_v25 = vld [vmem:[%s1484_s28 + $0x20] ss:$8 sps:$4 sm:$0xff]  }
  0x14   : > { %672 = vmatpush1.bf16.msra.mxu0 %v1273_v4  ;;  %1235 = vmatpush1.bf16.msra.mxu1 %v1273_v4  ;;  %v1294_v22 = vld [vmem:[%s1484_s28 + $0x90] ss:$8 sps:$4 sm:$0xff]   ;;  %v1297_v24 = vld [vmem:[%s1484_s28 + $0xa4] ss:$8 sps:$4 sm:$0xff]   ;;  %v1300_v26 = vld [vmem:[%s1484_s28 + $0xa0] ss:$8 sps:$4 sm:$0xff]  }
  0x15   : > { %673 = vmatprep.subr.bf16.mxu0 %v1419_v1  ;;  %1223 = vmatprep.subr.bf16.mxu1 %v1419_v1  ;;  %v1301_v27 = vld [vmem:[%s1484_s28 + $0x34] ss:$8 sps:$4 sm:$0xff]   ;;  %v1305_v29 = vld [vmem:[%s1484_s28 + $0x30] ss:$8 sps:$4 sm:$0xff]   ;;  %v1307_v31 = vld [vmem:[%s1484_s28 + $0x44] ss:$8 sps:$4 sm:$0xff]  }
  0x16   : > { %v1303_v28 = vld [vmem:[%s1484_s28 + $0xb4] ss:$8 sps:$4 sm:$0xff]   ;;  %v1306_v30 = vld [vmem:[%s1484_s28 + $0xb0] ss:$8 sps:$4 sm:$0xff]   ;;  %v1309_v32 = vld [vmem:[%s1484_s28 + $0xc4] ss:$8 sps:$4 sm:$0xff]  }
  0x17   : > { %v1311_v33 = vld [vmem:[%s1484_s28 + $0x40] ss:$8 sps:$4 sm:$0xff]   ;;  %v1313_v35 = vld [vmem:[%s1484_s28 + $0x54] ss:$8 sps:$4 sm:$0xff]   ;;  %v1317_v37 = vld [vmem:[%s1484_s28 + $0x50] ss:$8 sps:$4 sm:$0xff]  }
  0x18   : > { %674 = vmatpush1.bf16.msra.mxu0 %v1274_v6  ;;  %1236 = vmatpush1.bf16.msra.mxu1 %v1274_v6  ;;  %v1312_v34 = vld [vmem:[%s1484_s28 + $0xc0] ss:$8 sps:$4 sm:$0xff]   ;;  %v1315_v36 = vld [vmem:[%s1484_s28 + $0xd4] ss:$8 sps:$4 sm:$0xff]   ;;  %v1318_v38 = vld [vmem:[%s1484_s28 + $0xd0] ss:$8 sps:$4 sm:$0xff]  }
  0x19   : > { %675 = vmatprep.subr.bf16.mxu0 %v1419_v1  ;;  %1224 = vmatprep.subr.bf16.mxu1 %v1419_v1  ;;  %v1319_v39 = vld [vmem:[%s1484_s28 + $0x64] ss:$8 sps:$4 sm:$0xff]   ;;  %v1323_v41 = vld [vmem:[%s1484_s28 + $0x60] ss:$8 sps:$4 sm:$0xff]   ;;  %v1325_v43 = vld [vmem:[%s1484_s28 + $0x74] ss:$8 sps:$4 sm:$0xff]  }
  0x1a   : > { %v1321_v40 = vld [vmem:[%s1484_s28 + $0xe4] ss:$8 sps:$4 sm:$0xff]   ;;  %v1324_v42 = vld [vmem:[%s1484_s28 + $0xe0] ss:$8 sps:$4 sm:$0xff]   ;;  %v1327_v44 = vld [vmem:[%s1484_s28 + $0xf4] ss:$8 sps:$4 sm:$0xff]  }
  0x1b   : > { %v1329_v45 = vld [vmem:[%s1484_s28 + $0x70] ss:$8 sps:$4 sm:$0xff]  }
  0x1c   : > { %676 = vmatpush1.bf16.msra.mxu0 %v1275_v8  ;;  %1237 = vmatpush1.bf16.msra.mxu1 %v1275_v8  ;;  %v1330_v46 = vld [vmem:[%s1484_s28 + $0xf0] ss:$8 sps:$4 sm:$0xff]  }
  0x1d   : > { %677 = vmatprep.subr.bf16.mxu0 %v1419_v1  ;;  %1225 = vmatprep.subr.bf16.mxu1 %v1419_v1 }
  0x20   : > { %678 = vmatpush1.bf16.msra.mxu0 %v1276_v9  ;;  %1238 = vmatpush1.bf16.msra.mxu1 %v1276_v9 }
  0x21   : > { %679 = vmatprep.subr.bf16.mxu0 %v1419_v1  ;;  %1226 = vmatprep.subr.bf16.mxu1 %v1419_v1 }
  0x24   : > { %680 = vmatpush1.bf16.msra.mxu0 %v1277_v10  ;;  %1239 = vmatpush1.bf16.msra.mxu1 %v1277_v10 }
  0x25   : > { %681 = vmatprep.subr.bf16.mxu0 %v1419_v1  ;;  %1227 = vmatprep.subr.bf16.mxu1 %v1419_v1 }
  0x28   : > { %682 = vmatpush1.bf16.msra.mxu0 %v1278_v11  ;;  %1240 = vmatpush1.bf16.msra.mxu1 %v1278_v11 }
  0x29   : > { %683 = vmatprep.subr.bf16.mxu0 %v1419_v1  ;;  %1228 = vmatprep.subr.bf16.mxu1 %v1419_v1 }
  0x2c   : > { %684 = vmatpush1.bf16.msra.mxu0 %v1279_v12  ;;  %1241 = vmatpush1.bf16.msra.mxu1 %v1279_v12 }
  0x2d   : > { %685 = vmatprep.subr.bf16.mxu0 %v1419_v1  ;;  %1229 = vmatprep.subr.bf16.mxu1 %v1419_v1 }
  0x30   : > { %686 = vmatpush1.bf16.msra.mxu0 %v1280_v13  ;;  %1242 = vmatpush1.bf16.msra.mxu1 %v1280_v13 }
  0x31   : > { %687 = vmatprep.subr.bf16.mxu0 %v1419_v1  ;;  %1230 = vmatprep.subr.bf16.mxu1 %v1419_v1 }
  0x34   : > { %688 = vmatpush1.bf16.msra.mxu0 %v1281_v14  ;;  %1243 = vmatpush1.bf16.msra.mxu1 %v1281_v14 }
  0x35   : > { %689 = vmatprep.subr.bf16.mxu0 %v1419_v1  ;;  %1231 = vmatprep.subr.bf16.mxu1 %v1419_v1 }
  0x38   : > { %690 = vmatpush1.bf16.msra.mxu0 %v663_v16  ;;  %1244 = vmatpush1.bf16.msra.mxu1 %v663_v16 }
  0x3b   : > { %698 = vmatmul.mubr.bf16.vlgmr.msra.gmra.mrb[0].mxu0 %v1283_v17  ;;  %762 = vmatmul.mubr.bf16.vlgmr.msra.gmra.mrb[0].mxu1 %v1286_v18 }
  0x3c   : > { %1200 = vmatprep.mubr.msk.bf16.mxu0 %vm612_vm0, %v1289_v19  ;;  %1208 = vmatprep.mubr.msk.bf16.mxu1 %vm612_vm0, %v1291_v20 }
  0x43   : > { %706 = vmatmul.mubr.bf16.gmra.mrb[4].mxu0 %v1293_v21  ;;  %770 = vmatmul.mubr.bf16.gmra.mrb[4].mxu1 %v1294_v22 }
  0x44   : > { %1201 = vmatprep.mubr.msk.bf16.mxu0 %vm612_vm0, %v1295_v23  ;;  %1209 = vmatprep.mubr.msk.bf16.mxu1 %vm612_vm0, %v1297_v24 }
  0x4b   : > { %714 = vmatmul.mubr.bf16.gmra.mrb[8].mxu0 %v1299_v25  ;;  %778 = vmatmul.mubr.bf16.gmra.mrb[8].mxu1 %v1300_v26 }
  0x4c   : > { %1202 = vmatprep.mubr.msk.bf16.mxu0 %vm612_vm0, %v1301_v27  ;;  %1210 = vmatprep.mubr.msk.bf16.mxu1 %vm612_vm0, %v1303_v28 }
  0x53   : > { %722 = vmatmul.mubr.bf16.gmra.mrb[12].mxu0 %v1305_v29  ;;  %786 = vmatmul.mubr.bf16.gmra.mrb[12].mxu1 %v1306_v30 }
  0x54   : > { %1203 = vmatprep.mubr.msk.bf16.mxu0 %vm612_vm0, %v1307_v31  ;;  %1211 = vmatprep.mubr.msk.bf16.mxu1 %vm612_vm0, %v1309_v32 }
  0x5b   : > { %730 = vmatmul.mubr.bf16.gmra.mrb[16].mxu0 %v1311_v33  ;;  %794 = vmatmul.mubr.bf16.gmra.mrb[16].mxu1 %v1312_v34 }
  0x5c   : > { %1204 = vmatprep.mubr.msk.bf16.mxu0 %vm612_vm0, %v1313_v35  ;;  %1212 = vmatprep.mubr.msk.bf16.mxu1 %vm612_vm0, %v1315_v36 }
  0x63   : > { %738 = vmatmul.mubr.bf16.gmra.mrb[20].mxu0 %v1317_v37  ;;  %802 = vmatmul.mubr.bf16.gmra.mrb[20].mxu1 %v1318_v38 }
  0x64   : > { %1205 = vmatprep.mubr.msk.bf16.mxu0 %vm612_vm0, %v1319_v39  ;;  %1213 = vmatprep.mubr.msk.bf16.mxu1 %vm612_vm0, %v1321_v40 }
  0x6b   : > { %746 = vmatmul.mubr.bf16.gmra.mrb[24].mxu0 %v1323_v41  ;;  %810 = vmatmul.mubr.bf16.gmra.mrb[24].mxu1 %v1324_v42 }
  0x6c   : > { %1206 = vmatprep.mubr.msk.bf16.mxu0 %vm612_vm0, %v1325_v43  ;;  %1214 = vmatprep.mubr.msk.bf16.mxu1 %vm612_vm0, %v1327_v44 }
  0x73   : > { %754 = vmatmul.mubr.bf16.gmra.mrb[28].mxu0 %v1329_v45  ;;  %818 = vmatmul.mubr.bf16.gmra.mrb[28].mxu1 %v1330_v46 }
 0x10e   : > { %v699_v48 = vpop.f32.mrb[0].mxu0  ;;  %v763_v49 = vpop.f32.mrb[0].mxu1 }
 0x10f   : > { %v932_v50 = vadd.f32 %v1584_v47, %v699_v48  ;;  %v948_v51 = vadd.f32 %v1584_v47, %v763_v49  ;;  %v701_v52 = vpop.f32.mrb[1].mxu0  ;;  %v765_v53 = vpop.f32.mrb[1].mxu1 }
 0x110   : > { %v702_v54 = vpop.f32.mrb[2].mxu0  ;;  %v766_v55 = vpop.f32.mrb[2].mxu1 }
 0x111   : > { %1331 = vtanh.f32 %v932_v50  ;;  %v933_v56 = vadd.f32 %v1584_v47, %v702_v54  ;;  %v949_v57 = vadd.f32 %v1584_v47, %v766_v55  ;;  %v704_v58 = vpop.f32.mrb[3].mxu0  ;;  %v768_v59 = vpop.f32.mrb[3].mxu1 }
 0x112   : > { %1333 = vtanh.f32 %v948_v51 }
 0x113   : > { %1335 = vtanh.f32 %v933_v56 }
 0x114   : > { %1337 = vtanh.f32 %v949_v57 }
 0x116   : > { %v707_v60 = vpop.f32.mrb[4].mxu0  ;;  %v771_v61 = vpop.f32.mrb[4].mxu1 }
 0x117   : > { %v934_v62 = vadd.f32 %v1584_v47, %v707_v60  ;;  %v950_v63 = vadd.f32 %v1584_v47, %v771_v61  ;;  %v709_v0 = vpop.f32.mrb[5].mxu0  ;;  %v773_v1 = vpop.f32.mrb[5].mxu1 }
 0x118   : > { %v710_v2 = vpop.f32.mrb[6].mxu0  ;;  %v774_v3 = vpop.f32.mrb[6].mxu1 }
 0x119   : > { %1339 = vtanh.f32 %v934_v62  ;;  %v935_v4 = vadd.f32 %v1584_v47, %v710_v2  ;;  %v951_v5 = vadd.f32 %v1584_v47, %v774_v3  ;;  %v712_v6 = vpop.f32.mrb[7].mxu0  ;;  %v776_v7 = vpop.f32.mrb[7].mxu1 }
 0x11a   : > { %1341 = vtanh.f32 %v950_v63 }
 0x11b   : > { %v1332_v8 = vpop.eup %1331  ;;  %1343 = vtanh.f32 %v935_v4 }
 0x11c   : > { %v1334_v9 = vpop.eup %1333  ;;  %996 = vst [vmem:[%s1597_s29] sm:$0xff] %v1332_v8  ;;  %1345 = vtanh.f32 %v951_v5 }
 0x11d   : > { %v1336_v10 = vpop.eup %1335  ;;  %1012 = vst [vmem:[%s1597_s29 + $0x80] sm:$0xff] %v1334_v9 }
 0x11e   : > { %v1338_v11 = vpop.eup %1337  ;;  %997 = vst [vmem:[%s1597_s29 + $0x8] sm:$0xff] %v1336_v10  ;;  %v715_v12 = vpop.f32.mrb[8].mxu0 }
 0x11f   : > { %v779_v13 = vpop.f32.mrb[8].mxu1  ;;  %1013 = vst [vmem:[%s1597_s29 + $0x88] sm:$0xff] %v1338_v11  ;;  %v936_v14 = vadd.f32 %v1584_v47, %v715_v12  ;;  %v717_v16 = vpop.f32.mrb[9].mxu0 }
 0x120   : > { %v952_v15 = vadd.f32 %v1584_v47, %v779_v13  ;;  %v781_v17 = vpop.f32.mrb[9].mxu1  ;;  %v718_v18 = vpop.f32.mrb[10].mxu0 }
 0x121   : > { %v782_v19 = vpop.f32.mrb[10].mxu1  ;;  %1347 = vtanh.f32 %v936_v14  ;;  %v937_v20 = vadd.f32 %v1584_v47, %v718_v18  ;;  %v720_v22 = vpop.f32.mrb[11].mxu0 }
 0x122   : > { %v953_v21 = vadd.f32 %v1584_v47, %v782_v19  ;;  %v784_v23 = vpop.f32.mrb[11].mxu1  ;;  %1349 = vtanh.f32 %v952_v15 }
 0x123   : > { %v1340_v24 = vpop.eup %1339  ;;  %1351 = vtanh.f32 %v937_v20 }
 0x124   : > { %v1342_v25 = vpop.eup %1341  ;;  %998 = vst [vmem:[%s1597_s29 + $0x10] sm:$0xff] %v1340_v24  ;;  %1353 = vtanh.f32 %v953_v21 }
 0x125   : > { %v1344_v26 = vpop.eup %1343  ;;  %1014 = vst [vmem:[%s1597_s29 + $0x90] sm:$0xff] %v1342_v25 }
 0x126   : > { %v1346_v27 = vpop.eup %1345  ;;  %999 = vst [vmem:[%s1597_s29 + $0x18] sm:$0xff] %v1344_v26  ;;  %v723_v28 = vpop.f32.mrb[12].mxu0 }
 0x127   : > { %v787_v29 = vpop.f32.mrb[12].mxu1  ;;  %1015 = vst [vmem:[%s1597_s29 + $0x98] sm:$0xff] %v1346_v27  ;;  %v938_v30 = vadd.f32 %v1584_v47, %v723_v28  ;;  %v725_v32 = vpop.f32.mrb[13].mxu0 }
 0x128   : > { %v954_v31 = vadd.f32 %v1584_v47, %v787_v29  ;;  %v789_v33 = vpop.f32.mrb[13].mxu1  ;;  %v726_v34 = vpop.f32.mrb[14].mxu0 }
 0x129   : > { %v790_v35 = vpop.f32.mrb[14].mxu1  ;;  %1355 = vtanh.f32 %v938_v30  ;;  %v939_v36 = vadd.f32 %v1584_v47, %v726_v34  ;;  %v728_v38 = vpop.f32.mrb[15].mxu0 }
 0x12a   : > { %v955_v37 = vadd.f32 %v1584_v47, %v790_v35  ;;  %v792_v39 = vpop.f32.mrb[15].mxu1  ;;  %1357 = vtanh.f32 %v954_v31 }
 0x12b   : > { %v1348_v40 = vpop.eup %1347  ;;  %1359 = vtanh.f32 %v939_v36 }
 0x12c   : > { %v1350_v41 = vpop.eup %1349  ;;  %1000 = vst [vmem:[%s1597_s29 + $0x20] sm:$0xff] %v1348_v40  ;;  %1361 = vtanh.f32 %v955_v37 }
 0x12d   : > { %v1352_v42 = vpop.eup %1351  ;;  %1016 = vst [vmem:[%s1597_s29 + $0xa0] sm:$0xff] %v1350_v41 }
 0x12e   : > { %v1354_v43 = vpop.eup %1353  ;;  %1001 = vst [vmem:[%s1597_s29 + $0x28] sm:$0xff] %v1352_v42  ;;  %v731_v44 = vpop.f32.mrb[16].mxu0 }
 0x12f   : > { %v795_v45 = vpop.f32.mrb[16].mxu1  ;;  %1017 = vst [vmem:[%s1597_s29 + $0xa8] sm:$0xff] %v1354_v43  ;;  %v940_v46 = vadd.f32 %v1584_v47, %v731_v44  ;;  %v733_v49 = vpop.f32.mrb[17].mxu0 }
 0x130   : > { %v956_v48 = vadd.f32 %v1584_v47, %v795_v45  ;;  %v797_v50 = vpop.f32.mrb[17].mxu1  ;;  %v734_v51 = vpop.f32.mrb[18].mxu0 }
 0x131   : > { %v798_v52 = vpop.f32.mrb[18].mxu1  ;;  %1363 = vtanh.f32 %v940_v46  ;;  %v941_v53 = vadd.f32 %v1584_v47, %v734_v51  ;;  %v736_v55 = vpop.f32.mrb[19].mxu0 }
 0x132   : > { %v957_v54 = vadd.f32 %v1584_v47, %v798_v52  ;;  %v800_v56 = vpop.f32.mrb[19].mxu1  ;;  %1365 = vtanh.f32 %v956_v48 }
 0x133   : > { %v1356_v57 = vpop.eup %1355  ;;  %1367 = vtanh.f32 %v941_v53 }
 0x134   : > { %v1358_v58 = vpop.eup %1357  ;;  %1002 = vst [vmem:[%s1597_s29 + $0x30] sm:$0xff] %v1356_v57  ;;  %1369 = vtanh.f32 %v957_v54 }
 0x135   : > { %v1360_v59 = vpop.eup %1359  ;;  %1018 = vst [vmem:[%s1597_s29 + $0xb0] sm:$0xff] %v1358_v58 }
 0x136   : > { %v1362_v60 = vpop.eup %1361  ;;  %1003 = vst [vmem:[%s1597_s29 + $0x38] sm:$0xff] %v1360_v59  ;;  %v739_v61 = vpop.f32.mrb[20].mxu0 }
 0x137   : > { %v803_v62 = vpop.f32.mrb[20].mxu1  ;;  %1019 = vst [vmem:[%s1597_s29 + $0xb8] sm:$0xff] %v1362_v60  ;;  %v942_v63 = vadd.f32 %v1584_v47, %v739_v61  ;;  %v741_v1 = vpop.f32.mrb[21].mxu0 }
 0x138   : > { %v958_v0 = vadd.f32 %v1584_v47, %v803_v62  ;;  %v805_v2 = vpop.f32.mrb[21].mxu1  ;;  %v742_v3 = vpop.f32.mrb[22].mxu0 }
 0x139   : > { %v806_v4 = vpop.f32.mrb[22].mxu1  ;;  %1371 = vtanh.f32 %v942_v63  ;;  %v943_v5 = vadd.f32 %v1584_v47, %v742_v3  ;;  %v744_v7 = vpop.f32.mrb[23].mxu0 }
 0x13a   : > { %v959_v6 = vadd.f32 %v1584_v47, %v806_v4  ;;  %v808_v8 = vpop.f32.mrb[23].mxu1  ;;  %1373 = vtanh.f32 %v958_v0 }
 0x13b   : > { %v1364_v9 = vpop.eup %1363  ;;  %1375 = vtanh.f32 %v943_v5 }
 0x13c   : > { %v1366_v10 = vpop.eup %1365  ;;  %1004 = vst [vmem:[%s1597_s29 + $0x40] sm:$0xff] %v1364_v9  ;;  %1377 = vtanh.f32 %v959_v6 }
 0x13d   : > { %v1368_v11 = vpop.eup %1367  ;;  %1020 = vst [vmem:[%s1597_s29 + $0xc0] sm:$0xff] %v1366_v10 }
 0x13e   : > { %v1370_v12 = vpop.eup %1369  ;;  %1005 = vst [vmem:[%s1597_s29 + $0x48] sm:$0xff] %v1368_v11  ;;  %v747_v13 = vpop.f32.mrb[24].mxu0 }
 0x13f   : > { %v811_v14 = vpop.f32.mrb[24].mxu1  ;;  %1021 = vst [vmem:[%s1597_s29 + $0xc8] sm:$0xff] %v1370_v12  ;;  %v944_v15 = vadd.f32 %v1584_v47, %v747_v13  ;;  %v749_v17 = vpop.f32.mrb[25].mxu0 }
 0x140   : > { %v960_v16 = vadd.f32 %v1584_v47, %v811_v14  ;;  %v813_v18 = vpop.f32.mrb[25].mxu1  ;;  %v750_v19 = vpop.f32.mrb[26].mxu0 }
 0x141   : > { %v814_v20 = vpop.f32.mrb[26].mxu1  ;;  %1379 = vtanh.f32 %v944_v15  ;;  %v945_v21 = vadd.f32 %v1584_v47, %v750_v19  ;;  %v752_v23 = vpop.f32.mrb[27].mxu0 }
 0x142   : > { %v961_v22 = vadd.f32 %v1584_v47, %v814_v20  ;;  %v816_v24 = vpop.f32.mrb[27].mxu1  ;;  %1381 = vtanh.f32 %v960_v16 }
 0x143   : > { %v1372_v25 = vpop.eup %1371  ;;  %1383 = vtanh.f32 %v945_v21 }
 0x144   : > { %v1374_v26 = vpop.eup %1373  ;;  %1006 = vst [vmem:[%s1597_s29 + $0x50] sm:$0xff] %v1372_v25  ;;  %1385 = vtanh.f32 %v961_v22 }
 0x145   : > { %v1376_v27 = vpop.eup %1375  ;;  %1022 = vst [vmem:[%s1597_s29 + $0xd0] sm:$0xff] %v1374_v26 }
 0x146   : > { %v1378_v28 = vpop.eup %1377  ;;  %1007 = vst [vmem:[%s1597_s29 + $0x58] sm:$0xff] %v1376_v27  ;;  %v755_v29 = vpop.f32.mrb[28].mxu0 }
 0x147   : > { %v819_v30 = vpop.f32.mrb[28].mxu1  ;;  %1023 = vst [vmem:[%s1597_s29 + $0xd8] sm:$0xff] %v1378_v28  ;;  %v946_v31 = vadd.f32 %v1584_v47, %v755_v29  ;;  %v757_v33 = vpop.f32.mrb[29].mxu0 }
 0x148   : > { %v962_v32 = vadd.f32 %v1584_v47, %v819_v30  ;;  %v821_v34 = vpop.f32.mrb[29].mxu1  ;;  %v758_v35 = vpop.f32.mrb[30].mxu0 }
 0x149   : > { %v822_v36 = vpop.f32.mrb[30].mxu1  ;;  %1387 = vtanh.f32 %v946_v31  ;;  %v947_v37 = vadd.f32 %v1584_v47, %v758_v35  ;;  %v760_v39 = vpop.f32.mrb[31].mxu0 }
 0x14a   : > { %v963_v38 = vadd.f32 %v1584_v47, %v822_v36  ;;  %v824_v40 = vpop.f32.mrb[31].mxu1  ;;  %1389 = vtanh.f32 %v962_v32 }
 0x14b   : > { %v1380_v41 = vpop.eup %1379  ;;  %1391 = vtanh.f32 %v947_v37 }
 0x14c   : > { %v1382_v42 = vpop.eup %1381  ;;  %1008 = vst [vmem:[%s1597_s29 + $0x60] sm:$0xff] %v1380_v41  ;;  %1393 = vtanh.f32 %v963_v38 }
 0x14d   : > { %v1384_v43 = vpop.eup %1383  ;;  %1024 = vst [vmem:[%s1597_s29 + $0xe0] sm:$0xff] %v1382_v42 }
 0x14e   : > { %v1386_v44 = vpop.eup %1385  ;;  %1009 = vst [vmem:[%s1597_s29 + $0x68] sm:$0xff] %v1384_v43 }
 0x14f   : > { %1025 = vst [vmem:[%s1597_s29 + $0xe8] sm:$0xff] %v1386_v44 }
 0x153   : > { %v1388_v45 = vpop.eup %1387 }
 0x154   : > { %v1390_v46 = vpop.eup %1389  ;;  %1010 = vst [vmem:[%s1597_s29 + $0x70] sm:$0xff] %v1388_v45 }
 0x155   : > { %v1392_v47 = vpop.eup %1391  ;;  %1026 = vst [vmem:[%s1597_s29 + $0xf0] sm:$0xff] %v1390_v46 }
 0x156   : > { %v1394_v48 = vpop.eup %1393  ;;  %1011 = vst [vmem:[%s1597_s29 + $0x78] sm:$0xff] %v1392_v47 }
 0x157   : > { %1027 = vst [vmem:[%s1597_s29 + $0xf8] sm:$0xff] %v1394_v48 }
 0x158 PF: > { %s13_s14 = sadd.s32 1, %s1417_s14   ;;  %s1670_s12 = smov %s1413_s13 }
 0x159   : > { %p10_p5 = scmp.ge.s32.totalorder %s13_s14, 4   ;;  %s1671_s13 = smov %s1673_s15 }
 0x15b   :  { %12 = sbr.rel (!%p10_p5) target bundleno = 2 (0x2), region = 76 }

</bundles_post_ra>
